<compile_context>
chip_gen: v6e
topology: v6e:2x2x1
jax: 0.10.0
libtpu: 0.0.40
codegen_flags: <defaults>
</compile_context>

<pallas_src>
import functools

import jax
import jax.numpy as jnp
import numpy as np
from jax import lax
from jax.experimental import pallas as pl
from jax.experimental.pallas import tpu as pltpu

_SUBLANE = 8
_MIN_TM = 512                    # never shrink batch tiles below this to add grid steps
_TM_MAX = 16384                  # beyond this, per-step overhead is already well amortized
_HEADROOM = 4 * 1024 * 1024


def _round_up(x, m):
    return ((x + m - 1) // m) * m


def _round_down(x, m):
    return (x // m) * m


def _vmem_capacity_bytes():
    """Generation-aware VMEM capacity (64 MiB/TC on v7x, 128 MiB on v5e/v6e)."""
    try:
        return int(pltpu.get_tpu_info().vmem_capacity_bytes)
    except Exception:
        return 64 * 1024 * 1024  # conservative (v7x) fallback


def _pick_batch_tile(batch, per_row_bytes, resident_bytes, vmem_budget):
    """Largest batch tile whose double-buffered working set fits the VMEM budget,
    then rebalanced so a split grid has >=4 steps (two per v7x TensorCore) while
    keeping tiles >= _MIN_TM rows.  Small batches get a single full-size block."""
    avail = max(vmem_budget - resident_bytes - _HEADROOM, 1 << 20)
    tm = min(_TM_MAX, avail // per_row_bytes)
    tm = max(_round_down(tm, 256), 256)
    if tm >= batch:
        return batch                      # grid = 1, one big tile
    steps = pl.cdiv(batch, tm)
    if steps < 4:
        tm4 = _round_up(pl.cdiv(batch, 4), 256)
        if _MIN_TM <= tm4 <= tm:
            tm = tm4                      # >=4 steps, both v7x cores keep double-buffering
    return tm


def _sine_layer_kernel(x_ref, w_ref, b_ref, o_ref, *, omega_0):
    # x_ref: (tm, in_f)   w_ref: (out_f, in_f)   b_ref: (1, out_f)   o_ref: (tm, out_f)
    y = lax.dot_general(
        x_ref[...], w_ref[...],
        dimension_numbers=(((1,), (1,)), ((), ())),   # x @ W^T on the MXU
        preferred_element_type=jnp.float32)
    y = y + b_ref[...].astype(jnp.float32)
    if omega_0 != 1.0:            # compile-time branch; fold omega into W/b to skip it
        y = y * jnp.float32(omega_0)
    o_ref[...] = jnp.sin(y).astype(o_ref.dtype)


def sine_layer(x, weight, bias, *, omega_0=30.0, out_dtype=None, block_rows=None):
    """PyTorch-semantics SineLayer forward.

    x:      [..., in_f]
    weight: [out_f, in_f]   (PyTorch nn.Linear layout, consumed directly)
    bias:   [out_f]
    returns sin(omega_0 * (x @ weight.T + bias)), shape [..., out_f].

    bf16 fast path: pass x / weight as bfloat16 (and optionally out_dtype=bf16);
    the MXU still accumulates in f32 and sin is computed in f32.
    TODO(synk): validate SIREN quality with bf16 activations before making bf16
    the default (with omega folded into W the sin argument is O(10), so bf16
    input rounding enters sin's argument directly).
    """
    lead = x.shape[:-1]
    in_f = x.shape[-1]
    out_f, in_f_w = weight.shape
    assert in_f == in_f_w, "weight/in_features mismatch"
    if out_dtype is None:
        out_dtype = x.dtype

    xb = x.reshape(-1, in_f)              # metadata-only for contiguous x
    batch = xb.shape[0]
    weight = weight.astype(xb.dtype)      # tiny (out_f*in_f) cast; keeps MXU operands uniform
    bias_row = bias.reshape(1, out_f)

    x_item = jnp.dtype(xb.dtype).itemsize
    w_item = jnp.dtype(weight.dtype).itemsize
    b_item = jnp.dtype(bias_row.dtype).itemsize
    o_item = jnp.dtype(out_dtype).itemsize

    capacity = _vmem_capacity_bytes()
    resident = 2 * (out_f * in_f * w_item + out_f * b_item)      # W,b (double-buffered)
    per_row = (2 * in_f * x_item          # x tile, double-buffered
               + 2 * out_f * o_item       # out tile, double-buffered
               + 4 * out_f * 4)           # headroom for f32 matmul / sin temporaries

    if block_rows is None:
        tm = _pick_batch_tile(batch, per_row, resident, int(0.6 * capacity))
    else:
        tm = min(int(block_rows), batch)
        assert tm == batch or tm % _SUBLANE == 0, "block_rows must be a multiple of 8"
    grid = (pl.cdiv(batch, tm),)

    need = tm * per_row + resident + _HEADROOM
    vmem_limit = int(min(int(0.85 * capacity), max(need + (8 << 20), 32 << 20)))

    kernel = functools.partial(_sine_layer_kernel, omega_0=float(omega_0))

    cost = pl.CostEstimate(
        flops=2 * batch * in_f * out_f,
        transcendentals=batch * out_f,
        bytes_accessed=(batch * in_f * x_item
                        + out_f * in_f * w_item + out_f * b_item
                        + batch * out_f * o_item),
    )

    out = pl.pallas_call(
        kernel,
        out_shape=jax.ShapeDtypeStruct((batch, out_f), out_dtype),
        grid_spec=pltpu.PrefetchScalarGridSpec(
            num_scalar_prefetch=0,
            grid=grid,
            in_specs=[
                pl.BlockSpec((tm, in_f), lambda i: (i, 0)),      # batch tile of x
                pl.BlockSpec((out_f, in_f), lambda i: (0, 0)),   # full weight (resident)
                pl.BlockSpec((1, out_f), lambda i: (0, 0)),      # bias row (resident)
            ],
            out_specs=pl.BlockSpec((tm, out_f), lambda i: (i, 0)),
        ),
        compiler_params=pltpu.CompilerParams(
            dimension_semantics=("parallel",),
            vmem_limit_bytes=vmem_limit,
        ),
        cost_estimate=cost,
    )(xb, weight, bias_row)

    return out.reshape(*lead, out_f)


if __name__ == "__main__":
    # Module config (is_first=False branch of the SIREN init).
    in_features = 32
    out_features = 64
    omega_0 = 30.0

    key = jax.random.PRNGKey(0)
    kx, kw, kb, kx2 = jax.random.split(key, 4)

    # Parameter init matching the PyTorch module's ranges:
    #   weight ~ U(-sqrt(6/in)/omega_0, +sqrt(6/in)/omega_0)   (is_first=False)
    #   bias   ~ U(-1/sqrt(in), +1/sqrt(in))                   (nn.Linear default)
    w_bound = float(np.sqrt(6.0 / in_features) / omega_0)
    b_bound = float(1.0 / np.sqrt(in_features))
    weight = jax.random.uniform(kw, (out_features, in_features),
                                minval=-w_bound, maxval=w_bound, dtype=jnp.float32)
    bias = jax.random.uniform(kb, (out_features,),
                              minval=-b_bound, maxval=b_bound, dtype=jnp.float32)

    # ---- Path 1: f32, omega folded into params once at init (no in-kernel multiply).
    batch = 512
    x = jax.random.normal(kx, (batch, in_features), dtype=jnp.float32)
    weight_folded = omega_0 * weight
    bias_folded = omega_0 * bias
    out = jax.block_until_ready(sine_layer(x, weight_folded, bias_folded, omega_0=1.0))
    ref = jnp.sin(omega_0 * (x @ weight.T + bias[None, :]))
    np.testing.assert_allclose(np.asarray(out), np.asarray(ref), rtol=1e-5, atol=2e-5)

    # ---- Path 2: ragged multi-step grid (masked final writeback, no padding),
    #      unfolded params (in-kernel omega multiply).
    batch2 = 300
    x2 = jax.random.normal(kx2, (batch2, in_features), dtype=jnp.float32)
    out2 = jax.block_until_ready(
        sine_layer(x2, weight, bias, omega_0=omega_0, block_rows=128))
    ref2 = jnp.sin(omega_0 * (x2 @ weight.T + bias[None, :]))
    np.testing.assert_allclose(np.asarray(out2), np.asarray(ref2), rtol=1e-5, atol=2e-5)

    # ---- Path 3: bf16 I/O fast path (f32 MXU accumulate + f32 sin inside the kernel).
    x_bf = x.astype(jnp.bfloat16)
    w_bf = weight.astype(jnp.bfloat16)
    out3 = jax.block_until_ready(
        sine_layer(x_bf, w_bf, bias, omega_0=omega_0, out_dtype=jnp.bfloat16))
    ref3 = jnp.sin(omega_0 * (x_bf.astype(jnp.float32) @ w_bf.astype(jnp.float32).T
                              + bias[None, :]))
    np.testing.assert_allclose(np.asarray(out3.astype(jnp.float32)),
                               np.asarray(ref3), rtol=0, atol=2e-2)

    print("KERNEL_OK")
</pallas_src>

<mosaic_0001>
module attributes {stable_mosaic.version = 11 : i64} {
  func.func @_sine_layer_kernel(%arg0: i32, %arg1: memref<512x32xf32, #tpu.memory_space<vmem>>, %arg2: memref<64x32xf32, #tpu.memory_space<vmem>>, %arg3: memref<1x64xf32, #tpu.memory_space<vmem>>, %arg4: memref<512x64xf32, #tpu.memory_space<vmem>>) attributes {dimension_semantics = [#tpu.dimension_semantics<parallel>], iteration_bounds = array<i64: 1>, scalar_prefetch = 0 : i64, scratch_operands = 0 : i64, tpu.core_type = #tpu.core_type<tc>, window_params = [{transform_indices = @transform_0, window_bounds = array<i64: 512, 32>}, {pipeline_mode = #tpu.pipeline_mode<synchronous>, transform_indices = @transform_1, window_bounds = array<i64: 64, 32>}, {pipeline_mode = #tpu.pipeline_mode<synchronous>, transform_indices = @transform_2, window_bounds = array<i64: 1, 64>}, {transform_indices = @transform_3, window_bounds = array<i64: 512, 64>}]} {
    %c0 = arith.constant 0 : index
    %c0_0 = arith.constant 0 : index
    %0 = vector.load %arg1[%c0, %c0_0] : memref<512x32xf32, #tpu.memory_space<vmem>>, vector<512x32xf32>
    %c0_1 = arith.constant 0 : index
    %c0_2 = arith.constant 0 : index
    %1 = vector.load %arg2[%c0_1, %c0_2] : memref<64x32xf32, #tpu.memory_space<vmem>>, vector<64x32xf32>
    %cst = arith.constant dense<0.000000e+00> : vector<512x64xf32>
    %2 = tpu.matmul %0, %1, %cst {dimension_numbers = #tpu.dot_dimension_numbers<[1], [1], [0], [0], [0, 0, 1, 0], [], []>} : vector<512x32xf32>, vector<64x32xf32>, vector<512x64xf32> -> vector<512x64xf32>
    %c0_3 = arith.constant 0 : index
    %c0_4 = arith.constant 0 : index
    %3 = vector.load %arg3[%c0_3, %c0_4] : memref<1x64xf32, #tpu.memory_space<vmem>>, vector<1x64xf32>
    %4 = vector.broadcast %3 : vector<1x64xf32> to vector<512x64xf32>
    %5 = arith.addf %2, %4 : vector<512x64xf32>
    %6 = math.sin %5 : vector<512x64xf32>
    %c0_5 = arith.constant 0 : index
    %c0_6 = arith.constant 0 : index
    %7 = vector.load %arg4[%c0_5, %c0_6] : memref<512x64xf32, #tpu.memory_space<vmem>>, vector<512x64xf32>
    tpu.vector_store %arg4[%c0_5, %c0_6], %6 {strides = array<i32>} : memref<512x64xf32, #tpu.memory_space<vmem>>, vector<512x64xf32>,
    return
  }
  func.func @transform_0(%arg0: i32) -> (i32, i32) {
    %c0_i32 = arith.constant 0 : i32
    %c0_i32_0 = arith.constant 0 : i32
    return %arg0, %c0_i32 : i32, i32
  }
  func.func @transform_1(%arg0: i32) -> (i32, i32) {
    %c0_i32 = arith.constant 0 : i32
    %c0_i32_0 = arith.constant 0 : i32
    %c0_i32_1 = arith.constant 0 : i32
    return %c0_i32, %c0_i32_0 : i32, i32
  }
  func.func @transform_2(%arg0: i32) -> (i32, i32) {
    %c0_i32 = arith.constant 0 : i32
    %c0_i32_0 = arith.constant 0 : i32
    %c0_i32_1 = arith.constant 0 : i32
    return %c0_i32, %c0_i32_0 : i32, i32
  }
  func.func @transform_3(%arg0: i32) -> (i32, i32) {
    %c0_i32 = arith.constant 0 : i32
    %c0_i32_0 = arith.constant 0 : i32
    return %arg0, %c0_i32 : i32, i32
  }
}

</mosaic_0001>

<bundles_post_ra>
// kernel: tpu_custom_call.1
= control target key start
LH: loop header
LB: loop body
LE: loop exit
PB: predicated region body
PF: predicated region fallthrough
CT: control target
= control target key end

     0   :  { %vm93_vm0 = vcmask 261120   ;;  %s13785_s1 = inlined_call_operand.vmem [shape: f32[64,32], index: 1, kind: input, shape index: {}]   ;;  %s13786_s0 = inlined_call_operand.vmem [shape: f32[512,32], index: 0, kind: input, shape index: {}]   ;;  %s13787_s2 = inlined_call_operand.vmem [shape: f32[1,64], index: 2, kind: input, shape index: {}]   ;;  %s13788_s3 = inlined_call_operand.vmem [shape: f32[512,64], index: 3, kind: output, shape index: {}]  }
   0x1   :  { %v85_v0 = vld [vmem:[%s13785_s1 + $0x38] sm:$0xff]  ;;  %v84_v1 = vld [vmem:[%s13785_s1 + $0x30] sm:$0xff]  ;;  %v14_v2 = vld [vmem:[%s13786_s0] sm:$0xff] }
   0x2   :  { %7821 = vmatprep.subr.msk.mxu0 %vm93_vm0, %v85_v0  ;;  %7933 = vmatprep.subr.msk.mxu1 %vm93_vm0, %v85_v0  ;;  %v46_v3 = vld [vmem:[%s13786_s0 + $0x100] sm:$0xff]  ;;  %v83_v4 = vld [vmem:[%s13785_s1 + $0x28] sm:$0xff]  ;;  %v81_v6 = vld [vmem:[%s13785_s1 + $0x18] sm:$0xff] }
   0x3   :  { %7822 = vmatpush3.xpose.msk.msra.mxu0 %vm93_vm0, %v85_v0  ;;  %7941 = vmatpush3.xpose.msk.msra.mxu1 %vm93_vm0, %v85_v0  ;;  %v82_v5 = vld [vmem:[%s13785_s1 + $0x20] sm:$0xff]  ;;  %v80_v7 = vld [vmem:[%s13785_s1 + $0x10] sm:$0xff]  ;;  %v79_v8 = vld [vmem:[%s13785_s1 + $0x8] sm:$0xff] }
   0x4   :  { %7823 = vmatprep.subr.msk.mxu0 %vm93_vm0, %v84_v1  ;;  %7934 = vmatprep.subr.msk.mxu1 %vm93_vm0, %v84_v1  ;;  %v78_v9 = vld [vmem:[%s13785_s1] sm:$0xff]  ;;  %v15_v10 = vld [vmem:[%s13786_s0 + $0x8] sm:$0xff]  ;;  %v16_v12 = vld [vmem:[%s13786_s0 + $0x10] sm:$0xff] }
   0x5   :  { %7837 = vmatprep.mubr.msk.f32.mxu0 %vm93_vm0, %v14_v2  ;;  %7885 = vmatprep.mubr.msk.f32.mxu1 %vm93_vm0, %v46_v3  ;;  %v47_v11 = vld [vmem:[%s13786_s0 + $0x108] sm:$0xff]  ;;  %v48_v13 = vld [vmem:[%s13786_s0 + $0x110] sm:$0xff]  ;;  %v17_v14 = vld [vmem:[%s13786_s0 + $0x18] sm:$0xff] }
   0x6   :  { %v49_v15 = vld [vmem:[%s13786_s0 + $0x118] sm:$0xff]  ;;  %v18_v16 = vld [vmem:[%s13786_s0 + $0x20] sm:$0xff]  ;;  %v19_v18 = vld [vmem:[%s13786_s0 + $0x28] sm:$0xff] }
   0x7   :  { %7824 = vmatpush3.xpose.msk.msra.mxu0 %vm93_vm0, %v84_v1  ;;  %7942 = vmatpush3.xpose.msk.msra.mxu1 %vm93_vm0, %v84_v1  ;;  %v50_v17 = vld [vmem:[%s13786_s0 + $0x120] sm:$0xff]  ;;  %v51_v19 = vld [vmem:[%s13786_s0 + $0x128] sm:$0xff]  ;;  %v20_v20 = vld [vmem:[%s13786_s0 + $0x30] sm:$0xff] }
   0x8   :  { %7825 = vmatprep.subr.msk.mxu0 %vm93_vm0, %v83_v4  ;;  %7935 = vmatprep.subr.msk.mxu1 %vm93_vm0, %v83_v4  ;;  %v52_v21 = vld [vmem:[%s13786_s0 + $0x130] sm:$0xff]  ;;  %v21_v22 = vld [vmem:[%s13786_s0 + $0x38] sm:$0xff]  ;;  %v22_v24 = vld [vmem:[%s13786_s0 + $0x40] sm:$0xff] }
   0x9   :  { %v53_v23 = vld [vmem:[%s13786_s0 + $0x138] sm:$0xff]  ;;  %v54_v25 = vld [vmem:[%s13786_s0 + $0x140] sm:$0xff]  ;;  %v23_v26 = vld [vmem:[%s13786_s0 + $0x48] sm:$0xff] }
   0xa   :  { %v55_v27 = vld [vmem:[%s13786_s0 + $0x148] sm:$0xff]  ;;  %v24_v28 = vld [vmem:[%s13786_s0 + $0x50] sm:$0xff]  ;;  %v25_v30 = vld [vmem:[%s13786_s0 + $0x58] sm:$0xff] }
   0xb   :  { %7826 = vmatpush3.xpose.msk.msra.mxu0 %vm93_vm0, %v83_v4  ;;  %7943 = vmatpush3.xpose.msk.msra.mxu1 %vm93_vm0, %v83_v4  ;;  %v56_v29 = vld [vmem:[%s13786_s0 + $0x150] sm:$0xff]  ;;  %v57_v31 = vld [vmem:[%s13786_s0 + $0x158] sm:$0xff]  ;;  %v26_v32 = vld [vmem:[%s13786_s0 + $0x60] sm:$0xff] }
   0xc   :  { %7827 = vmatprep.subr.msk.mxu0 %vm93_vm0, %v82_v5  ;;  %7936 = vmatprep.subr.msk.mxu1 %vm93_vm0, %v82_v5  ;;  %v58_v33 = vld [vmem:[%s13786_s0 + $0x160] sm:$0xff]  ;;  %v27_v34 = vld [vmem:[%s13786_s0 + $0x68] sm:$0xff]  ;;  %v28_v36 = vld [vmem:[%s13786_s0 + $0x70] sm:$0xff] }
   0xd   :  { %v59_v35 = vld [vmem:[%s13786_s0 + $0x168] sm:$0xff]  ;;  %v60_v37 = vld [vmem:[%s13786_s0 + $0x170] sm:$0xff]  ;;  %v29_v38 = vld [vmem:[%s13786_s0 + $0x78] sm:$0xff] }
   0xe   :  { %v61_v39 = vld [vmem:[%s13786_s0 + $0x178] sm:$0xff]  ;;  %v30_v40 = vld [vmem:[%s13786_s0 + $0x80] sm:$0xff]  ;;  %v31_v42 = vld [vmem:[%s13786_s0 + $0x88] sm:$0xff] }
   0xf   :  { %7828 = vmatpush3.xpose.msk.msra.mxu0 %vm93_vm0, %v82_v5  ;;  %7944 = vmatpush3.xpose.msk.msra.mxu1 %vm93_vm0, %v82_v5  ;;  %v62_v41 = vld [vmem:[%s13786_s0 + $0x180] sm:$0xff]  ;;  %v63_v43 = vld [vmem:[%s13786_s0 + $0x188] sm:$0xff]  ;;  %v32_v44 = vld [vmem:[%s13786_s0 + $0x90] sm:$0xff] }
  0x10   :  { %7829 = vmatprep.subr.msk.mxu0 %vm93_vm0, %v81_v6  ;;  %7937 = vmatprep.subr.msk.mxu1 %vm93_vm0, %v81_v6  ;;  %v64_v45 = vld [vmem:[%s13786_s0 + $0x190] sm:$0xff]  ;;  %v33_v46 = vld [vmem:[%s13786_s0 + $0x98] sm:$0xff]  ;;  %v34_v48 = vld [vmem:[%s13786_s0 + $0xa0] sm:$0xff] }
  0x11   :  { %v65_v47 = vld [vmem:[%s13786_s0 + $0x198] sm:$0xff]  ;;  %v66_v49 = vld [vmem:[%s13786_s0 + $0x1a0] sm:$0xff]  ;;  %v35_v50 = vld [vmem:[%s13786_s0 + $0xa8] sm:$0xff] }
  0x12   :  { %v67_v51 = vld [vmem:[%s13786_s0 + $0x1a8] sm:$0xff]  ;;  %v36_v52 = vld [vmem:[%s13786_s0 + $0xb0] sm:$0xff]  ;;  %v37_v54 = vld [vmem:[%s13786_s0 + $0xb8] sm:$0xff] }
  0x13   :  { %7830 = vmatpush3.xpose.msk.msra.mxu0 %vm93_vm0, %v81_v6  ;;  %7945 = vmatpush3.xpose.msk.msra.mxu1 %vm93_vm0, %v81_v6  ;;  %v68_v53 = vld [vmem:[%s13786_s0 + $0x1b0] sm:$0xff]  ;;  %v69_v55 = vld [vmem:[%s13786_s0 + $0x1b8] sm:$0xff]  ;;  %v38_v56 = vld [vmem:[%s13786_s0 + $0xc0] sm:$0xff] }
  0x14   :  { %7831 = vmatprep.subr.msk.mxu0 %vm93_vm0, %v80_v7  ;;  %7938 = vmatprep.subr.msk.mxu1 %vm93_vm0, %v80_v7  ;;  %v70_v57 = vld [vmem:[%s13786_s0 + $0x1c0] sm:$0xff]  ;;  %v39_v58 = vld [vmem:[%s13786_s0 + $0xc8] sm:$0xff]  ;;  %v40_v60 = vld [vmem:[%s13786_s0 + $0xd0] sm:$0xff] }
  0x15   :  { %v71_v59 = vld [vmem:[%s13786_s0 + $0x1c8] sm:$0xff]  ;;  %v72_v61 = vld [vmem:[%s13786_s0 + $0x1d0] sm:$0xff]  ;;  %v41_v62 = vld [vmem:[%s13786_s0 + $0xd8] sm:$0xff] }
  0x16   :  { %v73_v63 = vld [vmem:[%s13786_s0 + $0x1d8] sm:$0xff]  ;;  %v42_v0 = vld [vmem:[%s13786_s0 + $0xe0] sm:$0xff]  ;;  %v43_v2 = vld [vmem:[%s13786_s0 + $0xe8] sm:$0xff] }
  0x17   :  { %7832 = vmatpush3.xpose.msk.msra.mxu0 %vm93_vm0, %v80_v7  ;;  %7946 = vmatpush3.xpose.msk.msra.mxu1 %vm93_vm0, %v80_v7  ;;  %v74_v1 = vld [vmem:[%s13786_s0 + $0x1e0] sm:$0xff]  ;;  %v75_v3 = vld [vmem:[%s13786_s0 + $0x1e8] sm:$0xff]  ;;  %v44_v4 = vld [vmem:[%s13786_s0 + $0xf0] sm:$0xff] }
  0x18   :  { %7833 = vmatprep.subr.msk.mxu0 %vm93_vm0, %v79_v8  ;;  %7939 = vmatprep.subr.msk.mxu1 %vm93_vm0, %v79_v8  ;;  %v76_v5 = vld [vmem:[%s13786_s0 + $0x1f0] sm:$0xff]  ;;  %v45_v6 = vld [vmem:[%s13786_s0 + $0xf8] sm:$0xff] }
  0x19   :  { %v77_v7 = vld [vmem:[%s13786_s0 + $0x1f8] sm:$0xff] }
  0x1b   :  { %7834 = vmatpush3.xpose.msk.msra.mxu0 %vm93_vm0, %v79_v8  ;;  %7947 = vmatpush3.xpose.msk.msra.mxu1 %vm93_vm0, %v79_v8  ;;  %v8818_v8 = vld [vmem:[%s13787_s2] ss:$0 sm:$0xff] }
  0x1c   :  { %7835 = vmatprep.subr.msk.mxu0 %vm93_vm0, %v78_v9  ;;  %7940 = vmatprep.subr.msk.mxu1 %vm93_vm0, %v78_v9 }
  0x1f   :  { %7836 = vmatpush3.xpose.msk.msra.mxu0 %vm93_vm0, %v78_v9  ;;  %7948 = vmatpush3.xpose.msk.msra.mxu1 %vm93_vm0, %v78_v9 }
  0x22   :  { %7838 = vmatmul.mubr.msk.f32.vlgmr.msra.gmra.mxu0 %vm93_vm0, %v15_v10  ;;  %7886 = vmatmul.mubr.msk.f32.vlgmr.msra.gmra.mxu1 %vm93_vm0, %v47_v11 }
  0x23   :  { %7840 = vmatprep.mubr.msk.f32.mxu0 %vm93_vm0, %v16_v12  ;;  %7888 = vmatprep.mubr.msk.f32.mxu1 %vm93_vm0, %v48_v13 }
  0x26   :  { %7841 = vmatmul.mubr.msk.f32.gmra.mxu0 %vm93_vm0, %v17_v14  ;;  %7889 = vmatmul.mubr.msk.f32.gmra.mxu1 %vm93_vm0, %v49_v15 }
  0x27   :  { %7843 = vmatprep.mubr.msk.f32.mxu0 %vm93_vm0, %v18_v16  ;;  %7891 = vmatprep.mubr.msk.f32.mxu1 %vm93_vm0, %v50_v17 }
  0x2a   :  { %7844 = vmatmul.mubr.msk.f32.gmra.mxu0 %vm93_vm0, %v19_v18  ;;  %7892 = vmatmul.mubr.msk.f32.gmra.mxu1 %vm93_vm0, %v51_v19 }
  0x2b   :  { %7846 = vmatprep.mubr.msk.f32.mxu0 %vm93_vm0, %v20_v20  ;;  %7894 = vmatprep.mubr.msk.f32.mxu1 %vm93_vm0, %v52_v21 }
  0x2e   :  { %7847 = vmatmul.mubr.msk.f32.gmra.mxu0 %vm93_vm0, %v21_v22  ;;  %7895 = vmatmul.mubr.msk.f32.gmra.mxu1 %vm93_vm0, %v53_v23 }
  0x2f   :  { %7849 = vmatprep.mubr.msk.f32.mxu0 %vm93_vm0, %v22_v24  ;;  %7897 = vmatprep.mubr.msk.f32.mxu1 %vm93_vm0, %v54_v25 }
  0x32   :  { %7850 = vmatmul.mubr.msk.f32.gmra.mxu0 %vm93_vm0, %v23_v26  ;;  %7898 = vmatmul.mubr.msk.f32.gmra.mxu1 %vm93_vm0, %v55_v27 }
  0x33   :  { %7852 = vmatprep.mubr.msk.f32.mxu0 %vm93_vm0, %v24_v28  ;;  %7900 = vmatprep.mubr.msk.f32.mxu1 %vm93_vm0, %v56_v29 }
  0x36   :  { %7853 = vmatmul.mubr.msk.f32.gmra.mxu0 %vm93_vm0, %v25_v30  ;;  %7901 = vmatmul.mubr.msk.f32.gmra.mxu1 %vm93_vm0, %v57_v31 }
  0x37   :  { %7855 = vmatprep.mubr.msk.f32.mxu0 %vm93_vm0, %v26_v32  ;;  %7903 = vmatprep.mubr.msk.f32.mxu1 %vm93_vm0, %v58_v33 }
  0x3a   :  { %7856 = vmatmul.mubr.msk.f32.gmra.mxu0 %vm93_vm0, %v27_v34  ;;  %7904 = vmatmul.mubr.msk.f32.gmra.mxu1 %vm93_vm0, %v59_v35 }
  0x3b   :  { %7858 = vmatprep.mubr.msk.f32.mxu0 %vm93_vm0, %v28_v36  ;;  %7906 = vmatprep.mubr.msk.f32.mxu1 %vm93_vm0, %v60_v37 }
  0x3e   :  { %7859 = vmatmul.mubr.msk.f32.gmra.mxu0 %vm93_vm0, %v29_v38  ;;  %7907 = vmatmul.mubr.msk.f32.gmra.mxu1 %vm93_vm0, %v61_v39 }
  0x3f   :  { %7861 = vmatprep.mubr.msk.f32.mxu0 %vm93_vm0, %v30_v40  ;;  %7909 = vmatprep.mubr.msk.f32.mxu1 %vm93_vm0, %v62_v41 }
  0x42   :  { %7862 = vmatmul.mubr.msk.f32.gmra.mxu0 %vm93_vm0, %v31_v42  ;;  %7910 = vmatmul.mubr.msk.f32.gmra.mxu1 %vm93_vm0, %v63_v43 }
  0x43   :  { %7864 = vmatprep.mubr.msk.f32.mxu0 %vm93_vm0, %v32_v44  ;;  %7912 = vmatprep.mubr.msk.f32.mxu1 %vm93_vm0, %v64_v45  ;;  %v8477_v44 = vmov 683565275  }
  0x46   :  { %7865 = vmatmul.mubr.msk.f32.gmra.mxu0 %vm93_vm0, %v33_v46  ;;  %7913 = vmatmul.mubr.msk.f32.gmra.mxu1 %vm93_vm0, %v65_v47 }
  0x47   :  { %7867 = vmatprep.mubr.msk.f32.mxu0 %vm93_vm0, %v34_v48  ;;  %7915 = vmatprep.mubr.msk.f32.mxu1 %vm93_vm0, %v66_v49  ;;  %v8478_v48 = vmov 2475754826  }
  0x4a   :  { %7868 = vmatmul.mubr.msk.f32.gmra.mxu0 %vm93_vm0, %v35_v50  ;;  %7916 = vmatmul.mubr.msk.f32.gmra.mxu1 %vm93_vm0, %v67_v51  ;;  %v8479_v50 = vmov 2131351028  }
  0x4b   :  { %7870 = vmatprep.mubr.msk.f32.mxu0 %vm93_vm0, %v36_v52  ;;  %7918 = vmatprep.mubr.msk.f32.mxu1 %vm93_vm0, %v68_v53  ;;  %v8480_v52 = vmov 2102212464  }
  0x4e   :  { %7871 = vmatmul.mubr.msk.f32.gmra.mxu0 %vm93_vm0, %v37_v54  ;;  %7919 = vmatmul.mubr.msk.f32.gmra.mxu1 %vm93_vm0, %v69_v55  ;;  %v8481_v54 = vmov 920167782  }
  0x4f   :  { %7873 = vmatprep.mubr.msk.f32.mxu0 %vm93_vm0, %v38_v56  ;;  %7921 = vmatprep.mubr.msk.f32.mxu1 %vm93_vm0, %v70_v57 }
  0x52   :  { %7874 = vmatmul.mubr.msk.f32.gmra.mxu0 %vm93_vm0, %v39_v58  ;;  %7922 = vmatmul.mubr.msk.f32.gmra.mxu1 %vm93_vm0, %v71_v59 }
  0x53   :  { %7876 = vmatprep.mubr.msk.f32.mxu0 %vm93_vm0, %v40_v60  ;;  %7924 = vmatprep.mubr.msk.f32.mxu1 %vm93_vm0, %v72_v61  ;;  %v8482_v61 = vmov 1326507024  }
  0x56   :  { %7877 = vmatmul.mubr.msk.f32.gmra.mxu0 %vm93_vm0, %v41_v62  ;;  %7925 = vmatmul.mubr.msk.f32.gmra.mxu1 %vm93_vm0, %v73_v63 }
  0x57   :  { %7879 = vmatprep.mubr.msk.f32.mxu0 %vm93_vm0, %v42_v0  ;;  %7927 = vmatprep.mubr.msk.f32.mxu1 %vm93_vm0, %v74_v1 }
  0x5a   :  { %7880 = vmatmul.mubr.msk.f32.gmra.mxu0 %vm93_vm0, %v43_v2  ;;  %7928 = vmatmul.mubr.msk.f32.gmra.mxu1 %vm93_vm0, %v75_v3 }
  0x5b   :  { %7882 = vmatprep.mubr.msk.f32.mxu0 %vm93_vm0, %v44_v4  ;;  %7930 = vmatprep.mubr.msk.f32.mxu1 %vm93_vm0, %v76_v5 }
  0x5e   :  { %7883 = vmatmul.mubr.msk.f32.gmra.mxu0 %vm93_vm0, %v45_v6  ;;  %7931 = vmatmul.mubr.msk.f32.gmra.mxu1 %vm93_vm0, %v77_v7 }
  0xe2   :  { %v7839_v9 = vpop.f32.mrf.mxu0  ;;  %v7887_v10 = vpop.f32.mrf.mxu1 }
  0xe3   :  { %v8821_v11 = vadd.f32 %v7839_v9, %v8818_v8  ;;  %v8824_v12 = vadd.f32 %v7887_v10, %v8818_v8 }
  0xe4   :  { %v376_v13 = vpop.f32.mrf.mxu0  ;;  %v536_v32 = vpop.f32.mrf.mxu1 }
  0xe5   :  { %v799_v14 = vand.u32 2147483647, %v8821_v11  ;;  %v802_v15 = vand.u32 2139095040, %v8821_v11  ;;  %v4127_v16 = vand.u32 2147483647, %v8824_v12  ;;  %v4130_v17 = vand.u32 2139095040, %v8824_v12 }
  0xe6   :  { %v8833_v20 = vadd.f32 %v8818_v8, %v376_v13  ;;  %v8840_v38 = vadd.f32 %v8818_v8, %v536_v32  ;;  %vm801_vm14 = vcmp.lt.s32.totalorder %v8821_v11, 0 }
  0xe7   :  { %v803_v18 = vshrl.u32 %v802_v15, 23  ;;  %v806_v19 = vand.u32 8388607, %v799_v14  ;;  %v4131_v21 = vshrl.u32 %v4130_v17, 23  ;;  %v4134_v22 = vand.u32 8388607, %v4127_v16 }
  0xe8   :  { %v698_v25 = vand.u32 2139095040, %v8833_v20  ;;  %v695_v30 = vand.u32 2147483647, %v8833_v20  ;;  %vm8945_vm15 = vcmp.le.f32.partialorder %v799_v14, 0.7853982 }
  0xe9   :  { %v7497_v23 = vadd.s32 4294967169, %v803_v18  ;;  %v7625_v24 = vadd.s32 4294967169, %v4131_v21  ;;  %v807_v26 = vor.u32 8388608, %v806_v19  ;;  %v4135_v28 = vor.u32 8388608, %v4134_v22 }
  0xea   :  { %v699_v31 = vshrl.u32 %v698_v25, 23  ;;  %v8850_v42 = vand.u32 8388607, %v695_v30 }
  0xeb   :  { %v809_v27 = vadd.s32 1, %v7497_v23  ;;  %v4137_v29 = vadd.s32 1, %v7625_v24  ;;  %v8842_v39 = vshll.u32 %v807_v26, 8  ;;  %v8846_v41 = vshll.u32 %v4135_v28, 8 }
  0xec   :  { %v7493_v34 = vadd.s32 4294967169, %v699_v31 }
  0xed   :  { %vm810_vm1 = vcmp.gt.s32.totalorder %v809_v27, 0  ;;  %vm4138_vm2 = vcmp.gt.s32.totalorder %v4137_v29, 0 }
  0xee   :  { %v811_v33 = vsel %vm810_vm1, %v809_v27, 0  ;;  %v4139_v37 = vsel %vm4138_vm2, %v4137_v29, 0  ;;  %v8853_v47 = vadd.s32 1, %v7493_v34 }
  0xef   :  { %v812_v35 = vshrl.u32 %v811_v33, 5  ;;  %v813_v36 = vand.u32 31, %v811_v33  ;;  %v8844_v40 = vshrl.u32 %v4139_v37, 5  ;;  %v4141_v46 = vand.u32 31, %v4139_v37 }
  0xf0   :  { %vm706_vm12 = vcmp.gt.s32.totalorder %v8853_v47, 0 }
  0xf1   :  { %v814_v43 = vsub.s32 32, %v813_v36  ;;  %v816_v45 = vshll.u32 %v8477_v44, %v813_v36  ;;  %v819_v49 = vshll.u32 %v8478_v48, %v813_v36  ;;  %v822_v51 = vshll.u32 %v8479_v50, %v813_v36 }
  0xf2   :  { %v825_v53 = vshll.u32 %v8480_v52, %v813_v36  ;;  %v828_v55 = vshll.u32 %v8481_v54, %v813_v36  ;;  %vm831_vm3 = vcmp.lt.s32.totalorder %v812_v35, 1  ;;  %vm832_vm4 = vcmp.lt.s32.totalorder %v812_v35, 2 }
  0xf3   :  { %v817_v56 = vshrl.u32 %v8478_v48, %v814_v43  ;;  %v820_v57 = vshrl.u32 %v8479_v50, %v814_v43  ;;  %v823_v58 = vshrl.u32 %v8480_v52, %v814_v43  ;;  %v815_v59 = vshrl.u32 %v8477_v44, %v814_v43 }
  0xf4   :  { %v826_v60 = vshrl.u32 %v8481_v54, %v814_v43  ;;  %v829_v62 = vshrl.u32 %v8482_v61, %v814_v43  ;;  %v4142_v2 = vsub.s32 32, %v4141_v46  ;;  %vm833_vm5 = vcmp.lt.s32.totalorder %v812_v35, 3 }
  0xf5   :  { %v818_v63 = vor.u32 %v817_v56, %v816_v45  ;;  %v821_v0 = vor.u32 %v820_v57, %v819_v49  ;;  %v824_v1 = vor.u32 %v823_v58, %v822_v51  ;;  %vm834_vm6 = vcmp.lt.s32.totalorder %v812_v35, 4 }
  0xf6   :  { %v827_v3 = vor.u32 %v826_v60, %v825_v53  ;;  %v830_v4 = vor.u32 %v829_v62, %v828_v55  ;;  %v4144_v17 = vshll.u32 %v8477_v44, %v4141_v46  ;;  %v4145_v21 = vshrl.u32 %v8478_v48, %v4142_v2 }
  0xf7   :  { %v835_v5 = vsel %vm831_vm3, %v815_v59, %v818_v63  ;;  %v836_v6 = vsel %vm834_vm6, %v824_v1, 2102212464  ;;  %v839_v7 = vsel %vm831_vm3, %v818_v63, %v821_v0  ;;  %v843_v9 = vsel %vm831_vm3, %v821_v0, %v824_v1 }
  0xf8   :  { %v837_v10 = vsel %vm833_vm5, %v821_v0, %v836_v6  ;;  %v840_v13 = vsel %vm834_vm6, %v827_v3, 920167782  ;;  %v844_v15 = vsel %vm834_vm6, %v830_v4, 1326507024  ;;  %v4147_v22 = vshll.u32 %v8478_v48, %v4141_v46 }
  0xf9   :  { %v841_v18 = vsel %vm833_vm5, %v824_v1, %v840_v13  ;;  %v845_v19 = vsel %vm833_vm5, %v827_v3, %v844_v15  ;;  %v838_v23 = vsel %vm832_vm4, %v835_v5, %v837_v10  ;;  %v4148_v26 = vshrl.u32 %v8479_v50, %v4142_v2 }
  0xfa   :  { %v842_v24 = vsel %vm832_vm4, %v839_v7, %v841_v18  ;;  %v846_v25 = vsel %vm832_vm4, %v843_v9, %v845_v19  ;;  %v4146_v32 = vor.u32 %v4145_v21, %v4144_v17  ;;  %v4150_v34 = vshll.u32 %v8479_v50, %v4141_v46 }
  0xfb   :  { %v8876_v27 = vmul.u32.u64.low %v8842_v39, %v846_v25  ;;  %v8877_v28 = vmul.u32.u64.high %v8842_v39, %v846_v25, %v8876_v27  ;;  %v8880_v29 = vmul.u32.u64.low %v8842_v39, %v842_v24  ;;  %v8881_v31 = vmul.u32.u64.high %v8842_v39, %v842_v24, %v8880_v29 }
  0xfc   :  { %v4149_v33 = vor.u32 %v4148_v26, %v4147_v22  ;;  %v4151_v36 = vshrl.u32 %v8480_v52, %v4142_v2  ;;  %v4143_v37 = vshrl.u32 %v8477_v44, %v4142_v2  ;;  %v4153_v35 = vshll.u32 %v8480_v52, %v4141_v46 }
  0xfd   :  { %v4154_v43 = vshrl.u32 %v8481_v54, %v4142_v2  ;;  %v4157_v45 = vshrl.u32 %v8482_v61, %v4142_v2  ;;  %v854_v49 = vmul.u32 %v8842_v39, %v838_v23  ;;  %v4156_v53 = vshll.u32 %v8481_v54, %v4141_v46 }
  0xfe   :  { %v4152_v51 = vor.u32 %v4151_v36, %v4150_v34  ;;  %vm4159_vm7 = vcmp.lt.s32.totalorder %v8844_v40, 1  ;;  %vm856_vm8 = vc.u32 %v8877_v28, %v8880_v29  ;;  %v857_v55 = vadd.s32 1, %v8881_v31 }
  0xff   :  { %v4155_v56 = vor.u32 %v4154_v43, %v4153_v35  ;;  %vm4160_vm9 = vcmp.lt.s32.totalorder %v8844_v40, 2  ;;  %v4158_v57 = vor.u32 %v4157_v45, %v4156_v53  ;;  %vm4161_vm10 = vcmp.lt.s32.totalorder %v8844_v40, 3 }
 0x100   :  { %vm4162_vm11 = vcmp.lt.s32.totalorder %v8844_v40, 4  ;;  %v4167_v58 = vsel %vm4159_vm7, %v4146_v32, %v4149_v33  ;;  %v858_v39 = vsel %vm856_vm8, %v857_v55, %v8881_v31  ;;  %v4171_v46 = vsel %vm4159_vm7, %v4149_v33, %v4152_v51 }
 0x101   :  { %v4164_v59 = vsel %vm4162_vm11, %v4152_v51, 2102212464  ;;  %v4168_v60 = vsel %vm4162_vm11, %v4155_v56, 920167782  ;;  %v859_v62 = vadd.s32 %v858_v39, %v854_v49  ;;  %v4163_v63 = vsel %vm4159_vm7, %v4143_v37, %v4146_v32 }
 0x102   :  { %v4169_v0 = vsel %vm4161_vm10, %v4152_v51, %v4168_v60  ;;  %v4172_v1 = vsel %vm4162_vm11, %v4158_v57, 1326507024  ;;  %v4165_v2 = vsel %vm4161_vm10, %v4149_v33, %v4164_v59  ;;  %v707_v15 = vsel %vm706_vm12, %v8853_v47, 0 }
 0x103   :  { %v4170_v3 = vsel %vm4160_vm9, %v4167_v58, %v4169_v0  ;;  %v4173_v4 = vsel %vm4161_vm10, %v4155_v56, %v4172_v1  ;;  %v860_v5 = vadd.s32 536870912, %v859_v62  ;;  %v4166_v18 = vsel %vm4160_vm9, %v4163_v63, %v4165_v2 }
 0x104   :  { %v4174_v6 = vsel %vm4160_vm9, %v4171_v46, %v4173_v4  ;;  %v8904_v7 = vmul.u32.u64.low %v8846_v41, %v4170_v3  ;;  %v8905_v9 = vmul.u32.u64.high %v8846_v41, %v4170_v3, %v8904_v7  ;;  %v709_v19 = vand.u32 31, %v707_v15 }
 0x105   :  { %v8909_v10 = vmul.u32.u64.low %v8846_v41, %v4174_v6  ;;  %v8910_v13 = vmul.u32.u64.high %v8846_v41, %v4174_v6, %v8909_v10  ;;  %v861_v17 = vshrl.u32 %v860_v5, 30  ;;  %v4026_v21 = vand.u32 2139095040, %v8840_v38 }
 0x106   :  { %v4185_v23 = vadd.s32 1, %v8905_v9  ;;  %v703_v24 = vor.u32 8388608, %v8850_v42  ;;  %v4182_v25 = vmul.u32 %v8846_v41, %v4166_v18  ;;  %v710_v26 = vsub.s32 32, %v709_v19 }
 0x107   :  { %v862_v22 = vshll.u32 %v861_v17, 30  ;;  %vm4184_vm13 = vc.u32 %v8910_v13, %v8904_v7  ;;  %v4027_v40 = vshrl.u32 %v4026_v21, 23  ;;  %v855_v32 = vadd.s32 %v8880_v29, %v8877_v28 }
 0x108   :  { %v4186_v47 = vsel %vm4184_vm13, %v4185_v23, %v8905_v9  ;;  %v8927_v34 = vshll.u32 %v703_v24, 8  ;;  %v4023_v41 = vand.u32 2147483647, %v8840_v38  ;;  %v8930_v36 = vshrl.u32 %v707_v15, 5 }
 0x109   :  { %v8921_v27 = vsub.s32 %v859_v62, %v862_v22  ;;  %v4187_v31 = vadd.s32 %v4186_v47, %v4182_v25  ;;  %v713_v37 = vshrl.u32 %v8478_v48, %v710_v26  ;;  %v716_v35 = vshrl.u32 %v8479_v50, %v710_v26 }
 0x10a   :  { %v719_v45 = vshrl.u32 %v8480_v52, %v710_v26  ;;  %v722_v49 = vshrl.u32 %v8481_v54, %v710_v26  ;;  %v8937_v28 = vadd.s32 4294967169, %v4027_v40  ;;  %v885_v29 = vsub.s32 4, %v861_v17 }
 0x10b   :  { %v865_v33 = vsub.s32 0, %v8921_v27  ;;  %v4188_v42 = vadd.s32 536870912, %v4187_v31  ;;  %v712_v53 = vshll.u32 %v8477_v44, %v709_v19  ;;  %v715_v55 = vshll.u32 %v8478_v48, %v709_v19 }
 0x10c   :  { %v718_v58 = vshll.u32 %v8479_v50, %v709_v19  ;;  %v721_v39 = vshll.u32 %v8480_v52, %v709_v19  ;;  %v725_v59 = vshrl.u32 %v8482_v61, %v710_v26  ;;  %v8955_v63 = vand.u32 8388607, %v4023_v41 }
 0x10d   :  { %v7498_v43 = vmin.u32 %v865_v33, %v8921_v27  ;;  %v8939_v51 = vshrl.u32 %v4188_v42, 30  ;;  %v714_v46 = vor.u32 %v713_v37, %v712_v53  ;;  %v717_v62 = vor.u32 %v716_v35, %v715_v55 }
 0x10e   :  { %v720_v14 = vor.u32 %v719_v45, %v718_v58  ;;  %v723_v1 = vor.u32 %v722_v49, %v721_v39  ;;  %v724_v2 = vshll.u32 %v8481_v54, %v709_v19  ;;  %v886_v3 = vsel %vm801_vm14, %v885_v29, %v861_v17 }
 0x10f   :  { %v867_v57 = vclz %v7498_v43  ;;  %v4190_v60 = vshll.u32 %v8939_v51, 30  ;;  %v711_v5 = vshrl.u32 %v8477_v44, %v710_v26  ;;  %vm727_vm0 = vcmp.lt.s32.totalorder %v8930_v36, 1 }
 0x110   :  { %v726_v6 = vor.u32 %v725_v59, %v724_v2  ;;  %vm728_vm2 = vcmp.lt.s32.totalorder %v8930_v36, 2  ;;  %vm729_vm3 = vcmp.lt.s32.totalorder %v8930_v36, 3  ;;  %vm4129_vm4 = vcmp.lt.s32.totalorder %v8824_v12, 0 }
 0x111   :  { %v7499_v0 = vadd.s32 4294967294, %v867_v57  ;;  %v8960_v4 = vsub.s32 %v4187_v31, %v4190_v60  ;;  %vm730_vm5 = vcmp.lt.s32.totalorder %v8930_v36, 4  ;;  %v735_v15 = vsel %vm727_vm0, %v714_v46, %v717_v62 }
 0x112   :  { %v732_v19 = vsel %vm730_vm5, %v720_v14, 2102212464  ;;  %v736_v21 = vsel %vm730_vm5, %v723_v1, 920167782  ;;  %v739_v25 = vsel %vm727_vm0, %v717_v62, %v720_v14  ;;  %v740_v31 = vsel %vm730_vm5, %v726_v6, 1326507024 }
 0x113   :  { %vm7500_vm1 = vcmp.lt.s32.totalorder %v7499_v0, 0  ;;  %v4193_v10 = vsub.s32 0, %v8960_v4  ;;  %v737_v24 = vsel %vm729_vm3, %v720_v14, %v736_v21  ;;  %v888_v33 = vsel %vm8945_vm15, 0, %v886_v3 }
 0x114   :  { %v870_v9 = vsel %vm7500_vm1, 0, %v7499_v0  ;;  %v738_v40 = vsel %vm728_vm2, %v735_v15, %v737_v24  ;;  %vm8983_vm6 = vcmp.le.f32.partialorder %v4127_v16, 0.7853982  ;;  %v731_v37 = vsel %vm727_vm0, %v711_v5, %v714_v46 }
 0x115   :  { %v871_v17 = vsub.s32 32, %v870_v9  ;;  %v875_v18 = vsub.s32 4294967266, %v870_v9  ;;  %v872_v22 = vshll.u32 %v8921_v27, %v870_v9  ;;  %v7626_v23 = vmin.u32 %v4193_v10, %v8960_v4 }
 0x116   :  { %v4213_v45 = vsub.s32 4, %v8939_v51  ;;  %v741_v49 = vsel %vm729_vm3, %v723_v1, %v740_v31  ;;  %v8997_v53 = vmul.u32.u64.low %v8927_v34, %v738_v40  ;;  %v8998_v55 = vmul.u32.u64.high %v8927_v34, %v738_v40, %v8997_v53 }
 0x117   :  { %v873_v26 = vshrl.u32 %v855_v32, %v871_v17  ;;  %v876_v47 = vadd.s32 127, %v875_v18  ;;  %v4195_v42 = vclz %v7626_v23  ;;  %v733_v32 = vsel %vm729_vm3, %v717_v62, %v732_v19  ;;  %v7842_v17 = vpop.f32.mrf.mxu0 }
 0x118   :  { %v742_v16 = vsel %vm728_vm2, %v739_v25, %v741_v49  ;;  %v734_v58 = vsel %vm728_vm2, %v731_v37, %v733_v32  ;;  %v892_v60 = vadd.s32 3, %v888_v33  ;;  %v4183_v46 = vadd.s32 %v8904_v7, %v8910_v13 }
 0x119   :  { %v874_v35 = vor.u32 %v873_v26, %v872_v22  ;;  %v877_v43 = vshll.u32 %v876_v47, 23  ;;  %v7627_v29 = vadd.s32 4294967294, %v4195_v42  ;;  %v4033_v62 = vadd.s32 1, %v8937_v28 }
 0x11a   :  { %v9004_v39 = vmul.u32.u64.low %v8927_v34, %v742_v16  ;;  %v9005_v59 = vmul.u32.u64.high %v8927_v34, %v742_v16, %v9004_v39  ;;  %v4214_v2 = vsel %vm4129_vm4, %v4213_v45, %v8939_v51  ;;  %v750_v5 = vmul.u32 %v8927_v34, %v734_v58 }
 0x11b   :  { %v878_v57 = vor.u32 4788187, %v877_v43  ;;  %vm7628_vm7 = vcmp.lt.s32.totalorder %v7627_v29, 0  ;;  %v881_v14 = vcvt.s32.f32 %v874_v35  ;;  %v753_v6 = vadd.s32 1, %v8998_v55 }
 0x11c   :  { %v4198_v1 = vsel %vm7628_vm7, 0, %v7627_v29  ;;  %vm752_vm8 = vc.u32 %v9005_v59, %v8997_v53  ;;  %vm4034_vm9 = vcmp.gt.s32.totalorder %v4033_v62, 0  ;;  %v4216_v18 = vsel %vm8983_vm6, 0, %v4214_v2 }
 0x11d   :  { %v879_v0 = vand.u32 2147483647, %v878_v57  ;;  %v4199_v36 = vsub.s32 32, %v4198_v1  ;;  %v4203_v3 = vsub.s32 4294967266, %v4198_v1  ;;  %v4200_v10 = vshll.u32 %v8960_v4, %v4198_v1 }
 0x11e   :  { %v754_v28 = vsel %vm752_vm8, %v753_v6, %v8998_v55  ;;  %v4035_v15 = vsel %vm4034_vm9, %v4033_v62, 0  ;;  %v9024_v25 = vadd.f32 %v7842_v17, %v8818_v8  ;;  %v9029_v47 = vand.u32 3, %v892_v60 }
 0x11f   :  { %v882_v9 = vmul.f32 %v881_v14, %v879_v0  ;;  %v4201_v7 = vshrl.u32 %v4183_v46, %v4199_v36  ;;  %v4204_v13 = vadd.s32 127, %v4203_v3  ;;  %v755_v34 = vadd.s32 %v754_v28, %v750_v5 }
 0x120   :  { %v4037_v19 = vand.u32 31, %v4035_v15  ;;  %v9031_v31 = vadd.s32 3, %v4216_v18  ;;  %v4031_v42 = vor.u32 8388608, %v8955_v63  ;;  %vm697_vm10 = vcmp.lt.s32.totalorder %v8833_v20, 0 }
 0x121   :  { %v883_v51 = vxor.u32 2147483648, %v882_v9  ;;  %v4202_v21 = vor.u32 %v4201_v7, %v4200_v10  ;;  %v4205_v22 = vshll.u32 %v4204_v13, 23  ;;  %v756_v23 = vadd.s32 536870912, %v755_v34 }
 0x122   :  { %v4038_v24 = vsub.s32 32, %v4037_v19  ;;  %v9037_v45 = vshrl.u32 %v4035_v15, 5  ;;  %v4040_v49 = vshll.u32 %v8477_v44, %v4037_v19  ;;  %v4043_v55 = vshll.u32 %v8478_v48, %v4037_v19 }
 0x123   :  { %v884_v4 = vsel %vm801_vm14, %v883_v51, %v882_v9  ;;  %v4206_v40 = vor.u32 4788187, %v4205_v22  ;;  %v757_v33 = vshrl.u32 %v756_v23, 30  ;;  %v4209_v35 = vcvt.s32.f32 %v4202_v21 }
 0x124   :  { %v887_v26 = vsel %vm8945_vm15, %v8821_v11, %v884_v4  ;;  %v4041_v37 = vshrl.u32 %v8478_v48, %v4038_v24  ;;  %v4044_v43 = vshrl.u32 %v8479_v50, %v4038_v24  ;;  %v4047_v29 = vshrl.u32 %v8480_v52, %v4038_v24 }
 0x125   :  { %8211 = vcosq.f32 %v887_v26  ;;  %v4207_v32 = vand.u32 2147483647, %v4206_v40  ;;  %v758_v56 = vshll.u32 %v757_v33, 30  ;;  %v4049_v63 = vshll.u32 %v8480_v52, %v4037_v19 }
 0x126   :  { %8213 = vsinq.f32 %v887_v26  ;;  %v4050_v57 = vshrl.u32 %v8481_v54, %v4038_v24  ;;  %v4042_v39 = vor.u32 %v4041_v37, %v4040_v49  ;;  %v4046_v60 = vshll.u32 %v8479_v50, %v4037_v19 }
 0x127   :  { %v4210_v16 = vmul.f32 %v4209_v35, %v4207_v32  ;;  %v9044_v58 = vsub.s32 %v755_v34, %v758_v56  ;;  %v1010_v46 = vand.u32 2139095040, %v9024_v25  ;;  %v4045_v0 = vor.u32 %v4044_v43, %v4043_v55 }
 0x128   :  { %v4051_v14 = vor.u32 %v4050_v57, %v4049_v63  ;;  %v4053_v1 = vshrl.u32 %v8482_v61, %v4038_v24  ;;  %v751_v2 = vadd.s32 %v8997_v53, %v9005_v59  ;;  %v4048_v3 = vor.u32 %v4047_v29, %v4046_v60 }
 0x129   :  { %v4211_v62 = vxor.u32 2147483648, %v4210_v16  ;;  %v761_v36 = vsub.s32 0, %v9044_v58  ;;  %v4052_v5 = vshll.u32 %v8481_v54, %v4037_v19  ;;  %vm898_vm11 = vcmp.eq.s32.totalorder %v9029_v47, 2 }
 0x12a   :  { %v781_v9 = vsub.s32 4, %v757_v33  ;;  %vm4055_vm12 = vcmp.lt.s32.totalorder %v9037_v45, 1  ;;  %v9057_v10 = vshll.u32 %v4031_v42, 8  ;;  %vm895_vm13 = vcmp.eq.s32.totalorder %v9029_v47, 0 }
 0x12b   :  { %v4212_v6 = vsel %vm4129_vm4, %v4211_v62, %v4210_v16  ;;  %v7494_v59 = vmin.u32 %v761_v36, %v9044_v58  ;;  %v4054_v7 = vor.u32 %v4053_v1, %v4052_v5  ;;  %vm4058_vm14 = vcmp.lt.s32.totalorder %v9037_v45, 4 }
 0x12c   :  { %v4215_v53 = vsel %vm8983_vm6, %v8824_v12, %v4212_v6  ;;  %vm894_vm15 = vcmp.lt.s32.totalorder %v9029_v47, 2  ;;  %vm7351_vm0 = vcmask 523264   ;;  %v4039_v13 = vshrl.u32 %v8477_v44, %v4038_v24 }
 0x12d   :  { %8215 = vcosq.f32 %v4215_v53  ;;  %v4063_v28 = vsel %vm4055_vm12, %v4042_v39, %v4045_v0  ;;  %v4064_v15 = vsel %vm4058_vm14, %v4051_v14, 920167782  ;;  %vm891_vm1 = vweird.f32 %v8821_v11 }
 0x12e   :  { %8217 = vsinq.f32 %v4215_v53  ;;  %vm9074_vm2 = vcmp.le.f32.partialorder %v695_v30, 0.7853982  ;;  %v763_v17 = vclz %v7494_v59  ;;  %vm4057_vm3 = vcmp.lt.s32.totalorder %v9037_v45, 3 }
 0x12f   :  { %v4060_v51 = vsel %vm4058_vm14, %v4048_v3, 2102212464  ;;  %v782_v18 = vsel %vm697_vm10, %v781_v9, %v757_v33  ;;  %vm4056_vm4 = vcmp.lt.s32.totalorder %v9037_v45, 2  ;;  %v4065_v34 = vsel %vm4057_vm3, %v4048_v3, %v4064_v15 }
 0x130   :  { %v4067_v19 = vsel %vm4055_vm12, %v4045_v0, %v4048_v3  ;;  %v7495_v21 = vadd.s32 4294967294, %v763_v17  ;;  %v4059_v30 = vsel %vm4055_vm12, %v4039_v13, %v4042_v39  ;;  %v4066_v22 = vsel %vm4056_vm4, %v4063_v28, %v4065_v34 }
 0x131   :  { %v4068_v4 = vsel %vm4058_vm14, %v4054_v7, 1326507024  ;;  %v4061_v24 = vsel %vm4057_vm3, %v4045_v0, %v4060_v51  ;;  %v9093_v40 = vmul.u32.u64.low %v9057_v10, %v4066_v22  ;;  %v9094_v33 = vmul.u32.u64.high %v9057_v10, %v4066_v22, %v9093_v40 }
 0x132   :  { %v8212_v23 = vpop.eup %8211  ;;  %v4069_v26 = vsel %vm4057_vm3, %v4051_v14, %v4068_v4  ;;  %vm7496_vm5 = vcmp.lt.s32.totalorder %v7495_v21, 0  ;;  %v1011_v35 = vshrl.u32 %v1010_v46, 23  ;;  %v4062_v57 = vsel %vm4056_vm4, %v4059_v30, %v4061_v24 }
 0x133   :  { %v8214_v42 = vpop.eup %8213  ;;  %v899_v37 = vxor.u32 2147483648, %v8212_v23  ;;  %v4070_v32 = vsel %vm4056_vm4, %v4067_v19, %v4069_v26  ;;  %v766_v56 = vsel %vm7496_vm5, 0, %v7495_v21  ;;  %v4221_v60 = vand.u32 3, %v9031_v31  ;;  %v7890_v31 = vpop.f32.mrf.mxu1 }
 0x134   :  { %v896_v43 = vxor.u32 2147483648, %v8214_v42  ;;  %v9100_v49 = vmul.u32.u64.low %v9057_v10, %v4070_v32  ;;  %v9101_v29 = vmul.u32.u64.high %v9057_v10, %v4070_v32, %v9100_v49  ;;  %v767_v55 = vsub.s32 32, %v766_v56 }
 0x135   :  { %v900_v16 = vsel %vm898_vm11, %v899_v37, %v8214_v42  ;;  %v771_v63 = vsub.s32 4294967266, %v766_v56  ;;  %v4081_v46 = vadd.s32 1, %v9094_v33  ;;  %v7505_v62 = vadd.s32 4294967169, %v1011_v35 }
 0x136   :  { %v897_v39 = vsel %vm895_vm13, %v8212_v23, %v896_v43  ;;  %v768_v14 = vshll.u32 %v9044_v58, %v766_v56  ;;  %v769_v1 = vshrl.u32 %v751_v2, %v767_v55  ;;  %v784_v45 = vsel %vm9074_vm2, 0, %v782_v18 }
 0x137   :  { %v901_v0 = vsel %vm894_vm15, %v897_v39, %v900_v16  ;;  %v772_v36 = vadd.s32 127, %v771_v63  ;;  %v4078_v5 = vmul.u32 %v9057_v10, %v4062_v57  ;;  %vm4080_vm6 = vc.u32 %v9101_v29, %v9093_v40 }
 0x138   :  { %v902_v3 = vsel %vm891_vm1, nan, %v901_v0  ;;  %v770_v47 = vor.u32 %v769_v1, %v768_v14  ;;  %v4082_v2 = vsel %vm4080_vm6, %v4081_v46, %v9094_v33  ;;  %v1017_v11 = vadd.s32 1, %v7505_v62 }
 0x139   :  { %7353 = vst.msk [vmem:[%s13788_s3 + $0x8] sm:$0xff] %vm7351_vm0, %v902_v3  ;;  %v773_v58 = vshll.u32 %v772_v36, 23  ;;  %v4083_v6 = vadd.s32 %v4082_v2, %v4078_v5  ;;  %v1007_v9 = vand.u32 2147483647, %v9024_v25  ;;  %vm4226_vm7 = vcmp.eq.s32.totalorder %v4221_v60, 2 }
 0x13a   :  { %v8216_v53 = vpop.eup %8215  ;;  %vm1018_vm8 = vcmp.gt.s32.totalorder %v1017_v11, 0  ;;  %v9128_v59 = vadd.f32 %v7890_v31, %v8818_v8  ;;  %v788_v28 = vadd.s32 3, %v784_v45  ;;  %v777_v34 = vcvt.s32.f32 %v770_v47 }
 0x13b   :  { %v774_v10 = vor.u32 4788187, %v773_v58  ;;  %v8218_v7 = vpop.eup %8217  ;;  %v4227_v13 = vxor.u32 2147483648, %v8216_v53  ;;  %v4084_v15 = vadd.s32 536870912, %v4083_v6  ;;  %v1019_v17 = vsel %vm1018_vm8, %v1017_v11, 0 }
 0x13c   :  { %v4224_v51 = vxor.u32 2147483648, %v8218_v7  ;;  %v1021_v19 = vand.u32 31, %v1019_v17  ;;  %vm4223_vm9 = vcmp.eq.s32.totalorder %v4221_v60, 0  ;;  %v1014_v22 = vand.u32 8388607, %v1007_v9 }
 0x13d   :  { %v775_v18 = vand.u32 2147483647, %v774_v10  ;;  %v4228_v21 = vsel %vm4226_vm7, %v4227_v13, %v8218_v7  ;;  %v9130_v30 = vshrl.u32 %v4084_v15, 30  ;;  %vm4222_vm11 = vcmp.lt.s32.totalorder %v4221_v60, 2 }
 0x13e   :  { %v4225_v4 = vsel %vm4223_vm9, %v8216_v53, %v4224_v51  ;;  %v1022_v24 = vsub.s32 32, %v1021_v19  ;;  %vm4219_vm12 = vweird.f32 %v8824_v12  ;;  %v9136_v32 = vand.u32 3, %v788_v28 }
 0x13f   :  { %v778_v23 = vmul.f32 %v777_v34, %v775_v18  ;;  %v4229_v26 = vsel %vm4222_vm11, %v4225_v4, %v4228_v21  ;;  %v4086_v33 = vshll.u32 %v9130_v30, 30  ;;  %v1015_v56 = vor.u32 8388608, %v1014_v22 }
 0x140   :  { %v4230_v42 = vsel %vm4219_vm12, nan, %v4229_v26  ;;  %v1025_v35 = vshrl.u32 %v8478_v48, %v1022_v24  ;;  %v1028_v49 = vshrl.u32 %v8479_v50, %v1022_v24  ;;  %v4338_v12 = vand.u32 2139095040, %v9128_v59 }
 0x141   :  { %v779_v37 = vxor.u32 2147483648, %v778_v23  ;;  %7385 = vst.msk [vmem:[%s13788_s3 + $0x108] sm:$0xff] %vm7351_vm0, %v4230_v42  ;;  %v9143_v43 = vsub.s32 %v4083_v6, %v4086_v33  ;;  %v1020_v55 = vshrl.u32 %v1019_v17, 5  ;;  %v1024_v63 = vshll.u32 %v8477_v44, %v1021_v19 }
 0x142   :  { %v1031_v57 = vshrl.u32 %v8480_v52, %v1022_v24  ;;  %v1027_v46 = vshll.u32 %v8478_v48, %v1021_v19  ;;  %v1030_v62 = vshll.u32 %v8479_v50, %v1021_v19  ;;  %v1033_v14 = vshll.u32 %v8480_v52, %v1021_v19 }
 0x143   :  { %v780_v16 = vsel %vm697_vm10, %v779_v37, %v778_v23  ;;  %v4089_v60 = vsub.s32 0, %v9143_v43  ;;  %v1026_v0 = vor.u32 %v1025_v35, %v1024_v63  ;;  %v1034_v1 = vshrl.u32 %v8481_v54, %v1022_v24 }
 0x144   :  { %v783_v39 = vsel %vm9074_vm2, %v8833_v20, %v780_v16  ;;  %v1029_v3 = vor.u32 %v1028_v49, %v1027_v46  ;;  %v1032_v45 = vor.u32 %v1031_v57, %v1030_v62  ;;  %v1036_v27 = vshll.u32 %v8481_v54, %v1021_v19 }
 0x145   :  { %8219 = vcosq.f32 %v783_v39  ;;  %v7622_v36 = vmin.u32 %v4089_v60, %v9143_v43  ;;  %v1035_v5 = vor.u32 %v1034_v1, %v1033_v14  ;;  %v1037_v31 = vshrl.u32 %v8482_v61, %v1022_v24 }
 0x146   :  { %8221 = vsinq.f32 %v783_v39  ;;  %v1055_v47 = vshll.u32 %v1015_v56, 8  ;;  %v1023_v2 = vshrl.u32 %v8477_v44, %v1022_v24  ;;  %vm1039_vm10 = vcmp.lt.s32.totalorder %v1020_v55, 1 }
 0x147   :  { %v4091_v58 = vclz %v7622_v36  ;;  %v4339_v11 = vshrl.u32 %v4338_v12, 23  ;;  %vm4025_vm13 = vcmp.lt.s32.totalorder %v8840_v38, 0  ;;  %v1038_v6 = vor.u32 %v1037_v31, %v1036_v27 }
 0x148   :  { %vm1040_vm14 = vcmp.lt.s32.totalorder %v1020_v55, 2  ;;  %vm1041_vm15 = vcmp.lt.s32.totalorder %v1020_v55, 3  ;;  %vm1042_vm1 = vcmp.lt.s32.totalorder %v1020_v55, 4  ;;  %v1047_v7 = vsel %vm1039_vm10, %v1026_v0, %v1029_v3 }
 0x149   :  { %v7623_v53 = vadd.s32 4294967294, %v4091_v58  ;;  %v1044_v10 = vsel %vm1042_vm1, %v1032_v45, 2102212464  ;;  %v1048_v13 = vsel %vm1042_vm1, %v1035_v5, 920167782  ;;  %v1043_v28 = vsel %vm1039_vm10, %v1023_v2, %v1026_v0 }
 0x14a   :  { %v1049_v15 = vsel %vm1041_vm15, %v1032_v45, %v1048_v13  ;;  %v1051_v17 = vsel %vm1039_vm10, %v1029_v3, %v1032_v45  ;;  %v1052_v51 = vsel %vm1042_vm1, %v1038_v6, 1326507024  ;;  %vm9166_vm2 = vcmp.le.f32.partialorder %v4023_v41, 0.7853982 }
 0x14b   :  { %vm7624_vm3 = vcmp.lt.s32.totalorder %v7623_v53, 0  ;;  %v1045_v34 = vsel %vm1041_vm15, %v1029_v3, %v1044_v10  ;;  %v1050_v19 = vsel %vm1040_vm14, %v1047_v7, %v1049_v15  ;;  %v1053_v21 = vsel %vm1041_vm15, %v1035_v5, %v1052_v51 }
 0x14c   :  { %v4094_v22 = vsel %vm7624_vm3, 0, %v7623_v53  ;;  %v1054_v4 = vsel %vm1040_vm14, %v1051_v17, %v1053_v21  ;;  %v9172_v23 = vmul.u32.u64.low %v1055_v47, %v1050_v19  ;;  %v9173_v24 = vmul.u32.u64.high %v1055_v47, %v1050_v19, %v9172_v23 }
 0x14d   :  { %v4079_v26 = vadd.s32 %v9093_v40, %v9101_v29  ;;  %v4095_v33 = vsub.s32 32, %v4094_v22  ;;  %v4099_v41 = vsub.s32 4294967266, %v4094_v22  ;;  %v4109_v42 = vsub.s32 4, %v9130_v30 }
 0x14e   :  { %v9179_v37 = vmul.u32.u64.low %v1055_v47, %v1054_v4  ;;  %v9180_v35 = vmul.u32.u64.high %v1055_v47, %v1054_v4, %v9179_v37  ;;  %v4335_v56 = vand.u32 2147483647, %v9128_v59  ;;  %v7633_v49 = vadd.s32 4294967169, %v4339_v11  ;;  %v386_v11 = vpop.f32.mrf.mxu0 }
 0x14f   :  { %v4096_v12 = vshll.u32 %v9143_v43, %v4094_v22  ;;  %v4097_v16 = vshrl.u32 %v4079_v26, %v4095_v33  ;;  %v4100_v63 = vadd.s32 127, %v4099_v41  ;;  %v1046_v57 = vsel %vm1040_vm14, %v1043_v28, %v1045_v34 }
 0x150   :  { %vm790_vm4 = vcmp.lt.s32.totalorder %v9136_v32, 2  ;;  %vm791_vm5 = vcmp.eq.s32.totalorder %v9136_v32, 0  ;;  %v1065_v40 = vadd.s32 1, %v9173_v24  ;;  %v4345_v29 = vadd.s32 1, %v7633_v49 }
 0x151   :  { %vm794_vm6 = vcmp.eq.s32.totalorder %v9136_v32, 2  ;;  %v4098_v60 = vor.u32 %v4097_v16, %v4096_v12  ;;  %v4101_v46 = vshll.u32 %v4100_v63, 23  ;;  %v4110_v43 = vsel %vm4025_vm13, %v4109_v42, %v9130_v30 }
 0x152   :  { %v8220_v39 = vpop.eup %8219  ;;  %v1062_v55 = vmul.u32 %v1055_v47, %v1046_v57  ;;  %vm1064_vm7 = vc.u32 %v9180_v35, %v9172_v23  ;;  %vm4346_vm8 = vcmp.gt.s32.totalorder %v4345_v29, 0  ;;  %v4342_v3 = vand.u32 8388607, %v4335_v56 }
 0x153   :  { %v8222_v62 = vpop.eup %8221  ;;  %v795_v0 = vxor.u32 2147483648, %v8220_v39  ;;  %v4102_v1 = vor.u32 4788187, %v4101_v46  ;;  %v1066_v36 = vsel %vm1064_vm7, %v1065_v40, %v9173_v24  ;;  %v4112_v5 = vsel %vm9166_vm2, 0, %v4110_v43 }
 0x154   :  { %v792_v14 = vxor.u32 2147483648, %v8222_v62  ;;  %v1067_v27 = vadd.s32 %v1066_v36, %v1062_v55  ;;  %v4347_v30 = vsel %vm4346_vm8, %v4345_v29, 0  ;;  %v4105_v58 = vcvt.s32.f32 %v4098_v60 }
 0x155   :  { %v796_v45 = vsel %vm794_vm6, %v795_v0, %v8222_v62  ;;  %v4103_v47 = vand.u32 2147483647, %v4102_v1  ;;  %v4349_v2 = vand.u32 31, %v4347_v30  ;;  %vm787_vm9 = vweird.f32 %v8833_v20 }
 0x156   :  { %v793_v31 = vsel %vm791_vm5, %v8220_v39, %v792_v14  ;;  %v1068_v53 = vadd.s32 536870912, %v1067_v27  ;;  %v4116_v13 = vadd.s32 3, %v4112_v5  ;;  %v4343_v17 = vor.u32 8388608, %v4342_v3 }
 0x157   :  { %v797_v6 = vsel %vm790_vm4, %v793_v31, %v796_v45  ;;  %v4106_v7 = vmul.f32 %v4105_v58, %v4103_v47  ;;  %v4350_v28 = vsub.s32 32, %v4349_v2  ;;  %v4352_v51 = vshll.u32 %v8477_v44, %v4349_v2 }
 0x158   :  { %v798_v10 = vsel %vm787_vm9, nan, %v797_v6  ;;  %v9208_v15 = vshrl.u32 %v1068_v53, 30  ;;  %v9212_v20 = vadd.f32 %v8818_v8, %v386_v11  ;;  %v4355_v19 = vshll.u32 %v8478_v48, %v4349_v2 }
 0x159   :  { %7352 = vst.msk [vmem:[%s13788_s3] sm:$0xff] %vm7351_vm0, %v798_v10  ;;  %v4107_v32 = vxor.u32 2147483648, %v4106_v7  ;;  %v4353_v34 = vshrl.u32 %v8478_v48, %v4350_v28  ;;  %v4356_v21 = vshrl.u32 %v8479_v50, %v4350_v28  ;;  %v4358_v4 = vshll.u32 %v8479_v50, %v4349_v2 }
 0x15a   :  { %v1070_v22 = vshll.u32 %v9208_v15, 30  ;;  %v4359_v24 = vshrl.u32 %v8480_v52, %v4350_v28  ;;  %v4362_v26 = vshrl.u32 %v8481_v54, %v4350_v28  ;;  %v4348_v8 = vshrl.u32 %v4347_v30, 5 }
 0x15b   :  { %v4108_v33 = vsel %vm4025_vm13, %v4107_v32, %v4106_v7  ;;  %v4354_v41 = vor.u32 %v4353_v34, %v4352_v51  ;;  %v4361_v42 = vshll.u32 %v8480_v52, %v4349_v2  ;;  %v4357_v12 = vor.u32 %v4356_v21, %v4355_v19 }
 0x15c   :  { %v4111_v37 = vsel %vm9166_vm2, %v8840_v38, %v4108_v33  ;;  %v9227_v49 = vsub.s32 %v1067_v27, %v1070_v22  ;;  %v4360_v16 = vor.u32 %v4359_v24, %v4358_v4  ;;  %v4364_v57 = vshll.u32 %v8481_v54, %v4349_v2 }
 0x15d   :  { %8223 = vcosq.f32 %v4111_v37  ;;  %v4363_v63 = vor.u32 %v4362_v26, %v4361_v42  ;;  %v4365_v40 = vshrl.u32 %v8482_v61, %v4350_v28  ;;  %v9231_v29 = vand.u32 3, %v4116_v13 }
 0x15e   :  { %8225 = vsinq.f32 %v4111_v37  ;;  %v1073_v39 = vsub.s32 0, %v9227_v49  ;;  %vm1009_vm11 = vcmp.lt.s32.totalorder %v9024_v25, 0  ;;  %vm4370_vm12 = vcmp.lt.s32.totalorder %v4348_v8, 4 }
 0x15f   :  { %v4366_v60 = vor.u32 %v4365_v40, %v4364_v57  ;;  %v4383_v18 = vshll.u32 %v4343_v17, 8  ;;  %v906_v46 = vand.u32 2139095040, %v9212_v20  ;;  %v4351_v62 = vshrl.u32 %v8477_v44, %v4350_v28 }
 0x160   :  { %v7506_v43 = vmin.u32 %v1073_v39, %v9227_v49  ;;  %vm4367_vm10 = vcmp.lt.s32.totalorder %v4348_v8, 1  ;;  %v4372_v0 = vsel %vm4370_vm12, %v4360_v16, 2102212464  ;;  %vm4368_vm13 = vcmp.lt.s32.totalorder %v4348_v8, 2 }
 0x161   :  { %v4375_v55 = vsel %vm4367_vm10, %v4354_v41, %v4357_v12  ;;  %v4376_v14 = vsel %vm4370_vm12, %v4363_v63, 920167782  ;;  %v903_v1 = vand.u32 2147483647, %v9212_v20  ;;  %vm4369_vm14 = vcmp.lt.s32.totalorder %v4348_v8, 3 }
 0x162   :  { %v1075_v36 = vclz %v7506_v43  ;;  %v4371_v3 = vsel %vm4367_vm10, %v4351_v62, %v4354_v41  ;;  %v4379_v45 = vsel %vm4367_vm10, %v4357_v12, %v4360_v16  ;;  %v4373_v5 = vsel %vm4369_vm14, %v4357_v12, %v4372_v0 }
 0x163   :  { %v4377_v27 = vsel %vm4369_vm14, %v4360_v16, %v4376_v14  ;;  %v4380_v30 = vsel %vm4370_vm12, %v4366_v60, 1326507024  ;;  %v907_v31 = vshrl.u32 %v906_v46, 23  ;;  %v1093_v58 = vsub.s32 4, %v9208_v15 }
 0x164   :  { %v7507_v47 = vadd.s32 4294967294, %v1075_v36  ;;  %v4378_v2 = vsel %vm4368_vm13, %v4375_v55, %v4377_v27  ;;  %v4381_v11 = vsel %vm4369_vm14, %v4363_v63, %v4380_v30  ;;  %v4374_v13 = vsel %vm4368_vm13, %v4371_v3, %v4373_v5 }
 0x165   :  { %v4382_v6 = vsel %vm4368_vm13, %v4379_v45, %v4381_v11  ;;  %v9245_v53 = vmul.u32.u64.low %v4383_v18, %v4378_v2  ;;  %v9246_v10 = vmul.u32.u64.high %v4383_v18, %v4378_v2, %v9245_v53  ;;  %v7501_v7 = vadd.s32 4294967169, %v907_v31 }
 0x166   :  { %vm7508_vm15 = vcmp.lt.s32.totalorder %v7507_v47, 0  ;;  %v9250_v28 = vmul.u32.u64.low %v4383_v18, %v4382_v6  ;;  %v9251_v17 = vmul.u32.u64.high %v4383_v18, %v4382_v6, %v9250_v28  ;;  %vm4115_vm1 = vweird.f32 %v8840_v38 }
 0x167   :  { %vm4122_vm2 = vcmp.eq.s32.totalorder %v9231_v29, 2  ;;  %vm9257_vm3 = vcmp.le.f32.partialorder %v1007_v9, 0.7853982  ;;  %v1078_v32 = vsel %vm7508_vm15, 0, %v7507_v47  ;;  %v913_v34 = vadd.s32 1, %v7501_v7 }
 0x168   :  { %v1063_v19 = vadd.s32 %v9172_v23, %v9180_v35  ;;  %v1079_v21 = vsub.s32 32, %v1078_v32  ;;  %v1083_v22 = vsub.s32 4294967266, %v1078_v32  ;;  %v1094_v4 = vsel %vm1009_vm11, %v1093_v58, %v9208_v15  ;;  %v546_v23 = vpop.f32.mrf.mxu1 }
 0x169   :  { %v4390_v24 = vmul.u32 %v4383_v18, %v4374_v13  ;;  %v4393_v26 = vadd.s32 1, %v9246_v10  ;;  %v910_v9 = vand.u32 8388607, %v903_v1  ;;  %vm914_vm4 = vcmp.gt.s32.totalorder %v913_v34, 0  ;;  %v9281_v18 = vld [vmem:[%s13787_s2] ss:$0 sm:$0xff] }
 0x16a   :  { %v8224_v33 = vpop.eup %8223  ;;  %v1080_v8 = vshll.u32 %v9227_v49, %v1078_v32  ;;  %v1081_v41 = vshrl.u32 %v1063_v19, %v1079_v21  ;;  %v1084_v42 = vadd.s32 127, %v1083_v22  ;;  %vm4392_vm5 = vc.u32 %v9251_v17, %v9245_v53 }
 0x16b   :  { %v8226_v35 = vpop.eup %8225  ;;  %v4123_v37 = vxor.u32 2147483648, %v8224_v33  ;;  %v1096_v15 = vsel %vm9257_vm3, 0, %v1094_v4  ;;  %v4394_v12 = vsel %vm4392_vm5, %v4393_v26, %v9246_v10  ;;  %v915_v16 = vsel %vm914_vm4, %v913_v34, 0 }
 0x16c   :  { %v4120_v63 = vxor.u32 2147483648, %v8226_v35  ;;  %v1082_v57 = vor.u32 %v1081_v41, %v1080_v8  ;;  %v1085_v40 = vshll.u32 %v1084_v42, 23  ;;  %v4395_v39 = vadd.s32 %v4394_v12, %v4390_v24 }
 0x16d   :  { %vm4119_vm6 = vcmp.eq.s32.totalorder %v9231_v29, 0  ;;  %v4124_v49 = vsel %vm4122_vm2, %v4123_v37, %v8226_v35  ;;  %v917_v60 = vand.u32 31, %v915_v16  ;;  %v9284_v46 = vadd.f32 %v9281_v18, %v546_v23 }
 0x16e   :  { %vm4118_vm7 = vcmp.lt.s32.totalorder %v9231_v29, 2  ;;  %v4121_v43 = vsel %vm4119_vm6, %v8224_v33, %v4120_v63  ;;  %v1086_v62 = vor.u32 4788187, %v1085_v40  ;;  %v4396_v0 = vadd.s32 536870912, %v4395_v39 }
 0x16f   :  { %v4125_v55 = vsel %vm4118_vm7, %v4121_v43, %v4124_v49  ;;  %v9287_v14 = vadd.s32 3, %v1096_v15  ;;  %v911_v36 = vor.u32 8388608, %v910_v9  ;;  %v918_v3 = vsub.s32 32, %v917_v60 }
 0x170   :  { %v4126_v45 = vsel %vm4115_vm1, nan, %v4125_v55  ;;  %v1087_v5 = vand.u32 2147483647, %v1086_v62  ;;  %v1089_v27 = vcvt.s32.f32 %v1082_v57  ;;  %v9291_v30 = vshrl.u32 %v4396_v0, 30 }
 0x171   :  { %7384 = vst.msk [vmem:[%s13788_s3 + $0x100] sm:$0xff] %vm7351_vm0, %v4126_v45  ;;  %v921_v29 = vshrl.u32 %v8478_v48, %v918_v3  ;;  %v924_v31 = vshrl.u32 %v8479_v50, %v918_v3  ;;  %v927_v47 = vshrl.u32 %v8480_v52, %v918_v3  ;;  %v4234_v58 = vand.u32 2139095040, %v9284_v46 }
 0x172   :  { %v1090_v2 = vmul.f32 %v1089_v27, %v1087_v5  ;;  %v4398_v38 = vshll.u32 %v9291_v30, 30  ;;  %v920_v11 = vshll.u32 %v8477_v44, %v917_v60  ;;  %v923_v6 = vshll.u32 %v8478_v48, %v917_v60 }
 0x173   :  { %v916_v10 = vshrl.u32 %v915_v16, 5  ;;  %v926_v7 = vshll.u32 %v8479_v50, %v917_v60  ;;  %v929_v13 = vshll.u32 %v8480_v52, %v917_v60  ;;  %v930_v28 = vshrl.u32 %v8481_v54, %v918_v3 }
 0x174   :  { %v1091_v32 = vxor.u32 2147483648, %v1090_v2  ;;  %v9307_v34 = vsub.s32 %v4395_v39, %v4398_v38  ;;  %v922_v19 = vor.u32 %v921_v29, %v920_v11  ;;  %v925_v21 = vor.u32 %v924_v31, %v923_v6 }
 0x175   :  { %v928_v22 = vor.u32 %v927_v47, %v926_v7  ;;  %v931_v4 = vor.u32 %v930_v28, %v929_v13  ;;  %v932_v24 = vshll.u32 %v8481_v54, %v917_v60  ;;  %v933_v26 = vshrl.u32 %v8482_v61, %v918_v3 }
 0x176   :  { %v1092_v9 = vsel %vm1009_vm11, %v1091_v32, %v1090_v2  ;;  %v4401_v33 = vsub.s32 0, %v9307_v34  ;;  %v951_v8 = vshll.u32 %v911_v36, 8  ;;  %v4231_v41 = vand.u32 2147483647, %v9284_v46 }
 0x177   :  { %v1095_v42 = vsel %vm9257_vm3, %v9024_v25, %v1092_v9  ;;  %v919_v23 = vshrl.u32 %v8477_v44, %v918_v3  ;;  %v934_v35 = vor.u32 %v933_v26, %v932_v24  ;;  %v4235_v37 = vshrl.u32 %v4234_v58, 23 }
 0x178   :  { %8227 = vcosq.f32 %v1095_v42  ;;  %v7634_v15 = vmin.u32 %v4401_v33, %v9307_v34  ;;  %vm935_vm8 = vcmp.lt.s32.totalorder %v916_v10, 1  ;;  %vm938_vm9 = vcmp.lt.s32.totalorder %v916_v10, 4 }
 0x179   :  { %8229 = vsinq.f32 %v1095_v42  ;;  %v940_v12 = vsel %vm938_vm9, %v928_v22, 2102212464  ;;  %v943_v16 = vsel %vm935_vm8, %v922_v19, %v925_v21  ;;  %v944_v63 = vsel %vm938_vm9, %v931_v4, 920167782 }
 0x17a   :  { %v4403_v57 = vclz %v7634_v15  ;;  %vm936_vm11 = vcmp.lt.s32.totalorder %v916_v10, 2  ;;  %vm937_vm12 = vcmp.lt.s32.totalorder %v916_v10, 3  ;;  %v939_v40 = vsel %vm935_vm8, %v919_v23, %v922_v19  ;;  %v7845_v23 = vpop.f32.mrf.mxu0 }
 0x17b   :  { %v941_v39 = vsel %vm937_vm12, %v925_v21, %v940_v12  ;;  %v945_v51 = vsel %vm937_vm12, %v928_v22, %v944_v63  ;;  %v947_v49 = vsel %vm935_vm8, %v925_v21, %v928_v22  ;;  %v948_v60 = vsel %vm938_vm9, %v934_v35, 1326507024 }
 0x17c   :  { %v7635_v43 = vadd.s32 4294967294, %v4403_v57  ;;  %v4421_v62 = vsub.s32 4, %v9291_v30  ;;  %v946_v0 = vsel %vm936_vm11, %v943_v16, %v945_v51  ;;  %v949_v55 = vsel %vm937_vm12, %v931_v4, %v948_v60 }
 0x17d   :  { %v942_v36 = vsel %vm936_vm11, %v939_v40, %v941_v39  ;;  %v950_v3 = vsel %vm936_vm11, %v947_v49, %v949_v55  ;;  %v9321_v45 = vmul.u32.u64.low %v951_v8, %v946_v0  ;;  %v9322_v5 = vmul.u32.u64.high %v951_v8, %v946_v0, %v9321_v45 }
 0x17e   :  { %vm7636_vm10 = vcmp.lt.s32.totalorder %v7635_v43, 0  ;;  %v9324_v27 = vmul.u32.u64.low %v951_v8, %v950_v3  ;;  %v9325_v29 = vmul.u32.u64.high %v951_v8, %v950_v3, %v9324_v27  ;;  %v7629_v31 = vadd.s32 4294967169, %v4235_v37 }
 0x17f   :  { %vm9329_vm13 = vcmp.le.f32.partialorder %v4335_v56, 0.7853982  ;;  %vm4337_vm14 = vcmp.lt.s32.totalorder %v9128_v59, 0  ;;  %v4391_v58 = vadd.s32 %v9245_v53, %v9251_v17  ;;  %v4406_v2 = vsel %vm7636_vm10, 0, %v7635_v43 }
 0x180   :  { %v4407_v38 = vsub.s32 32, %v4406_v2  ;;  %v4411_v11 = vsub.s32 4294967266, %v4406_v2  ;;  %v4422_v6 = vsel %vm4337_vm14, %v4421_v62, %v9291_v30  ;;  %v4241_v10 = vadd.s32 1, %v7629_v31 }
 0x181   :  { %v1101_v7 = vand.u32 3, %v9287_v14  ;;  %v958_v13 = vmul.u32 %v951_v8, %v942_v36  ;;  %v961_v56 = vadd.s32 1, %v9322_v5  ;;  %v4238_v28 = vand.u32 8388607, %v4231_v41 }
 0x182   :  { %v4408_v32 = vshll.u32 %v9307_v34, %v4406_v2  ;;  %v4409_v19 = vshrl.u32 %v4391_v58, %v4407_v38  ;;  %v4412_v53 = vadd.s32 127, %v4411_v11  ;;  %vm960_vm15 = vc.u32 %v9325_v29, %v9321_v45 }
 0x183   :  { %v4424_v17 = vsel %vm9329_vm13, 0, %v4422_v6  ;;  %v962_v30 = vsel %vm960_vm15, %v961_v56, %v9322_v5  ;;  %vm4242_vm1 = vcmp.gt.s32.totalorder %v4241_v10, 0  ;;  %vm1099_vm2 = vweird.f32 %v9024_v25 }
 0x184   :  { %v4410_v21 = vor.u32 %v4409_v19, %v4408_v32  ;;  %v4413_v14 = vshll.u32 %v4412_v53, 23  ;;  %v963_v22 = vadd.s32 %v962_v30, %v958_v13  ;;  %v4243_v4 = vsel %vm4242_vm1, %v4241_v10, 0 }
 0x185   :  { %v8228_v24 = vpop.eup %8227  ;;  %vm1102_vm3 = vcmp.lt.s32.totalorder %v1101_v7, 2  ;;  %vm1103_vm4 = vcmp.eq.s32.totalorder %v1101_v7, 0  ;;  %v4245_v34 = vand.u32 31, %v4243_v4  ;;  %v4239_v42 = vor.u32 8388608, %v4238_v28 }
 0x186   :  { %v8230_v26 = vpop.eup %8229  ;;  %v1107_v9 = vxor.u32 2147483648, %v8228_v24  ;;  %v4414_v33 = vor.u32 4788187, %v4413_v14  ;;  %v964_v8 = vadd.s32 536870912, %v963_v22  ;;  %vm1106_vm5 = vcmp.eq.s32.totalorder %v1101_v7, 2 }
 0x187   :  { %v1104_v35 = vxor.u32 2147483648, %v8230_v26  ;;  %v9349_v37 = vadd.s32 3, %v4424_v17  ;;  %v4246_v15 = vsub.s32 32, %v4245_v34  ;;  %v4417_v63 = vcvt.s32.f32 %v4410_v21 }
 0x188   :  { %v1108_v12 = vsel %vm1106_vm5, %v1107_v9, %v8230_v26  ;;  %v4415_v16 = vand.u32 2147483647, %v4414_v33  ;;  %v965_v57 = vshrl.u32 %v964_v8, 30  ;;  %v9353_v39 = vadd.s32 %v9321_v45, %v9325_v29 }
 0x189   :  { %v1105_v40 = vsel %vm1103_vm4, %v8228_v24, %v1104_v35  ;;  %v4249_v51 = vshrl.u32 %v8478_v48, %v4246_v15  ;;  %v9357_v49 = vadd.f32 %v9281_v18, %v7845_v23  ;;  %v9360_v0 = vshll.u32 %v4239_v42, 8 }
 0x18a   :  { %v1109_v60 = vsel %vm1102_vm3, %v1105_v40, %v1108_v12  ;;  %v4418_v43 = vmul.f32 %v4417_v63, %v4415_v16  ;;  %v966_v62 = vshll.u32 %v965_v57, 30  ;;  %v4248_v36 = vshll.u32 %v8477_v44, %v4245_v34 }
 0x18b   :  { %v1110_v55 = vsel %vm1099_vm2, nan, %v1109_v60  ;;  %v4252_v3 = vshrl.u32 %v8479_v50, %v4246_v15  ;;  %v4255_v45 = vshrl.u32 %v8480_v52, %v4246_v15  ;;  %v4244_v29 = vshrl.u32 %v4243_v4, 5 }
 0x18c   :  { %7355 = vst.msk [vmem:[%s13788_s3 + $0x18] sm:$0xff] %vm7351_vm0, %v1110_v55  ;;  %v4419_v5 = vxor.u32 2147483648, %v4418_v43  ;;  %v9371_v27 = vsub.s32 %v963_v22, %v966_v62  ;;  %v4251_v31 = vshll.u32 %v8478_v48, %v4245_v34  ;;  %v4250_v58 = vor.u32 %v4249_v51, %v4248_v36 }
 0x18d   :  { %v4254_v25 = vshll.u32 %v8479_v50, %v4245_v34  ;;  %v4257_v2 = vshll.u32 %v8480_v52, %v4245_v34  ;;  %v4258_v38 = vshrl.u32 %v8481_v54, %v4246_v15  ;;  %vm905_vm6 = vcmp.lt.s32.totalorder %v9212_v20, 0 }
 0x18e   :  { %v4420_v11 = vsel %vm4337_vm14, %v4419_v5, %v4418_v43  ;;  %v969_v6 = vsub.s32 0, %v9371_v27  ;;  %v4260_v10 = vshll.u32 %v8481_v54, %v4245_v34  ;;  %v4261_v7 = vshrl.u32 %v8482_v61, %v4246_v15 }
 0x18f   :  { %v4423_v13 = vsel %vm9329_vm13, %v9128_v59, %v4420_v11  ;;  %v4253_v56 = vor.u32 %v4252_v3, %v4251_v31  ;;  %v4256_v28 = vor.u32 %v4255_v45, %v4254_v25  ;;  %v4259_v32 = vor.u32 %v4258_v38, %v4257_v2 }
 0x190   :  { %8231 = vcosq.f32 %v4423_v13  ;;  %v7502_v19 = vmin.u32 %v969_v6, %v9371_v27  ;;  %v4262_v53 = vor.u32 %v4261_v7, %v4260_v10  ;;  %v1218_v17 = vand.u32 2139095040, %v9357_v49 }
 0x191   :  { %8233 = vsinq.f32 %v4423_v13  ;;  %v989_v30 = vsub.s32 4, %v965_v57  ;;  %v4247_v21 = vshrl.u32 %v8477_v44, %v4246_v15  ;;  %vm4263_vm7 = vcmp.lt.s32.totalorder %v4244_v29, 1 }
 0x192   :  { %v971_v14 = vclz %v7502_v19  ;;  %vm4264_vm8 = vcmp.lt.s32.totalorder %v4244_v29, 2  ;;  %vm4265_vm9 = vcmp.lt.s32.totalorder %v4244_v29, 3  ;;  %vm4266_vm11 = vcmp.lt.s32.totalorder %v4244_v29, 4 }
 0x193   :  { %v4268_v47 = vsel %vm4266_vm11, %v4256_v28, 2102212464  ;;  %v4271_v22 = vsel %vm4263_vm7, %v4250_v58, %v4253_v56  ;;  %v4272_v4 = vsel %vm4266_vm11, %v4259_v32, 920167782  ;;  %v4275_v24 = vsel %vm4263_vm7, %v4253_v56, %v4256_v28 }
 0x194   :  { %v7503_v34 = vadd.s32 4294967294, %v971_v14  ;;  %v4267_v26 = vsel %vm4263_vm7, %v4247_v21, %v4250_v58  ;;  %v4273_v9 = vsel %vm4265_vm9, %v4256_v28, %v4272_v4  ;;  %v4276_v33 = vsel %vm4266_vm11, %v4262_v53, 1326507024  ;;  %v7893_v21 = vpop.f32.mrf.mxu1 }
 0x195   :  { %v4269_v8 = vsel %vm4265_vm9, %v4253_v56, %v4268_v47  ;;  %v4274_v42 = vsel %vm4264_vm8, %v4271_v22, %v4273_v9  ;;  %v4277_v23 = vsel %vm4265_vm9, %v4259_v32, %v4276_v33  ;;  %v1219_v35 = vshrl.u32 %v1218_v17, 23 }
 0x196   :  { %vm7504_vm12 = vcmp.lt.s32.totalorder %v7503_v34, 0  ;;  %v4278_v15 = vsel %vm4264_vm8, %v4275_v24, %v4277_v23  ;;  %v9392_v12 = vmul.u32.u64.low %v9360_v0, %v4274_v42  ;;  %v9393_v16 = vmul.u32.u64.high %v9360_v0, %v4274_v42, %v9392_v12 }
 0x197   :  { %v974_v63 = vsel %vm7504_vm12, 0, %v7503_v34  ;;  %v990_v40 = vsel %vm905_vm6, %v989_v30, %v965_v57  ;;  %v9399_v51 = vmul.u32.u64.low %v9360_v0, %v4278_v15  ;;  %v9400_v60 = vmul.u32.u64.high %v9360_v0, %v4278_v15, %v9399_v51 }
 0x198   :  { %v975_v43 = vsub.s32 32, %v974_v63  ;;  %v979_v62 = vsub.s32 4294967266, %v974_v63  ;;  %v4270_v55 = vsel %vm4264_vm8, %v4267_v26, %v4269_v8  ;;  %v7513_v36 = vadd.s32 4294967169, %v1219_v35 }
 0x199   :  { %vm9405_vm10 = vcmp.le.f32.partialorder %v903_v1, 0.7853982  ;;  %v976_v45 = vshll.u32 %v9371_v27, %v974_v63  ;;  %v1215_v5 = vand.u32 2147483647, %v9357_v49  ;;  %v4289_v58 = vadd.s32 1, %v9393_v16 }
 0x19a   :  { %v977_v57 = vshrl.u32 %v9353_v39, %v975_v43  ;;  %v980_v31 = vadd.s32 127, %v979_v62  ;;  %v1225_v25 = vadd.s32 1, %v7513_v36  ;;  %v4429_v29 = vand.u32 3, %v9349_v37 }
 0x19b   :  { %v992_v2 = vsel %vm9405_vm10, 0, %v990_v40  ;;  %v4286_v1 = vmul.u32 %v9360_v0, %v4270_v55  ;;  %vm4288_vm13 = vc.u32 %v9400_v60, %v9392_v12  ;;  %vm4427_vm15 = vweird.f32 %v9128_v59 }
 0x19c   :  { %v978_v38 = vor.u32 %v977_v57, %v976_v45  ;;  %v981_v27 = vshll.u32 %v980_v31, 23  ;;  %v4290_v11 = vsel %vm4288_vm13, %v4289_v58, %v9393_v16  ;;  %vm1226_vm14 = vcmp.gt.s32.totalorder %v1225_v25, 0 }
 0x19d   :  { %v8232_v39 = vpop.eup %8231  ;;  %v4291_v6 = vadd.s32 %v4290_v11, %v4286_v1  ;;  %v1227_v10 = vsel %vm1226_vm14, %v1225_v25, 0  ;;  %v996_v56 = vadd.s32 3, %v992_v2  ;;  %v1222_v0 = vand.u32 8388607, %v1215_v5 }
 0x19e   :  { %v8234_v7 = vpop.eup %8233  ;;  %v4435_v37 = vxor.u32 2147483648, %v8232_v39  ;;  %v982_v13 = vor.u32 4788187, %v981_v27  ;;  %vm4434_vm1 = vcmp.eq.s32.totalorder %v4429_v29, 2  ;;  %v1229_v19 = vand.u32 31, %v1227_v10 }
 0x19f   :  { %v4432_v28 = vxor.u32 2147483648, %v8234_v7  ;;  %v4292_v32 = vadd.s32 536870912, %v4291_v6  ;;  %vm4431_vm2 = vcmp.eq.s32.totalorder %v4429_v29, 0  ;;  %v985_v30 = vcvt.s32.f32 %v978_v38 }
 0x1a0   :  { %v4436_v53 = vsel %vm4434_vm1, %v4435_v37, %v8234_v7  ;;  %v983_v17 = vand.u32 2147483647, %v982_v13  ;;  %vm4430_vm3 = vcmp.lt.s32.totalorder %v4429_v29, 2  ;;  %v1230_v22 = vsub.s32 32, %v1229_v19 }
 0x1a1   :  { %v4433_v14 = vsel %vm4431_vm2, %v8232_v39, %v4432_v28  ;;  %v9423_v47 = vshrl.u32 %v4292_v32, 30  ;;  %v9425_v34 = vand.u32 3, %v996_v56  ;;  %v1223_v26 = vor.u32 8388608, %v1222_v0 }
 0x1a2   :  { %v4437_v4 = vsel %vm4430_vm3, %v4433_v14, %v4436_v53  ;;  %v986_v24 = vmul.f32 %v985_v30, %v983_v17  ;;  %v1232_v8 = vshll.u32 %v8477_v44, %v1229_v19  ;;  %v9432_v42 = vadd.f32 %v9281_v18, %v7893_v21 }
 0x1a3   :  { %v4438_v9 = vsel %vm4427_vm15, nan, %v4437_v4  ;;  %v4294_v33 = vshll.u32 %v9423_v47, 30  ;;  %v1233_v35 = vshrl.u32 %v8478_v48, %v1230_v22  ;;  %v1236_v15 = vshrl.u32 %v8479_v50, %v1230_v22 }
 0x1a4   :  { %7387 = vst.msk [vmem:[%s13788_s3 + $0x118] sm:$0xff] %vm7351_vm0, %v4438_v9  ;;  %v987_v23 = vxor.u32 2147483648, %v986_v24  ;;  %v1239_v59 = vshrl.u32 %v8480_v52, %v1230_v22  ;;  %v1235_v63 = vshll.u32 %v8478_v48, %v1229_v19  ;;  %v1238_v40 = vshll.u32 %v8479_v50, %v1229_v19 }
 0x1a5   :  { %v9441_v16 = vsub.s32 %v4291_v6, %v4294_v33  ;;  %v1242_v51 = vshrl.u32 %v8481_v54, %v1230_v22  ;;  %v1228_v62 = vshrl.u32 %v1227_v10, 5  ;;  %v1234_v55 = vor.u32 %v1233_v35, %v1232_v8 }
 0x1a6   :  { %v988_v43 = vsel %vm905_vm6, %v987_v23, %v986_v24  ;;  %v1241_v36 = vshll.u32 %v8480_v52, %v1229_v19  ;;  %v1237_v31 = vor.u32 %v1236_v15, %v1235_v63  ;;  %v1240_v58 = vor.u32 %v1239_v59, %v1238_v40 }
 0x1a7   :  { %v991_v45 = vsel %vm9405_vm10, %v9212_v20, %v988_v43  ;;  %v4297_v57 = vsub.s32 0, %v9441_v16  ;;  %v1244_v29 = vshll.u32 %v8481_v54, %v1229_v19  ;;  %v1245_v2 = vshrl.u32 %v8482_v61, %v1230_v22 }
 0x1a8   :  { %8235 = vcosq.f32 %v991_v45  ;;  %v1243_v25 = vor.u32 %v1242_v51, %v1241_v36  ;;  %v1263_v38 = vshll.u32 %v1223_v26, 8  ;;  %v4546_v27 = vand.u32 2139095040, %v9432_v42 }
 0x1a9   :  { %8237 = vsinq.f32 %v991_v45  ;;  %v7630_v1 = vmin.u32 %v4297_v57, %v9441_v16  ;;  %v1231_v11 = vshrl.u32 %v8477_v44, %v1230_v22  ;;  %v1246_v3 = vor.u32 %v1245_v2, %v1244_v29 }
 0x1aa   :  { %vm1247_vm4 = vcmp.lt.s32.totalorder %v1228_v62, 1  ;;  %vm1248_vm5 = vcmp.lt.s32.totalorder %v1228_v62, 2  ;;  %vm1249_vm6 = vcmp.lt.s32.totalorder %v1228_v62, 3  ;;  %vm1250_vm7 = vcmp.lt.s32.totalorder %v1228_v62, 4 }
 0x1ab   :  { %v4299_v39 = vclz %v7630_v1  ;;  %v1255_v6 = vsel %vm1247_vm4, %v1234_v55, %v1237_v31  ;;  %v1252_v10 = vsel %vm1250_vm7, %v1240_v58, 2102212464  ;;  %v1256_v7 = vsel %vm1250_vm7, %v1243_v25, 920167782 }
 0x1ac   :  { %v1259_v37 = vsel %vm1247_vm4, %v1237_v31, %v1240_v58  ;;  %v1260_v13 = vsel %vm1250_vm7, %v1246_v3, 1326507024  ;;  %v4317_v0 = vsub.s32 4, %v9423_v47  ;;  %v1257_v28 = vsel %vm1249_vm6, %v1240_v58, %v1256_v7 }
 0x1ad   :  { %v7631_v56 = vadd.s32 4294967294, %v4299_v39  ;;  %v1261_v32 = vsel %vm1249_vm6, %v1243_v25, %v1260_v13  ;;  %v1251_v19 = vsel %vm1247_vm4, %v1231_v11, %v1234_v55  ;;  %v1258_v53 = vsel %vm1248_vm5, %v1255_v6, %v1257_v28 }
 0x1ae   :  { %v1262_v17 = vsel %vm1248_vm5, %v1259_v37, %v1261_v32  ;;  %v4547_v30 = vshrl.u32 %v4546_v27, 23  ;;  %v1253_v21 = vsel %vm1249_vm6, %v1237_v31, %v1252_v10  ;;  %vm9473_vm9 = vcmp.le.f32.partialorder %v4231_v41, 0.7853982 }
 0x1af   :  { %vm7632_vm8 = vcmp.lt.s32.totalorder %v7631_v56, 0  ;;  %v9464_v14 = vmul.u32.u64.low %v1263_v38, %v1262_v17  ;;  %v9465_v22 = vmul.u32.u64.high %v1263_v38, %v1262_v17, %v9464_v14  ;;  %v4287_v8 = vadd.s32 %v9392_v12, %v9400_v60 }
 0x1b0   :  { %v4302_v4 = vsel %vm7632_vm8, 0, %v7631_v56  ;;  %v9467_v24 = vmul.u32.u64.low %v1263_v38, %v1258_v53  ;;  %v9468_v26 = vmul.u32.u64.high %v1263_v38, %v1258_v53, %v9467_v24  ;;  %v7641_v9 = vadd.s32 4294967169, %v4547_v30 }
 0x1b1   :  { %v4303_v23 = vsub.s32 32, %v4302_v4  ;;  %v4307_v35 = vsub.s32 4294967266, %v4302_v4  ;;  %vm995_vm11 = vweird.f32 %v9212_v20  ;;  %vm998_vm12 = vcmp.lt.s32.totalorder %v9425_v34, 2 }
 0x1b2   :  { %vm4233_vm10 = vcmp.lt.s32.totalorder %v9284_v46, 0  ;;  %v1254_v15 = vsel %vm1248_vm5, %v1251_v19, %v1253_v21  ;;  %v4553_v59 = vadd.s32 1, %v7641_v9  ;;  %v4304_v63 = vshll.u32 %v9441_v16, %v4302_v4  ;;  %v396_v16 = vpop.f32.mrf.mxu0 }
 0x1b3   :  { %v4305_v41 = vshrl.u32 %v4287_v8, %v4303_v23  ;;  %v4308_v40 = vadd.s32 127, %v4307_v35  ;;  %vm1272_vm13 = vc.u32 %v9465_v22, %v9467_v24  ;;  %vm999_vm14 = vcmp.eq.s32.totalorder %v9425_v34, 0 }
 0x1b4   :  { %v4318_v12 = vsel %vm4233_vm10, %v4317_v0, %v9423_v47  ;;  %v1273_v60 = vadd.s32 1, %v9468_v26  ;;  %vm4554_vm15 = vcmp.gt.s32.totalorder %v4553_v59, 0  ;;  %v1270_v55 = vmul.u32 %v1263_v38, %v1254_v15 }
 0x1b5   :  { %v8236_v51 = vpop.eup %8235  ;;  %v4306_v43 = vor.u32 %v4305_v41, %v4304_v63  ;;  %v4309_v62 = vshll.u32 %v4308_v40, 23  ;;  %v4555_v36 = vsel %vm4554_vm15, %v4553_v59, 0  ;;  %v4543_v58 = vand.u32 2147483647, %v9432_v42 }
 0x1b6   :  { %v8238_v45 = vpop.eup %8237  ;;  %v1003_v57 = vxor.u32 2147483648, %v8236_v51  ;;  %v1274_v31 = vsel %vm1272_vm13, %v1273_v60, %v9468_v26  ;;  %v4557_v25 = vand.u32 31, %v4555_v36  ;;  %vm1002_vm1 = vcmp.eq.s32.totalorder %v9425_v34, 2 }
 0x1b7   :  { %v1000_v29 = vxor.u32 2147483648, %v8238_v45  ;;  %v4310_v47 = vor.u32 4788187, %v4309_v62  ;;  %v1275_v2 = vadd.s32 %v1274_v31, %v1270_v55  ;;  %v4320_v27 = vsel %vm9473_vm9, 0, %v4318_v12 }
 0x1b8   :  { %v1004_v1 = vsel %vm1002_vm1, %v1003_v57, %v8238_v45  ;;  %v4558_v11 = vsub.s32 32, %v4557_v25  ;;  %v9497_v38 = vadd.f32 %v9281_v18, %v396_v16  ;;  %v4313_v6 = vcvt.s32.f32 %v4306_v43 }
 0x1b9   :  { %v1001_v3 = vsel %vm999_vm14, %v8236_v51, %v1000_v29  ;;  %v4311_v39 = vand.u32 2147483647, %v4310_v47  ;;  %v1276_v10 = vadd.s32 536870912, %v1275_v2  ;;  %v4550_v37 = vand.u32 8388607, %v4543_v58 }
 0x1ba   :  { %v1005_v7 = vsel %vm998_vm12, %v1001_v3, %v1004_v1  ;;  %v4561_v13 = vshrl.u32 %v8478_v48, %v4558_v11  ;;  %v4564_v56 = vshrl.u32 %v8479_v50, %v4558_v11  ;;  %v4567_v19 = vshrl.u32 %v8480_v52, %v4558_v11 }
 0x1bb   :  { %v1006_v0 = vsel %vm995_vm11, nan, %v1005_v7  ;;  %v4314_v28 = vmul.f32 %v4313_v6, %v4311_v39  ;;  %v1277_v32 = vshrl.u32 %v1276_v10, 30  ;;  %v4556_v34 = vshrl.u32 %v4555_v36, 5 }
 0x1bc   :  { %7354 = vst.msk [vmem:[%s13788_s3 + $0x10] sm:$0xff] %vm7351_vm0, %v1006_v0  ;;  %v4560_v53 = vshll.u32 %v8477_v44, %v4557_v25  ;;  %v4566_v17 = vshll.u32 %v8479_v50, %v4557_v25  ;;  %v4570_v30 = vshrl.u32 %v8481_v54, %v4558_v11  ;;  %v4563_v20 = vshll.u32 %v8478_v48, %v4557_v25 }
 0x1bd   :  { %v4315_v21 = vxor.u32 2147483648, %v4314_v28  ;;  %v1278_v14 = vshll.u32 %v1277_v32, 30  ;;  %v4569_v4 = vshll.u32 %v8480_v52, %v4557_v25  ;;  %v4572_v8 = vshll.u32 %v8481_v54, %v4557_v25 }
 0x1be   :  { %v4562_v26 = vor.u32 %v4561_v13, %v4560_v53  ;;  %v4568_v9 = vor.u32 %v4567_v19, %v4566_v17  ;;  %v4573_v23 = vshrl.u32 %v8482_v61, %v4558_v11  ;;  %v4565_v59 = vor.u32 %v4564_v56, %v4563_v20 }
 0x1bf   :  { %v4316_v35 = vsel %vm4233_vm10, %v4315_v21, %v4314_v28  ;;  %v9523_v15 = vsub.s32 %v1275_v2, %v1278_v14  ;;  %v4571_v63 = vor.u32 %v4570_v30, %v4569_v4  ;;  %v4324_v40 = vadd.s32 3, %v4320_v27 }
 0x1c0   :  { %v4319_v41 = vsel %vm9473_vm9, %v9284_v46, %v4316_v35  ;;  %v4551_v12 = vor.u32 8388608, %v4550_v37  ;;  %v4574_v60 = vor.u32 %v4573_v23, %v4572_v8  ;;  %vm4578_vm2 = vcmp.lt.s32.totalorder %v4556_v34, 4 }
 0x1c1   :  { %8239 = vcosq.f32 %v4319_v41  ;;  %v1281_v51 = vsub.s32 0, %v9523_v15  ;;  %v1114_v43 = vand.u32 2139095040, %v9497_v38  ;;  %v4559_v62 = vshrl.u32 %v8477_v44, %v4558_v11 }
 0x1c2   :  { %8241 = vsinq.f32 %v4319_v41  ;;  %vm4575_vm3 = vcmp.lt.s32.totalorder %v4556_v34, 1  ;;  %v4580_v55 = vsel %vm4578_vm2, %v4568_v9, 2102212464  ;;  %vm4577_vm4 = vcmp.lt.s32.totalorder %v4556_v34, 3 }
 0x1c3   :  { %v7514_v36 = vmin.u32 %v1281_v51, %v9523_v15  ;;  %v4583_v16 = vsel %vm4575_vm3, %v4562_v26, %v4565_v59  ;;  %v4584_v33 = vsel %vm4578_vm2, %v4571_v63, 920167782  ;;  %v1301_v45 = vsub.s32 4, %v1277_v32 }
 0x1c4   :  { %v4585_v57 = vsel %vm4577_vm4, %v4568_v9, %v4584_v33  ;;  %v4587_v31 = vsel %vm4575_vm3, %v4565_v59, %v4568_v9  ;;  %v4588_v25 = vsel %vm4578_vm2, %v4574_v60, 1326507024  ;;  %vm4576_vm5 = vcmp.lt.s32.totalorder %v4556_v34, 2 }
 0x1c5   :  { %v1283_v29 = vclz %v7514_v36  ;;  %v4579_v47 = vsel %vm4575_vm3, %v4559_v62, %v4562_v26  ;;  %v4581_v2 = vsel %vm4577_vm4, %v4565_v59, %v4580_v55  ;;  %v4586_v1 = vsel %vm4576_vm5, %v4583_v16, %v4585_v57 }
 0x1c6   :  { %v4589_v27 = vsel %vm4577_vm4, %v4571_v63, %v4588_v25  ;;  %v4591_v3 = vshll.u32 %v4551_v12, 8  ;;  %v1115_v39 = vshrl.u32 %v1114_v43, 23  ;;  %vm1217_vm6 = vcmp.lt.s32.totalorder %v9357_v49, 0  ;;  %v556_v25 = vpop.f32.mrf.mxu1 }
 0x1c7   :  { %v7515_v11 = vadd.s32 4294967294, %v1283_v29  ;;  %v4590_v6 = vsel %vm4576_vm5, %v4587_v31, %v4589_v27  ;;  %v1302_v56 = vsel %vm1217_vm6, %v1301_v45, %v1277_v32  ;;  %v4582_v0 = vsel %vm4576_vm5, %v4579_v47, %v4581_v2 }
 0x1c8   :  { %v9533_v10 = vmul.u32.u64.low %v4591_v3, %v4590_v6  ;;  %v9534_v7 = vmul.u32.u64.high %v4591_v3, %v4590_v6, %v9533_v10  ;;  %v9536_v37 = vmul.u32.u64.low %v4591_v3, %v4586_v1  ;;  %v9537_v13 = vmul.u32.u64.high %v4591_v3, %v4586_v1, %v9536_v37 }
 0x1c9   :  { %vm7516_vm7 = vcmp.lt.s32.totalorder %v7515_v11, 0  ;;  %v7509_v28 = vadd.s32 4294967169, %v1115_v39  ;;  %v4325_v19 = vand.u32 3, %v4324_v40  ;;  %vm9544_vm8 = vcmp.le.f32.partialorder %v1215_v5, 0.7853982 }
 0x1ca   :  { %v1286_v53 = vsel %vm7516_vm7, 0, %v7515_v11  ;;  %v1111_v17 = vand.u32 2147483647, %v9497_v38  ;;  %v1271_v30 = vadd.s32 %v9467_v24, %v9465_v22  ;;  %v1304_v32 = vsel %vm9544_vm8, 0, %v1302_v56 }
 0x1cb   :  { %v1287_v21 = vsub.s32 32, %v1286_v53  ;;  %v1291_v14 = vsub.s32 4294967266, %v1286_v53  ;;  %v1121_v20 = vadd.s32 1, %v7509_v28  ;;  %v4598_v4 = vmul.u32 %v4591_v3, %v4582_v0 }
 0x1cc   :  { %vm4600_vm9 = vc.u32 %v9534_v7, %v9536_v37  ;;  %v4601_v5 = vadd.s32 1, %v9537_v13  ;;  %v1288_v26 = vshll.u32 %v9523_v15, %v1286_v53  ;;  %vm4330_vm12 = vcmp.eq.s32.totalorder %v4325_v19, 2 }
 0x1cd   :  { %v1289_v9 = vshrl.u32 %v1271_v30, %v1287_v21  ;;  %v1292_v8 = vadd.s32 127, %v1291_v14  ;;  %vm1122_vm11 = vcmp.gt.s32.totalorder %v1121_v20, 0  ;;  %v1308_v60 = vadd.s32 3, %v1304_v32 }
 0x1ce   :  { %v8240_v23 = vpop.eup %8239  ;;  %v4602_v22 = vsel %vm4600_vm9, %v4601_v5, %v9537_v13  ;;  %v1123_v24 = vsel %vm1122_vm11, %v1121_v20, 0  ;;  %v1118_v51 = vand.u32 8388607, %v1111_v17  ;;  %vm4327_vm10 = vcmp.eq.s32.totalorder %v4325_v19, 0 }
 0x1cf   :  { %v8242_v35 = vpop.eup %8241  ;;  %v4331_v59 = vxor.u32 2147483648, %v8240_v23  ;;  %v1290_v63 = vor.u32 %v1289_v9, %v1288_v26  ;;  %v1293_v41 = vshll.u32 %v1292_v8, 23  ;;  %v4603_v40 = vadd.s32 %v4602_v22, %v4598_v4 }
 0x1d0   :  { %v4328_v12 = vxor.u32 2147483648, %v8242_v35  ;;  %v1125_v43 = vand.u32 31, %v1123_v24  ;;  %vm4323_vm13 = vweird.f32 %v9284_v46  ;;  %vm4326_vm14 = vcmp.lt.s32.totalorder %v4325_v19, 2 }
 0x1d1   :  { %v4332_v15 = vsel %vm4330_vm12, %v4331_v59, %v8242_v35  ;;  %v1294_v62 = vor.u32 4788187, %v1293_v41  ;;  %v4604_v55 = vadd.s32 536870912, %v4603_v40  ;;  %v1297_v57 = vcvt.s32.f32 %v1290_v63 }
 0x1d2   :  { %v4329_v36 = vsel %vm4327_vm10, %v8240_v23, %v4328_v12  ;;  %v1126_v16 = vsub.s32 32, %v1125_v43  ;;  %v9563_v47 = vand.u32 3, %v1308_v60  ;;  %v1119_v2 = vor.u32 8388608, %v1118_v51 }
 0x1d3   :  { %v4333_v33 = vsel %vm4326_vm14, %v4329_v36, %v4332_v15  ;;  %v1295_v45 = vand.u32 2147483647, %v1294_v62  ;;  %v9561_v31 = vshrl.u32 %v4604_v55, 30  ;;  %v1124_v39 = vshrl.u32 %v1123_v24, 5 }
 0x1d4   :  { %v4334_v29 = vsel %vm4323_vm13, nan, %v4333_v33  ;;  %v1129_v27 = vshrl.u32 %v8478_v48, %v1126_v16  ;;  %v1132_v3 = vshrl.u32 %v8479_v50, %v1126_v16  ;;  %v1135_v11 = vshrl.u32 %v8480_v52, %v1126_v16 }
 0x1d5   :  { %7386 = vst.msk [vmem:[%s13788_s3 + $0x110] sm:$0xff] %vm7351_vm0, %v4334_v29  ;;  %v1298_v1 = vmul.f32 %v1297_v57, %v1295_v45  ;;  %v4606_v46 = vshll.u32 %v9561_v31, 30  ;;  %v1138_v6 = vshrl.u32 %v8481_v54, %v1126_v16  ;;  %v9575_v10 = vadd.f32 %v9281_v18, %v556_v25 }
 0x1d6   :  { %v1128_v0 = vshll.u32 %v8477_v44, %v1125_v43  ;;  %v1131_v28 = vshll.u32 %v8478_v48, %v1125_v43  ;;  %v1134_v19 = vshll.u32 %v8479_v50, %v1125_v43  ;;  %v1137_v53 = vshll.u32 %v8480_v52, %v1125_v43 }
 0x1d7   :  { %v1299_v13 = vxor.u32 2147483648, %v1298_v1  ;;  %v9577_v56 = vsub.s32 %v4603_v40, %v4606_v46  ;;  %v1140_v30 = vshll.u32 %v8481_v54, %v1125_v43  ;;  %v1141_v21 = vshrl.u32 %v8482_v61, %v1126_v16 }
 0x1d8   :  { %v1130_v20 = vor.u32 %v1129_v27, %v1128_v0  ;;  %v1133_v32 = vor.u32 %v1132_v3, %v1131_v28  ;;  %vm4545_vm15 = vcmp.lt.s32.totalorder %v9432_v42, 0  ;;  %v1136_v5 = vor.u32 %v1135_v11, %v1134_v19 }
 0x1d9   :  { %v1300_v14 = vsel %vm1217_vm6, %v1299_v13, %v1298_v1  ;;  %v4609_v18 = vsub.s32 0, %v9577_v56  ;;  %v1139_v26 = vor.u32 %v1138_v6, %v1137_v53  ;;  %v1142_v9 = vor.u32 %v1141_v21, %v1140_v30 }
 0x1da   :  { %v1303_v4 = vsel %vm9544_vm8, %v9357_v49, %v1300_v14  ;;  %v1159_v23 = vshll.u32 %v1119_v2, 8  ;;  %v4442_v22 = vand.u32 2139095040, %v9575_v10  ;;  %v4629_v24 = vsub.s32 4, %v9561_v31 }
 0x1db   :  { %8243 = vcosq.f32 %v1303_v4  ;;  %v7642_v8 = vmin.u32 %v4609_v18, %v9577_v56  ;;  %v1127_v35 = vshrl.u32 %v8477_v44, %v1126_v16  ;;  %vm1143_vm1 = vcmp.lt.s32.totalorder %v1124_v39, 1 }
 0x1dc   :  { %8245 = vsinq.f32 %v1303_v4  ;;  %vm1145_vm2 = vcmp.lt.s32.totalorder %v1124_v39, 3  ;;  %vm1146_vm3 = vcmp.lt.s32.totalorder %v1124_v39, 4  ;;  %v1151_v34 = vsel %vm1143_vm1, %v1130_v20, %v1133_v32 }
 0x1dd   :  { %v4611_v59 = vclz %v7642_v8  ;;  %v1148_v63 = vsel %vm1146_vm3, %v1136_v5, 2102212464  ;;  %v1152_v41 = vsel %vm1146_vm3, %v1139_v26, 920167782  ;;  %v1155_v40 = vsel %vm1143_vm1, %v1133_v32, %v1136_v5 }
 0x1de   :  { %v1156_v12 = vsel %vm1146_vm3, %v1142_v9, 1326507024  ;;  %vm1144_vm4 = vcmp.lt.s32.totalorder %v1124_v39, 2  ;;  %v1153_v51 = vsel %vm1145_vm2, %v1136_v5, %v1152_v41  ;;  %v1147_v15 = vsel %vm1143_vm1, %v1127_v35, %v1130_v20  ;;  %v7848_v39 = vpop.f32.mrf.mxu0 }
 0x1df   :  { %v7643_v60 = vadd.s32 4294967294, %v4611_v59  ;;  %v1157_v43 = vsel %vm1145_vm2, %v1139_v26, %v1156_v12  ;;  %v1154_v62 = vsel %vm1144_vm4, %v1151_v34, %v1153_v51  ;;  %v4443_v36 = vshrl.u32 %v4442_v22, 23  ;;  %v9635_v26 = vld [vmem:[%s13787_s2] ss:$0 sm:$0xff] }
 0x1e0   :  { %v1158_v55 = vsel %vm1144_vm4, %v1155_v40, %v1157_v43  ;;  %v1149_v16 = vsel %vm1145_vm2, %v1133_v32, %v1148_v63  ;;  %v9604_v25 = vmul.u32.u64.low %v1159_v23, %v1154_v62  ;;  %v9605_v29 = vmul.u32.u64.high %v1159_v23, %v1154_v62, %v9604_v25 }
 0x1e1   :  { %vm7644_vm5 = vcmp.lt.s32.totalorder %v7643_v60, 0  ;;  %v9601_v33 = vmul.u32.u64.low %v1159_v23, %v1158_v55  ;;  %v9602_v45 = vmul.u32.u64.high %v1159_v23, %v1158_v55, %v9601_v33  ;;  %v7637_v2 = vadd.s32 4294967169, %v4443_v36 }
 0x1e2   :  { %v4614_v57 = vsel %vm7644_vm5, 0, %v7643_v60  ;;  %v4599_v1 = vadd.s32 %v9536_v37, %v9534_v7  ;;  %v4630_v3 = vsel %vm4545_vm15, %v4629_v24, %v9561_v31  ;;  %vm1310_vm6 = vcmp.lt.s32.totalorder %v9563_v47, 2 }
 0x1e3   :  { %v4615_v46 = vsub.s32 32, %v4614_v57  ;;  %v4619_v27 = vsub.s32 4294967266, %v4614_v57  ;;  %vm9616_vm7 = vcmp.le.f32.partialorder %v4543_v58, 0.7853982  ;;  %v1150_v6 = vsel %vm1144_vm4, %v1147_v15, %v1149_v16 }
 0x1e4   :  { %v4449_v13 = vadd.s32 1, %v7637_v2  ;;  %vm1307_vm8 = vweird.f32 %v9357_v49  ;;  %v4616_v7 = vshll.u32 %v9577_v56, %v4614_v57  ;;  %vm1168_vm9 = vc.u32 %v9602_v45, %v9604_v25 }
 0x1e5   :  { %v4617_v37 = vshrl.u32 %v4599_v1, %v4615_v46  ;;  %v4620_v0 = vadd.s32 127, %v4619_v27  ;;  %v4632_v31 = vsel %vm9616_vm7, 0, %v4630_v3  ;;  %v1169_v58 = vadd.s32 1, %v9605_v29 }
 0x1e6   :  { %v4439_v28 = vand.u32 2147483647, %v9575_v10  ;;  %vm4450_vm11 = vcmp.gt.s32.totalorder %v4449_v13, 0  ;;  %v1166_v30 = vmul.u32 %v1159_v23, %v1150_v6  ;;  %vm1311_vm12 = vcmp.eq.s32.totalorder %v9563_v47, 0 }
 0x1e7   :  { %v4618_v19 = vor.u32 %v4617_v37, %v4616_v7  ;;  %v4621_v53 = vshll.u32 %v4620_v0, 23  ;;  %v4451_v21 = vsel %vm4450_vm11, %v4449_v13, 0  ;;  %vm1314_vm10 = vcmp.eq.s32.totalorder %v9563_v47, 2 }
 0x1e8   :  { %v8244_v14 = vpop.eup %8243  ;;  %v1170_v56 = vsel %vm1168_vm9, %v1169_v58, %v9605_v29  ;;  %v4453_v18 = vand.u32 31, %v4451_v21  ;;  %v9638_v9 = vadd.f32 %v9635_v26, %v7848_v39  ;;  %v9640_v23 = vadd.s32 3, %v4632_v31 }
 0x1e9   :  { %v8246_v20 = vpop.eup %8245  ;;  %v1315_v32 = vxor.u32 2147483648, %v8244_v14  ;;  %v4622_v4 = vor.u32 4788187, %v4621_v53  ;;  %v1171_v5 = vadd.s32 %v1170_v56, %v1166_v30  ;;  %v4446_v22 = vand.u32 8388607, %v4439_v28 }
 0x1ea   :  { %v1312_v8 = vxor.u32 2147483648, %v8246_v20  ;;  %v4454_v24 = vsub.s32 32, %v4453_v18  ;;  %v4625_v34 = vcvt.s32.f32 %v4618_v19  ;;  %v4456_v40 = vshll.u32 %v8477_v44, %v4453_v18 }
 0x1eb   :  { %v1316_v35 = vsel %vm1314_vm10, %v1315_v32, %v8246_v20  ;;  %v4623_v59 = vand.u32 2147483647, %v4622_v4  ;;  %v1172_v63 = vadd.s32 536870912, %v1171_v5  ;;  %v4447_v36 = vor.u32 8388608, %v4446_v22 }
 0x1ec   :  { %v1313_v41 = vsel %vm1311_vm12, %v8244_v14, %v1312_v8  ;;  %v4457_v12 = vshrl.u32 %v8478_v48, %v4454_v24  ;;  %v4460_v60 = vshrl.u32 %v8479_v50, %v4454_v24  ;;  %v4463_v62 = vshrl.u32 %v8480_v52, %v4454_v24 }
 0x1ed   :  { %v1317_v51 = vsel %vm1310_vm6, %v1313_v41, %v1316_v35  ;;  %v4626_v43 = vmul.f32 %v4625_v34, %v4623_v59  ;;  %v9651_v15 = vshrl.u32 %v1172_v63, 30  ;;  %v4452_v16 = vshrl.u32 %v4451_v21, 5  ;;  %v7896_v34 = vpop.f32.mrf.mxu1 }
 0x1ee   :  { %v1318_v55 = vsel %vm1307_vm8, nan, %v1317_v51  ;;  %v4459_v33 = vshll.u32 %v8478_v48, %v4453_v18  ;;  %v4458_v29 = vor.u32 %v4457_v12, %v4456_v40  ;;  %v4462_v2 = vshll.u32 %v8479_v50, %v4453_v18 }
 0x1ef   :  { %7357 = vst.msk [vmem:[%s13788_s3 + $0x28] sm:$0xff] %vm7351_vm0, %v1318_v55  ;;  %v4627_v57 = vxor.u32 2147483648, %v4626_v43  ;;  %v1174_v47 = vshll.u32 %v9651_v15, 30  ;;  %v4465_v1 = vshll.u32 %v8480_v52, %v4453_v18  ;;  %v4466_v49 = vshrl.u32 %v8481_v54, %v4454_v24 }
 0x1f0   :  { %v4468_v46 = vshll.u32 %v8481_v54, %v4453_v18  ;;  %v4469_v27 = vshrl.u32 %v8482_v61, %v4454_v24  ;;  %v4461_v13 = vor.u32 %v4460_v60, %v4459_v33  ;;  %v4464_v7 = vor.u32 %v4463_v62, %v4462_v2 }
 0x1f1   :  { %v4628_v3 = vsel %vm4545_vm15, %v4627_v57, %v4626_v43  ;;  %v9669_v6 = vsub.s32 %v1171_v5, %v1174_v47  ;;  %v4467_v0 = vor.u32 %v4466_v49, %v4465_v1  ;;  %v1423_v58 = vand.u32 2147483647, %v9638_v9 }
 0x1f2   :  { %v4631_v37 = vsel %vm9616_vm7, %v9432_v42, %v4628_v3  ;;  %v4470_v31 = vor.u32 %v4469_v27, %v4468_v46  ;;  %v4455_v19 = vshrl.u32 %v8477_v44, %v4454_v24  ;;  %v1426_v53 = vand.u32 2139095040, %v9638_v9 }
 0x1f3   :  { %8247 = vcosq.f32 %v4631_v37  ;;  %v1177_v39 = vsub.s32 0, %v9669_v6  ;;  %vm1113_vm13 = vcmp.lt.s32.totalorder %v9497_v38, 0  ;;  %vm4471_vm14 = vcmp.lt.s32.totalorder %v4452_v16, 1 }
 0x1f4   :  { %8249 = vsinq.f32 %v4631_v37  ;;  %vm4473_vm15 = vcmp.lt.s32.totalorder %v4452_v16, 3  ;;  %vm4474_vm1 = vcmp.lt.s32.totalorder %v4452_v16, 4  ;;  %v4479_v21 = vsel %vm4471_vm14, %v4458_v29, %v4461_v13 }
 0x1f5   :  { %v7510_v11 = vmin.u32 %v1177_v39, %v9669_v6  ;;  %v4476_v30 = vsel %vm4474_vm1, %v4464_v7, 2102212464  ;;  %v4480_v14 = vsel %vm4474_vm1, %v4467_v0, 920167782  ;;  %v4483_v18 = vsel %vm4471_vm14, %v4461_v13, %v4464_v7 }
 0x1f6   :  { %v4481_v56 = vsel %vm4473_vm15, %v4464_v7, %v4480_v14  ;;  %v4484_v20 = vsel %vm4474_vm1, %v4470_v31, 1326507024  ;;  %v4487_v32 = vshll.u32 %v4447_v36, 8  ;;  %v1197_v5 = vsub.s32 4, %v9651_v15 }
 0x1f7   :  { %v1179_v4 = vclz %v7510_v11  ;;  %vm4472_vm2 = vcmp.lt.s32.totalorder %v4452_v16, 2  ;;  %v4475_v8 = vsel %vm4471_vm14, %v4455_v19, %v4458_v29  ;;  %v4477_v22 = vsel %vm4473_vm15, %v4461_v13, %v4476_v30 }
 0x1f8   :  { %v4482_v24 = vsel %vm4472_vm2, %v4479_v21, %v4481_v56  ;;  %v4485_v35 = vsel %vm4473_vm15, %v4467_v0, %v4484_v20  ;;  %v1427_v59 = vshrl.u32 %v1426_v53, 23  ;;  %vm9689_vm3 = vcmp.le.f32.partialorder %v1111_v17, 0.7853982 }
 0x1f9   :  { %v7511_v63 = vadd.s32 4294967294, %v1179_v4  ;;  %v4486_v41 = vsel %vm4472_vm2, %v4483_v18, %v4485_v35  ;;  %v9684_v40 = vmul.u32.u64.low %v4487_v32, %v4482_v24  ;;  %v9685_v12 = vmul.u32.u64.high %v4487_v32, %v4482_v24, %v9684_v40 }
 0x1fa   :  { %v9693_v51 = vmul.u32.u64.low %v4487_v32, %v4486_v41  ;;  %v9694_v43 = vmul.u32.u64.high %v4487_v32, %v4486_v41, %v9693_v51  ;;  %v7521_v62 = vadd.s32 4294967169, %v1427_v59  ;;  %v4637_v55 = vand.u32 3, %v9640_v23 }
 0x1fb   :  { %vm7512_vm4 = vcmp.lt.s32.totalorder %v7511_v63, 0  ;;  %v4478_v36 = vsel %vm4472_vm2, %v4475_v8, %v4477_v22  ;;  %v9698_v16 = vadd.f32 %v9635_v26, %v7896_v34  ;;  %v1167_v33 = vadd.s32 %v9604_v25, %v9602_v45 }
 0x1fc   :  { %v1182_v57 = vsel %vm7512_vm4, 0, %v7511_v63  ;;  %v9704_v17 = vand.u32 8388607, %v1423_v58  ;;  %v1433_v47 = vadd.s32 1, %v7521_v62  ;;  %vm4635_vm5 = vweird.f32 %v9432_v42 }
 0x1fd   :  { %v1183_v29 = vsub.s32 32, %v1182_v57  ;;  %v1187_v2 = vsub.s32 4294967266, %v1182_v57  ;;  %v1198_v23 = vsel %vm1113_vm13, %v1197_v5, %v9651_v15  ;;  %v4497_v1 = vadd.s32 1, %v9685_v12 }
 0x1fe   :  { %v1184_v49 = vshll.u32 %v9669_v6, %v1182_v57  ;;  %v4494_v46 = vmul.u32 %v4487_v32, %v4478_v36  ;;  %vm4496_vm6 = vc.u32 %v9694_v43, %v9684_v40  ;;  %vm1434_vm7 = vcmp.gt.s32.totalorder %v1433_v47, 0 }
 0x1ff   :  { %v1185_v45 = vshrl.u32 %v1167_v33, %v1183_v29  ;;  %v1188_v25 = vadd.s32 127, %v1187_v2  ;;  %v4498_v27 = vsel %vm4496_vm6, %v4497_v1, %v9685_v12  ;;  %v1435_v3 = vsel %vm1434_vm7, %v1433_v47, 0 }
 0x200   :  { %v8248_v13 = vpop.eup %8247  ;;  %vm4638_vm8 = vcmp.lt.s32.totalorder %v4637_v55, 2  ;;  %v1200_v7 = vsel %vm9689_vm3, 0, %v1198_v23  ;;  %v4499_v37 = vadd.s32 %v4498_v27, %v4494_v46  ;;  %v1437_v15 = vand.u32 31, %v1435_v3 }
 0x201   :  { %v8250_v0 = vpop.eup %8249  ;;  %vm4639_vm9 = vcmp.eq.s32.totalorder %v4637_v55, 0  ;;  %v4643_v31 = vxor.u32 2147483648, %v8248_v13  ;;  %v1186_v6 = vor.u32 %v1185_v45, %v1184_v49  ;;  %v1189_v39 = vshll.u32 %v1188_v25, 23 }
 0x202   :  { %v4640_v19 = vxor.u32 2147483648, %v8250_v0  ;;  %vm4642_vm11 = vcmp.eq.s32.totalorder %v4637_v55, 2  ;;  %v4500_v53 = vadd.s32 536870912, %v4499_v37  ;;  %v1438_v11 = vsub.s32 32, %v1437_v15 }
 0x203   :  { %v4644_v30 = vsel %vm4642_vm11, %v4643_v31, %v8250_v0  ;;  %v1190_v21 = vor.u32 4788187, %v1189_v39  ;;  %v9716_v14 = vadd.s32 3, %v1200_v7  ;;  %v1431_v56 = vor.u32 8388608, %v9704_v17 }
 0x204   :  { %v4641_v18 = vsel %vm4639_vm9, %v8248_v13, %v4640_v19  ;;  %v4501_v20 = vshrl.u32 %v4500_v53, 30  ;;  %v4751_v32 = vand.u32 2147483647, %v9698_v16  ;;  %v4754_v4 = vand.u32 2139095040, %v9698_v16 }
 0x205   :  { %v4645_v5 = vsel %vm4638_vm8, %v4641_v18, %v4644_v30  ;;  %v1191_v8 = vand.u32 2147483647, %v1190_v21  ;;  %v1193_v22 = vcvt.s32.f32 %v1186_v6  ;;  %v1441_v24 = vshrl.u32 %v8478_v48, %v1438_v11 }
 0x206   :  { %v4646_v35 = vsel %vm4635_vm5, nan, %v4645_v5  ;;  %v9726_v59 = vadd.s32 %v9684_v40, %v9694_v43  ;;  %v4502_v34 = vshll.u32 %v4501_v20, 30  ;;  %v1444_v63 = vshrl.u32 %v8479_v50, %v1438_v11 }
 0x207   :  { %7389 = vst.msk [vmem:[%s13788_s3 + $0x128] sm:$0xff] %vm7351_vm0, %v4646_v35  ;;  %v1194_v41 = vmul.f32 %v1193_v22, %v1191_v8  ;;  %v1436_v12 = vshrl.u32 %v1435_v3, 5  ;;  %v1440_v51 = vshll.u32 %v8477_v44, %v1437_v15  ;;  %v1447_v62 = vshrl.u32 %v8480_v52, %v1438_v11 }
 0x208   :  { %v9735_v55 = vsub.s32 %v4499_v37, %v4502_v34  ;;  %v1443_v42 = vshll.u32 %v8478_v48, %v1437_v15  ;;  %v1446_v40 = vshll.u32 %v8479_v50, %v1437_v15  ;;  %v1450_v43 = vshrl.u32 %v8481_v54, %v1438_v11 }
 0x209   :  { %v1195_v36 = vxor.u32 2147483648, %v1194_v41  ;;  %v1442_v33 = vor.u32 %v1441_v24, %v1440_v51  ;;  %v1449_v57 = vshll.u32 %v8480_v52, %v1437_v15  ;;  %v1453_v17 = vshrl.u32 %v8482_v61, %v1438_v11 }
 0x20a   :  { %vm4441_vm12 = vcmp.lt.s32.totalorder %v9575_v10, 0  ;;  %v4505_v47 = vsub.s32 0, %v9735_v55  ;;  %v1445_v29 = vor.u32 %v1444_v63, %v1443_v42  ;;  %v1448_v2 = vor.u32 %v1447_v62, %v1446_v40 }
 0x20b   :  { %v1452_v23 = vshll.u32 %v8481_v54, %v1437_v15  ;;  %v1196_v1 = vsel %vm1113_vm13, %v1195_v36, %v1194_v41  ;;  %v1451_v49 = vor.u32 %v1450_v43, %v1449_v57  ;;  %v1471_v46 = vshll.u32 %v1431_v56, 8 }
 0x20c   :  { %v4755_v45 = vshrl.u32 %v4754_v4, 23  ;;  %v1199_v25 = vsel %vm9689_vm3, %v9497_v38, %v1196_v1  ;;  %v7638_v27 = vmin.u32 %v4505_v47, %v9735_v55  ;;  %v1439_v3 = vshrl.u32 %v8477_v44, %v1438_v11 }
 0x20d   :  { %v1454_v13 = vor.u32 %v1453_v17, %v1452_v23  ;;  %8251 = vcosq.f32 %v1199_v25  ;;  %v4525_v7 = vsub.s32 4, %v4501_v20  ;;  %vm1455_vm10 = vcmp.lt.s32.totalorder %v1436_v12, 1 }
 0x20e   :  { %vm1458_vm14 = vcmp.lt.s32.totalorder %v1436_v12, 4  ;;  %8253 = vsinq.f32 %v1199_v25  ;;  %v4507_v37 = vclz %v7638_v27  ;;  %v1463_v0 = vsel %vm1455_vm10, %v1442_v33, %v1445_v29 }
 0x20f   :  { %v1460_v15 = vsel %vm1458_vm14, %v1448_v2, 2102212464  ;;  %vm1456_vm13 = vcmp.lt.s32.totalorder %v1436_v12, 2  ;;  %vm1457_vm15 = vcmp.lt.s32.totalorder %v1436_v12, 3  ;;  %v1464_v31 = vsel %vm1458_vm14, %v1451_v49, 920167782 }
 0x210   :  { %v1467_v6 = vsel %vm1455_vm10, %v1445_v29, %v1448_v2  ;;  %v7639_v39 = vadd.s32 4294967294, %v4507_v37  ;;  %v1459_v60 = vsel %vm1455_vm10, %v1439_v3, %v1442_v33  ;;  %v1465_v19 = vsel %vm1457_vm15, %v1448_v2, %v1464_v31 }
 0x211   :  { %v1468_v53 = vsel %vm1458_vm14, %v1454_v13, 1326507024  ;;  %v1461_v30 = vsel %vm1457_vm15, %v1445_v29, %v1460_v15  ;;  %v1466_v11 = vsel %vm1456_vm13, %v1463_v0, %v1465_v19  ;;  %v7649_v56 = vadd.s32 4294967169, %v4755_v45 }
 0x212   :  { %v1469_v21 = vsel %vm1457_vm15, %v1451_v49, %v1468_v53  ;;  %vm7640_vm1 = vcmp.lt.s32.totalorder %v7639_v39, 0  ;;  %v9754_v4 = vmul.u32.u64.low %v1471_v46, %v1466_v11  ;;  %v9755_v5 = vmul.u32.u64.high %v1471_v46, %v1466_v11, %v9754_v4 }
 0x213   :  { %v1470_v18 = vsel %vm1456_vm13, %v1467_v6, %v1469_v21  ;;  %v4510_v8 = vsel %vm7640_vm1, 0, %v7639_v39  ;;  %v4526_v22 = vsel %vm4441_vm12, %v4525_v7, %v4501_v20  ;;  %v1462_v41 = vsel %vm1456_vm13, %v1459_v60, %v1461_v30 }
 0x214   :  { %v9760_v24 = vmul.u32.u64.low %v1471_v46, %v1470_v18  ;;  %v9761_v35 = vmul.u32.u64.high %v1471_v46, %v1470_v18, %v9760_v24  ;;  %v4511_v34 = vsub.s32 32, %v4510_v8  ;;  %v4515_v63 = vsub.s32 4294967266, %v4510_v8 }
 0x215   :  { %v4761_v51 = vadd.s32 1, %v7649_v56  ;;  %v1205_v62 = vand.u32 3, %v9716_v14  ;;  %vm9767_vm2 = vcmp.le.f32.partialorder %v4439_v28, 0.7853982  ;;  %v4512_v40 = vshll.u32 %v9735_v55, %v4510_v8  ;;  %v406_v8 = vpop.f32.mrf.mxu0 }
 0x216   :  { %v4513_v20 = vshrl.u32 %v9726_v59, %v4511_v34  ;;  %v4516_v43 = vadd.s32 127, %v4515_v63  ;;  %v1481_v36 = vadd.s32 1, %v9755_v5  ;;  %v4528_v12 = vsel %vm9767_vm2, 0, %v4526_v22 }
 0x217   :  { %vm4762_vm3 = vcmp.gt.s32.totalorder %v4761_v51, 0  ;;  %v1478_v33 = vmul.u32 %v1471_v46, %v1462_v41  ;;  %vm1480_vm4 = vc.u32 %v9761_v35, %v9754_v4  ;;  %v4758_v55 = vand.u32 8388607, %v4751_v32 }
 0x218   :  { %v4763_v14 = vsel %vm4762_vm3, %v4761_v51, 0  ;;  %v4514_v28 = vor.u32 %v4513_v20, %v4512_v40  ;;  %v4517_v57 = vshll.u32 %v4516_v43, 23  ;;  %v1482_v17 = vsel %vm1480_vm4, %v1481_v36, %v9755_v5 }
 0x219   :  { %vm1203_vm5 = vweird.f32 %v9497_v38  ;;  %v1483_v59 = vadd.s32 %v1482_v17, %v1478_v33  ;;  %v4765_v47 = vand.u32 31, %v4763_v14  ;;  %vm1206_vm6 = vcmp.lt.s32.totalorder %v1205_v62, 2 }
 0x21a   :  { %v8252_v29 = vpop.eup %8251  ;;  %vm1207_vm7 = vcmp.eq.s32.totalorder %v1205_v62, 0  ;;  %vm1210_vm8 = vcmp.eq.s32.totalorder %v1205_v62, 2  ;;  %v4518_v2 = vor.u32 4788187, %v4517_v57  ;;  %v9782_v49 = vadd.s32 3, %v4528_v12 }
 0x21b   :  { %v8254_v23 = vpop.eup %8253  ;;  %v1211_v1 = vxor.u32 2147483648, %v8252_v29  ;;  %v1484_v46 = vadd.s32 536870912, %v1483_v59  ;;  %v4766_v45 = vsub.s32 32, %v4765_v47  ;;  %v4521_v3 = vcvt.s32.f32 %v4514_v28 }
 0x21c   :  { %v1208_v25 = vxor.u32 2147483648, %v8254_v23  ;;  %v4519_v27 = vand.u32 2147483647, %v4518_v2  ;;  %v4759_v13 = vor.u32 8388608, %v4758_v55  ;;  %v4768_v15 = vshll.u32 %v8477_v44, %v4765_v47 }
 0x21d   :  { %v1212_v7 = vsel %vm1210_vm8, %v1211_v1, %v8254_v23  ;;  %v1485_v37 = vshrl.u32 %v1484_v46, 30  ;;  %v4769_v0 = vshrl.u32 %v8478_v48, %v4766_v45  ;;  %v4772_v39 = vshrl.u32 %v8479_v50, %v4766_v45 }
 0x21e   :  { %v1209_v31 = vsel %vm1207_vm7, %v8252_v29, %v1208_v25  ;;  %v4522_v6 = vmul.f32 %v4521_v3, %v4519_v27  ;;  %v4775_v60 = vshrl.u32 %v8480_v52, %v4766_v45  ;;  %v4764_v30 = vshrl.u32 %v4763_v14, 5  ;;  %v566_v3 = vpop.f32.mrf.mxu1 }
 0x21f   :  { %v1213_v19 = vsel %vm1206_vm6, %v1209_v31, %v1212_v7  ;;  %v1486_v53 = vshll.u32 %v1485_v37, 30  ;;  %v4771_v11 = vshll.u32 %v8478_v48, %v4765_v47  ;;  %vm1425_vm9 = vcmp.lt.s32.totalorder %v9638_v9, 0 }
 0x220   :  { %v1214_v21 = vsel %vm1203_vm5, nan, %v1213_v19  ;;  %v4523_v56 = vxor.u32 2147483648, %v4522_v6  ;;  %v4770_v18 = vor.u32 %v4769_v0, %v4768_v15  ;;  %v4774_v5 = vshll.u32 %v8479_v50, %v4765_v47 }
 0x221   :  { %7356 = vst.msk [vmem:[%s13788_s3 + $0x20] sm:$0xff] %vm7351_vm0, %v1214_v21  ;;  %v9799_v22 = vsub.s32 %v1483_v59, %v1486_v53  ;;  %v4773_v24 = vor.u32 %v4772_v39, %v4771_v11  ;;  %v4777_v34 = vshll.u32 %v8480_v52, %v4765_v47  ;;  %v4778_v38 = vshrl.u32 %v8481_v54, %v4766_v45 }
 0x222   :  { %v4524_v63 = vsel %vm4441_vm12, %v4523_v56, %v4522_v6  ;;  %v4776_v41 = vor.u32 %v4775_v60, %v4774_v5  ;;  %v4780_v51 = vshll.u32 %v8481_v54, %v4765_v47  ;;  %v4781_v62 = vshrl.u32 %v8482_v61, %v4766_v45 }
 0x223   :  { %v4527_v40 = vsel %vm9767_vm2, %v9575_v10, %v4524_v63  ;;  %v1489_v20 = vsub.s32 0, %v9799_v22  ;;  %v4779_v43 = vor.u32 %v4778_v38, %v4777_v34  ;;  %v9812_v36 = vadd.f32 %v9635_v26, %v406_v8 }
 0x224   :  { %8255 = vcosq.f32 %v4527_v40  ;;  %v4767_v12 = vshrl.u32 %v8477_v44, %v4766_v45  ;;  %v4782_v33 = vor.u32 %v4781_v62, %v4780_v51  ;;  %vm4783_vm11 = vcmp.lt.s32.totalorder %v4764_v30, 1 }
 0x225   :  { %8257 = vsinq.f32 %v4527_v40  ;;  %v7522_v14 = vmin.u32 %v1489_v20, %v9799_v22  ;;  %v1509_v28 = vsub.s32 4, %v1485_v37  ;;  %vm4786_vm12 = vcmp.lt.s32.totalorder %v4764_v30, 4 }
 0x226   :  { %v4788_v57 = vsel %vm4786_vm12, %v4776_v41, 2102212464  ;;  %v4791_v17 = vsel %vm4783_vm11, %v4770_v18, %v4773_v24  ;;  %v4792_v42 = vsel %vm4786_vm12, %v4779_v43, 920167782  ;;  %v4799_v55 = vshll.u32 %v4759_v13, 8 }
 0x227   :  { %v1491_v59 = vclz %v7522_v14  ;;  %vm4785_vm10 = vcmp.lt.s32.totalorder %v4764_v30, 3  ;;  %v4787_v47 = vsel %vm4783_vm11, %v4767_v12, %v4770_v18  ;;  %v4795_v29 = vsel %vm4783_vm11, %v4773_v24, %v4776_v41 }
 0x228   :  { %vm4784_vm14 = vcmp.lt.s32.totalorder %v4764_v30, 2  ;;  %v4789_v2 = vsel %vm4785_vm10, %v4773_v24, %v4788_v57  ;;  %v4793_v23 = vsel %vm4785_vm10, %v4776_v41, %v4792_v42  ;;  %v4796_v1 = vsel %vm4786_vm12, %v4782_v33, 1326507024 }
 0x229   :  { %v7523_v46 = vadd.s32 4294967294, %v1491_v59  ;;  %v1510_v45 = vsel %vm1425_vm9, %v1509_v28, %v1485_v37  ;;  %v4794_v25 = vsel %vm4784_vm14, %v4791_v17, %v4793_v23  ;;  %v4797_v27 = vsel %vm4785_vm10, %v4779_v43, %v4796_v1 }
 0x22a   :  { %v4790_v7 = vsel %vm4784_vm14, %v4787_v47, %v4789_v2  ;;  %v4798_v15 = vsel %vm4784_vm14, %v4795_v29, %v4797_v27  ;;  %v9818_v0 = vmul.u32.u64.low %v4799_v55, %v4794_v25  ;;  %v9819_v31 = vmul.u32.u64.high %v4799_v55, %v4794_v25, %v9818_v0 }
 0x22b   :  { %vm7524_vm13 = vcmp.lt.s32.totalorder %v7523_v46, 0  ;;  %v9822_v13 = vmul.u32.u64.low %v4799_v55, %v4798_v15  ;;  %v9823_v6 = vmul.u32.u64.high %v4799_v55, %v4798_v15, %v9822_v13  ;;  %v1322_v39 = vand.u32 2139095040, %v9812_v36 }
 0x22c   :  { %v4533_v60 = vand.u32 3, %v9782_v49  ;;  %vm9829_vm15 = vcmp.le.f32.partialorder %v1423_v58, 0.7853982  ;;  %v1494_v19 = vsel %vm7524_vm13, 0, %v7523_v46  ;;  %v9834_v53 = vadd.f32 %v9635_v26, %v566_v3 }
 0x22d   :  { %v1479_v30 = vadd.s32 %v9754_v4, %v9761_v35  ;;  %v1495_v11 = vsub.s32 32, %v1494_v19  ;;  %v1499_v21 = vsub.s32 4294967266, %v1494_v19  ;;  %v1323_v56 = vshrl.u32 %v1322_v39, 23 }
 0x22e   :  { %v1512_v18 = vsel %vm9829_vm15, 0, %v1510_v45  ;;  %v4806_v49 = vmul.u32 %v4799_v55, %v4790_v7  ;;  %v4809_v5 = vadd.s32 1, %v9819_v31  ;;  %v1319_v58 = vand.u32 2147483647, %v9812_v36 }
 0x22f   :  { %v1496_v8 = vshll.u32 %v9799_v22, %v1494_v19  ;;  %v1497_v24 = vshrl.u32 %v1479_v30, %v1495_v11  ;;  %v1500_v34 = vadd.s32 127, %v1499_v21  ;;  %vm4808_vm1 = vc.u32 %v9823_v6, %v9818_v0 }
 0x230   :  { %vm4534_vm2 = vcmp.lt.s32.totalorder %v4533_v60, 2  ;;  %v4810_v4 = vsel %vm4808_vm1, %v4809_v5, %v9819_v31  ;;  %v7517_v35 = vadd.s32 4294967169, %v1323_v56  ;;  %v4650_v38 = vand.u32 2139095040, %v9834_v53 }
 0x231   :  { %v8256_v63 = vpop.eup %8255  ;;  %vm4535_vm3 = vcmp.eq.s32.totalorder %v4533_v60, 0  ;;  %v1498_v41 = vor.u32 %v1497_v24, %v1496_v8  ;;  %v1501_v51 = vshll.u32 %v1500_v34, 23  ;;  %v4811_v62 = vadd.s32 %v4810_v4, %v4806_v49 }
 0x232   :  { %v8258_v40 = vpop.eup %8257  ;;  %vm4538_vm4 = vcmp.eq.s32.totalorder %v4533_v60, 2  ;;  %v4539_v20 = vxor.u32 2147483648, %v8256_v63  ;;  %v1516_v22 = vadd.s32 3, %v1512_v18  ;;  %v1329_v43 = vadd.s32 1, %v7517_v35 }
 0x233   :  { %v4536_v12 = vxor.u32 2147483648, %v8258_v40  ;;  %v1502_v33 = vor.u32 4788187, %v1501_v51  ;;  %v4812_v14 = vadd.s32 536870912, %v4811_v62  ;;  %v1326_v28 = vand.u32 8388607, %v1319_v58 }
 0x234   :  { %v4540_v57 = vsel %vm4538_vm4, %v4539_v20, %v8258_v40  ;;  %v1505_v17 = vcvt.s32.f32 %v1498_v41  ;;  %vm1330_vm5 = vcmp.gt.s32.totalorder %v1329_v43, 0  ;;  %v4651_v42 = vshrl.u32 %v4650_v38, 23 }
 0x235   :  { %v4537_v55 = vsel %vm4535_vm3, %v8256_v63, %v4536_v12  ;;  %v1503_v59 = vand.u32 2147483647, %v1502_v33  ;;  %v4813_v47 = vshrl.u32 %v4812_v14, 30  ;;  %v1331_v29 = vsel %vm1330_vm5, %v1329_v43, 0 }
 0x236   :  { %vm4531_vm6 = vweird.f32 %v9575_v10  ;;  %v4541_v2 = vsel %vm4534_vm2, %v4537_v55, %v4540_v57  ;;  %v1333_v23 = vand.u32 31, %v1331_v29  ;;  %v9852_v45 = vand.u32 3, %v1516_v22 }
 0x237   :  { %v4542_v1 = vsel %vm4531_vm6, nan, %v4541_v2  ;;  %v1506_v46 = vmul.f32 %v1505_v17, %v1503_v59  ;;  %vm4753_vm7 = vcmp.lt.s32.totalorder %v9698_v16, 0  ;;  %v4814_v25 = vshll.u32 %v4813_v47, 30 }
 0x238   :  { %7388 = vst.msk [vmem:[%s13788_s3 + $0x120] sm:$0xff] %vm7351_vm0, %v4542_v1  ;;  %v1327_v27 = vor.u32 8388608, %v1326_v28  ;;  %v1334_v3 = vsub.s32 32, %v1333_v23  ;;  %v4647_v7 = vand.u32 2147483647, %v9834_v53  ;;  %v7645_v10 = vadd.s32 4294967169, %v4651_v42 }
 0x239   :  { %v1507_v15 = vxor.u32 2147483648, %v1506_v46  ;;  %v9860_v31 = vsub.s32 %v4811_v62, %v4814_v25  ;;  %v4837_v13 = vsub.s32 4, %v4813_v47  ;;  %v1332_v39 = vshrl.u32 %v1331_v29, 5 }
 0x23a   :  { %v1336_v60 = vshll.u32 %v8477_v44, %v1333_v23  ;;  %v1337_v19 = vshrl.u32 %v8478_v48, %v1334_v3  ;;  %v1339_v30 = vshll.u32 %v8478_v48, %v1333_v23  ;;  %v1340_v11 = vshrl.u32 %v8479_v50, %v1334_v3 }
 0x23b   :  { %v1508_v21 = vsel %vm1425_vm9, %v1507_v15, %v1506_v46  ;;  %vm9870_vm8 = vcmp.le.f32.partialorder %v4751_v32, 0.7853982  ;;  %v4817_v18 = vsub.s32 0, %v9860_v31  ;;  %v1342_v49 = vshll.u32 %v8479_v50, %v1333_v23 }
 0x23c   :  { %v1343_v5 = vshrl.u32 %v8480_v52, %v1334_v3  ;;  %v1511_v8 = vsel %vm9829_vm15, %v9638_v9, %v1508_v21  ;;  %v1338_v24 = vor.u32 %v1337_v19, %v1336_v60  ;;  %v1345_v34 = vshll.u32 %v8480_v52, %v1333_v23 }
 0x23d   :  { %v1346_v4 = vshrl.u32 %v8481_v54, %v1334_v3  ;;  %8259 = vcosq.f32 %v1511_v8  ;;  %v7650_v32 = vmin.u32 %v4817_v18, %v9860_v31  ;;  %v1341_v35 = vor.u32 %v1340_v11, %v1339_v30 }
 0x23e   :  { %v1344_v38 = vor.u32 %v1343_v5, %v1342_v49  ;;  %8261 = vsinq.f32 %v1511_v8  ;;  %v1348_v41 = vshll.u32 %v8481_v54, %v1333_v23  ;;  %v1349_v51 = vshrl.u32 %v8482_v61, %v1334_v3 }
 0x23f   :  { %v1347_v63 = vor.u32 %v1346_v4, %v1345_v34  ;;  %v4807_v37 = vadd.s32 %v9818_v0, %v9823_v6  ;;  %v4819_v62 = vclz %v7650_v32  ;;  %v1367_v40 = vshll.u32 %v1327_v27, 8 }
 0x240   :  { %v4657_v20 = vadd.s32 1, %v7645_v10  ;;  %v4838_v22 = vsel %vm4753_vm7, %v4837_v13, %v4813_v47  ;;  %v1335_v43 = vshrl.u32 %v8477_v44, %v1334_v3  ;;  %v1350_v12 = vor.u32 %v1349_v51, %v1348_v41 }
 0x241   :  { %vm1351_vm9 = vcmp.lt.s32.totalorder %v1332_v39, 1  ;;  %v7651_v33 = vadd.s32 4294967294, %v4819_v62  ;;  %vm1353_vm11 = vcmp.lt.s32.totalorder %v1332_v39, 3  ;;  %vm1354_vm12 = vcmp.lt.s32.totalorder %v1332_v39, 4 }
 0x242   :  { %v1359_v14 = vsel %vm1351_vm9, %v1338_v24, %v1341_v35  ;;  %v1356_v28 = vsel %vm1354_vm12, %v1344_v38, 2102212464  ;;  %v1360_v57 = vsel %vm1354_vm12, %v1347_v63, 920167782  ;;  %v1363_v17 = vsel %vm1351_vm9, %v1341_v35, %v1344_v38 }
 0x243   :  { %v1364_v0 = vsel %vm1354_vm12, %v1350_v12, 1326507024  ;;  %vm7652_vm10 = vcmp.lt.s32.totalorder %v7651_v33, 0  ;;  %vm1352_vm14 = vcmp.lt.s32.totalorder %v1332_v39, 2  ;;  %v1361_v6 = vsel %vm1353_vm11, %v1344_v38, %v1360_v57 }
 0x244   :  { %v1365_v42 = vsel %vm1353_vm11, %v1347_v63, %v1364_v0  ;;  %v4822_v55 = vsel %vm7652_vm10, 0, %v7651_v33  ;;  %v4840_v59 = vsel %vm9870_vm8, 0, %v4838_v22  ;;  %v1362_v47 = vsel %vm1352_vm14, %v1359_v14, %v1361_v6 }
 0x245   :  { %v1366_v29 = vsel %vm1352_vm14, %v1363_v17, %v1365_v42  ;;  %v4823_v2 = vsub.s32 32, %v4822_v55  ;;  %v4827_v23 = vsub.s32 4294967266, %v4822_v55  ;;  %v1355_v1 = vsel %vm1351_vm9, %v1335_v43, %v1338_v24 }
 0x246   :  { %v1357_v46 = vsel %vm1353_vm11, %v1341_v35, %v1356_v28  ;;  %v9900_v25 = vmul.u32.u64.low %v1367_v40, %v1366_v29  ;;  %v9901_v27 = vmul.u32.u64.high %v1367_v40, %v1366_v29, %v9900_v25  ;;  %vm1515_vm13 = vweird.f32 %v9638_v9  ;;  %v7851_v29 = vpop.f32.mrf.mxu0 }
 0x247   :  { %v9903_v3 = vmul.u32.u64.low %v1367_v40, %v1362_v47  ;;  %v9904_v10 = vmul.u32.u64.high %v1367_v40, %v1362_v47, %v9903_v3  ;;  %v4824_v15 = vshll.u32 %v9860_v31, %v4822_v55  ;;  %v4825_v13 = vshrl.u32 %v4807_v37, %v4823_v2 }
 0x248   :  { %v4828_v60 = vadd.s32 127, %v4827_v23  ;;  %vm4658_vm15 = vcmp.gt.s32.totalorder %v4657_v20, 0  ;;  %v4844_v19 = vadd.s32 3, %v4840_v59  ;;  %v1358_v30 = vsel %vm1352_vm14, %v1355_v1, %v1357_v46 }
 0x249   :  { %v4654_v11 = vand.u32 8388607, %v4647_v7  ;;  %v4659_v21 = vsel %vm4658_vm15, %v4657_v20, 0  ;;  %vm1518_vm1 = vcmp.lt.s32.totalorder %v9852_v45, 2  ;;  %v4826_v18 = vor.u32 %v4825_v13, %v4824_v15 }
 0x24a   :  { %v4829_v49 = vshll.u32 %v4828_v60, 23  ;;  %v4661_v5 = vand.u32 31, %v4659_v21  ;;  %v8260_v8 = vpop.eup %8259  ;;  %vm1519_vm2 = vcmp.eq.s32.totalorder %v9852_v45, 0  ;;  %vm1522_vm3 = vcmp.eq.s32.totalorder %v9852_v45, 2 }
 0x24b   :  { %vm1376_vm4 = vc.u32 %v9901_v27, %v9903_v3  ;;  %v1377_v31 = vadd.s32 1, %v9904_v10  ;;  %v8262_v39 = vpop.eup %8261  ;;  %v1523_v24 = vxor.u32 2147483648, %v8260_v8  ;;  %v1374_v4 = vmul.u32 %v1367_v40, %v1358_v30 }
 0x24c   :  { %v4830_v34 = vor.u32 4788187, %v4829_v49  ;;  %v4662_v32 = vsub.s32 32, %v4661_v5  ;;  %v1520_v35 = vxor.u32 2147483648, %v8262_v39  ;;  %v9918_v38 = vand.u32 3, %v4844_v19 }
 0x24d   :  { %v1378_v63 = vsel %vm1376_vm4, %v1377_v31, %v9904_v10  ;;  %v4655_v41 = vor.u32 8388608, %v4654_v11  ;;  %v1524_v51 = vsel %vm1522_vm3, %v1523_v24, %v8262_v39  ;;  %v4833_v62 = vcvt.s32.f32 %v4826_v18 }
 0x24e   :  { %v4831_v37 = vand.u32 2147483647, %v4830_v34  ;;  %v1379_v20 = vadd.s32 %v1378_v63, %v1374_v4  ;;  %v1521_v22 = vsel %vm1519_vm2, %v8260_v8, %v1520_v35  ;;  %v4660_v43 = vshrl.u32 %v4659_v21, 5  ;;  %v7899_v63 = vpop.f32.mrf.mxu1 }
 0x24f   :  { %v4665_v12 = vshrl.u32 %v8478_v48, %v4662_v32  ;;  %v4668_v33 = vshrl.u32 %v8479_v50, %v4662_v32  ;;  %v1525_v40 = vsel %vm1518_vm1, %v1521_v22, %v1524_v51  ;;  %v4671_v57 = vshrl.u32 %v8480_v52, %v4662_v32 }
 0x250   :  { %v4834_v14 = vmul.f32 %v4833_v62, %v4831_v37  ;;  %v1380_v28 = vadd.s32 536870912, %v1379_v20  ;;  %v1526_v17 = vsel %vm1515_vm13, nan, %v1525_v40  ;;  %v4664_v0 = vshll.u32 %v8477_v44, %v4661_v5 }
 0x251   :  { %v4667_v6 = vshll.u32 %v8478_v48, %v4661_v5  ;;  %v4670_v42 = vshll.u32 %v8479_v50, %v4661_v5  ;;  %7359 = vst.msk [vmem:[%s13788_s3 + $0x38] sm:$0xff] %vm7351_vm0, %v1526_v17  ;;  %v4673_v59 = vshll.u32 %v8480_v52, %v4661_v5  ;;  %v4674_v47 = vshrl.u32 %v8481_v54, %v4662_v32 }
 0x252   :  { %v4835_v45 = vxor.u32 2147483648, %v4834_v14  ;;  %v1381_v55 = vshrl.u32 %v1380_v28, 30  ;;  %v4666_v9 = vor.u32 %v4665_v12, %v4664_v0  ;;  %v4676_v23 = vshll.u32 %v8481_v54, %v4661_v5 }
 0x253   :  { %v4669_v2 = vor.u32 %v4668_v33, %v4667_v6  ;;  %v4677_v1 = vshrl.u32 %v8482_v61, %v4662_v32  ;;  %v4672_v10 = vor.u32 %v4671_v57, %v4670_v42  ;;  %v4675_v15 = vor.u32 %v4674_v47, %v4673_v59 }
 0x254   :  { %v4836_v46 = vsel %vm4753_vm7, %v4835_v45, %v4834_v14  ;;  %v1382_v25 = vshll.u32 %v1381_v55, 30  ;;  %v4695_v19 = vshll.u32 %v4655_v41, 8  ;;  %v9947_v30 = vadd.f32 %v9635_v26, %v7851_v29 }
 0x255   :  { %v4839_v13 = vsel %vm9870_vm8, %v9698_v16, %v4836_v46  ;;  %v4678_v60 = vor.u32 %v4677_v1, %v4676_v23  ;;  %v4663_v21 = vshrl.u32 %v8477_v44, %v4662_v32  ;;  %vm4679_vm5 = vcmp.lt.s32.totalorder %v4660_v43, 1 }
 0x256   :  { %8263 = vcosq.f32 %v4839_v13  ;;  %v9949_v11 = vsub.s32 %v1379_v20, %v1382_v25  ;;  %vm4680_vm6 = vcmp.lt.s32.totalorder %v4660_v43, 2  ;;  %vm4682_vm7 = vcmp.lt.s32.totalorder %v4660_v43, 4 }
 0x257   :  { %8265 = vsinq.f32 %v4839_v13  ;;  %v4687_v18 = vsel %vm4679_vm5, %v4666_v9, %v4669_v2  ;;  %vm4681_vm9 = vcmp.lt.s32.totalorder %v4660_v43, 3  ;;  %v4684_v56 = vsel %vm4682_vm7, %v4672_v10, 2102212464 }
 0x258   :  { %v1385_v49 = vsub.s32 0, %v9949_v11  ;;  %v4688_v5 = vsel %vm4682_vm7, %v4675_v15, 920167782  ;;  %v1405_v8 = vsub.s32 4, %v1381_v55  ;;  %v4691_v39 = vsel %vm4679_vm5, %v4669_v2, %v4672_v10 }
 0x259   :  { %v4689_v31 = vsel %vm4681_vm9, %v4672_v10, %v4688_v5  ;;  %v4692_v24 = vsel %vm4682_vm7, %v4678_v60, 1326507024  ;;  %v4683_v4 = vsel %vm4679_vm5, %v4663_v21, %v4666_v9  ;;  %v4685_v41 = vsel %vm4681_vm9, %v4669_v2, %v4684_v56 }
 0x25a   :  { %v7518_v34 = vmin.u32 %v1385_v49, %v9949_v11  ;;  %v4690_v35 = vsel %vm4680_vm6, %v4687_v18, %v4689_v31  ;;  %v4693_v32 = vsel %vm4681_vm9, %v4675_v15, %v4692_v24  ;;  %vm1321_vm8 = vcmp.lt.s32.totalorder %v9812_v36, 0 }
 0x25b   :  { %v4694_v51 = vsel %vm4680_vm6, %v4691_v39, %v4693_v32  ;;  %v9956_v37 = vmul.u32.u64.low %v4695_v19, %v4690_v35  ;;  %v9957_v62 = vmul.u32.u64.high %v4695_v19, %v4690_v35, %v9956_v37  ;;  %v9965_v33 = vadd.f32 %v9635_v26, %v7899_v63  ;;  %v416_v35 = vpop.f32.mrf.mxu0 }
 0x25c   :  { %v1387_v20 = vclz %v7518_v34  ;;  %v9961_v22 = vmul.u32.u64.low %v4695_v19, %v4694_v51  ;;  %v9962_v12 = vmul.u32.u64.high %v4695_v19, %v4694_v51, %v9961_v22  ;;  %vm9969_vm11 = vcmp.le.f32.partialorder %v1319_v58, 0.7853982 }
 0x25d   :  { %v4686_v28 = vsel %vm4680_vm6, %v4683_v4, %v4685_v41  ;;  %v1634_v57 = vand.u32 2139095040, %v9947_v30  ;;  %vm4846_vm12 = vcmp.lt.s32.totalorder %v9918_v38, 2  ;;  %vm4847_vm10 = vcmp.eq.s32.totalorder %v9918_v38, 0 }
 0x25e   :  { %v7519_v14 = vadd.s32 4294967294, %v1387_v20  ;;  %v1406_v17 = vsel %vm1321_vm8, %v1405_v8, %v1381_v55  ;;  %v4705_v26 = vadd.s32 1, %v9957_v62  ;;  %v1631_v0 = vand.u32 2147483647, %v9947_v30 }
 0x25f   :  { %vm4843_vm14 = vweird.f32 %v9698_v16  ;;  %vm4850_vm13 = vcmp.eq.s32.totalorder %v9918_v38, 2  ;;  %v1375_v58 = vadd.s32 %v9903_v3, %v9901_v27  ;;  %v1635_v43 = vshrl.u32 %v1634_v57, 23  ;;  %v10023_v16 = vld [vmem:[%s13787_s2] ss:$0 sm:$0xff] }
 0x260   :  { %vm7520_vm15 = vcmp.lt.s32.totalorder %v7519_v14, 0  ;;  %v4702_v42 = vmul.u32 %v4695_v19, %v4686_v28  ;;  %vm4704_vm1 = vc.u32 %v9962_v12, %v9956_v37  ;;  %v4962_v45 = vand.u32 2139095040, %v9965_v33 }
 0x261   :  { %v1390_v6 = vsel %vm7520_vm15, 0, %v7519_v14  ;;  %v1408_v47 = vsel %vm9969_vm11, 0, %v1406_v17  ;;  %v4706_v29 = vsel %vm4704_vm1, %v4705_v26, %v9957_v62  ;;  %v7529_v23 = vadd.s32 4294967169, %v1635_v43 }
 0x262   :  { %v1391_v55 = vsub.s32 32, %v1390_v6  ;;  %v1395_v59 = vsub.s32 4294967266, %v1390_v6  ;;  %v4707_v2 = vadd.s32 %v4706_v29, %v4702_v42  ;;  %v1638_v27 = vand.u32 8388607, %v1631_v0 }
 0x263   :  { %v8264_v9 = vpop.eup %8263  ;;  %v4959_v3 = vand.u32 2147483647, %v9965_v33  ;;  %v1392_v25 = vshll.u32 %v9949_v11, %v1390_v6  ;;  %v1641_v19 = vadd.s32 1, %v7529_v23  ;;  %v4963_v21 = vshrl.u32 %v4962_v45, 23 }
 0x264   :  { %v8266_v1 = vpop.eup %8265  ;;  %v4851_v46 = vxor.u32 2147483648, %v8264_v9  ;;  %v1393_v10 = vshrl.u32 %v1375_v58, %v1391_v55  ;;  %v1396_v15 = vadd.s32 127, %v1395_v59  ;;  %v4708_v60 = vadd.s32 536870912, %v4707_v2 }
 0x265   :  { %v4848_v13 = vxor.u32 2147483648, %v8266_v1  ;;  %v1412_v5 = vadd.s32 3, %v1408_v47  ;;  %v1639_v39 = vor.u32 8388608, %v1638_v27  ;;  %vm1642_vm2 = vcmp.gt.s32.totalorder %v1641_v19, 0 }
 0x266   :  { %v4852_v18 = vsel %vm4850_vm13, %v4851_v46, %v8266_v1  ;;  %v1394_v49 = vor.u32 %v1393_v10, %v1392_v25  ;;  %v1397_v56 = vshll.u32 %v1396_v15, 23  ;;  %v9999_v31 = vshrl.u32 %v4708_v60, 30 }
 0x267   :  { %v4849_v8 = vsel %vm4847_vm10, %v8264_v9, %v4848_v13  ;;  %v1643_v34 = vsel %vm1642_vm2, %v1641_v19, 0  ;;  %v10005_v4 = vand.u32 8388607, %v4959_v3  ;;  %v7657_v41 = vadd.s32 4294967169, %v4963_v21 }
 0x268   :  { %v4853_v11 = vsel %vm4846_vm12, %v4849_v8, %v4852_v18  ;;  %v1398_v24 = vor.u32 4788187, %v1397_v56  ;;  %v4710_v63 = vshll.u32 %v9999_v31, 30  ;;  %v1401_v51 = vcvt.s32.f32 %v1394_v49 }
 0x269   :  { %v4854_v32 = vsel %vm4843_vm14, nan, %v4853_v11  ;;  %v1645_v62 = vand.u32 31, %v1643_v34  ;;  %v10014_v20 = vand.u32 3, %v1412_v5  ;;  %v4703_v22 = vadd.s32 %v9956_v37, %v9962_v12 }
 0x26a   :  { %7391 = vst.msk [vmem:[%s13788_s3 + $0x138] sm:$0xff] %vm7351_vm0, %v4854_v32  ;;  %v1399_v38 = vand.u32 2147483647, %v1398_v24  ;;  %v10018_v14 = vsub.s32 %v4707_v2, %v4710_v63  ;;  %v10026_v28 = vadd.f32 %v10023_v16, %v416_v35  ;;  %v10028_v26 = vshll.u32 %v1639_v39, 8 }
 0x26b   :  { %v1646_v17 = vsub.s32 32, %v1645_v62  ;;  %v4967_v58 = vor.u32 8388608, %v10005_v4  ;;  %v1644_v6 = vshrl.u32 %v1643_v34, 5  ;;  %v1648_v37 = vshll.u32 %v8477_v44, %v1645_v62 }
 0x26c   :  { %v1402_v57 = vmul.f32 %v1401_v51, %v1399_v38  ;;  %v4713_v43 = vsub.s32 0, %v10018_v14  ;;  %v4969_v12 = vadd.s32 1, %v7657_v41  ;;  %v1651_v55 = vshll.u32 %v8478_v48, %v1645_v62 }
 0x26d   :  { %v1649_v45 = vshrl.u32 %v8478_v48, %v1646_v17  ;;  %v1652_v59 = vshrl.u32 %v8479_v50, %v1646_v17  ;;  %v1654_v29 = vshll.u32 %v8479_v50, %v1645_v62  ;;  %v1655_v9 = vshrl.u32 %v8480_v52, %v1646_v17 }
 0x26e   :  { %v1403_v42 = vxor.u32 2147483648, %v1402_v57  ;;  %v7646_v47 = vmin.u32 %v4713_v43, %v10018_v14  ;;  %v1657_v2 = vshll.u32 %v8480_v52, %v1645_v62  ;;  %v1658_v46 = vshrl.u32 %v8481_v54, %v1646_v17 }
 0x26f   :  { %v1650_v27 = vor.u32 %v1649_v45, %v1648_v37  ;;  %v1653_v1 = vor.u32 %v1652_v59, %v1651_v55  ;;  %v4733_v15 = vsub.s32 4, %v9999_v31  ;;  %vm4970_vm3 = vcmp.gt.s32.totalorder %v4969_v12, 0 }
 0x270   :  { %v1404_v23 = vsel %vm1321_vm8, %v1403_v42, %v1402_v57  ;;  %v4715_v10 = vclz %v7646_v47  ;;  %v1656_v13 = vor.u32 %v1655_v9, %v1654_v29  ;;  %v1659_v60 = vor.u32 %v1658_v46, %v1657_v2 }
 0x271   :  { %v1407_v25 = vsel %vm9969_vm11, %v9812_v36, %v1404_v23  ;;  %vm1663_vm4 = vcmp.lt.s32.totalorder %v1644_v6, 1  ;;  %vm4649_vm5 = vcmp.lt.s32.totalorder %v9834_v53, 0  ;;  %v1660_v21 = vshll.u32 %v8481_v54, %v1645_v62 }
 0x272   :  { %8267 = vcosq.f32 %v1407_v25  ;;  %v7647_v19 = vadd.s32 4294967294, %v4715_v10  ;;  %v1661_v18 = vshrl.u32 %v8482_v61, %v1646_v17  ;;  %v1647_v49 = vshrl.u32 %v8477_v44, %v1646_v17 }
 0x273   :  { %8269 = vsinq.f32 %v1407_v25  ;;  %vm1665_vm6 = vcmp.lt.s32.totalorder %v1644_v6, 3  ;;  %vm1666_vm7 = vcmp.lt.s32.totalorder %v1644_v6, 4  ;;  %v1671_v40 = vsel %vm1663_vm4, %v1650_v27, %v1653_v1 }
 0x274   :  { %vm7648_vm9 = vcmp.lt.s32.totalorder %v7647_v19, 0  ;;  %v1662_v56 = vor.u32 %v1661_v18, %v1660_v21  ;;  %v1668_v5 = vsel %vm1666_vm7, %v1656_v13, 2102212464  ;;  %v1672_v8 = vsel %vm1666_vm7, %v1659_v60, 920167782 }
 0x275   :  { %v4718_v39 = vsel %vm7648_vm9, 0, %v7647_v19  ;;  %v1667_v11 = vsel %vm1663_vm4, %v1647_v49, %v1650_v27  ;;  %v1669_v24 = vsel %vm1665_vm6, %v1653_v1, %v1668_v5  ;;  %v1673_v34 = vsel %vm1665_vm6, %v1656_v13, %v1672_v8 }
 0x276   :  { %v4719_v35 = vsub.s32 32, %v4718_v39  ;;  %v4723_v32 = vsub.s32 4294967266, %v4718_v39  ;;  %vm1664_vm8 = vcmp.lt.s32.totalorder %v1644_v6, 2  ;;  %v1675_v63 = vsel %vm1663_vm4, %v1653_v1, %v1656_v13 }
 0x277   :  { %v4720_v41 = vshll.u32 %v10018_v14, %v4718_v39  ;;  %v1674_v38 = vsel %vm1664_vm8, %v1671_v40, %v1673_v34  ;;  %v1676_v51 = vsel %vm1666_vm7, %v1662_v56, 1326507024  ;;  %v4971_v62 = vsel %vm4970_vm3, %v4969_v12, 0 }
 0x278   :  { %v4721_v57 = vshrl.u32 %v4703_v22, %v4719_v35  ;;  %v4724_v17 = vadd.s32 127, %v4723_v32  ;;  %v1670_v43 = vsel %vm1664_vm8, %v1667_v11, %v1669_v24  ;;  %v1677_v37 = vsel %vm1665_vm6, %v1659_v60, %v1676_v51 }
 0x279   :  { %vm1415_vm11 = vcmp.eq.s32.totalorder %v10014_v20, 0  ;;  %v1678_v42 = vsel %vm1664_vm8, %v1675_v63, %v1677_v37  ;;  %v10064_v45 = vmul.u32.u64.low %v10028_v26, %v1674_v38  ;;  %v10065_v55 = vmul.u32.u64.high %v10028_v26, %v1674_v38, %v10064_v45 }
 0x27a   :  { %v4973_v59 = vand.u32 31, %v4971_v62  ;;  %vm1414_vm12 = vcmp.lt.s32.totalorder %v10014_v20, 2  ;;  %vm10071_vm10 = vcmp.le.f32.partialorder %v4647_v7, 0.7853982  ;;  %v4722_v22 = vor.u32 %v4721_v57, %v4720_v41 }
 0x27b   :  { %v4725_v6 = vshll.u32 %v4724_v17, 23  ;;  %v10076_v12 = vmul.u32.u64.low %v10028_v26, %v1678_v42  ;;  %v10077_v47 = vmul.u32.u64.high %v10028_v26, %v1678_v42, %v10076_v12  ;;  %vm1411_vm14 = vweird.f32 %v9812_v36 }
 0x27c   :  { %vm1418_vm13 = vcmp.eq.s32.totalorder %v10014_v20, 2  ;;  %v4734_v29 = vsel %vm4649_vm5, %v4733_v15, %v9999_v31  ;;  %v4974_v9 = vsub.s32 32, %v4973_v59  ;;  %v10086_v7 = vshll.u32 %v4967_v58, 8 }
 0x27d   :  { %v4726_v2 = vor.u32 4788187, %v4725_v6  ;;  %v1686_v23 = vmul.u32 %v10028_v26, %v1670_v43  ;;  %v10089_v27 = vshrl.u32 %v4971_v62, 5  ;;  %v4976_v1 = vshll.u32 %v8477_v44, %v4973_v59 }
 0x27e   :  { %v1689_v46 = vadd.s32 1, %v10065_v55  ;;  %v4977_v25 = vshrl.u32 %v8478_v48, %v4974_v9  ;;  %v4979_v10 = vshll.u32 %v8478_v48, %v4973_v59  ;;  %v4982_v31 = vshll.u32 %v8479_v50, %v4973_v59 }
 0x27f   :  { %v8268_v15 = vpop.eup %8267  ;;  %v4727_v13 = vand.u32 2147483647, %v4726_v2  ;;  %v4729_v4 = vcvt.s32.f32 %v4722_v22  ;;  %vm1688_vm15 = vc.u32 %v10077_v47, %v10064_v45  ;;  %v4980_v26 = vshrl.u32 %v8479_v50, %v4974_v9 }
 0x280   :  { %v8270_v58 = vpop.eup %8269  ;;  %v1419_v60 = vxor.u32 2147483648, %v8268_v15  ;;  %v1690_v19 = vsel %vm1688_vm15, %v1689_v46, %v10065_v55  ;;  %v4983_v21 = vshrl.u32 %v8480_v52, %v4974_v9  ;;  %v4985_v18 = vshll.u32 %v8480_v52, %v4973_v59 }
 0x281   :  { %v1416_v49 = vxor.u32 2147483648, %v8270_v58  ;;  %v4730_v40 = vmul.f32 %v4729_v4, %v4727_v13  ;;  %v1691_v56 = vadd.s32 %v1690_v19, %v1686_v23  ;;  %v4988_v5 = vshll.u32 %v8481_v54, %v4973_v59 }
 0x282   :  { %v1420_v8 = vsel %vm1418_vm13, %v1419_v60, %v8270_v58  ;;  %v4978_v39 = vor.u32 %v4977_v25, %v4976_v1  ;;  %v4986_v11 = vshrl.u32 %v8481_v54, %v4974_v9  ;;  %v4989_v24 = vshrl.u32 %v8482_v61, %v4974_v9 }
 0x283   :  { %v1417_v34 = vsel %vm1415_vm11, %v8268_v15, %v1416_v49  ;;  %v4731_v35 = vxor.u32 2147483648, %v4730_v40  ;;  %v1692_v32 = vadd.s32 536870912, %v1691_v56  ;;  %v4981_v63 = vor.u32 %v4980_v26, %v4979_v10 }
 0x284   :  { %v1421_v41 = vsel %vm1414_vm12, %v1417_v34, %v1420_v8  ;;  %v4736_v38 = vsel %vm10071_vm10, 0, %v4734_v29  ;;  %v4984_v51 = vor.u32 %v4983_v21, %v4982_v31  ;;  %v4987_v62 = vor.u32 %v4986_v11, %v4985_v18 }
 0x285   :  { %v1422_v57 = vsel %vm1411_vm14, nan, %v1421_v41  ;;  %v4732_v17 = vsel %vm4649_vm5, %v4731_v35, %v4730_v40  ;;  %v1693_v43 = vshrl.u32 %v1692_v32, 30  ;;  %v4990_v37 = vor.u32 %v4989_v24, %v4988_v5  ;;  %v576_v24 = vpop.f32.mrf.mxu1 }
 0x286   :  { %7358 = vst.msk [vmem:[%s13788_s3 + $0x30] sm:$0xff] %vm7351_vm0, %v1422_v57  ;;  %v4735_v20 = vsel %vm10071_vm10, %v9834_v53, %v4732_v17  ;;  %v4975_v42 = vshrl.u32 %v8477_v44, %v4974_v9  ;;  %vm4991_vm1 = vcmp.lt.s32.totalorder %v10089_v27, 1  ;;  %vm4993_vm2 = vcmp.lt.s32.totalorder %v10089_v27, 3 }
 0x287   :  { %8271 = vcosq.f32 %v4735_v20  ;;  %v1694_v36 = vshll.u32 %v1693_v43, 30  ;;  %vm4994_vm3 = vcmp.lt.s32.totalorder %v10089_v27, 4  ;;  %v4999_v55 = vsel %vm4991_vm1, %v4978_v39, %v4981_v63 }
 0x288   :  { %8273 = vsinq.f32 %v4735_v20  ;;  %v4996_v59 = vsel %vm4994_vm3, %v4984_v51, 2102212464  ;;  %v5000_v22 = vsel %vm4994_vm3, %v4987_v62, 920167782  ;;  %v5003_v14 = vsel %vm4991_vm1, %v4981_v63, %v4984_v51 }
 0x289   :  { %v10132_v6 = vsub.s32 %v1691_v56, %v1694_v36  ;;  %vm4992_vm4 = vcmp.lt.s32.totalorder %v10089_v27, 2  ;;  %v5001_v12 = vsel %vm4993_vm2, %v4984_v51, %v5000_v22  ;;  %v5004_v29 = vsel %vm4994_vm3, %v4990_v37, 1326507024 }
 0x28a   :  { %v4740_v9 = vadd.s32 3, %v4736_v38  ;;  %v1717_v2 = vsub.s32 4, %v1693_v43  ;;  %v5002_v23 = vsel %vm4992_vm4, %v4999_v55, %v5001_v12  ;;  %v5005_v1 = vsel %vm4993_vm2, %v4987_v62, %v5004_v29 }
 0x28b   :  { %v1697_v46 = vsub.s32 0, %v10132_v6  ;;  %v4995_v25 = vsel %vm4991_vm1, %v4975_v42, %v4978_v39  ;;  %v4997_v10 = vsel %vm4993_vm2, %v4981_v63, %v4996_v59  ;;  %v5006_v31 = vsel %vm4992_vm4, %v5003_v14, %v5005_v1 }
 0x28c   :  { %v10149_v15 = vmul.u32.u64.low %v10086_v7, %v5006_v31  ;;  %v10150_v13 = vmul.u32.u64.high %v10086_v7, %v5006_v31, %v10149_v15  ;;  %v10153_v4 = vmul.u32.u64.low %v10086_v7, %v5002_v23  ;;  %v10154_v26 = vmul.u32.u64.high %v10086_v7, %v5002_v23, %v10153_v4 }
 0x28d   :  { %vm1633_vm5 = vcmp.lt.s32.totalorder %v9947_v30, 0  ;;  %v7530_v58 = vmin.u32 %v1697_v46, %v10132_v6  ;;  %v4741_v60 = vand.u32 3, %v4740_v9  ;;  %v4998_v21 = vsel %vm4992_vm4, %v4995_v25, %v4997_v10 }
 0x28e   :  { %v1718_v19 = vsel %vm1633_vm5, %v1717_v2, %v1693_v43  ;;  %v1530_v18 = vand.u32 2139095040, %v10026_v28  ;;  %vm10165_vm6 = vcmp.le.f32.partialorder %v1631_v0, 0.7853982  ;;  %vm5016_vm7 = vc.u32 %v10150_v13, %v10153_v4 }
 0x28f   :  { %v1699_v49 = vclz %v7530_v58  ;;  %v5017_v56 = vadd.s32 1, %v10154_v26  ;;  %v1720_v39 = vsel %vm10165_vm6, 0, %v1718_v19  ;;  %v5014_v27 = vmul.u32 %v10086_v7, %v4998_v21 }
 0x290   :  { %v1531_v5 = vshrl.u32 %v1530_v18, 23  ;;  %v1527_v11 = vand.u32 2147483647, %v10026_v28  ;;  %vm4742_vm9 = vcmp.lt.s32.totalorder %v4741_v60, 2  ;;  %vm4743_vm8 = vcmp.eq.s32.totalorder %v4741_v60, 0 }
 0x291   :  { %v7531_v8 = vadd.s32 4294967294, %v1699_v49  ;;  %v5018_v0 = vsel %vm5016_vm7, %v5017_v56, %v10154_v26  ;;  %vm4746_vm11 = vcmp.eq.s32.totalorder %v4741_v60, 2  ;;  %v1687_v35 = vadd.s32 %v10064_v45, %v10077_v47 }
 0x292   :  { %v7525_v34 = vadd.s32 4294967169, %v1531_v5  ;;  %v5019_v32 = vadd.s32 %v5018_v0, %v5014_v27  ;;  %v1724_v38 = vadd.s32 3, %v1720_v39  ;;  %v10179_v7 = vadd.f32 %v10023_v16, %v576_v24 }
 0x293   :  { %vm7532_vm12 = vcmp.lt.s32.totalorder %v7531_v8, 0  ;;  %v1534_v37 = vand.u32 8388607, %v1527_v11  ;;  %vm4739_vm14 = vweird.f32 %v9834_v53  ;;  %vm4961_vm13 = vcmp.lt.s32.totalorder %v9965_v33, 0 }
 0x294   :  { %v8272_v63 = vpop.eup %8271  ;;  %v1702_v41 = vsel %vm7532_vm12, 0, %v7531_v8  ;;  %v1537_v51 = vadd.s32 1, %v7525_v34  ;;  %v5020_v45 = vadd.s32 536870912, %v5019_v32  ;;  %v4858_v29 = vand.u32 2139095040, %v10179_v7 }
 0x295   :  { %v8274_v62 = vpop.eup %8273  ;;  %v4747_v57 = vxor.u32 2147483648, %v8272_v63  ;;  %v1703_v17 = vsub.s32 32, %v1702_v41  ;;  %v1707_v43 = vsub.s32 4294967266, %v1702_v41  ;;  %v1704_v42 = vshll.u32 %v10132_v6, %v1702_v41 }
 0x296   :  { %v4744_v20 = vxor.u32 2147483648, %v8274_v62  ;;  %vm1538_vm10 = vcmp.gt.s32.totalorder %v1537_v51, 0  ;;  %v5021_v14 = vshrl.u32 %v5020_v45, 30  ;;  %v10194_v10 = vand.u32 3, %v1724_v38 }
 0x297   :  { %v4748_v47 = vsel %vm4746_vm11, %v4747_v57, %v8274_v62  ;;  %v1705_v36 = vshrl.u32 %v1687_v35, %v1703_v17  ;;  %v1708_v55 = vadd.s32 127, %v1707_v43  ;;  %v1539_v59 = vsel %vm1538_vm10, %v1537_v51, 0 }
 0x298   :  { %v4745_v22 = vsel %vm4743_vm8, %v8272_v63, %v4744_v20  ;;  %v1541_v12 = vand.u32 31, %v1539_v59  ;;  %v5022_v1 = vshll.u32 %v5021_v14, 30  ;;  %v5015_v31 = vadd.s32 %v10153_v4, %v10150_v13 }
 0x299   :  { %v4749_v9 = vsel %vm4742_vm9, %v4745_v22, %v4748_v47  ;;  %v1706_v2 = vor.u32 %v1705_v36, %v1704_v42  ;;  %v1709_v23 = vshll.u32 %v1708_v55, 23  ;;  %v1535_v53 = vor.u32 8388608, %v1534_v37 }
 0x29a   :  { %v4750_v6 = vsel %vm4739_vm14, nan, %v4749_v9  ;;  %v1542_v46 = vsub.s32 32, %v1541_v12  ;;  %v10197_v15 = vsub.s32 %v5019_v32, %v5022_v1  ;;  %v5045_v26 = vsub.s32 4, %v5021_v14 }
 0x29b   :  { %7390 = vst.msk [vmem:[%s13788_s3 + $0x130] sm:$0xff] %vm7351_vm0, %v4750_v6  ;;  %v1710_v25 = vor.u32 4788187, %v1709_v23  ;;  %v4859_v60 = vshrl.u32 %v4858_v29, 23  ;;  %v1713_v21 = vcvt.s32.f32 %v1706_v2  ;;  %v1544_v18 = vshll.u32 %v8477_v44, %v1541_v12 }
 0x29c   :  { %v1545_v58 = vshrl.u32 %v8478_v48, %v1542_v46  ;;  %v1548_v49 = vshrl.u32 %v8479_v50, %v1542_v46  ;;  %v5025_v56 = vsub.s32 0, %v10197_v15  ;;  %v1547_v5 = vshll.u32 %v8478_v48, %v1541_v12 }
 0x29d   :  { %v1711_v19 = vand.u32 2147483647, %v1710_v25  ;;  %v1550_v8 = vshll.u32 %v8479_v50, %v1541_v12  ;;  %v1551_v13 = vshrl.u32 %v8480_v52, %v1542_v46  ;;  %v1540_v39 = vshrl.u32 %v1539_v59, 5 }
 0x29e   :  { %v1553_v27 = vshll.u32 %v8480_v52, %v1541_v12  ;;  %v1554_v24 = vshrl.u32 %v8481_v54, %v1542_v46  ;;  %v7658_v0 = vmin.u32 %v5025_v56, %v10197_v15  ;;  %v1546_v34 = vor.u32 %v1545_v58, %v1544_v18 }
 0x29f   :  { %v1714_v4 = vmul.f32 %v1713_v21, %v1711_v19  ;;  %v1549_v35 = vor.u32 %v1548_v49, %v1547_v5  ;;  %v1552_v32 = vor.u32 %v1551_v13, %v1550_v8  ;;  %v1556_v38 = vshll.u32 %v8481_v54, %v1541_v12 }
 0x2a0   :  { %v1555_v41 = vor.u32 %v1554_v24, %v1553_v27  ;;  %v1557_v51 = vshrl.u32 %v8482_v61, %v1542_v46  ;;  %vm10213_vm15 = vcmp.le.f32.partialorder %v4959_v3, 0.7853982  ;;  %v5027_v57 = vclz %v7658_v0  ;;  %v7854_v24 = vpop.f32.mrf.mxu0 }
 0x2a1   :  { %v1715_v63 = vxor.u32 2147483648, %v1714_v4  ;;  %v5046_v17 = vsel %vm4961_vm13, %v5045_v26, %v5021_v14  ;;  %v1575_v43 = vshll.u32 %v1535_v53, 8  ;;  %v7653_v37 = vadd.s32 4294967169, %v4859_v60 }
 0x2a2   :  { %v1543_v42 = vshrl.u32 %v8477_v44, %v1542_v46  ;;  %v1558_v45 = vor.u32 %v1557_v51, %v1556_v38  ;;  %vm1559_vm1 = vcmp.lt.s32.totalorder %v1540_v39, 1  ;;  %v7659_v47 = vadd.s32 4294967294, %v5027_v57 }
 0x2a3   :  { %v1716_v20 = vsel %vm1633_vm5, %v1715_v63, %v1714_v4  ;;  %vm1561_vm2 = vcmp.lt.s32.totalorder %v1540_v39, 3  ;;  %vm1562_vm3 = vcmp.lt.s32.totalorder %v1540_v39, 4  ;;  %v1567_v55 = vsel %vm1559_vm1, %v1546_v34, %v1549_v35 }
 0x2a4   :  { %v1719_v3 = vsel %vm10165_vm6, %v9947_v30, %v1716_v20  ;;  %v1564_v36 = vsel %vm1562_vm3, %v1552_v32, 2102212464  ;;  %v1568_v59 = vsel %vm1562_vm3, %v1555_v41, 920167782  ;;  %vm7660_vm4 = vcmp.lt.s32.totalorder %v7659_v47, 0 }
 0x2a5   :  { %8275 = vcosq.f32 %v1719_v3  ;;  %vm1560_vm5 = vcmp.lt.s32.totalorder %v1540_v39, 2  ;;  %v1569_v22 = vsel %vm1561_vm2, %v1552_v32, %v1568_v59  ;;  %v5030_v14 = vsel %vm7660_vm4, 0, %v7659_v47 }
 0x2a6   :  { %8277 = vsinq.f32 %v1719_v3  ;;  %v1563_v12 = vsel %vm1559_vm1, %v1543_v42, %v1546_v34  ;;  %v1570_v40 = vsel %vm1560_vm5, %v1567_v55, %v1569_v22  ;;  %v1571_v29 = vsel %vm1559_vm1, %v1549_v35, %v1552_v32 }
 0x2a7   :  { %v5031_v9 = vsub.s32 32, %v5030_v14  ;;  %v5035_v2 = vsub.s32 4294967266, %v5030_v14  ;;  %v1565_v23 = vsel %vm1561_vm2, %v1549_v35, %v1564_v36  ;;  %v1572_v6 = vsel %vm1562_vm3, %v1558_v45, 1326507024 }
 0x2a8   :  { %v5032_v1 = vshll.u32 %v10197_v15, %v5030_v14  ;;  %v1573_v46 = vsel %vm1561_vm2, %v1555_v41, %v1572_v6  ;;  %v10236_v25 = vmul.u32.u64.low %v1575_v43, %v1570_v40  ;;  %v10237_v53 = vmul.u32.u64.high %v1575_v43, %v1570_v40, %v10236_v25 }
 0x2a9   :  { %v5033_v26 = vshrl.u32 %v5015_v31, %v5031_v9  ;;  %v5036_v58 = vadd.s32 127, %v5035_v2  ;;  %v1574_v60 = vsel %vm1560_vm5, %v1571_v29, %v1573_v46  ;;  %v4865_v19 = vadd.s32 1, %v7653_v37 }
 0x2aa   :  { %v5048_v21 = vsel %vm10213_vm15, 0, %v5046_v17  ;;  %v10243_v18 = vmul.u32.u64.low %v1575_v43, %v1574_v60  ;;  %v10244_v49 = vmul.u32.u64.high %v1575_v43, %v1574_v60, %v10243_v18  ;;  %v4855_v56 = vand.u32 2147483647, %v10179_v7 }
 0x2ab   :  { %v5034_v15 = vor.u32 %v5033_v26, %v5032_v1  ;;  %v5037_v5 = vshll.u32 %v5036_v58, 23  ;;  %v1566_v8 = vsel %vm1560_vm5, %v1563_v12, %v1565_v23  ;;  %vm4866_vm6 = vcmp.gt.s32.totalorder %v4865_v19, 0 }
 0x2ac   :  { %v1585_v13 = vadd.s32 1, %v10237_v53  ;;  %v4867_v31 = vsel %vm4866_vm6, %v4865_v19, 0  ;;  %vm1726_vm7 = vcmp.lt.s32.totalorder %v10194_v10, 2  ;;  %vm1727_vm9 = vcmp.eq.s32.totalorder %v10194_v10, 0 }
 0x2ad   :  { %vm1730_vm8 = vcmp.eq.s32.totalorder %v10194_v10, 2  ;;  %v5038_v4 = vor.u32 4788187, %v5037_v5  ;;  %v4869_v27 = vand.u32 31, %v4867_v31  ;;  %vm1723_vm11 = vweird.f32 %v9947_v30 }
 0x2ae   :  { %v5052_v0 = vadd.s32 3, %v5048_v21  ;;  %v1582_v34 = vmul.u32 %v1575_v43, %v1566_v8  ;;  %vm1584_vm12 = vc.u32 %v10244_v49, %v10236_v25  ;;  %v4862_v39 = vand.u32 8388607, %v4855_v56 }
 0x2af   :  { %v5039_v35 = vand.u32 2147483647, %v5038_v4  ;;  %v5041_v32 = vcvt.s32.f32 %v5034_v15  ;;  %v1586_v63 = vsel %vm1584_vm12, %v1585_v13, %v10237_v53  ;;  %v4870_v41 = vsub.s32 32, %v4869_v27 }
 0x2b0   :  { %v1587_v38 = vadd.s32 %v1586_v63, %v1582_v34  ;;  %v10258_v51 = vshrl.u32 %v4867_v31, 5  ;;  %v4872_v57 = vshll.u32 %v8477_v44, %v4869_v27  ;;  %v10262_v17 = vadd.f32 %v10023_v16, %v7854_v24 }
 0x2b1   :  { %v5042_v37 = vmul.f32 %v5041_v32, %v5039_v35  ;;  %v4873_v20 = vshrl.u32 %v8478_v48, %v4870_v41  ;;  %v4875_v42 = vshll.u32 %v8478_v48, %v4869_v27  ;;  %v4876_v45 = vshrl.u32 %v8479_v50, %v4870_v41 }
 0x2b2   :  { %v8276_v43 = vpop.eup %8275  ;;  %v1588_v36 = vadd.s32 536870912, %v1587_v38  ;;  %v4878_v55 = vshll.u32 %v8479_v50, %v4869_v27  ;;  %v4879_v59 = vshrl.u32 %v8480_v52, %v4870_v41  ;;  %v4881_v12 = vshll.u32 %v8480_v52, %v4869_v27 }
 0x2b3   :  { %v8278_v3 = vpop.eup %8277  ;;  %v1731_v47 = vxor.u32 2147483648, %v8276_v43  ;;  %v5043_v14 = vxor.u32 2147483648, %v5042_v37  ;;  %v4882_v40 = vshrl.u32 %v8481_v54, %v4870_v41  ;;  %v4874_v2 = vor.u32 %v4873_v20, %v4872_v57 }
 0x2b4   :  { %v1728_v22 = vxor.u32 2147483648, %v8278_v3  ;;  %v10273_v9 = vshrl.u32 %v1588_v36, 30  ;;  %v4877_v23 = vor.u32 %v4876_v45, %v4875_v42  ;;  %v4884_v46 = vshll.u32 %v8481_v54, %v4869_v27 }
 0x2b5   :  { %v1732_v29 = vsel %vm1730_vm8, %v1731_v47, %v8278_v3  ;;  %v5044_v1 = vsel %vm4961_vm13, %v5043_v14, %v5042_v37  ;;  %v4885_v53 = vshrl.u32 %v8482_v61, %v4870_v41  ;;  %v4880_v19 = vor.u32 %v4879_v59, %v4878_v55  ;;  %v7902_v3 = vpop.f32.mrf.mxu1 }
 0x2b6   :  { %v1729_v6 = vsel %vm1727_vm9, %v8276_v43, %v1728_v22  ;;  %v5047_v58 = vsel %vm10213_vm15, %v9965_v33, %v5044_v1  ;;  %v1590_v60 = vshll.u32 %v10273_v9, 30  ;;  %v4883_v18 = vor.u32 %v4882_v40, %v4881_v12 }
 0x2b7   :  { %v1733_v26 = vsel %vm1726_vm7, %v1729_v6, %v1732_v29  ;;  %8279 = vcosq.f32 %v5047_v58  ;;  %v4886_v15 = vor.u32 %v4885_v53, %v4884_v46  ;;  %v10295_v5 = vand.u32 3, %v5052_v0 }
 0x2b8   :  { %v1734_v21 = vsel %vm1723_vm11, nan, %v1733_v26  ;;  %8281 = vsinq.f32 %v5047_v58  ;;  %v10293_v10 = vsub.s32 %v1587_v38, %v1590_v60  ;;  %v4863_v62 = vor.u32 8388608, %v4862_v39 }
 0x2b9   :  { %7361 = vst.msk [vmem:[%s13788_s3 + $0x48] sm:$0xff] %vm7351_vm0, %v1734_v21  ;;  %vm4887_vm10 = vcmp.lt.s32.totalorder %v10258_v51, 1  ;;  %v1842_v8 = vand.u32 2139095040, %v10262_v17  ;;  %vm4889_vm14 = vcmp.lt.s32.totalorder %v10258_v51, 3  ;;  %vm4890_vm13 = vcmp.lt.s32.totalorder %v10258_v51, 4 }
 0x2ba   :  { %v1593_v30 = vsub.s32 0, %v10293_v10  ;;  %v4895_v13 = vsel %vm4887_vm10, %v4874_v2, %v4877_v23  ;;  %v4871_v31 = vshrl.u32 %v8477_v44, %v4870_v41  ;;  %v4892_v4 = vsel %vm4890_vm13, %v4880_v19, 2102212464 }
 0x2bb   :  { %v4896_v27 = vsel %vm4890_vm13, %v4883_v18, 920167782  ;;  %v4900_v24 = vsel %vm4890_vm13, %v4886_v15, 1326507024  ;;  %vm4888_vm15 = vcmp.lt.s32.totalorder %v10258_v51, 2  ;;  %v4899_v39 = vsel %vm4887_vm10, %v4877_v23, %v4880_v19 }
 0x2bc   :  { %v7526_v0 = vmin.u32 %v1593_v30, %v10293_v10  ;;  %v4897_v34 = vsel %vm4889_vm14, %v4880_v19, %v4896_v27  ;;  %v4901_v32 = vsel %vm4889_vm14, %v4883_v18, %v4900_v24  ;;  %v4903_v63 = vshll.u32 %v4863_v62, 8 }
 0x2bd   :  { %v4898_v35 = vsel %vm4888_vm15, %v4895_v13, %v4897_v34  ;;  %v1843_v41 = vshrl.u32 %v1842_v8, 23  ;;  %v4891_v57 = vsel %vm4887_vm10, %v4871_v31, %v4874_v2  ;;  %v4893_v43 = vsel %vm4889_vm14, %v4877_v23, %v4892_v4 }
 0x2be   :  { %v1595_v38 = vclz %v7526_v0  ;;  %v4902_v37 = vsel %vm4888_vm15, %v4899_v39, %v4901_v32  ;;  %v10321_v20 = vmul.u32.u64.low %v4903_v63, %v4898_v35  ;;  %v10322_v42 = vmul.u32.u64.high %v4903_v63, %v4898_v35, %v10321_v20 }
 0x2bf   :  { %v7537_v45 = vadd.s32 4294967169, %v1843_v41  ;;  %v1613_v36 = vsub.s32 4, %v10273_v9  ;;  %v10326_v55 = vmul.u32.u64.low %v4903_v63, %v4902_v37  ;;  %v10327_v59 = vmul.u32.u64.high %v4903_v63, %v4902_v37, %v10326_v55 }
 0x2c0   :  { %v7527_v47 = vadd.s32 4294967294, %v1595_v38  ;;  %vm5051_vm1 = vweird.f32 %v9965_v33  ;;  %vm5055_vm2 = vcmp.eq.s32.totalorder %v10295_v5, 0  ;;  %vm1529_vm3 = vcmp.lt.s32.totalorder %v10026_v28, 0 }
 0x2c1   :  { %v4894_v22 = vsel %vm4888_vm15, %v4891_v57, %v4893_v43  ;;  %v1849_v14 = vadd.s32 1, %v7537_v45  ;;  %vm5058_vm4 = vcmp.eq.s32.totalorder %v10295_v5, 2  ;;  %v1839_v12 = vand.u32 2147483647, %v10262_v17 }
 0x2c2   :  { %vm7528_vm5 = vcmp.lt.s32.totalorder %v7527_v47, 0  ;;  %v10337_v40 = vadd.f32 %v10023_v16, %v7902_v3  ;;  %v1583_v29 = vadd.s32 %v10236_v25, %v10244_v49  ;;  %v4913_v23 = vadd.s32 1, %v10322_v42 }
 0x2c3   :  { %v1598_v2 = vsel %vm7528_vm5, 0, %v7527_v47  ;;  %vm1850_vm6 = vcmp.gt.s32.totalorder %v1849_v14, 0  ;;  %v1614_v46 = vsel %vm1529_vm3, %v1613_v36, %v10273_v9  ;;  %v4910_v53 = vmul.u32 %v4903_v63, %v4894_v22 }
 0x2c4   :  { %v8280_v6 = vpop.eup %8279  ;;  %v1599_v1 = vsub.s32 32, %v1598_v2  ;;  %v1603_v51 = vsub.s32 4294967266, %v1598_v2  ;;  %v1600_v60 = vshll.u32 %v10293_v10, %v1598_v2  ;;  %vm4912_vm7 = vc.u32 %v10327_v59, %v10321_v20 }
 0x2c5   :  { %v8282_v26 = vpop.eup %8281  ;;  %v5059_v58 = vxor.u32 2147483648, %v8280_v6  ;;  %v1851_v25 = vsel %vm1850_vm6, %v1849_v14, 0  ;;  %v4914_v18 = vsel %vm4912_vm7, %v4913_v23, %v10322_v42  ;;  %v1846_v9 = vand.u32 8388607, %v1839_v12 }
 0x2c6   :  { %v5056_v49 = vxor.u32 2147483648, %v8282_v26  ;;  %v1601_v19 = vshrl.u32 %v1583_v29, %v1599_v1  ;;  %v1604_v21 = vadd.s32 127, %v1603_v51  ;;  %v4915_v62 = vadd.s32 %v4914_v18, %v4910_v53 }
 0x2c7   :  { %v5060_v15 = vsel %vm5058_vm4, %v5059_v58, %v8282_v26  ;;  %v1853_v8 = vand.u32 31, %v1851_v25  ;;  %vm5054_vm9 = vcmp.lt.s32.totalorder %v10295_v5, 2  ;;  %vm10358_vm8 = vcmp.le.f32.partialorder %v1527_v11, 0.7853982 }
 0x2c8   :  { %v5057_v10 = vsel %vm5055_vm2, %v8280_v6, %v5056_v49  ;;  %v1602_v30 = vor.u32 %v1601_v19, %v1600_v60  ;;  %v1605_v13 = vshll.u32 %v1604_v21, 23  ;;  %v4916_v27 = vadd.s32 536870912, %v4915_v62 }
 0x2c9   :  { %v5061_v31 = vsel %vm5054_vm9, %v5057_v10, %v5060_v15  ;;  %v1854_v24 = vsub.s32 32, %v1853_v8  ;;  %v1616_v39 = vsel %vm10358_vm8, 0, %v1614_v46  ;;  %v1847_v11 = vor.u32 8388608, %v1846_v9 }
 0x2ca   :  { %v5062_v0 = vsel %vm5051_vm1, nan, %v5061_v31  ;;  %v1606_v34 = vor.u32 4788187, %v1605_v13  ;;  %v10370_v5 = vshrl.u32 %v4916_v27, 30  ;;  %v5170_v32 = vand.u32 2139095040, %v10337_v40 }
 0x2cb   :  { %7393 = vst.msk [vmem:[%s13788_s3 + $0x148] sm:$0xff] %vm7351_vm0, %v5062_v0  ;;  %v1857_v35 = vshrl.u32 %v8478_v48, %v1854_v24  ;;  %v1609_v41 = vcvt.s32.f32 %v1602_v30  ;;  %v1860_v33 = vshrl.u32 %v8479_v50, %v1854_v24  ;;  %v1863_v38 = vshrl.u32 %v8480_v52, %v1854_v24 }
 0x2cc   :  { %v1607_v63 = vand.u32 2147483647, %v1606_v34  ;;  %v4918_v57 = vshll.u32 %v10370_v5, 30  ;;  %v1852_v43 = vshrl.u32 %v1851_v25, 5  ;;  %v1856_v37 = vshll.u32 %v8477_v44, %v1853_v8 }
 0x2cd   :  { %v1862_v42 = vshll.u32 %v8479_v50, %v1853_v8  ;;  %v1859_v3 = vshll.u32 %v8478_v48, %v1853_v8  ;;  %v1865_v47 = vshll.u32 %v8480_v52, %v1853_v8  ;;  %v1866_v36 = vshrl.u32 %v8481_v54, %v1854_v24 }
 0x2ce   :  { %v1610_v45 = vmul.f32 %v1609_v41, %v1607_v63  ;;  %v10382_v55 = vsub.s32 %v4915_v62, %v4918_v57  ;;  %v1858_v22 = vor.u32 %v1857_v35, %v1856_v37  ;;  %v1869_v29 = vshrl.u32 %v8482_v61, %v1854_v24 }
 0x2cf   :  { %v1864_v14 = vor.u32 %v1863_v38, %v1862_v42  ;;  %v1861_v23 = vor.u32 %v1860_v33, %v1859_v3  ;;  %v1867_v6 = vor.u32 %v1866_v36, %v1865_v47  ;;  %v1868_v1 = vshll.u32 %v8481_v54, %v1853_v8 }
 0x2d0   :  { %v1611_v2 = vxor.u32 2147483648, %v1610_v45  ;;  %v1620_v51 = vadd.s32 3, %v1616_v39  ;;  %v4921_v46 = vsub.s32 0, %v10382_v55  ;;  %v1887_v53 = vshll.u32 %v1847_v11, 8 }
 0x2d1   :  { %v5171_v26 = vshrl.u32 %v5170_v32, 23  ;;  %v1855_v60 = vshrl.u32 %v8477_v44, %v1854_v24  ;;  %v1870_v25 = vor.u32 %v1869_v29, %v1868_v1  ;;  %vm1874_vm11 = vcmp.lt.s32.totalorder %v1852_v43, 4 }
 0x2d2   :  { %v1612_v58 = vsel %vm1529_vm3, %v1611_v2, %v1610_v45  ;;  %v7654_v19 = vmin.u32 %v4921_v46, %v10382_v55  ;;  %vm1871_vm12 = vcmp.lt.s32.totalorder %v1852_v43, 1  ;;  %v1876_v21 = vsel %vm1874_vm11, %v1864_v14, 2102212464 }
 0x2d3   :  { %v1615_v49 = vsel %vm10358_vm8, %v10026_v28, %v1612_v58  ;;  %vm1872_vm10 = vcmp.lt.s32.totalorder %v1852_v43, 2  ;;  %v1879_v18 = vsel %vm1871_vm12, %v1858_v22, %v1861_v23  ;;  %v1880_v15 = vsel %vm1874_vm11, %v1867_v6, 920167782 }
 0x2d4   :  { %8283 = vcosq.f32 %v1615_v49  ;;  %v4923_v62 = vclz %v7654_v19  ;;  %vm1873_vm14 = vcmp.lt.s32.totalorder %v1852_v43, 3  ;;  %v1883_v9 = vsel %vm1871_vm12, %v1861_v23, %v1864_v14 }
 0x2d5   :  { %8285 = vsinq.f32 %v1615_v49  ;;  %v1875_v8 = vsel %vm1871_vm12, %v1855_v60, %v1858_v22  ;;  %v1877_v10 = vsel %vm1873_vm14, %v1861_v23, %v1876_v21  ;;  %v1881_v30 = vsel %vm1873_vm14, %v1864_v14, %v1880_v15 }
 0x2d6   :  { %v1884_v13 = vsel %vm1874_vm11, %v1870_v25, 1326507024  ;;  %v7655_v31 = vadd.s32 4294967294, %v4923_v62  ;;  %v4941_v4 = vsub.s32 4, %v10370_v5  ;;  %v1882_v27 = vsel %vm1872_vm10, %v1879_v18, %v1881_v30 }
 0x2d7   :  { %v1885_v24 = vsel %vm1873_vm14, %v1867_v6, %v1884_v13  ;;  %v10400_v34 = vmul.u32.u64.low %v1887_v53, %v1882_v27  ;;  %v10401_v39 = vmul.u32.u64.high %v1887_v53, %v1882_v27, %v10400_v34  ;;  %v7665_v11 = vadd.s32 4294967169, %v5171_v26 }
 0x2d8   :  { %v1886_v0 = vsel %vm1872_vm10, %v1883_v9, %v1885_v24  ;;  %vm7656_vm13 = vcmp.lt.s32.totalorder %v7655_v31, 0  ;;  %v1878_v35 = vsel %vm1872_vm10, %v1875_v8, %v1877_v10  ;;  %v1621_v41 = vand.u32 3, %v1620_v51 }
 0x2d9   :  { %v10405_v32 = vmul.u32.u64.low %v1887_v53, %v1886_v0  ;;  %v10406_v63 = vmul.u32.u64.high %v1887_v53, %v1886_v0, %v10405_v32  ;;  %vm4857_vm15 = vcmp.lt.s32.totalorder %v10179_v7, 0  ;;  %v4926_v33 = vsel %vm7656_vm13, 0, %v7655_v31 }
 0x2da   :  { %v5177_v38 = vadd.s32 1, %v7665_v11  ;;  %v4911_v57 = vadd.s32 %v10321_v20, %v10327_v59  ;;  %v4927_v37 = vsub.s32 32, %v4926_v33  ;;  %v4931_v42 = vsub.s32 4294967266, %v4926_v33 }
 0x2db   :  { %v5167_v45 = vand.u32 2147483647, %v10337_v40  ;;  %v4942_v43 = vsel %vm4857_vm15, %v4941_v4, %v10370_v5  ;;  %v1894_v3 = vmul.u32 %v1887_v53, %v1878_v35  ;;  %v1897_v47 = vadd.s32 1, %v10401_v39  ;;  %v426_v53 = vpop.f32.mrf.mxu0 }
 0x2dc   :  { %vm5178_vm1 = vcmp.gt.s32.totalorder %v5177_v38, 0  ;;  %v4928_v36 = vshll.u32 %v10382_v55, %v4926_v33  ;;  %v4929_v22 = vshrl.u32 %v4911_v57, %v4927_v37  ;;  %v4932_v14 = vadd.s32 127, %v4931_v42 }
 0x2dd   :  { %vm1896_vm2 = vc.u32 %v10406_v63, %v10400_v34  ;;  %vm10421_vm3 = vcmp.le.f32.partialorder %v4855_v56, 0.7853982  ;;  %v5179_v5 = vsel %vm5178_vm1, %v5177_v38, 0  ;;  %vm1619_vm4 = vweird.f32 %v10026_v28 }
 0x2de   :  { %v1898_v59 = vsel %vm1896_vm2, %v1897_v47, %v10401_v39  ;;  %v4930_v29 = vor.u32 %v4929_v22, %v4928_v36  ;;  %v4933_v2 = vshll.u32 %v4932_v14, 23  ;;  %v4944_v23 = vsel %vm10421_vm3, 0, %v4942_v43 }
 0x2df   :  { %v1899_v55 = vadd.s32 %v1898_v59, %v1894_v3  ;;  %v5174_v6 = vand.u32 8388607, %v5167_v45  ;;  %v5181_v1 = vand.u32 31, %v5179_v5  ;;  %vm1622_vm5 = vcmp.lt.s32.totalorder %v1621_v41, 2 }
 0x2e0   :  { %vm1623_vm6 = vcmp.eq.s32.totalorder %v1621_v41, 0  ;;  %v4934_v56 = vor.u32 4788187, %v4933_v2  ;;  %vm1626_vm7 = vcmp.eq.s32.totalorder %v1621_v41, 2  ;;  %v10431_v60 = vadd.s32 3, %v4944_v23 }
 0x2e1   :  { %v8284_v51 = vpop.eup %8283  ;;  %v1900_v46 = vadd.s32 536870912, %v1899_v55  ;;  %v5182_v25 = vsub.s32 32, %v5181_v1  ;;  %v4937_v21 = vcvt.s32.f32 %v4930_v29  ;;  %v5175_v62 = vor.u32 8388608, %v5174_v6 }
 0x2e2   :  { %v8286_v26 = vpop.eup %8285  ;;  %v1627_v58 = vxor.u32 2147483648, %v8284_v51  ;;  %v4935_v19 = vand.u32 2147483647, %v4934_v56  ;;  %v10437_v8 = vadd.f32 %v10023_v16, %v426_v53  ;;  %v5184_v27 = vshll.u32 %v8477_v44, %v5181_v1 }
 0x2e3   :  { %v1624_v49 = vxor.u32 2147483648, %v8286_v26  ;;  %v10433_v18 = vshrl.u32 %v1900_v46, 30  ;;  %v5185_v9 = vshrl.u32 %v8478_v48, %v5182_v25  ;;  %v5188_v31 = vshrl.u32 %v8479_v50, %v5182_v25 }
 0x2e4   :  { %v1628_v15 = vsel %vm1626_vm7, %v1627_v58, %v8286_v26  ;;  %v4938_v30 = vmul.f32 %v4937_v21, %v4935_v19  ;;  %v5187_v24 = vshll.u32 %v8478_v48, %v5181_v1  ;;  %v5191_v0 = vshrl.u32 %v8480_v52, %v5182_v25 }
 0x2e5   :  { %v1625_v10 = vsel %vm1623_vm6, %v8284_v51, %v1624_v49  ;;  %v1902_v13 = vshll.u32 %v10433_v18, 30  ;;  %v5190_v35 = vshll.u32 %v8479_v50, %v5181_v1  ;;  %v5180_v32 = vshrl.u32 %v5179_v5, 5 }
 0x2e6   :  { %v1629_v4 = vsel %vm1622_vm5, %v1625_v10, %v1628_v15  ;;  %v4939_v16 = vxor.u32 2147483648, %v4938_v30  ;;  %v5186_v41 = vor.u32 %v5185_v9, %v5184_v27  ;;  %v5193_v33 = vshll.u32 %v8480_v52, %v5181_v1  ;;  %v586_v27 = vpop.f32.mrf.mxu1 }
 0x2e7   :  { %v1630_v39 = vsel %vm1619_vm4, nan, %v1629_v4  ;;  %v10448_v11 = vsub.s32 %v1899_v55, %v1902_v13  ;;  %v5194_v38 = vshrl.u32 %v8481_v54, %v5182_v25  ;;  %v5189_v37 = vor.u32 %v5188_v31, %v5187_v24 }
 0x2e8   :  { %7360 = vst.msk [vmem:[%s13788_s3 + $0x40] sm:$0xff] %vm7351_vm0, %v1630_v39  ;;  %v4940_v28 = vsel %vm4857_vm15, %v4939_v16, %v4938_v30  ;;  %v5192_v42 = vor.u32 %v5191_v0, %v5190_v35  ;;  %v5196_v47 = vshll.u32 %v8481_v54, %v5181_v1  ;;  %v5197_v36 = vshrl.u32 %v8482_v61, %v5182_v25 }
 0x2e9   :  { %v1905_v57 = vsub.s32 0, %v10448_v11  ;;  %v4943_v43 = vsel %vm10421_vm3, %v10179_v7, %v4940_v28  ;;  %v5195_v3 = vor.u32 %v5194_v38, %v5193_v33  ;;  %v5215_v14 = vshll.u32 %v5175_v62, 8 }
 0x2ea   :  { %8287 = vcosq.f32 %v4943_v43  ;;  %v1738_v59 = vand.u32 2139095040, %v10437_v8  ;;  %v5183_v5 = vshrl.u32 %v8477_v44, %v5182_v25  ;;  %v5198_v29 = vor.u32 %v5197_v36, %v5196_v47 }
 0x2eb   :  { %v7538_v22 = vmin.u32 %v1905_v57, %v10448_v11  ;;  %8289 = vsinq.f32 %v4943_v43  ;;  %vm5199_vm9 = vcmp.lt.s32.totalorder %v5180_v32, 1  ;;  %vm5200_vm8 = vcmp.lt.s32.totalorder %v5180_v32, 2 }
 0x2ec   :  { %vm5201_vm11 = vcmp.lt.s32.totalorder %v5180_v32, 3  ;;  %vm5202_vm12 = vcmp.lt.s32.totalorder %v5180_v32, 4  ;;  %v5207_v23 = vsel %vm5199_vm9, %v5186_v41, %v5189_v37  ;;  %v5211_v6 = vsel %vm5199_vm9, %v5189_v37, %v5192_v42 }
 0x2ed   :  { %v1907_v2 = vclz %v7538_v22  ;;  %v5204_v20 = vsel %vm5202_vm12, %v5192_v42, 2102212464  ;;  %v5208_v55 = vsel %vm5202_vm12, %v5195_v3, 920167782  ;;  %v5203_v51 = vsel %vm5199_vm9, %v5183_v5, %v5186_v41 }
 0x2ee   :  { %v5209_v56 = vsel %vm5201_vm11, %v5192_v42, %v5208_v55  ;;  %v5212_v46 = vsel %vm5202_vm12, %v5198_v29, 1326507024  ;;  %v5205_v53 = vsel %vm5201_vm11, %v5189_v37, %v5204_v20  ;;  %v1739_v49 = vshrl.u32 %v1738_v59, 23 }
 0x2ef   :  { %v7539_v1 = vadd.s32 4294967294, %v1907_v2  ;;  %v5210_v26 = vsel %vm5200_vm8, %v5207_v23, %v5209_v56  ;;  %v5213_v58 = vsel %vm5201_vm11, %v5195_v3, %v5212_v46  ;;  %v1895_v15 = vadd.s32 %v10400_v34, %v10406_v63 }
 0x2f0   :  { %v5214_v25 = vsel %vm5200_vm8, %v5211_v6, %v5213_v58  ;;  %v10470_v19 = vmul.u32.u64.low %v5215_v14, %v5210_v26  ;;  %v10471_v21 = vmul.u32.u64.high %v5215_v14, %v5210_v26, %v10470_v19  ;;  %v5206_v31 = vsel %vm5200_vm8, %v5203_v51, %v5205_v53 }
 0x2f1   :  { %vm7540_vm10 = vcmp.lt.s32.totalorder %v7539_v1, 0  ;;  %v10476_v9 = vmul.u32.u64.low %v5215_v14, %v5214_v25  ;;  %v10477_v10 = vmul.u32.u64.high %v5215_v14, %v5214_v25, %v10476_v9  ;;  %v7533_v4 = vadd.s32 4294967169, %v1739_v49 }
 0x2f2   :  { %v1910_v62 = vsel %vm7540_vm10, 0, %v7539_v1  ;;  %v4949_v24 = vand.u32 3, %v10431_v60  ;;  %v1925_v39 = vsub.s32 4, %v10433_v18  ;;  %v1735_v16 = vand.u32 2147483647, %v10437_v8 }
 0x2f3   :  { %v1911_v30 = vsub.s32 32, %v1910_v62  ;;  %v1915_v13 = vsub.s32 4294967266, %v1910_v62  ;;  %v1912_v0 = vshll.u32 %v10448_v11, %v1910_v62  ;;  %vm4947_vm14 = vweird.f32 %v10179_v7  ;;  %v10492_v60 = vld [vmem:[%s13787_s2] ss:$0 sm:$0xff] }
 0x2f4   :  { %v5225_v35 = vadd.s32 1, %v10471_v21  ;;  %v1745_v41 = vadd.s32 1, %v7533_v4  ;;  %vm1841_vm13 = vcmp.lt.s32.totalorder %v10262_v17, 0  ;;  %v5222_v32 = vmul.u32 %v5215_v14, %v5206_v31 }
 0x2f5   :  { %v1913_v34 = vshrl.u32 %v1895_v15, %v1911_v30  ;;  %v1916_v63 = vadd.s32 127, %v1915_v13  ;;  %vm5224_vm15 = vc.u32 %v10477_v10, %v10470_v19  ;;  %v10495_v11 = vadd.f32 %v10492_v60, %v586_v27 }
 0x2f6   :  { %v5226_v28 = vsel %vm5224_vm15, %v5225_v35, %v10471_v21  ;;  %vm1746_vm1 = vcmp.gt.s32.totalorder %v1745_v41, 0  ;;  %vm4954_vm2 = vcmp.eq.s32.totalorder %v4949_v24, 2  ;;  %vm10500_vm3 = vcmp.le.f32.partialorder %v1839_v12, 0.7853982 }
 0x2f7   :  { %v1914_v33 = vor.u32 %v1913_v34, %v1912_v0  ;;  %v1917_v38 = vshll.u32 %v1916_v63, 23  ;;  %v8288_v57 = vpop.eup %8287  ;;  %v5227_v42 = vadd.s32 %v5226_v28, %v5222_v32  ;;  %v1747_v43 = vsel %vm1746_vm1, %v1745_v41, 0 }
 0x2f8   :  { %v8290_v3 = vpop.eup %8289  ;;  %v4955_v47 = vxor.u32 2147483648, %v8288_v57  ;;  %v10507_v22 = vsel %vm1841_vm13, %v1925_v39, %v10433_v18  ;;  %v1742_v14 = vand.u32 8388607, %v1735_v16  ;;  %v1749_v29 = vand.u32 31, %v1747_v43 }
 0x2f9   :  { %v1918_v36 = vor.u32 4788187, %v1917_v38  ;;  %v4952_v59 = vxor.u32 2147483648, %v8290_v3  ;;  %v5228_v5 = vadd.s32 536870912, %v5227_v42  ;;  %v5066_v12 = vand.u32 2139095040, %v10495_v11 }
 0x2fa   :  { %vm4951_vm4 = vcmp.eq.s32.totalorder %v4949_v24, 0  ;;  %v4956_v2 = vsel %vm4954_vm2, %v4955_v47, %v8290_v3  ;;  %v1921_v23 = vcvt.s32.f32 %v1914_v33  ;;  %vm4950_vm5 = vcmp.lt.s32.totalorder %v4949_v24, 2 }
 0x2fb   :  { %v1919_v20 = vand.u32 2147483647, %v1918_v36  ;;  %v4953_v55 = vsel %vm4951_vm4, %v8288_v57, %v4952_v59  ;;  %v10512_v6 = vshrl.u32 %v5228_v5, 30  ;;  %v1750_v1 = vsub.s32 32, %v1749_v29 }
 0x2fc   :  { %v4957_v51 = vsel %vm4950_vm5, %v4953_v55, %v4956_v2  ;;  %v1928_v56 = vsel %vm10500_vm3, 0, %v10507_v22  ;;  %v1743_v46 = vor.u32 8388608, %v1742_v14  ;;  %v1752_v58 = vshll.u32 %v8477_v44, %v1749_v29 }
 0x2fd   :  { %v1922_v18 = vmul.f32 %v1921_v23, %v1919_v20  ;;  %v4958_v53 = vsel %vm4947_vm14, nan, %v4957_v51  ;;  %v5230_v26 = vshll.u32 %v10512_v6, 30  ;;  %v5067_v49 = vshrl.u32 %v5066_v12, 23 }
 0x2fe   :  { %7392 = vst.msk [vmem:[%s13788_s3 + $0x140] sm:$0xff] %vm7351_vm0, %v4958_v53  ;;  %v1753_v21 = vshrl.u32 %v8478_v48, %v1750_v1  ;;  %v1756_v15 = vshrl.u32 %v8479_v50, %v1750_v1  ;;  %v1759_v62 = vshrl.u32 %v8480_v52, %v1750_v1  ;;  %v1755_v7 = vshll.u32 %v8478_v48, %v1749_v29 }
 0x2ff   :  { %v1923_v25 = vxor.u32 2147483648, %v1922_v18  ;;  %v10528_v9 = vsub.s32 %v5227_v42, %v5230_v26  ;;  %v1758_v30 = vshll.u32 %v8479_v50, %v1749_v29  ;;  %v1762_v13 = vshrl.u32 %v8481_v54, %v1750_v1 }
 0x300   :  { %v1748_v4 = vshrl.u32 %v1747_v43, 5  ;;  %v1754_v27 = vor.u32 %v1753_v21, %v1752_v58  ;;  %v1761_v24 = vshll.u32 %v8480_v52, %v1749_v29  ;;  %v1757_v34 = vor.u32 %v1756_v15, %v1755_v7 }
 0x301   :  { %v1924_v31 = vsel %vm1841_vm13, %v1923_v25, %v1922_v18  ;;  %v5233_v39 = vsub.s32 0, %v10528_v9  ;;  %v1760_v63 = vor.u32 %v1759_v62, %v1758_v30  ;;  %vm5169_vm6 = vcmp.lt.s32.totalorder %v10337_v40, 0 }
 0x302   :  { %v1927_v0 = vsel %vm10500_vm3, %v10262_v17, %v1924_v31  ;;  %v1763_v35 = vor.u32 %v1762_v13, %v1761_v24  ;;  %v1764_v41 = vshll.u32 %v8481_v54, %v1749_v29  ;;  %v1765_v32 = vshrl.u32 %v8482_v61, %v1750_v1 }
 0x303   :  { %8291 = vcosq.f32 %v1927_v0  ;;  %v7666_v33 = vmin.u32 %v5233_v39, %v10528_v9  ;;  %v1783_v38 = vshll.u32 %v1743_v46, 8  ;;  %v7661_v28 = vadd.s32 4294967169, %v5067_v49 }
 0x304   :  { %8293 = vsinq.f32 %v1927_v0  ;;  %v1751_v57 = vshrl.u32 %v8477_v44, %v1750_v1  ;;  %v1766_v37 = vor.u32 %v1765_v32, %v1764_v41  ;;  %vm1767_vm7 = vcmp.lt.s32.totalorder %v1748_v4, 1  ;;  %v7857_v32 = vpop.f32.mrf.mxu0 }
 0x305   :  { %vm1768_vm9 = vcmp.lt.s32.totalorder %v1748_v4, 2  ;;  %v5235_v42 = vclz %v7666_v33  ;;  %vm1769_vm8 = vcmp.lt.s32.totalorder %v1748_v4, 3  ;;  %vm1770_vm11 = vcmp.lt.s32.totalorder %v1748_v4, 4 }
 0x306   :  { %v1775_v43 = vsel %vm1767_vm7, %v1754_v27, %v1757_v34  ;;  %v1772_v3 = vsel %vm1770_vm11, %v1760_v63, 2102212464  ;;  %v1776_v47 = vsel %vm1770_vm11, %v1763_v35, 920167782  ;;  %v1779_v36 = vsel %vm1767_vm7, %v1757_v34, %v1760_v63 }
 0x307   :  { %v1780_v22 = vsel %vm1770_vm11, %v1766_v37, 1326507024  ;;  %v7667_v14 = vadd.s32 4294967294, %v5235_v42  ;;  %v5253_v59 = vsub.s32 4, %v10512_v6  ;;  %v1777_v5 = vsel %vm1769_vm8, %v1760_v63, %v1776_v47 }
 0x308   :  { %v1781_v29 = vsel %vm1769_vm8, %v1763_v35, %v1780_v22  ;;  %v1932_v12 = vadd.s32 3, %v1928_v56  ;;  %v1771_v2 = vsel %vm1767_vm7, %v1751_v57, %v1754_v27  ;;  %v1778_v20 = vsel %vm1768_vm9, %v1775_v43, %v1777_v5 }
 0x309   :  { %v1782_v23 = vsel %vm1768_vm9, %v1779_v36, %v1781_v29  ;;  %vm7668_vm12 = vcmp.lt.s32.totalorder %v7667_v14, 0  ;;  %v1773_v55 = vsel %vm1769_vm8, %v1757_v34, %v1772_v3  ;;  %v5073_v26 = vadd.s32 1, %v7661_v28 }
 0x30a   :  { %v10551_v1 = vmul.u32.u64.low %v1783_v38, %v1782_v23  ;;  %v10552_v51 = vmul.u32.u64.high %v1783_v38, %v1782_v23, %v10551_v1  ;;  %v5238_v18 = vsel %vm7668_vm12, 0, %v7667_v14  ;;  %v5223_v56 = vadd.s32 %v10470_v19, %v10477_v10 }
 0x30b   :  { %v10554_v46 = vmul.u32.u64.low %v1783_v38, %v1778_v20  ;;  %v10555_v53 = vmul.u32.u64.high %v1783_v38, %v1778_v20, %v10554_v46  ;;  %v5239_v58 = vsub.s32 32, %v5238_v18  ;;  %v5243_v49 = vsub.s32 4294967266, %v5238_v18 }
 0x30c   :  { %v5254_v25 = vsel %vm5169_vm6, %v5253_v59, %v10512_v6  ;;  %vm1931_vm10 = vweird.f32 %v10262_v17  ;;  %v1933_v21 = vand.u32 3, %v1932_v12  ;;  %vm10566_vm14 = vcmp.le.f32.partialorder %v5167_v45, 0.7853982 }
 0x30d   :  { %v1774_v62 = vsel %vm1768_vm9, %v1771_v2, %v1773_v55  ;;  %vm5074_vm13 = vcmp.gt.s32.totalorder %v5073_v26, 0  ;;  %v5240_v19 = vshll.u32 %v10528_v9, %v5238_v18  ;;  %v5241_v10 = vshrl.u32 %v5223_v56, %v5239_v58 }
 0x30e   :  { %v5244_v7 = vadd.s32 127, %v5243_v49  ;;  %vm1792_vm15 = vc.u32 %v10552_v51, %v10554_v46  ;;  %v5256_v6 = vsel %vm10566_vm14, 0, %v5254_v25  ;;  %v1793_v30 = vadd.s32 1, %v10555_v53 }
 0x30f   :  { %v5063_v45 = vand.u32 2147483647, %v10495_v11  ;;  %v5075_v13 = vsel %vm5074_vm13, %v5073_v26, 0  ;;  %v5242_v27 = vor.u32 %v5241_v10, %v5240_v19  ;;  %v1790_v24 = vmul.u32 %v1783_v38, %v1774_v62 }
 0x310   :  { %v8292_v31 = vpop.eup %8291  ;;  %v5245_v4 = vshll.u32 %v5244_v7, 23  ;;  %v5077_v0 = vand.u32 31, %v5075_v13  ;;  %vm1934_vm1 = vcmp.lt.s32.totalorder %v1933_v21, 2  ;;  %vm1935_vm2 = vcmp.eq.s32.totalorder %v1933_v21, 0 }
 0x311   :  { %v8294_v39 = vpop.eup %8293  ;;  %v1939_v9 = vxor.u32 2147483648, %v8292_v31  ;;  %v1794_v34 = vsel %vm1792_vm15, %v1793_v30, %v10555_v53  ;;  %vm1938_vm3 = vcmp.eq.s32.totalorder %v1933_v21, 2  ;;  %v5260_v28 = vadd.s32 3, %v5256_v6 }
 0x312   :  { %v1936_v63 = vxor.u32 2147483648, %v8294_v39  ;;  %v5246_v35 = vor.u32 4788187, %v5245_v4  ;;  %v1795_v41 = vadd.s32 %v1794_v34, %v1790_v24  ;;  %v5070_v57 = vand.u32 8388607, %v5063_v45 }
 0x313   :  { %v1940_v33 = vsel %vm1938_vm3, %v1939_v9, %v8294_v39  ;;  %v5078_v37 = vsub.s32 32, %v5077_v0  ;;  %v5249_v43 = vcvt.s32.f32 %v5242_v27  ;;  %v10585_v14 = vadd.f32 %v10492_v60, %v7857_v32 }
 0x314   :  { %v1937_v42 = vsel %vm1935_vm2, %v8292_v31, %v1936_v63  ;;  %v5247_v38 = vand.u32 2147483647, %v5246_v35  ;;  %v1796_v3 = vadd.s32 536870912, %v1795_v41  ;;  %v5076_v2 = vshrl.u32 %v5075_v13, 5 }
 0x315   :  { %v1941_v47 = vsel %vm1934_vm1, %v1937_v42, %v1940_v33  ;;  %v5081_v36 = vshrl.u32 %v8478_v48, %v5078_v37  ;;  %v5084_v22 = vshrl.u32 %v8479_v50, %v5078_v37  ;;  %v5087_v12 = vshrl.u32 %v8480_v52, %v5078_v37  ;;  %v7905_v42 = vpop.f32.mrf.mxu1 }
 0x316   :  { %v1942_v59 = vsel %vm1931_vm10, nan, %v1941_v47  ;;  %v5250_v5 = vmul.f32 %v5249_v43, %v5247_v38  ;;  %v10589_v29 = vshrl.u32 %v1796_v3, 30  ;;  %v5080_v20 = vshll.u32 %v8477_v44, %v5077_v0 }
 0x317   :  { %7363 = vst.msk [vmem:[%s13788_s3 + $0x58] sm:$0xff] %vm7351_vm0, %v1942_v59  ;;  %v5083_v23 = vshll.u32 %v8478_v48, %v5077_v0  ;;  %v5090_v55 = vshrl.u32 %v8481_v54, %v5078_v37  ;;  %v5086_v18 = vshll.u32 %v8479_v50, %v5077_v0  ;;  %v5089_v53 = vshll.u32 %v8480_v52, %v5077_v0 }
 0x318   :  { %v5251_v1 = vxor.u32 2147483648, %v5250_v5  ;;  %v1798_v17 = vshll.u32 %v10589_v29, 30  ;;  %v5082_v26 = vor.u32 %v5081_v36, %v5080_v20  ;;  %v5092_v58 = vshll.u32 %v8481_v54, %v5077_v0 }
 0x319   :  { %v5085_v56 = vor.u32 %v5084_v22, %v5083_v23  ;;  %v5093_v49 = vshrl.u32 %v8482_v61, %v5078_v37  ;;  %v5088_v62 = vor.u32 %v5087_v12, %v5086_v18  ;;  %v5091_v19 = vor.u32 %v5090_v55, %v5089_v53 }
 0x31a   :  { %v5252_v25 = vsel %vm5169_vm6, %v5251_v1, %v5250_v5  ;;  %v10606_v21 = vsub.s32 %v1795_v41, %v1798_v17  ;;  %v10611_v7 = vand.u32 3, %v5260_v28  ;;  %v5071_v6 = vor.u32 8388608, %v5070_v57 }
 0x31b   :  { %v5255_v10 = vsel %vm10566_vm14, %v10337_v40, %v5252_v25  ;;  %v5094_v30 = vor.u32 %v5093_v49, %v5092_v58  ;;  %v5079_v31 = vshrl.u32 %v8477_v44, %v5078_v37  ;;  %v2050_v27 = vand.u32 2139095040, %v10585_v14 }
 0x31c   :  { %8295 = vcosq.f32 %v5255_v10  ;;  %v1801_v13 = vsub.s32 0, %v10606_v21  ;;  %vm5095_vm4 = vcmp.lt.s32.totalorder %v5076_v2, 1  ;;  %vm5097_vm5 = vcmp.lt.s32.totalorder %v5076_v2, 3 }
 0x31d   :  { %8297 = vsinq.f32 %v5255_v10  ;;  %vm5098_vm6 = vcmp.lt.s32.totalorder %v5076_v2, 4  ;;  %v5103_v15 = vsel %vm5095_vm4, %v5082_v26, %v5085_v56  ;;  %v5107_v9 = vsel %vm5095_vm4, %v5085_v56, %v5088_v62 }
 0x31e   :  { %v7534_v4 = vmin.u32 %v1801_v13, %v10606_v21  ;;  %v5100_v24 = vsel %vm5098_vm6, %v5088_v62, 2102212464  ;;  %v5104_v0 = vsel %vm5098_vm6, %v5091_v19, 920167782  ;;  %v5108_v34 = vsel %vm5098_vm6, %v5094_v30, 1326507024 }
 0x31f   :  { %v5105_v39 = vsel %vm5097_vm5, %v5088_v62, %v5104_v0  ;;  %v5111_v63 = vshll.u32 %v5071_v6, 8  ;;  %v1821_v41 = vsub.s32 4, %v10589_v29  ;;  %vm5096_vm7 = vcmp.lt.s32.totalorder %v5076_v2, 2 }
 0x320   :  { %v1803_v35 = vclz %v7534_v4  ;;  %v5099_v32 = vsel %vm5095_vm4, %v5079_v31, %v5082_v26  ;;  %v5101_v33 = vsel %vm5097_vm5, %v5085_v56, %v5100_v24  ;;  %v5106_v28 = vsel %vm5096_vm7, %v5103_v15, %v5105_v39 }
 0x321   :  { %v5109_v57 = vsel %vm5097_vm5, %v5091_v19, %v5108_v34  ;;  %v2051_v37 = vshrl.u32 %v2050_v27, 23  ;;  %v10621_v3 = vmul.u32.u64.low %v5111_v63, %v5106_v28  ;;  %v10622_v47 = vmul.u32.u64.high %v5111_v63, %v5106_v28, %v10621_v3 }
 0x322   :  { %v7535_v38 = vadd.s32 4294967294, %v1803_v35  ;;  %v5110_v43 = vsel %vm5096_vm7, %v5107_v9, %v5109_v57  ;;  %vm1737_vm9 = vcmp.lt.s32.totalorder %v10437_v8, 0  ;;  %vm10630_vm8 = vcmp.le.f32.partialorder %v1735_v16, 0.7853982 }
 0x323   :  { %v10625_v36 = vmul.u32.u64.low %v5111_v63, %v5110_v43  ;;  %v10626_v22 = vmul.u32.u64.high %v5111_v63, %v5110_v43, %v10625_v36  ;;  %v7545_v59 = vadd.s32 4294967169, %v2051_v37  ;;  %v5102_v12 = vsel %vm5096_vm7, %v5099_v32, %v5101_v33 }
 0x324   :  { %vm7536_vm11 = vcmp.lt.s32.totalorder %v7535_v38, 0  ;;  %v10635_v2 = vadd.f32 %v10492_v60, %v7905_v42  ;;  %vm5262_vm12 = vcmp.lt.s32.totalorder %v10611_v7, 2  ;;  %v1791_v20 = vadd.s32 %v10554_v46, %v10552_v51 }
 0x325   :  { %v1806_v23 = vsel %vm7536_vm11, 0, %v7535_v38  ;;  %v2047_v55 = vand.u32 2147483647, %v10585_v14  ;;  %v2057_v1 = vadd.s32 1, %v7545_v59  ;;  %vm5259_vm10 = vweird.f32 %v10337_v40 }
 0x326   :  { %v1807_v16 = vsub.s32 32, %v1806_v23  ;;  %v1811_v17 = vsub.s32 4294967266, %v1806_v23  ;;  %v1822_v18 = vsel %vm1737_vm9, %v1821_v41, %v10589_v29  ;;  %v5121_v53 = vadd.s32 1, %v10622_v47 }
 0x327   :  { %v1808_v26 = vshll.u32 %v10606_v21, %v1806_v23  ;;  %v5118_v56 = vmul.u32 %v5111_v63, %v5102_v12  ;;  %vm5120_vm14 = vc.u32 %v10626_v22, %v10621_v3  ;;  %vm2058_vm13 = vcmp.gt.s32.totalorder %v2057_v1, 0 }
 0x328   :  { %v1809_v51 = vshrl.u32 %v1791_v20, %v1807_v16  ;;  %v1812_v46 = vadd.s32 127, %v1811_v17  ;;  %v5122_v58 = vsel %vm5120_vm14, %v5121_v53, %v10622_v47  ;;  %v2059_v49 = vsel %vm2058_vm13, %v2057_v1, 0 }
 0x329   :  { %v8296_v25 = vpop.eup %8295  ;;  %v1824_v62 = vsel %vm10630_vm8, 0, %v1822_v18  ;;  %v5123_v19 = vadd.s32 %v5122_v58, %v5118_v56  ;;  %v2054_v29 = vand.u32 8388607, %v2047_v55  ;;  %v2061_v10 = vand.u32 31, %v2059_v49 }
 0x32a   :  { %v8298_v6 = vpop.eup %8297  ;;  %vm5263_vm15 = vcmp.eq.s32.totalorder %v10611_v7, 0  ;;  %v5267_v21 = vxor.u32 2147483648, %v8296_v25  ;;  %v1810_v30 = vor.u32 %v1809_v51, %v1808_v26  ;;  %v1813_v13 = vshll.u32 %v1812_v46, 23 }
 0x32b   :  { %v5264_v31 = vxor.u32 2147483648, %v8298_v6  ;;  %vm5266_vm1 = vcmp.eq.s32.totalorder %v10611_v7, 2  ;;  %v5124_v27 = vadd.s32 536870912, %v5123_v19  ;;  %v2062_v4 = vsub.s32 32, %v2061_v10 }
 0x32c   :  { %v5268_v24 = vsel %vm5266_vm1, %v5267_v21, %v8298_v6  ;;  %v1814_v15 = vor.u32 4788187, %v1813_v13  ;;  %v10655_v0 = vadd.s32 3, %v1824_v62  ;;  %v5375_v39 = vand.u32 2147483647, %v10635_v2 }
 0x32d   :  { %v5265_v9 = vsel %vm5263_vm15, %v8296_v25, %v5264_v31  ;;  %v5125_v34 = vshrl.u32 %v5124_v27, 30  ;;  %v2055_v63 = vor.u32 8388608, %v2054_v29  ;;  %v5378_v35 = vand.u32 2139095040, %v10635_v2 }
 0x32e   :  { %v5269_v41 = vsel %vm5262_vm12, %v5265_v9, %v5268_v24  ;;  %v1815_v32 = vand.u32 2147483647, %v1814_v15  ;;  %v1817_v33 = vcvt.s32.f32 %v1810_v30  ;;  %v2065_v28 = vshrl.u32 %v8478_v48, %v2062_v4 }
 0x32f   :  { %v5270_v57 = vsel %vm5259_vm10, nan, %v5269_v41  ;;  %v10665_v37 = vadd.s32 %v10621_v3, %v10626_v22  ;;  %v5126_v42 = vshll.u32 %v5125_v34, 30  ;;  %v2068_v38 = vshrl.u32 %v8479_v50, %v2062_v4 }
 0x330   :  { %7395 = vst.msk [vmem:[%s13788_s3 + $0x158] sm:$0xff] %vm7351_vm0, %v5270_v57  ;;  %v1818_v7 = vmul.f32 %v1817_v33, %v1815_v32  ;;  %v2060_v43 = vshrl.u32 %v2059_v49, 5  ;;  %v2064_v47 = vshll.u32 %v8477_v44, %v2061_v10  ;;  %v2071_v36 = vshrl.u32 %v8480_v52, %v2062_v4 }
 0x331   :  { %v10674_v59 = vsub.s32 %v5123_v19, %v5126_v42  ;;  %v2067_v40 = vshll.u32 %v8478_v48, %v2061_v10  ;;  %v2070_v3 = vshll.u32 %v8479_v50, %v2061_v10  ;;  %v2074_v22 = vshrl.u32 %v8481_v54, %v2062_v4 }
 0x332   :  { %v1819_v12 = vxor.u32 2147483648, %v1818_v7  ;;  %v2066_v20 = vor.u32 %v2065_v28, %v2064_v47  ;;  %v2073_v23 = vshll.u32 %v8480_v52, %v2061_v10  ;;  %v2077_v1 = vshrl.u32 %v8482_v61, %v2062_v4 }
 0x333   :  { %vm5065_vm2 = vcmp.lt.s32.totalorder %v10495_v11, 0  ;;  %v5129_v16 = vsub.s32 0, %v10674_v59  ;;  %v2069_v17 = vor.u32 %v2068_v38, %v2067_v40  ;;  %v2072_v18 = vor.u32 %v2071_v36, %v2070_v3 }
 0x334   :  { %v2076_v53 = vshll.u32 %v8481_v54, %v2061_v10  ;;  %v1820_v26 = vsel %vm1737_vm9, %v1819_v12, %v1818_v7  ;;  %v2075_v56 = vor.u32 %v2074_v22, %v2073_v23  ;;  %v2095_v51 = vshll.u32 %v2055_v63, 8 }
 0x335   :  { %v5379_v46 = vshrl.u32 %v5378_v35, 23  ;;  %v1823_v58 = vsel %vm10630_vm8, %v10437_v8, %v1820_v26  ;;  %v7662_v49 = vmin.u32 %v5129_v16, %v10674_v59  ;;  %v2063_v25 = vshrl.u32 %v8477_v44, %v2062_v4 }
 0x336   :  { %v2078_v62 = vor.u32 %v2077_v1, %v2076_v53  ;;  %8299 = vcosq.f32 %v1823_v58  ;;  %v5149_v19 = vsub.s32 4, %v5125_v34  ;;  %vm2079_vm3 = vcmp.lt.s32.totalorder %v2060_v43, 1 }
 0x337   :  { %vm2082_vm4 = vcmp.lt.s32.totalorder %v2060_v43, 4  ;;  %8301 = vsinq.f32 %v1823_v58  ;;  %v5131_v29 = vclz %v7662_v49  ;;  %v2087_v6 = vsel %vm2079_vm3, %v2066_v20, %v2069_v17 }
 0x338   :  { %v2084_v10 = vsel %vm2082_vm4, %v2072_v18, 2102212464  ;;  %vm2080_vm5 = vcmp.lt.s32.totalorder %v2060_v43, 2  ;;  %vm2081_vm6 = vcmp.lt.s32.totalorder %v2060_v43, 3  ;;  %v2088_v21 = vsel %vm2082_vm4, %v2075_v56, 920167782 }
 0x339   :  { %v2091_v30 = vsel %vm2079_vm3, %v2069_v17, %v2072_v18  ;;  %v7663_v13 = vadd.s32 4294967294, %v5131_v29  ;;  %v2083_v5 = vsel %vm2079_vm3, %v2063_v25, %v2066_v20  ;;  %v2089_v31 = vsel %vm2081_vm6, %v2072_v18, %v2088_v21 }
 0x33a   :  { %v2092_v27 = vsel %vm2082_vm4, %v2078_v62, 1326507024  ;;  %v2085_v24 = vsel %vm2081_vm6, %v2069_v17, %v2084_v10  ;;  %v2090_v4 = vsel %vm2080_vm5, %v2087_v6, %v2089_v31  ;;  %v7673_v9 = vadd.s32 4294967169, %v5379_v46 }
 0x33b   :  { %v2093_v15 = vsel %vm2081_vm6, %v2075_v56, %v2092_v27  ;;  %vm7664_vm7 = vcmp.lt.s32.totalorder %v7663_v13, 0  ;;  %v10693_v35 = vmul.u32.u64.low %v2095_v51, %v2090_v4  ;;  %v10694_v41 = vmul.u32.u64.high %v2095_v51, %v2090_v4, %v10693_v35 }
 0x33c   :  { %v2094_v63 = vsel %vm2080_vm5, %v2091_v30, %v2093_v15  ;;  %v5134_v32 = vsel %vm7664_vm7, 0, %v7663_v13  ;;  %v5150_v33 = vsel %vm5065_vm2, %v5149_v19, %v5125_v34  ;;  %v2086_v7 = vsel %vm2080_vm5, %v2083_v5, %v2085_v24 }
 0x33d   :  { %v10699_v28 = vmul.u32.u64.low %v2095_v51, %v2094_v63  ;;  %v10700_v57 = vmul.u32.u64.high %v2095_v51, %v2094_v63, %v10699_v28  ;;  %v5135_v42 = vsub.s32 32, %v5134_v32  ;;  %v5139_v38 = vsub.s32 4294967266, %v5134_v32 }
 0x33e   :  { %v5385_v47 = vadd.s32 1, %v7673_v9  ;;  %v1829_v36 = vand.u32 3, %v10655_v0  ;;  %vm10706_vm9 = vcmp.le.f32.partialorder %v5063_v45, 0.7853982  ;;  %v5136_v3 = vshll.u32 %v10674_v59, %v5134_v32  ;;  %v436_v32 = vpop.f32.mrf.mxu0 }
 0x33f   :  { %v5137_v34 = vshrl.u32 %v10665_v37, %v5135_v42  ;;  %v5140_v22 = vadd.s32 127, %v5139_v38  ;;  %v2105_v12 = vadd.s32 1, %v10694_v41  ;;  %v5152_v43 = vsel %vm10706_vm9, 0, %v5150_v33 }
 0x340   :  { %vm5386_vm8 = vcmp.gt.s32.totalorder %v5385_v47, 0  ;;  %v2102_v20 = vmul.u32 %v2095_v51, %v2086_v7  ;;  %vm2104_vm11 = vc.u32 %v10700_v57, %v10693_v35  ;;  %v5382_v59 = vand.u32 8388607, %v5375_v39 }
 0x341   :  { %v5387_v0 = vsel %vm5386_vm8, %v5385_v47, 0  ;;  %v5138_v45 = vor.u32 %v5137_v34, %v5136_v3  ;;  %v5141_v23 = vshll.u32 %v5140_v22, 23  ;;  %v2106_v1 = vsel %vm2104_vm11, %v2105_v12, %v10694_v41 }
 0x342   :  { %vm1827_vm12 = vweird.f32 %v10437_v8  ;;  %v2107_v37 = vadd.s32 %v2106_v1, %v2102_v20  ;;  %v5389_v16 = vand.u32 31, %v5387_v0  ;;  %vm1830_vm10 = vcmp.lt.s32.totalorder %v1829_v36, 2 }
 0x343   :  { %v8300_v17 = vpop.eup %8299  ;;  %vm1831_vm14 = vcmp.eq.s32.totalorder %v1829_v36, 0  ;;  %vm1834_vm13 = vcmp.eq.s32.totalorder %v1829_v36, 2  ;;  %v5142_v18 = vor.u32 4788187, %v5141_v23  ;;  %v10721_v56 = vadd.s32 3, %v5152_v43 }
 0x344   :  { %v8302_v53 = vpop.eup %8301  ;;  %v1835_v26 = vxor.u32 2147483648, %v8300_v17  ;;  %v2108_v51 = vadd.s32 536870912, %v2107_v37  ;;  %v5390_v46 = vsub.s32 32, %v5389_v16  ;;  %v5145_v25 = vcvt.s32.f32 %v5138_v45 }
 0x345   :  { %v1832_v58 = vxor.u32 2147483648, %v8302_v53  ;;  %v5143_v49 = vand.u32 2147483647, %v5142_v18  ;;  %v5383_v62 = vor.u32 8388608, %v5382_v59  ;;  %v5392_v10 = vshll.u32 %v8477_v44, %v5389_v16 }
 0x346   :  { %v1836_v19 = vsel %vm1834_vm13, %v1835_v26, %v8302_v53  ;;  %v2109_v29 = vshrl.u32 %v2108_v51, 30  ;;  %v5393_v6 = vshrl.u32 %v8478_v48, %v5390_v46  ;;  %v5396_v13 = vshrl.u32 %v8479_v50, %v5390_v46 }
 0x347   :  { %v1833_v21 = vsel %vm1831_vm14, %v8300_v17, %v1832_v58  ;;  %v5146_v30 = vmul.f32 %v5145_v25, %v5143_v49  ;;  %v5399_v5 = vshrl.u32 %v8480_v52, %v5390_v46  ;;  %v5388_v24 = vshrl.u32 %v5387_v0, 5  ;;  %v596_v25 = vpop.f32.mrf.mxu1 }
 0x348   :  { %v1837_v31 = vsel %vm1830_vm10, %v1833_v21, %v1836_v19  ;;  %v2110_v27 = vshll.u32 %v2109_v29, 30  ;;  %v5395_v4 = vshll.u32 %v8478_v48, %v5389_v16  ;;  %vm2049_vm15 = vcmp.lt.s32.totalorder %v10585_v14, 0 }
 0x349   :  { %v1838_v15 = vsel %vm1827_vm12, nan, %v1837_v31  ;;  %v5147_v9 = vxor.u32 2147483648, %v5146_v30  ;;  %v5394_v63 = vor.u32 %v5393_v6, %v5392_v10  ;;  %v5398_v41 = vshll.u32 %v8479_v50, %v5389_v16 }
 0x34a   :  { %7362 = vst.msk [vmem:[%s13788_s3 + $0x50] sm:$0xff] %vm7351_vm0, %v1838_v15  ;;  %v10738_v33 = vsub.s32 %v2107_v37, %v2110_v27  ;;  %v5397_v28 = vor.u32 %v5396_v13, %v5395_v4  ;;  %v5401_v42 = vshll.u32 %v8480_v52, %v5389_v16  ;;  %v5402_v8 = vshrl.u32 %v8481_v54, %v5390_v46 }
 0x34b   :  { %v5148_v38 = vsel %vm5065_vm2, %v5147_v9, %v5146_v30  ;;  %v5400_v7 = vor.u32 %v5399_v5, %v5398_v41  ;;  %v5404_v47 = vshll.u32 %v8481_v54, %v5389_v16  ;;  %v5405_v36 = vshrl.u32 %v8482_v61, %v5390_v46 }
 0x34c   :  { %v5151_v3 = vsel %vm10706_vm9, %v10495_v11, %v5148_v38  ;;  %v2113_v34 = vsub.s32 0, %v10738_v33  ;;  %v5403_v22 = vor.u32 %v5402_v8, %v5401_v42  ;;  %v10751_v12 = vadd.f32 %v10492_v60, %v436_v32 }
 0x34d   :  { %8303 = vcosq.f32 %v5151_v3  ;;  %v5391_v43 = vshrl.u32 %v8477_v44, %v5390_v46  ;;  %v5406_v20 = vor.u32 %v5405_v36, %v5404_v47  ;;  %vm5407_vm1 = vcmp.lt.s32.totalorder %v5388_v24, 1 }
 0x34e   :  { %8305 = vsinq.f32 %v5151_v3  ;;  %v7546_v0 = vmin.u32 %v2113_v34, %v10738_v33  ;;  %v2133_v45 = vsub.s32 4, %v2109_v29  ;;  %vm5410_vm2 = vcmp.lt.s32.totalorder %v5388_v24, 4 }
 0x34f   :  { %v5412_v23 = vsel %vm5410_vm2, %v5400_v7, 2102212464  ;;  %v5415_v1 = vsel %vm5407_vm1, %v5394_v63, %v5397_v28  ;;  %v5416_v40 = vsel %vm5410_vm2, %v5403_v22, 920167782  ;;  %v5423_v59 = vshll.u32 %v5383_v62, 8 }
 0x350   :  { %v2115_v37 = vclz %v7546_v0  ;;  %vm5409_vm3 = vcmp.lt.s32.totalorder %v5388_v24, 3  ;;  %v5411_v16 = vsel %vm5407_vm1, %v5391_v43, %v5394_v63  ;;  %v5419_v17 = vsel %vm5407_vm1, %v5397_v28, %v5400_v7 }
 0x351   :  { %vm5408_vm4 = vcmp.lt.s32.totalorder %v5388_v24, 2  ;;  %v5413_v18 = vsel %vm5409_vm3, %v5397_v28, %v5412_v23  ;;  %v5417_v53 = vsel %vm5409_vm3, %v5400_v7, %v5416_v40  ;;  %v5420_v26 = vsel %vm5410_vm2, %v5406_v20, 1326507024 }
 0x352   :  { %v7547_v51 = vadd.s32 4294967294, %v2115_v37  ;;  %v2134_v46 = vsel %vm2049_vm15, %v2133_v45, %v2109_v29  ;;  %v5418_v58 = vsel %vm5408_vm4, %v5415_v1, %v5417_v53  ;;  %v5421_v49 = vsel %vm5409_vm3, %v5403_v22, %v5420_v26 }
 0x353   :  { %v5414_v19 = vsel %vm5408_vm4, %v5411_v16, %v5413_v18  ;;  %v5422_v10 = vsel %vm5408_vm4, %v5419_v17, %v5421_v49  ;;  %v10757_v6 = vmul.u32.u64.low %v5423_v59, %v5418_v58  ;;  %v10758_v21 = vmul.u32.u64.high %v5423_v59, %v5418_v58, %v10757_v6 }
 0x354   :  { %vm7548_vm5 = vcmp.lt.s32.totalorder %v7547_v51, 0  ;;  %v10761_v62 = vmul.u32.u64.low %v5423_v59, %v5422_v10  ;;  %v10762_v30 = vmul.u32.u64.high %v5423_v59, %v5422_v10, %v10761_v62  ;;  %v1946_v13 = vand.u32 2139095040, %v10751_v12 }
 0x355   :  { %v5157_v5 = vand.u32 3, %v10721_v56  ;;  %vm10768_vm6 = vcmp.le.f32.partialorder %v2047_v55, 0.7853982  ;;  %v2118_v31 = vsel %vm7548_vm5, 0, %v7547_v51  ;;  %v10773_v27 = vadd.f32 %v10492_v60, %v596_v25 }
 0x356   :  { %v2103_v24 = vadd.s32 %v10693_v35, %v10700_v57  ;;  %v2119_v4 = vsub.s32 32, %v2118_v31  ;;  %v2123_v15 = vsub.s32 4294967266, %v2118_v31  ;;  %v1947_v9 = vshrl.u32 %v1946_v13, 23 }
 0x357   :  { %v2136_v63 = vsel %vm10768_vm6, 0, %v2134_v46  ;;  %v5430_v56 = vmul.u32 %v5423_v59, %v5414_v19  ;;  %v5433_v41 = vadd.s32 1, %v10758_v21  ;;  %v1943_v55 = vand.u32 2147483647, %v10751_v12 }
 0x358   :  { %v2120_v32 = vshll.u32 %v10738_v33, %v2118_v31  ;;  %v2121_v28 = vshrl.u32 %v2103_v24, %v2119_v4  ;;  %v2124_v42 = vadd.s32 127, %v2123_v15  ;;  %vm5432_vm7 = vc.u32 %v10762_v30, %v10757_v6 }
 0x359   :  { %vm5158_vm9 = vcmp.lt.s32.totalorder %v5157_v5, 2  ;;  %v5434_v60 = vsel %vm5432_vm7, %v5433_v41, %v10758_v21  ;;  %v7541_v35 = vadd.s32 4294967169, %v1947_v9  ;;  %v5274_v57 = vand.u32 2139095040, %v10773_v27 }
 0x35a   :  { %v8304_v8 = vpop.eup %8303  ;;  %vm5159_vm8 = vcmp.eq.s32.totalorder %v5157_v5, 0  ;;  %v2122_v38 = vor.u32 %v2121_v28, %v2120_v32  ;;  %v2125_v7 = vshll.u32 %v2124_v42, 23  ;;  %v5435_v47 = vadd.s32 %v5434_v60, %v5430_v56 }
 0x35b   :  { %v8306_v36 = vpop.eup %8305  ;;  %vm5162_vm11 = vcmp.eq.s32.totalorder %v5157_v5, 2  ;;  %v5163_v3 = vxor.u32 2147483648, %v8304_v8  ;;  %v2140_v33 = vadd.s32 3, %v2136_v63  ;;  %v1953_v34 = vadd.s32 1, %v7541_v35 }
 0x35c   :  { %v5160_v22 = vxor.u32 2147483648, %v8306_v36  ;;  %v2126_v43 = vor.u32 4788187, %v2125_v7  ;;  %v5436_v20 = vadd.s32 536870912, %v5435_v47  ;;  %v1950_v0 = vand.u32 8388607, %v1943_v55 }
 0x35d   :  { %v5164_v45 = vsel %vm5162_vm11, %v5163_v3, %v8306_v36  ;;  %v2129_v23 = vcvt.s32.f32 %v2122_v38  ;;  %vm1954_vm12 = vcmp.gt.s32.totalorder %v1953_v34, 0  ;;  %v5275_v1 = vshrl.u32 %v5274_v57, 23 }
 0x35e   :  { %v5161_v40 = vsel %vm5159_vm8, %v8304_v8, %v5160_v22  ;;  %v2127_v59 = vand.u32 2147483647, %v2126_v43  ;;  %v5437_v37 = vshrl.u32 %v5436_v20, 30  ;;  %v1955_v16 = vsel %vm1954_vm12, %v1953_v34, 0 }
 0x35f   :  { %vm5155_vm10 = vweird.f32 %v10495_v11  ;;  %v5165_v17 = vsel %vm5158_vm9, %v5161_v40, %v5164_v45  ;;  %v1957_v18 = vand.u32 31, %v1955_v16  ;;  %v10791_v51 = vand.u32 3, %v2140_v33 }
 0x360   :  { %v5166_v53 = vsel %vm5155_vm10, nan, %v5165_v17  ;;  %v2130_v26 = vmul.f32 %v2129_v23, %v2127_v59  ;;  %vm5377_vm14 = vcmp.lt.s32.totalorder %v10635_v2, 0  ;;  %v5438_v46 = vshll.u32 %v5437_v37, 30 }
 0x361   :  { %7394 = vst.msk [vmem:[%s13788_s3 + $0x150] sm:$0xff] %vm7351_vm0, %v5166_v53  ;;  %v1951_v58 = vor.u32 8388608, %v1950_v0  ;;  %v1958_v49 = vsub.s32 32, %v1957_v18  ;;  %v5271_v25 = vand.u32 2147483647, %v10773_v27  ;;  %v7669_v11 = vadd.s32 4294967169, %v5275_v1 }
 0x362   :  { %v2131_v19 = vxor.u32 2147483648, %v2130_v26  ;;  %v10799_v10 = vsub.s32 %v5435_v47, %v5438_v46  ;;  %v5461_v21 = vsub.s32 4, %v5437_v37  ;;  %v1956_v62 = vshrl.u32 %v1955_v16, 5 }
 0x363   :  { %v1960_v13 = vshll.u32 %v8477_v44, %v1957_v18  ;;  %v1961_v5 = vshrl.u32 %v8478_v48, %v1958_v49  ;;  %v1963_v31 = vshll.u32 %v8478_v48, %v1957_v18  ;;  %v1964_v24 = vshrl.u32 %v8479_v50, %v1958_v49 }
 0x364   :  { %v2132_v4 = vsel %vm2049_vm15, %v2131_v19, %v2130_v26  ;;  %vm10809_vm13 = vcmp.le.f32.partialorder %v5375_v39, 0.7853982  ;;  %v5441_v9 = vsub.s32 0, %v10799_v10  ;;  %v1966_v63 = vshll.u32 %v8479_v50, %v1957_v18 }
 0x365   :  { %v1967_v56 = vshrl.u32 %v8480_v52, %v1958_v49  ;;  %v2135_v41 = vsel %vm10768_vm6, %v10585_v14, %v2132_v4  ;;  %v1962_v32 = vor.u32 %v1961_v5, %v1960_v13  ;;  %v1969_v28 = vshll.u32 %v8480_v52, %v1957_v18 }
 0x366   :  { %v1970_v42 = vshrl.u32 %v8481_v54, %v1958_v49  ;;  %8307 = vcosq.f32 %v2135_v41  ;;  %v7674_v39 = vmin.u32 %v5441_v9, %v10799_v10  ;;  %v1965_v60 = vor.u32 %v1964_v24, %v1963_v31 }
 0x367   :  { %v1968_v35 = vor.u32 %v1967_v56, %v1966_v63  ;;  %8309 = vsinq.f32 %v2135_v41  ;;  %v1972_v8 = vshll.u32 %v8481_v54, %v1957_v18  ;;  %v1973_v38 = vshrl.u32 %v8482_v61, %v1958_v49 }
 0x368   :  { %v1971_v57 = vor.u32 %v1970_v42, %v1969_v28  ;;  %v5431_v29 = vadd.s32 %v10757_v6, %v10762_v30  ;;  %v5443_v7 = vclz %v7674_v39  ;;  %v1991_v47 = vshll.u32 %v1951_v58, 8 }
 0x369   :  { %v5281_v36 = vadd.s32 1, %v7669_v11  ;;  %v5462_v3 = vsel %vm5377_vm14, %v5461_v21, %v5437_v37  ;;  %v1959_v33 = vshrl.u32 %v8477_v44, %v1958_v49  ;;  %v1974_v34 = vor.u32 %v1973_v38, %v1972_v8 }
 0x36a   :  { %vm1975_vm15 = vcmp.lt.s32.totalorder %v1956_v62, 1  ;;  %v7675_v22 = vadd.s32 4294967294, %v5443_v7  ;;  %vm1977_vm1 = vcmp.lt.s32.totalorder %v1956_v62, 3  ;;  %vm1978_vm2 = vcmp.lt.s32.totalorder %v1956_v62, 4 }
 0x36b   :  { %v1983_v43 = vsel %vm1975_vm15, %v1962_v32, %v1965_v60  ;;  %v1980_v20 = vsel %vm1978_vm2, %v1968_v35, 2102212464  ;;  %v1984_v0 = vsel %vm1978_vm2, %v1971_v57, 920167782  ;;  %v1987_v45 = vsel %vm1975_vm15, %v1965_v60, %v1968_v35 }
 0x36c   :  { %v1988_v6 = vsel %vm1978_vm2, %v1974_v34, 1326507024  ;;  %vm7676_vm3 = vcmp.lt.s32.totalorder %v7675_v22, 0  ;;  %vm1976_vm4 = vcmp.lt.s32.totalorder %v1956_v62, 2  ;;  %v1985_v30 = vsel %vm1977_vm1, %v1968_v35, %v1984_v0 }
 0x36d   :  { %v1989_v23 = vsel %vm1977_vm1, %v1971_v57, %v1988_v6  ;;  %v5446_v1 = vsel %vm7676_vm3, 0, %v7675_v22  ;;  %v5464_v40 = vsel %vm10809_vm13, 0, %v5462_v3  ;;  %v1986_v59 = vsel %vm1976_vm4, %v1983_v43, %v1985_v30 }
 0x36e   :  { %v1990_v37 = vsel %vm1976_vm4, %v1987_v45, %v1989_v23  ;;  %v5447_v16 = vsub.s32 32, %v5446_v1  ;;  %v5451_v17 = vsub.s32 4294967266, %v5446_v1  ;;  %v1979_v18 = vsel %vm1975_vm15, %v1959_v33, %v1962_v32 }
 0x36f   :  { %v1981_v53 = vsel %vm1977_vm1, %v1965_v60, %v1980_v20  ;;  %v10839_v26 = vmul.u32.u64.low %v1991_v47, %v1990_v37  ;;  %v10840_v46 = vmul.u32.u64.high %v1991_v47, %v1990_v37, %v10839_v26  ;;  %vm2139_vm5 = vweird.f32 %v10585_v14 }
 0x370   :  { %v10842_v58 = vmul.u32.u64.low %v1991_v47, %v1986_v59  ;;  %v10843_v49 = vmul.u32.u64.high %v1991_v47, %v1986_v59, %v10842_v58  ;;  %v5448_v11 = vshll.u32 %v10799_v10, %v5446_v1  ;;  %v5449_v19 = vshrl.u32 %v5431_v29, %v5447_v16  ;;  %v7860_v59 = vpop.f32.mrf.mxu0 }
 0x371   :  { %v5452_v21 = vadd.s32 127, %v5451_v17  ;;  %vm5282_vm6 = vcmp.gt.s32.totalorder %v5281_v36, 0  ;;  %v5468_v13 = vadd.s32 3, %v5464_v40  ;;  %v1982_v5 = vsel %vm1976_vm4, %v1979_v18, %v1981_v53 }
 0x372   :  { %v5278_v31 = vand.u32 8388607, %v5271_v25  ;;  %v5283_v24 = vsel %vm5282_vm6, %v5281_v36, 0  ;;  %vm2142_vm7 = vcmp.lt.s32.totalorder %v10791_v51, 2  ;;  %v5450_v4 = vor.u32 %v5449_v19, %v5448_v11 }
 0x373   :  { %v5453_v9 = vshll.u32 %v5452_v21, 23  ;;  %v5285_v63 = vand.u32 31, %v5283_v24  ;;  %v8308_v56 = vpop.eup %8307  ;;  %vm2143_vm9 = vcmp.eq.s32.totalorder %v10791_v51, 0  ;;  %vm2146_vm8 = vcmp.eq.s32.totalorder %v10791_v51, 2 }
 0x374   :  { %vm2000_vm11 = vc.u32 %v10840_v46, %v10842_v58  ;;  %v2001_v10 = vadd.s32 1, %v10843_v49  ;;  %v8310_v62 = vpop.eup %8309  ;;  %v2147_v41 = vxor.u32 2147483648, %v8308_v56  ;;  %v1998_v28 = vmul.u32 %v1991_v47, %v1982_v5 }
 0x375   :  { %v5454_v32 = vor.u32 4788187, %v5453_v9  ;;  %v5286_v42 = vsub.s32 32, %v5285_v63  ;;  %v2144_v39 = vxor.u32 2147483648, %v8310_v62  ;;  %v10857_v60 = vand.u32 3, %v5468_v13 }
 0x376   :  { %v2002_v35 = vsel %vm2000_vm11, %v2001_v10, %v10843_v49  ;;  %v5279_v57 = vor.u32 8388608, %v5278_v31  ;;  %v2148_v8 = vsel %vm2146_vm8, %v2147_v41, %v8310_v62  ;;  %v5457_v29 = vcvt.s32.f32 %v5450_v4  ;;  %v10890_v13 = vld [vmem:[%s13787_s2] ss:$0 sm:$0xff] }
 0x377   :  { %v5455_v38 = vand.u32 2147483647, %v5454_v32  ;;  %v2003_v7 = vadd.s32 %v2002_v35, %v1998_v28  ;;  %v2145_v36 = vsel %vm2143_vm9, %v8308_v56, %v2144_v39  ;;  %v10862_v3 = vshrl.u32 %v5283_v24, 5  ;;  %v7908_v35 = vpop.f32.mrf.mxu1 }
 0x378   :  { %v5289_v33 = vshrl.u32 %v8478_v48, %v5286_v42  ;;  %v5292_v47 = vshrl.u32 %v8479_v50, %v5286_v42  ;;  %v2149_v34 = vsel %vm2142_vm7, %v2145_v36, %v2148_v8  ;;  %v5295_v20 = vshrl.u32 %v8480_v52, %v5286_v42 }
 0x379   :  { %v5458_v22 = vmul.f32 %v5457_v29, %v5455_v38  ;;  %v2004_v43 = vadd.s32 536870912, %v2003_v7  ;;  %v2150_v0 = vsel %vm2139_vm5, nan, %v2149_v34  ;;  %v5288_v45 = vshll.u32 %v8477_v44, %v5285_v63 }
 0x37a   :  { %v5291_v6 = vshll.u32 %v8478_v48, %v5285_v63  ;;  %v5294_v30 = vshll.u32 %v8479_v50, %v5285_v63  ;;  %7365 = vst.msk [vmem:[%s13788_s3 + $0x68] sm:$0xff] %vm7351_vm0, %v2150_v0  ;;  %v5297_v1 = vshll.u32 %v8480_v52, %v5285_v63  ;;  %v5298_v40 = vshrl.u32 %v8481_v54, %v5286_v42 }
 0x37b   :  { %v5459_v51 = vxor.u32 2147483648, %v5458_v22  ;;  %v2005_v23 = vshrl.u32 %v2004_v43, 30  ;;  %v5290_v14 = vor.u32 %v5289_v33, %v5288_v45  ;;  %v5300_v16 = vshll.u32 %v8481_v54, %v5285_v63 }
 0x37c   :  { %v5293_v37 = vor.u32 %v5292_v47, %v5291_v6  ;;  %v5301_v17 = vshrl.u32 %v8482_v61, %v5286_v42  ;;  %v5296_v26 = vor.u32 %v5295_v20, %v5294_v30  ;;  %v5299_v49 = vor.u32 %v5298_v40, %v5297_v1 }
 0x37d   :  { %v5460_v18 = vsel %vm5377_vm14, %v5459_v51, %v5458_v22  ;;  %v2006_v53 = vshll.u32 %v2005_v23, 30  ;;  %v5319_v21 = vshll.u32 %v5279_v57, 8  ;;  %v10893_v5 = vadd.f32 %v10890_v13, %v7860_v59 }
 0x37e   :  { %v5463_v11 = vsel %vm10809_vm13, %v10635_v2, %v5460_v18  ;;  %v5302_v19 = vor.u32 %v5301_v17, %v5300_v16  ;;  %v5287_v24 = vshrl.u32 %v8477_v44, %v5286_v42  ;;  %vm5303_vm12 = vcmp.lt.s32.totalorder %v10862_v3, 1 }
 0x37f   :  { %8311 = vcosq.f32 %v5463_v11  ;;  %v10895_v31 = vsub.s32 %v2003_v7, %v2006_v53  ;;  %vm5304_vm10 = vcmp.lt.s32.totalorder %v10862_v3, 2  ;;  %vm5306_vm14 = vcmp.lt.s32.totalorder %v10862_v3, 4 }
 0x380   :  { %8313 = vsinq.f32 %v5463_v11  ;;  %v5311_v15 = vsel %vm5303_vm12, %v5290_v14, %v5293_v37  ;;  %vm5305_vm13 = vcmp.lt.s32.totalorder %v10862_v3, 3  ;;  %v5308_v9 = vsel %vm5306_vm14, %v5296_v26, 2102212464 }
 0x381   :  { %v2009_v4 = vsub.s32 0, %v10895_v31  ;;  %v5312_v63 = vsel %vm5306_vm14, %v5299_v49, 920167782  ;;  %v2029_v56 = vsub.s32 4, %v2005_v23  ;;  %v5315_v62 = vsel %vm5303_vm12, %v5293_v37, %v5296_v26 }
 0x382   :  { %v5313_v10 = vsel %vm5305_vm13, %v5296_v26, %v5312_v63  ;;  %v5316_v41 = vsel %vm5306_vm14, %v5302_v19, 1326507024  ;;  %v5307_v28 = vsel %vm5303_vm12, %v5287_v24, %v5290_v14  ;;  %v5309_v57 = vsel %vm5305_vm13, %v5293_v37, %v5308_v9 }
 0x383   :  { %v7542_v32 = vmin.u32 %v2009_v4, %v10895_v31  ;;  %v5314_v42 = vsel %vm5304_vm10, %v5311_v15, %v5313_v10  ;;  %v5317_v39 = vsel %vm5305_vm13, %v5299_v49, %v5316_v41  ;;  %vm1945_vm15 = vcmp.lt.s32.totalorder %v10751_v12, 0 }
 0x384   :  { %v5318_v8 = vsel %vm5304_vm10, %v5315_v62, %v5317_v39  ;;  %v10908_v38 = vmul.u32.u64.low %v5319_v21, %v5314_v42  ;;  %v10909_v29 = vmul.u32.u64.high %v5319_v21, %v5314_v42, %v10908_v38  ;;  %v10917_v47 = vadd.f32 %v10890_v13, %v7908_v35  ;;  %v446_v39 = vpop.f32.mrf.mxu0 }
 0x385   :  { %v2011_v7 = vclz %v7542_v32  ;;  %v10913_v36 = vmul.u32.u64.low %v5319_v21, %v5318_v8  ;;  %v10914_v33 = vmul.u32.u64.high %v5319_v21, %v5318_v8, %v10913_v36  ;;  %vm10921_vm1 = vcmp.le.f32.partialorder %v1943_v55, 0.7853982 }
 0x386   :  { %v5310_v43 = vsel %vm5304_vm10, %v5307_v28, %v5309_v57  ;;  %v2258_v20 = vand.u32 2139095040, %v10893_v5  ;;  %vm5470_vm2 = vcmp.lt.s32.totalorder %v10857_v60, 2  ;;  %vm5471_vm3 = vcmp.eq.s32.totalorder %v10857_v60, 0 }
 0x387   :  { %v7543_v22 = vadd.s32 4294967294, %v2011_v7  ;;  %v2030_v0 = vsel %vm1945_vm15, %v2029_v56, %v2005_v23  ;;  %v5329_v45 = vadd.s32 1, %v10909_v29  ;;  %v2255_v55 = vand.u32 2147483647, %v10893_v5 }
 0x388   :  { %vm5467_vm4 = vweird.f32 %v10635_v2  ;;  %vm5474_vm5 = vcmp.eq.s32.totalorder %v10857_v60, 2  ;;  %v1999_v3 = vadd.s32 %v10842_v58, %v10840_v46  ;;  %v2259_v6 = vshrl.u32 %v2258_v20, 23 }
 0x389   :  { %vm7544_vm6 = vcmp.lt.s32.totalorder %v7543_v22, 0  ;;  %v5326_v51 = vmul.u32 %v5319_v21, %v5310_v43  ;;  %vm5328_vm7 = vc.u32 %v10914_v33, %v10908_v38  ;;  %v5586_v23 = vand.u32 2139095040, %v10917_v47 }
 0x38a   :  { %v2014_v30 = vsel %vm7544_vm6, 0, %v7543_v22  ;;  %v2032_v59 = vsel %vm10921_vm1, 0, %v2030_v0  ;;  %v5330_v14 = vsel %vm5328_vm7, %v5329_v45, %v10909_v29  ;;  %v7553_v17 = vadd.s32 4294967169, %v2259_v6 }
 0x38b   :  { %v2015_v1 = vsub.s32 32, %v2014_v30  ;;  %v2019_v40 = vsub.s32 4294967266, %v2014_v30  ;;  %v5331_v16 = vadd.s32 %v5330_v14, %v5326_v51  ;;  %v2262_v46 = vand.u32 8388607, %v2255_v55 }
 0x38c   :  { %v8312_v37 = vpop.eup %8311  ;;  %v5583_v58 = vand.u32 2147483647, %v10917_v47  ;;  %v2016_v26 = vshll.u32 %v10895_v31, %v2014_v30  ;;  %v2265_v24 = vadd.s32 1, %v7553_v17  ;;  %v5587_v15 = vshrl.u32 %v5586_v23, 23 }
 0x38d   :  { %v8314_v18 = vpop.eup %8313  ;;  %v5475_v53 = vxor.u32 2147483648, %v8312_v37  ;;  %v2017_v49 = vshrl.u32 %v1999_v3, %v2015_v1  ;;  %v2020_v11 = vadd.s32 127, %v2019_v40  ;;  %v5332_v21 = vadd.s32 536870912, %v5331_v16 }
 0x38e   :  { %v5472_v19 = vxor.u32 2147483648, %v8314_v18  ;;  %v2036_v56 = vadd.s32 3, %v2032_v59  ;;  %v2263_v41 = vor.u32 8388608, %v2262_v46  ;;  %vm2266_vm9 = vcmp.gt.s32.totalorder %v2265_v24, 0 }
 0x38f   :  { %v5476_v4 = vsel %vm5474_vm5, %v5475_v53, %v8314_v18  ;;  %v2018_v9 = vor.u32 %v2017_v49, %v2016_v26  ;;  %v2021_v63 = vshll.u32 %v2020_v11, 23  ;;  %v10952_v62 = vshrl.u32 %v5332_v21, 30 }
 0x390   :  { %v5473_v10 = vsel %vm5471_vm3, %v8312_v37, %v5472_v19  ;;  %v2267_v28 = vsel %vm2266_vm9, %v2265_v24, 0  ;;  %v10958_v42 = vand.u32 8388607, %v5583_v58  ;;  %v7681_v8 = vadd.s32 4294967169, %v5587_v15 }
 0x391   :  { %v5477_v31 = vsel %vm5470_vm2, %v5473_v10, %v5476_v4  ;;  %v2022_v32 = vor.u32 4788187, %v2021_v63  ;;  %v5334_v57 = vshll.u32 %v10952_v62, 30  ;;  %v2025_v29 = vcvt.s32.f32 %v2018_v9 }
 0x392   :  { %v5478_v35 = vsel %vm5467_vm4, nan, %v5477_v31  ;;  %v2269_v7 = vand.u32 31, %v2267_v28  ;;  %v10967_v36 = vand.u32 3, %v2036_v56  ;;  %v5327_v22 = vadd.s32 %v10908_v38, %v10914_v33 }
 0x393   :  { %7397 = vst.msk [vmem:[%s13788_s3 + $0x168] sm:$0xff] %vm7351_vm0, %v5478_v35  ;;  %v2023_v60 = vand.u32 2147483647, %v2022_v32  ;;  %v10971_v43 = vsub.s32 %v5331_v16, %v5334_v57  ;;  %v10974_v2 = vadd.f32 %v10890_v13, %v446_v39  ;;  %v10976_v45 = vshll.u32 %v2263_v41, 8 }
 0x394   :  { %v2270_v0 = vsub.s32 32, %v2269_v7  ;;  %v5591_v3 = vor.u32 8388608, %v10958_v42  ;;  %v2268_v30 = vshrl.u32 %v2267_v28, 5  ;;  %v2272_v51 = vshll.u32 %v8477_v44, %v2269_v7 }
 0x395   :  { %v2026_v20 = vmul.f32 %v2025_v29, %v2023_v60  ;;  %v5337_v6 = vsub.s32 0, %v10971_v43  ;;  %v5593_v23 = vadd.s32 1, %v7681_v8  ;;  %v2275_v33 = vshll.u32 %v8478_v48, %v2269_v7 }
 0x396   :  { %v2273_v38 = vshrl.u32 %v8478_v48, %v2270_v0  ;;  %v2276_v40 = vshrl.u32 %v8479_v50, %v2270_v0  ;;  %v2278_v14 = vshll.u32 %v8479_v50, %v2269_v7  ;;  %v2279_v37 = vshrl.u32 %v8480_v52, %v2270_v0 }
 0x397   :  { %v2027_v1 = vxor.u32 2147483648, %v2026_v20  ;;  %v7670_v59 = vmin.u32 %v5337_v6, %v10971_v43  ;;  %v2281_v16 = vshll.u32 %v8480_v52, %v2269_v7  ;;  %v2282_v53 = vshrl.u32 %v8481_v54, %v2270_v0 }
 0x398   :  { %v2274_v46 = vor.u32 %v2273_v38, %v2272_v51  ;;  %v2277_v18 = vor.u32 %v2276_v40, %v2275_v33  ;;  %v5357_v11 = vsub.s32 4, %v10952_v62  ;;  %vm5594_vm8 = vcmp.gt.s32.totalorder %v5593_v23, 0 }
 0x399   :  { %v2028_v17 = vsel %vm1945_vm15, %v2027_v1, %v2026_v20  ;;  %v5339_v49 = vclz %v7670_v59  ;;  %v2280_v19 = vor.u32 %v2279_v37, %v2278_v14  ;;  %v2283_v21 = vor.u32 %v2282_v53, %v2281_v16 }
 0x39a   :  { %v2031_v26 = vsel %vm10921_vm1, %v10751_v12, %v2028_v17  ;;  %vm2287_vm11 = vcmp.lt.s32.totalorder %v2268_v30, 1  ;;  %vm5273_vm12 = vcmp.lt.s32.totalorder %v10773_v27, 0  ;;  %v2284_v15 = vshll.u32 %v8481_v54, %v2269_v7 }
 0x39b   :  { %8315 = vcosq.f32 %v2031_v26  ;;  %v7671_v24 = vadd.s32 4294967294, %v5339_v49  ;;  %v2285_v4 = vshrl.u32 %v8482_v61, %v2270_v0  ;;  %v2271_v9 = vshrl.u32 %v8477_v44, %v2270_v0 }
 0x39c   :  { %8317 = vsinq.f32 %v2031_v26  ;;  %vm2289_vm10 = vcmp.lt.s32.totalorder %v2268_v30, 3  ;;  %vm2290_vm14 = vcmp.lt.s32.totalorder %v2268_v30, 4  ;;  %v2295_v34 = vsel %vm2287_vm11, %v2274_v46, %v2277_v18 }
 0x39d   :  { %vm7672_vm13 = vcmp.lt.s32.totalorder %v7671_v24, 0  ;;  %v2286_v63 = vor.u32 %v2285_v4, %v2284_v15  ;;  %v2292_v56 = vsel %vm2290_vm14, %v2280_v19, 2102212464  ;;  %v2296_v10 = vsel %vm2290_vm14, %v2283_v21, 920167782 }
 0x39e   :  { %v5342_v41 = vsel %vm7672_vm13, 0, %v7671_v24  ;;  %v2291_v31 = vsel %vm2287_vm11, %v2271_v9, %v2274_v46  ;;  %v2293_v32 = vsel %vm2289_vm10, %v2277_v18, %v2292_v56  ;;  %v2297_v28 = vsel %vm2289_vm10, %v2280_v19, %v2296_v10 }
 0x39f   :  { %v5343_v39 = vsub.s32 32, %v5342_v41  ;;  %v5347_v35 = vsub.s32 4294967266, %v5342_v41  ;;  %vm2288_vm15 = vcmp.lt.s32.totalorder %v2268_v30, 2  ;;  %v2299_v57 = vsel %vm2287_vm11, %v2277_v18, %v2280_v19 }
 0x3a0   :  { %v5344_v8 = vshll.u32 %v10971_v43, %v5342_v41  ;;  %v2298_v60 = vsel %vm2288_vm15, %v2295_v34, %v2297_v28  ;;  %v2300_v29 = vsel %vm2290_vm14, %v2286_v63, 1326507024  ;;  %v5595_v7 = vsel %vm5594_vm8, %v5593_v23, 0 }
 0x3a1   :  { %v5345_v20 = vshrl.u32 %v5327_v22, %v5343_v39  ;;  %v5348_v0 = vadd.s32 127, %v5347_v35  ;;  %v2294_v6 = vsel %vm2288_vm15, %v2291_v31, %v2293_v32  ;;  %v2301_v51 = vsel %vm2289_vm10, %v2283_v21, %v2300_v29 }
 0x3a2   :  { %vm2039_vm1 = vcmp.eq.s32.totalorder %v10967_v36, 0  ;;  %v2302_v1 = vsel %vm2288_vm15, %v2299_v57, %v2301_v51  ;;  %v11012_v38 = vmul.u32.u64.low %v10976_v45, %v2298_v60  ;;  %v11013_v33 = vmul.u32.u64.high %v10976_v45, %v2298_v60, %v11012_v38 }
 0x3a3   :  { %v5597_v40 = vand.u32 31, %v5595_v7  ;;  %vm2038_vm2 = vcmp.lt.s32.totalorder %v10967_v36, 2  ;;  %vm11019_vm3 = vcmp.le.f32.partialorder %v5271_v25, 0.7853982  ;;  %v5346_v22 = vor.u32 %v5345_v20, %v5344_v8 }
 0x3a4   :  { %v5349_v30 = vshll.u32 %v5348_v0, 23  ;;  %v11024_v23 = vmul.u32.u64.low %v10976_v45, %v2302_v1  ;;  %v11025_v59 = vmul.u32.u64.high %v10976_v45, %v2302_v1, %v11024_v23  ;;  %vm2035_vm4 = vweird.f32 %v10751_v12 }
 0x3a5   :  { %vm2042_vm5 = vcmp.eq.s32.totalorder %v10967_v36, 2  ;;  %v5358_v14 = vsel %vm5273_vm12, %v5357_v11, %v10952_v62  ;;  %v5598_v37 = vsub.s32 32, %v5597_v40  ;;  %v11034_v25 = vshll.u32 %v5591_v3, 8 }
 0x3a6   :  { %v5350_v16 = vor.u32 4788187, %v5349_v30  ;;  %v2310_v17 = vmul.u32 %v10976_v45, %v2294_v6  ;;  %v11037_v46 = vshrl.u32 %v5595_v7, 5  ;;  %v5600_v18 = vshll.u32 %v8477_v44, %v5597_v40 }
 0x3a7   :  { %v2313_v53 = vadd.s32 1, %v11013_v33  ;;  %v5601_v26 = vshrl.u32 %v8478_v48, %v5598_v37  ;;  %v5603_v49 = vshll.u32 %v8478_v48, %v5597_v40  ;;  %v5606_v62 = vshll.u32 %v8479_v50, %v5597_v40 }
 0x3a8   :  { %v8316_v11 = vpop.eup %8315  ;;  %v5351_v19 = vand.u32 2147483647, %v5350_v16  ;;  %v5353_v42 = vcvt.s32.f32 %v5346_v22  ;;  %vm2312_vm6 = vc.u32 %v11025_v59, %v11012_v38  ;;  %v5604_v45 = vshrl.u32 %v8479_v50, %v5598_v37 }
 0x3a9   :  { %v8318_v3 = vpop.eup %8317  ;;  %v2043_v21 = vxor.u32 2147483648, %v8316_v11  ;;  %v2314_v24 = vsel %vm2312_vm6, %v2313_v53, %v11013_v33  ;;  %v5607_v15 = vshrl.u32 %v8480_v52, %v5598_v37  ;;  %v5609_v4 = vshll.u32 %v8480_v52, %v5597_v40 }
 0x3aa   :  { %v2040_v9 = vxor.u32 2147483648, %v8318_v3  ;;  %v5354_v34 = vmul.f32 %v5353_v42, %v5351_v19  ;;  %v2315_v63 = vadd.s32 %v2314_v24, %v2310_v17  ;;  %v5612_v56 = vshll.u32 %v8481_v54, %v5597_v40 }
 0x3ab   :  { %v2044_v10 = vsel %vm2042_vm5, %v2043_v21, %v8318_v3  ;;  %v5602_v41 = vor.u32 %v5601_v26, %v5600_v18  ;;  %v5610_v31 = vshrl.u32 %v8481_v54, %v5598_v37  ;;  %v5613_v32 = vshrl.u32 %v8482_v61, %v5598_v37 }
 0x3ac   :  { %v2041_v28 = vsel %vm2039_vm1, %v8316_v11, %v2040_v9  ;;  %v5355_v39 = vxor.u32 2147483648, %v5354_v34  ;;  %v2316_v35 = vadd.s32 536870912, %v2315_v63  ;;  %v5605_v57 = vor.u32 %v5604_v45, %v5603_v49 }
 0x3ad   :  { %v2045_v8 = vsel %vm2038_vm2, %v2041_v28, %v2044_v10  ;;  %v5360_v60 = vsel %vm11019_vm3, 0, %v5358_v14  ;;  %v5608_v29 = vor.u32 %v5607_v15, %v5606_v62  ;;  %v5611_v7 = vor.u32 %v5610_v31, %v5609_v4 }
 0x3ae   :  { %v2046_v20 = vsel %vm2035_vm4, nan, %v2045_v8  ;;  %v5356_v0 = vsel %vm5273_vm12, %v5355_v39, %v5354_v34  ;;  %v2317_v6 = vshrl.u32 %v2316_v35, 30  ;;  %v5614_v51 = vor.u32 %v5613_v32, %v5612_v56  ;;  %v606_v32 = vpop.f32.mrf.mxu1 }
 0x3af   :  { %7364 = vst.msk [vmem:[%s13788_s3 + $0x60] sm:$0xff] %vm7351_vm0, %v2046_v20  ;;  %v5359_v36 = vsel %vm11019_vm3, %v10773_v27, %v5356_v0  ;;  %v5599_v1 = vshrl.u32 %v8477_v44, %v5598_v37  ;;  %vm5615_vm7 = vcmp.lt.s32.totalorder %v11037_v46, 1  ;;  %vm5617_vm9 = vcmp.lt.s32.totalorder %v11037_v46, 3 }
 0x3b0   :  { %8319 = vcosq.f32 %v5359_v36  ;;  %v2318_v12 = vshll.u32 %v2317_v6, 30  ;;  %vm5618_vm8 = vcmp.lt.s32.totalorder %v11037_v46, 4  ;;  %v5623_v33 = vsel %vm5615_vm7, %v5602_v41, %v5605_v57 }
 0x3b1   :  { %8321 = vsinq.f32 %v5359_v36  ;;  %v5620_v40 = vsel %vm5618_vm8, %v5608_v29, 2102212464  ;;  %v5624_v22 = vsel %vm5618_vm8, %v5611_v7, 920167782  ;;  %v5627_v43 = vsel %vm5615_vm7, %v5605_v57, %v5608_v29 }
 0x3b2   :  { %v11080_v30 = vsub.s32 %v2315_v63, %v2318_v12  ;;  %vm5616_vm11 = vcmp.lt.s32.totalorder %v11037_v46, 2  ;;  %v5625_v23 = vsel %vm5617_vm9, %v5608_v29, %v5624_v22  ;;  %v5628_v14 = vsel %vm5618_vm8, %v5614_v51, 1326507024 }
 0x3b3   :  { %v5364_v37 = vadd.s32 3, %v5360_v60  ;;  %v2341_v16 = vsub.s32 4, %v2317_v6  ;;  %v5626_v17 = vsel %vm5616_vm11, %v5623_v33, %v5625_v23  ;;  %v5629_v18 = vsel %vm5617_vm9, %v5611_v7, %v5628_v14 }
 0x3b4   :  { %v2321_v53 = vsub.s32 0, %v11080_v30  ;;  %v5619_v26 = vsel %vm5615_vm7, %v5599_v1, %v5602_v41  ;;  %v5621_v49 = vsel %vm5617_vm9, %v5605_v57, %v5620_v40  ;;  %v5630_v62 = vsel %vm5616_vm11, %v5627_v43, %v5629_v18 }
 0x3b5   :  { %v11097_v11 = vmul.u32.u64.low %v11034_v25, %v5630_v62  ;;  %v11098_v19 = vmul.u32.u64.high %v11034_v25, %v5630_v62, %v11097_v11  ;;  %v11101_v42 = vmul.u32.u64.low %v11034_v25, %v5626_v17  ;;  %v11102_v45 = vmul.u32.u64.high %v11034_v25, %v5626_v17, %v11101_v42 }
 0x3b6   :  { %vm2257_vm12 = vcmp.lt.s32.totalorder %v10893_v5, 0  ;;  %v7554_v3 = vmin.u32 %v2321_v53, %v11080_v30  ;;  %v5365_v21 = vand.u32 3, %v5364_v37  ;;  %v5622_v15 = vsel %vm5616_vm11, %v5619_v26, %v5621_v49 }
 0x3b7   :  { %v2342_v24 = vsel %vm2257_vm12, %v2341_v16, %v2317_v6  ;;  %v2154_v4 = vand.u32 2139095040, %v10974_v2  ;;  %vm11113_vm10 = vcmp.le.f32.partialorder %v2255_v55, 0.7853982  ;;  %vm5640_vm14 = vc.u32 %v11098_v19, %v11101_v42 }
 0x3b8   :  { %v2323_v9 = vclz %v7554_v3  ;;  %v5641_v63 = vadd.s32 1, %v11102_v45  ;;  %v2344_v41 = vsel %vm11113_vm10, 0, %v2342_v24  ;;  %v5638_v46 = vmul.u32 %v11034_v25, %v5622_v15 }
 0x3b9   :  { %v2155_v56 = vshrl.u32 %v2154_v4, 23  ;;  %v2151_v31 = vand.u32 2147483647, %v10974_v2  ;;  %vm5366_vm13 = vcmp.lt.s32.totalorder %v5365_v21, 2  ;;  %vm5367_vm15 = vcmp.eq.s32.totalorder %v5365_v21, 0 }
 0x3ba   :  { %v7555_v10 = vadd.s32 4294967294, %v2323_v9  ;;  %v5642_v55 = vsel %vm5640_vm14, %v5641_v63, %v11102_v45  ;;  %vm5370_vm1 = vcmp.eq.s32.totalorder %v5365_v21, 2  ;;  %v2311_v39 = vadd.s32 %v11012_v38, %v11025_v59 }
 0x3bb   :  { %v7549_v28 = vadd.s32 4294967169, %v2155_v56  ;;  %v5643_v35 = vadd.s32 %v5642_v55, %v5638_v46  ;;  %v2348_v60 = vadd.s32 3, %v2344_v41  ;;  %v11127_v25 = vadd.f32 %v10890_v13, %v606_v32 }
 0x3bc   :  { %vm7556_vm2 = vcmp.lt.s32.totalorder %v7555_v10, 0  ;;  %v2158_v51 = vand.u32 8388607, %v2151_v31  ;;  %vm5363_vm4 = vweird.f32 %v10773_v27  ;;  %vm5585_vm5 = vcmp.lt.s32.totalorder %v10917_v47, 0 }
 0x3bd   :  { %v8320_v57 = vpop.eup %8319  ;;  %v2326_v8 = vsel %vm7556_vm2, 0, %v7555_v10  ;;  %v2161_v29 = vadd.s32 1, %v7549_v28  ;;  %v5644_v38 = vadd.s32 536870912, %v5643_v35  ;;  %v5482_v14 = vand.u32 2139095040, %v11127_v25 }
 0x3be   :  { %v8322_v7 = vpop.eup %8321  ;;  %v5371_v20 = vxor.u32 2147483648, %v8320_v57  ;;  %v2327_v0 = vsub.s32 32, %v2326_v8  ;;  %v2331_v6 = vsub.s32 4294967266, %v2326_v8  ;;  %v2328_v1 = vshll.u32 %v11080_v30, %v2326_v8 }
 0x3bf   :  { %v5368_v36 = vxor.u32 2147483648, %v8322_v7  ;;  %vm2162_vm3 = vcmp.gt.s32.totalorder %v2161_v29, 0  ;;  %v5645_v43 = vshrl.u32 %v5644_v38, 30  ;;  %v11142_v49 = vand.u32 3, %v2348_v60 }
 0x3c0   :  { %v5372_v59 = vsel %vm5370_vm1, %v5371_v20, %v8322_v7  ;;  %v2329_v12 = vshrl.u32 %v2311_v39, %v2327_v0  ;;  %v2332_v33 = vadd.s32 127, %v2331_v6  ;;  %v2163_v40 = vsel %vm2162_vm3, %v2161_v29, 0 }
 0x3c1   :  { %v5369_v22 = vsel %vm5367_vm15, %v8320_v57, %v5368_v36  ;;  %v2165_v23 = vand.u32 31, %v2163_v40  ;;  %v5646_v18 = vshll.u32 %v5645_v43, 30  ;;  %v5639_v62 = vadd.s32 %v11101_v42, %v11098_v19 }
 0x3c2   :  { %v5373_v37 = vsel %vm5366_vm13, %v5369_v22, %v5372_v59  ;;  %v2330_v16 = vor.u32 %v2329_v12, %v2328_v1  ;;  %v2333_v17 = vshll.u32 %v2332_v33, 23  ;;  %v2159_v27 = vor.u32 8388608, %v2158_v51 }
 0x3c3   :  { %v5374_v30 = vsel %vm5363_vm4, nan, %v5373_v37  ;;  %v2166_v53 = vsub.s32 32, %v2165_v23  ;;  %v11145_v11 = vsub.s32 %v5643_v35, %v5646_v18  ;;  %v5669_v45 = vsub.s32 4, %v5645_v43 }
 0x3c4   :  { %7396 = vst.msk [vmem:[%s13788_s3 + $0x160] sm:$0xff] %vm7351_vm0, %v5374_v30  ;;  %v2334_v26 = vor.u32 4788187, %v2333_v17  ;;  %v5483_v21 = vshrl.u32 %v5482_v14, 23  ;;  %v2337_v15 = vcvt.s32.f32 %v2330_v16  ;;  %v2168_v4 = vshll.u32 %v8477_v44, %v2165_v23 }
 0x3c5   :  { %v2169_v3 = vshrl.u32 %v8478_v48, %v2166_v53  ;;  %v2172_v9 = vshrl.u32 %v8479_v50, %v2166_v53  ;;  %v5649_v63 = vsub.s32 0, %v11145_v11  ;;  %v2171_v56 = vshll.u32 %v8478_v48, %v2165_v23 }
 0x3c6   :  { %v2335_v24 = vand.u32 2147483647, %v2334_v26  ;;  %v2174_v10 = vshll.u32 %v8479_v50, %v2165_v23  ;;  %v2175_v19 = vshrl.u32 %v8480_v52, %v2166_v53  ;;  %v2164_v41 = vshrl.u32 %v2163_v40, 5 }
 0x3c7   :  { %v2177_v46 = vshll.u32 %v8480_v52, %v2165_v23  ;;  %v2178_v32 = vshrl.u32 %v8481_v54, %v2166_v53  ;;  %v7682_v55 = vmin.u32 %v5649_v63, %v11145_v11  ;;  %v2170_v28 = vor.u32 %v2169_v3, %v2168_v4 }
 0x3c8   :  { %v2338_v42 = vmul.f32 %v2337_v15, %v2335_v24  ;;  %v2173_v39 = vor.u32 %v2172_v9, %v2171_v56  ;;  %v2176_v35 = vor.u32 %v2175_v19, %v2174_v10  ;;  %v2180_v60 = vshll.u32 %v8481_v54, %v2165_v23 }
 0x3c9   :  { %v2179_v8 = vor.u32 %v2178_v32, %v2177_v46  ;;  %v2181_v29 = vshrl.u32 %v8482_v61, %v2166_v53  ;;  %vm11161_vm6 = vcmp.le.f32.partialorder %v5583_v58, 0.7853982  ;;  %v5651_v20 = vclz %v7682_v55  ;;  %v7863_v32 = vpop.f32.mrf.mxu0 }
 0x3ca   :  { %v2339_v57 = vxor.u32 2147483648, %v2338_v42  ;;  %v5670_v0 = vsel %vm5585_vm5, %v5669_v45, %v5645_v43  ;;  %v2199_v6 = vshll.u32 %v2159_v27, 8  ;;  %v7677_v51 = vadd.s32 4294967169, %v5483_v21 }
 0x3cb   :  { %v2167_v1 = vshrl.u32 %v8477_v44, %v2166_v53  ;;  %v2182_v38 = vor.u32 %v2181_v29, %v2180_v60  ;;  %vm2183_vm7 = vcmp.lt.s32.totalorder %v2164_v41, 1  ;;  %v7683_v59 = vadd.s32 4294967294, %v5651_v20 }
 0x3cc   :  { %v2340_v36 = vsel %vm2257_vm12, %v2339_v57, %v2338_v42  ;;  %vm2185_vm9 = vcmp.lt.s32.totalorder %v2164_v41, 3  ;;  %vm2186_vm8 = vcmp.lt.s32.totalorder %v2164_v41, 4  ;;  %v2191_v33 = vsel %vm2183_vm7, %v2170_v28, %v2173_v39 }
 0x3cd   :  { %v2343_v58 = vsel %vm11113_vm10, %v10893_v5, %v2340_v36  ;;  %v2188_v12 = vsel %vm2186_vm8, %v2176_v35, 2102212464  ;;  %v2192_v40 = vsel %vm2186_vm8, %v2179_v8, 920167782  ;;  %vm7684_vm11 = vcmp.lt.s32.totalorder %v7683_v59, 0 }
 0x3ce   :  { %8323 = vcosq.f32 %v2343_v58  ;;  %vm2184_vm12 = vcmp.lt.s32.totalorder %v2164_v41, 2  ;;  %v2193_v22 = vsel %vm2185_vm9, %v2176_v35, %v2192_v40  ;;  %v5654_v43 = vsel %vm7684_vm11, 0, %v7683_v59 }
 0x3cf   :  { %8325 = vsinq.f32 %v2343_v58  ;;  %v2187_v23 = vsel %vm2183_vm7, %v2167_v1, %v2170_v28  ;;  %v2194_v34 = vsel %vm2184_vm12, %v2191_v33, %v2193_v22  ;;  %v2195_v14 = vsel %vm2183_vm7, %v2173_v39, %v2176_v35 }
 0x3d0   :  { %v5655_v37 = vsub.s32 32, %v5654_v43  ;;  %v5659_v16 = vsub.s32 4294967266, %v5654_v43  ;;  %v2189_v17 = vsel %vm2185_vm9, %v2173_v39, %v2188_v12  ;;  %v2196_v30 = vsel %vm2186_vm8, %v2182_v38, 1326507024 }
 0x3d1   :  { %v5656_v18 = vshll.u32 %v11145_v11, %v5654_v43  ;;  %v2197_v53 = vsel %vm2185_vm9, %v2179_v8, %v2196_v30  ;;  %v11184_v26 = vmul.u32.u64.low %v2199_v6, %v2194_v34  ;;  %v11185_v27 = vmul.u32.u64.high %v2199_v6, %v2194_v34, %v11184_v26 }
 0x3d2   :  { %v5657_v45 = vshrl.u32 %v5639_v62, %v5655_v37  ;;  %v5660_v3 = vadd.s32 127, %v5659_v16  ;;  %v2198_v21 = vsel %vm2184_vm12, %v2195_v14, %v2197_v53  ;;  %v5489_v24 = vadd.s32 1, %v7677_v51 }
 0x3d3   :  { %v5672_v15 = vsel %vm11161_vm6, 0, %v5670_v0  ;;  %v11191_v4 = vmul.u32.u64.low %v2199_v6, %v2198_v21  ;;  %v11192_v9 = vmul.u32.u64.high %v2199_v6, %v2198_v21, %v11191_v4  ;;  %v5479_v63 = vand.u32 2147483647, %v11127_v25 }
 0x3d4   :  { %v5658_v11 = vor.u32 %v5657_v45, %v5656_v18  ;;  %v5661_v56 = vshll.u32 %v5660_v3, 23  ;;  %v2190_v10 = vsel %vm2184_vm12, %v2187_v23, %v2189_v17  ;;  %vm5490_vm10 = vcmp.gt.s32.totalorder %v5489_v24, 0 }
 0x3d5   :  { %v2209_v19 = vadd.s32 1, %v11185_v27  ;;  %v5491_v62 = vsel %vm5490_vm10, %v5489_v24, 0  ;;  %vm2350_vm14 = vcmp.lt.s32.totalorder %v11142_v49, 2  ;;  %vm2351_vm13 = vcmp.eq.s32.totalorder %v11142_v49, 0 }
 0x3d6   :  { %vm2354_vm15 = vcmp.eq.s32.totalorder %v11142_v49, 2  ;;  %v5662_v42 = vor.u32 4788187, %v5661_v56  ;;  %v5493_v46 = vand.u32 31, %v5491_v62  ;;  %vm2347_vm1 = vweird.f32 %v10893_v5 }
 0x3d7   :  { %v5676_v55 = vadd.s32 3, %v5672_v15  ;;  %v2206_v28 = vmul.u32 %v2199_v6, %v2190_v10  ;;  %vm2208_vm2 = vc.u32 %v11192_v9, %v11184_v26  ;;  %v5486_v41 = vand.u32 8388607, %v5479_v63 }
 0x3d8   :  { %v5663_v39 = vand.u32 2147483647, %v5662_v42  ;;  %v5665_v35 = vcvt.s32.f32 %v5658_v11  ;;  %v2210_v57 = vsel %vm2208_vm2, %v2209_v19, %v11185_v27  ;;  %v5494_v8 = vsub.s32 32, %v5493_v46 }
 0x3d9   :  { %v2211_v60 = vadd.s32 %v2210_v57, %v2206_v28  ;;  %v11206_v29 = vshrl.u32 %v5491_v62, 5  ;;  %v5496_v20 = vshll.u32 %v8477_v44, %v5493_v46  ;;  %v11210_v0 = vadd.f32 %v10890_v13, %v7863_v32 }
 0x3da   :  { %v5666_v51 = vmul.f32 %v5665_v35, %v5663_v39  ;;  %v5497_v36 = vshrl.u32 %v8478_v48, %v5494_v8  ;;  %v5499_v1 = vshll.u32 %v8478_v48, %v5493_v46  ;;  %v5500_v38 = vshrl.u32 %v8479_v50, %v5494_v8 }
 0x3db   :  { %v8324_v6 = vpop.eup %8323  ;;  %v2212_v12 = vadd.s32 536870912, %v2211_v60  ;;  %v5502_v33 = vshll.u32 %v8479_v50, %v5493_v46  ;;  %v5503_v40 = vshrl.u32 %v8480_v52, %v5494_v8  ;;  %v5505_v23 = vshll.u32 %v8480_v52, %v5493_v46 }
 0x3dc   :  { %v8326_v58 = vpop.eup %8325  ;;  %v2355_v59 = vxor.u32 2147483648, %v8324_v6  ;;  %v5667_v43 = vxor.u32 2147483648, %v5666_v51  ;;  %v5506_v34 = vshrl.u32 %v8481_v54, %v5494_v8  ;;  %v5498_v16 = vor.u32 %v5497_v36, %v5496_v20 }
 0x3dd   :  { %v2352_v22 = vxor.u32 2147483648, %v8326_v58  ;;  %v11221_v37 = vshrl.u32 %v2212_v12, 30  ;;  %v5501_v17 = vor.u32 %v5500_v38, %v5499_v1  ;;  %v5508_v53 = vshll.u32 %v8481_v54, %v5493_v46 }
 0x3de   :  { %v2356_v14 = vsel %vm2354_vm15, %v2355_v59, %v8326_v58  ;;  %v5668_v18 = vsel %vm5585_vm5, %v5667_v43, %v5666_v51  ;;  %v5509_v27 = vshrl.u32 %v8482_v61, %v5494_v8  ;;  %v5504_v24 = vor.u32 %v5503_v40, %v5502_v33  ;;  %v7911_v58 = vpop.f32.mrf.mxu1 }
 0x3df   :  { %v2353_v30 = vsel %vm2351_vm13, %v8324_v6, %v2352_v22  ;;  %v5671_v3 = vsel %vm11161_vm6, %v10917_v47, %v5668_v18  ;;  %v2214_v21 = vshll.u32 %v11221_v37, 30  ;;  %v5507_v4 = vor.u32 %v5506_v34, %v5505_v23 }
 0x3e0   :  { %v2357_v45 = vsel %vm2350_vm14, %v2353_v30, %v2356_v14  ;;  %8327 = vcosq.f32 %v5671_v3  ;;  %v5510_v11 = vor.u32 %v5509_v27, %v5508_v53  ;;  %v11243_v56 = vand.u32 3, %v5676_v55 }
 0x3e1   :  { %v2358_v15 = vsel %vm2347_vm1, nan, %v2357_v45  ;;  %8329 = vsinq.f32 %v5671_v3  ;;  %v11241_v49 = vsub.s32 %v2211_v60, %v2214_v21  ;;  %v5487_v7 = vor.u32 8388608, %v5486_v41 }
 0x3e2   :  { %7367 = vst.msk [vmem:[%s13788_s3 + $0x78] sm:$0xff] %vm7351_vm0, %v2358_v15  ;;  %vm5511_vm3 = vcmp.lt.s32.totalorder %v11206_v29, 1  ;;  %v2466_v10 = vand.u32 2139095040, %v11210_v0  ;;  %vm5513_vm4 = vcmp.lt.s32.totalorder %v11206_v29, 3  ;;  %vm5514_vm5 = vcmp.lt.s32.totalorder %v11206_v29, 4 }
 0x3e3   :  { %v2217_v5 = vsub.s32 0, %v11241_v49  ;;  %v5519_v19 = vsel %vm5511_vm3, %v5498_v16, %v5501_v17  ;;  %v5495_v62 = vshrl.u32 %v8477_v44, %v5494_v8  ;;  %v5516_v42 = vsel %vm5514_vm5, %v5504_v24, 2102212464 }
 0x3e4   :  { %v5520_v46 = vsel %vm5514_vm5, %v5507_v4, 920167782  ;;  %v5524_v32 = vsel %vm5514_vm5, %v5510_v11, 1326507024  ;;  %vm5512_vm6 = vcmp.lt.s32.totalorder %v11206_v29, 2  ;;  %v5523_v41 = vsel %vm5511_vm3, %v5501_v17, %v5504_v24 }
 0x3e5   :  { %v7550_v55 = vmin.u32 %v2217_v5, %v11241_v49  ;;  %v5521_v28 = vsel %vm5513_vm4, %v5504_v24, %v5520_v46  ;;  %v5525_v35 = vsel %vm5513_vm4, %v5507_v4, %v5524_v32  ;;  %v5527_v57 = vshll.u32 %v5487_v7, 8 }
 0x3e6   :  { %v5522_v39 = vsel %vm5512_vm6, %v5519_v19, %v5521_v28  ;;  %v2467_v8 = vshrl.u32 %v2466_v10, 23  ;;  %v5515_v20 = vsel %vm5511_vm3, %v5495_v62, %v5498_v16  ;;  %v5517_v6 = vsel %vm5513_vm4, %v5501_v17, %v5516_v42 }
 0x3e7   :  { %v2219_v60 = vclz %v7550_v55  ;;  %v5526_v51 = vsel %vm5512_vm6, %v5523_v41, %v5525_v35  ;;  %v11269_v36 = vmul.u32.u64.low %v5527_v57, %v5522_v39  ;;  %v11270_v1 = vmul.u32.u64.high %v5527_v57, %v5522_v39, %v11269_v36 }
 0x3e8   :  { %v7561_v38 = vadd.s32 4294967169, %v2467_v8  ;;  %v2237_v12 = vsub.s32 4, %v11221_v37  ;;  %v11274_v33 = vmul.u32.u64.low %v5527_v57, %v5526_v51  ;;  %v11275_v40 = vmul.u32.u64.high %v5527_v57, %v5526_v51, %v11274_v33 }
 0x3e9   :  { %v7551_v59 = vadd.s32 4294967294, %v2219_v60  ;;  %vm5675_vm7 = vweird.f32 %v10917_v47  ;;  %vm5679_vm9 = vcmp.eq.s32.totalorder %v11243_v56, 0  ;;  %vm2153_vm8 = vcmp.lt.s32.totalorder %v10974_v2, 0 }
 0x3ea   :  { %v5518_v22 = vsel %vm5512_vm6, %v5515_v20, %v5517_v6  ;;  %v2473_v43 = vadd.s32 1, %v7561_v38  ;;  %vm5682_vm11 = vcmp.eq.s32.totalorder %v11243_v56, 2  ;;  %v2463_v23 = vand.u32 2147483647, %v11210_v0 }
 0x3eb   :  { %vm7552_vm12 = vcmp.lt.s32.totalorder %v7551_v59, 0  ;;  %v11285_v34 = vadd.f32 %v10890_v13, %v7911_v58  ;;  %v2207_v14 = vadd.s32 %v11184_v26, %v11192_v9  ;;  %v5537_v17 = vadd.s32 1, %v11270_v1 }
 0x3ec   :  { %v2222_v16 = vsel %vm7552_vm12, 0, %v7551_v59  ;;  %vm2474_vm10 = vcmp.gt.s32.totalorder %v2473_v43, 0  ;;  %v2238_v53 = vsel %vm2153_vm8, %v2237_v12, %v11221_v37  ;;  %v5534_v27 = vmul.u32 %v5527_v57, %v5518_v22 }
 0x3ed   :  { %v8328_v30 = vpop.eup %8327  ;;  %v2223_v18 = vsub.s32 32, %v2222_v16  ;;  %v2227_v29 = vsub.s32 4294967266, %v2222_v16  ;;  %v2224_v13 = vshll.u32 %v11241_v49, %v2222_v16  ;;  %vm5536_vm14 = vc.u32 %v11275_v40, %v11269_v36 }
 0x3ee   :  { %v8330_v45 = vpop.eup %8329  ;;  %v5683_v3 = vxor.u32 2147483648, %v8328_v30  ;;  %v2475_v26 = vsel %vm2474_vm10, %v2473_v43, 0  ;;  %v5538_v15 = vsel %vm5536_vm14, %v5537_v17, %v11270_v1  ;;  %v2470_v37 = vand.u32 8388607, %v2463_v23 }
 0x3ef   :  { %v5680_v9 = vxor.u32 2147483648, %v8330_v45  ;;  %v2225_v21 = vshrl.u32 %v2207_v14, %v2223_v18  ;;  %v2228_v24 = vadd.s32 127, %v2227_v29  ;;  %v5539_v11 = vadd.s32 %v5538_v15, %v5534_v27 }
 0x3f0   :  { %v5684_v4 = vsel %vm5682_vm11, %v5683_v3, %v8330_v45  ;;  %v2477_v7 = vand.u32 31, %v2475_v26  ;;  %vm5678_vm13 = vcmp.lt.s32.totalorder %v11243_v56, 2  ;;  %vm11306_vm15 = vcmp.le.f32.partialorder %v2151_v31, 0.7853982 }
 0x3f1   :  { %v5681_v49 = vsel %vm5679_vm9, %v8328_v30, %v5680_v9  ;;  %v2226_v10 = vor.u32 %v2225_v21, %v2224_v13  ;;  %v2229_v5 = vshll.u32 %v2228_v24, 23  ;;  %v5540_v42 = vadd.s32 536870912, %v5539_v11 }
 0x3f2   :  { %v5685_v19 = vsel %vm5678_vm13, %v5681_v49, %v5684_v4  ;;  %v2478_v46 = vsub.s32 32, %v2477_v7  ;;  %v2240_v28 = vsel %vm11306_vm15, 0, %v2238_v53  ;;  %v2471_v31 = vor.u32 8388608, %v2470_v37 }
 0x3f3   :  { %v5686_v32 = vsel %vm5675_vm7, nan, %v5685_v19  ;;  %v2230_v55 = vor.u32 4788187, %v2229_v5  ;;  %v11318_v56 = vshrl.u32 %v5540_v42, 30  ;;  %v5794_v39 = vand.u32 2139095040, %v11285_v34 }
 0x3f4   :  { %7399 = vst.msk [vmem:[%s13788_s3 + $0x178] sm:$0xff] %vm7351_vm0, %v5686_v32  ;;  %v2481_v41 = vshrl.u32 %v8478_v48, %v2478_v46  ;;  %v2233_v57 = vcvt.s32.f32 %v2226_v10  ;;  %v2484_v47 = vshrl.u32 %v8479_v50, %v2478_v46  ;;  %v2487_v8 = vshrl.u32 %v8480_v52, %v2478_v46 }
 0x3f5   :  { %v2231_v35 = vand.u32 2147483647, %v2230_v55  ;;  %v5542_v60 = vshll.u32 %v11318_v56, 30  ;;  %v2476_v20 = vshrl.u32 %v2475_v26, 5  ;;  %v2480_v6 = vshll.u32 %v8477_v44, %v2477_v7 }
 0x3f6   :  { %v2486_v51 = vshll.u32 %v8479_v50, %v2477_v7  ;;  %v2483_v38 = vshll.u32 %v8478_v48, %v2477_v7  ;;  %v2489_v58 = vshll.u32 %v8480_v52, %v2477_v7  ;;  %v2490_v59 = vshrl.u32 %v8481_v54, %v2478_v46 }
 0x3f7   :  { %v2234_v1 = vmul.f32 %v2233_v57, %v2231_v35  ;;  %v11330_v12 = vsub.s32 %v5539_v11, %v5542_v60  ;;  %v2482_v33 = vor.u32 %v2481_v41, %v2480_v6  ;;  %v2493_v43 = vshrl.u32 %v8482_v61, %v2478_v46 }
 0x3f8   :  { %v2488_v22 = vor.u32 %v2487_v8, %v2486_v51  ;;  %v2485_v16 = vor.u32 %v2484_v47, %v2483_v38  ;;  %v2491_v17 = vor.u32 %v2490_v59, %v2489_v58  ;;  %v2492_v30 = vshll.u32 %v8481_v54, %v2477_v7 }
 0x3f9   :  { %v2235_v14 = vxor.u32 2147483648, %v2234_v1  ;;  %v2244_v18 = vadd.s32 3, %v2240_v28  ;;  %v5545_v29 = vsub.s32 0, %v11330_v12  ;;  %v2511_v53 = vshll.u32 %v2471_v31, 8 }
 0x3fa   :  { %v5795_v27 = vshrl.u32 %v5794_v39, 23  ;;  %v2479_v3 = vshrl.u32 %v8477_v44, %v2478_v46  ;;  %v2494_v13 = vor.u32 %v2493_v43, %v2492_v30  ;;  %vm2498_vm1 = vcmp.lt.s32.totalorder %v2476_v20, 4 }
 0x3fb   :  { %v2236_v45 = vsel %vm2153_vm8, %v2235_v14, %v2234_v1  ;;  %v7678_v9 = vmin.u32 %v5545_v29, %v11330_v12  ;;  %vm2495_vm2 = vcmp.lt.s32.totalorder %v2476_v20, 1  ;;  %v2500_v21 = vsel %vm2498_vm1, %v2488_v22, 2102212464  ;;  %v456_v29 = vpop.f32.mrf.mxu0 }
 0x3fc   :  { %v2239_v26 = vsel %vm11306_vm15, %v10974_v2, %v2236_v45  ;;  %vm2496_vm3 = vcmp.lt.s32.totalorder %v2476_v20, 2  ;;  %v2503_v24 = vsel %vm2495_vm2, %v2482_v33, %v2485_v16  ;;  %v2504_v15 = vsel %vm2498_vm1, %v2491_v17, 920167782 }
 0x3fd   :  { %8331 = vcosq.f32 %v2239_v26  ;;  %v5547_v4 = vclz %v7678_v9  ;;  %vm2497_vm4 = vcmp.lt.s32.totalorder %v2476_v20, 3  ;;  %v2507_v11 = vsel %vm2495_vm2, %v2485_v16, %v2488_v22 }
 0x3fe   :  { %8333 = vsinq.f32 %v2239_v26  ;;  %v2499_v37 = vsel %vm2495_vm2, %v2479_v3, %v2482_v33  ;;  %v2501_v7 = vsel %vm2497_vm4, %v2485_v16, %v2500_v21  ;;  %v2505_v49 = vsel %vm2497_vm4, %v2488_v22, %v2504_v15 }
 0x3ff   :  { %v2508_v10 = vsel %vm2498_vm1, %v2494_v13, 1326507024  ;;  %v7679_v5 = vadd.s32 4294967294, %v5547_v4  ;;  %v5565_v19 = vsub.s32 4, %v11318_v56  ;;  %v2506_v62 = vsel %vm2496_vm3, %v2503_v24, %v2505_v49 }
 0x400   :  { %v2509_v42 = vsel %vm2497_vm4, %v2491_v17, %v2508_v10  ;;  %v11348_v32 = vmul.u32.u64.low %v2511_v53, %v2506_v62  ;;  %v11349_v55 = vmul.u32.u64.high %v2511_v53, %v2506_v62, %v11348_v32  ;;  %v7689_v28 = vadd.s32 4294967169, %v5795_v27 }
 0x401   :  { %v2510_v46 = vsel %vm2496_vm3, %v2507_v11, %v2509_v42  ;;  %vm7680_vm5 = vcmp.lt.s32.totalorder %v7679_v5, 0  ;;  %v2502_v31 = vsel %vm2496_vm3, %v2499_v37, %v2501_v7  ;;  %v2245_v35 = vand.u32 3, %v2244_v18  ;;  %v11387_v11 = vld [vmem:[%s13787_s2] ss:$0 sm:$0xff] }
 0x402   :  { %v11353_v41 = vmul.u32.u64.low %v2511_v53, %v2510_v46  ;;  %v11354_v39 = vmul.u32.u64.high %v2511_v53, %v2510_v46, %v11353_v41  ;;  %vm5481_vm6 = vcmp.lt.s32.totalorder %v11127_v25, 0  ;;  %v5550_v57 = vsel %vm7680_vm5, 0, %v7679_v5 }
 0x403   :  { %v5801_v47 = vadd.s32 1, %v7689_v28  ;;  %v5535_v8 = vadd.s32 %v11269_v36, %v11275_v40  ;;  %v5551_v60 = vsub.s32 32, %v5550_v57  ;;  %v5555_v6 = vsub.s32 4294967266, %v5550_v57 }
 0x404   :  { %v5791_v51 = vand.u32 2147483647, %v11285_v34  ;;  %v5566_v20 = vsel %vm5481_vm6, %v5565_v19, %v11318_v56  ;;  %v2518_v1 = vmul.u32 %v2511_v53, %v2502_v31  ;;  %v2521_v38 = vadd.s32 1, %v11349_v55 }
 0x405   :  { %vm5802_vm7 = vcmp.gt.s32.totalorder %v5801_v47, 0  ;;  %v5552_v58 = vshll.u32 %v11330_v12, %v5550_v57  ;;  %v5553_v59 = vshrl.u32 %v5535_v8, %v5551_v60  ;;  %v5556_v33 = vadd.s32 127, %v5555_v6 }
 0x406   :  { %vm2520_vm9 = vc.u32 %v11354_v39, %v11348_v32  ;;  %vm11369_vm8 = vcmp.le.f32.partialorder %v5479_v63, 0.7853982  ;;  %v5803_v56 = vsel %vm5802_vm7, %v5801_v47, 0  ;;  %vm2243_vm11 = vweird.f32 %v10974_v2 }
 0x407   :  { %v2522_v40 = vsel %vm2520_vm9, %v2521_v38, %v11349_v55  ;;  %v5554_v22 = vor.u32 %v5553_v59, %v5552_v58  ;;  %v5557_v43 = vshll.u32 %v5556_v33, 23  ;;  %v5568_v14 = vsel %vm11369_vm8, 0, %v5566_v20 }
 0x408   :  { %v2523_v12 = vadd.s32 %v2522_v40, %v2518_v1  ;;  %v5798_v16 = vand.u32 8388607, %v5791_v51  ;;  %v5805_v17 = vand.u32 31, %v5803_v56  ;;  %vm2246_vm12 = vcmp.lt.s32.totalorder %v2245_v35, 2 }
 0x409   :  { %vm2247_vm10 = vcmp.eq.s32.totalorder %v2245_v35, 0  ;;  %v5558_v63 = vor.u32 4788187, %v5557_v43  ;;  %vm2250_vm14 = vcmp.eq.s32.totalorder %v2245_v35, 2  ;;  %v11379_v45 = vadd.s32 3, %v5568_v14 }
 0x40a   :  { %v8332_v30 = vpop.eup %8331  ;;  %v2524_v18 = vadd.s32 536870912, %v2523_v12  ;;  %v5806_v3 = vsub.s32 32, %v5805_v17  ;;  %v5561_v9 = vcvt.s32.f32 %v5554_v22  ;;  %v5799_v15 = vor.u32 8388608, %v5798_v16 }
 0x40b   :  { %v8334_v53 = vpop.eup %8333  ;;  %v2251_v27 = vxor.u32 2147483648, %v8332_v30  ;;  %v5559_v26 = vand.u32 2147483647, %v5558_v63  ;;  %v11390_v37 = vadd.f32 %v11387_v11, %v456_v29  ;;  %v5808_v62 = vshll.u32 %v8477_v44, %v5805_v17 }
 0x40c   :  { %v2248_v13 = vxor.u32 2147483648, %v8334_v53  ;;  %v11381_v21 = vshrl.u32 %v2524_v18, 30  ;;  %v5809_v4 = vshrl.u32 %v8478_v48, %v5806_v3  ;;  %v5812_v5 = vshrl.u32 %v8479_v50, %v5806_v3 }
 0x40d   :  { %v2252_v24 = vsel %vm2250_vm14, %v2251_v27, %v8334_v53  ;;  %v5562_v49 = vmul.f32 %v5561_v9, %v5559_v26  ;;  %v5811_v42 = vshll.u32 %v8478_v48, %v5805_v17  ;;  %v5815_v46 = vshrl.u32 %v8480_v52, %v5806_v3 }
 0x40e   :  { %v2249_v7 = vsel %vm2247_vm10, %v8332_v30, %v2248_v13  ;;  %v2526_v10 = vshll.u32 %v11381_v21, 30  ;;  %v5814_v41 = vshll.u32 %v8479_v50, %v5805_v17  ;;  %v5804_v35 = vshrl.u32 %v5803_v56, 5 }
 0x40f   :  { %v2253_v19 = vsel %vm2246_vm12, %v2249_v7, %v2252_v24  ;;  %v5563_v28 = vxor.u32 2147483648, %v5562_v49  ;;  %v5810_v57 = vor.u32 %v5809_v4, %v5808_v62  ;;  %v5817_v47 = vshll.u32 %v8480_v52, %v5805_v17 }
 0x410   :  { %v2254_v55 = vsel %vm2243_vm11, nan, %v2253_v19  ;;  %v11401_v31 = vsub.s32 %v2523_v12, %v2526_v10  ;;  %v5818_v8 = vshrl.u32 %v8481_v54, %v5806_v3  ;;  %v5813_v6 = vor.u32 %v5812_v5, %v5811_v42  ;;  %v616_v42 = vpop.f32.mrf.mxu1 }
 0x411   :  { %7366 = vst.msk [vmem:[%s13788_s3 + $0x70] sm:$0xff] %vm7351_vm0, %v2254_v55  ;;  %v5564_v2 = vsel %vm5481_vm6, %v5563_v28, %v5562_v49  ;;  %v5816_v20 = vor.u32 %v5815_v46, %v5814_v41  ;;  %v5820_v58 = vshll.u32 %v8481_v54, %v5805_v17  ;;  %v5821_v59 = vshrl.u32 %v8482_v61, %v5806_v3 }
 0x412   :  { %v2529_v60 = vsub.s32 0, %v11401_v31  ;;  %v5567_v1 = vsel %vm11369_vm8, %v11127_v25, %v5564_v2  ;;  %v5819_v38 = vor.u32 %v5818_v8, %v5817_v47  ;;  %v5839_v40 = vshll.u32 %v5799_v15, 8 }
 0x413   :  { %8335 = vcosq.f32 %v5567_v1  ;;  %v2362_v56 = vand.u32 2139095040, %v11390_v37  ;;  %v5807_v22 = vshrl.u32 %v8477_v44, %v5806_v3  ;;  %v5822_v43 = vor.u32 %v5821_v59, %v5820_v58 }
 0x414   :  { %v7562_v33 = vmin.u32 %v2529_v60, %v11401_v31  ;;  %8337 = vsinq.f32 %v5567_v1  ;;  %vm5823_vm13 = vcmp.lt.s32.totalorder %v5804_v35, 1  ;;  %vm5824_vm15 = vcmp.lt.s32.totalorder %v5804_v35, 2 }
 0x415   :  { %vm5825_vm1 = vcmp.lt.s32.totalorder %v5804_v35, 3  ;;  %vm5826_vm2 = vcmp.lt.s32.totalorder %v5804_v35, 4  ;;  %v5831_v12 = vsel %vm5823_vm13, %v5810_v57, %v5813_v6  ;;  %v5835_v17 = vsel %vm5823_vm13, %v5813_v6, %v5816_v20 }
 0x416   :  { %v2531_v14 = vclz %v7562_v33  ;;  %v5828_v36 = vsel %vm5826_vm2, %v5816_v20, 2102212464  ;;  %v5832_v16 = vsel %vm5826_vm2, %v5819_v38, 920167782  ;;  %v5827_v63 = vsel %vm5823_vm13, %v5807_v22, %v5810_v57 }
 0x417   :  { %v5833_v18 = vsel %vm5825_vm1, %v5816_v20, %v5832_v16  ;;  %v5836_v29 = vsel %vm5826_vm2, %v5822_v43, 1326507024  ;;  %v5829_v53 = vsel %vm5825_vm1, %v5813_v6, %v5828_v36  ;;  %v2363_v26 = vshrl.u32 %v2362_v56, 23 }
 0x418   :  { %v7563_v30 = vadd.s32 4294967294, %v2531_v14  ;;  %v5834_v27 = vsel %vm5824_vm15, %v5831_v12, %v5833_v18  ;;  %v5837_v13 = vsel %vm5825_vm1, %v5819_v38, %v5836_v29  ;;  %v2519_v15 = vadd.s32 %v11348_v32, %v11354_v39 }
 0x419   :  { %v5838_v3 = vsel %vm5824_vm15, %v5835_v17, %v5837_v13  ;;  %v11423_v9 = vmul.u32.u64.low %v5839_v40, %v5834_v27  ;;  %v11424_v24 = vmul.u32.u64.high %v5839_v40, %v5834_v27, %v11423_v9  ;;  %v5830_v19 = vsel %vm5824_vm15, %v5827_v63, %v5829_v53 }
 0x41a   :  { %vm7564_vm3 = vcmp.lt.s32.totalorder %v7563_v30, 0  ;;  %v11429_v7 = vmul.u32.u64.low %v5839_v40, %v5838_v3  ;;  %v11430_v49 = vmul.u32.u64.high %v5839_v40, %v5838_v3, %v11429_v7  ;;  %v7557_v62 = vadd.s32 4294967169, %v2363_v26 }
 0x41b   :  { %v2534_v4 = vsel %vm7564_vm3, 0, %v7563_v30  ;;  %v5573_v46 = vand.u32 3, %v11379_v45  ;;  %v2549_v28 = vsub.s32 4, %v11381_v21  ;;  %v2359_v41 = vand.u32 2147483647, %v11390_v37 }
 0x41c   :  { %v2535_v10 = vsub.s32 32, %v2534_v4  ;;  %v2539_v5 = vsub.s32 4294967266, %v2534_v4  ;;  %v2536_v55 = vshll.u32 %v11401_v31, %v2534_v4  ;;  %vm5571_vm4 = vweird.f32 %v11127_v25 }
 0x41d   :  { %v5849_v57 = vadd.s32 1, %v11424_v24  ;;  %v2369_v47 = vadd.s32 1, %v7557_v62  ;;  %vm2465_vm5 = vcmp.lt.s32.totalorder %v11210_v0, 0  ;;  %v5846_v35 = vmul.u32 %v5839_v40, %v5830_v19 }
 0x41e   :  { %v2537_v32 = vshrl.u32 %v2519_v15, %v2535_v10  ;;  %v2540_v39 = vadd.s32 127, %v2539_v5  ;;  %vm5848_vm6 = vc.u32 %v11430_v49, %v11423_v9  ;;  %v11443_v45 = vadd.f32 %v11387_v11, %v616_v42 }
 0x41f   :  { %v5850_v2 = vsel %vm5848_vm6, %v5849_v57, %v11424_v24  ;;  %vm2370_vm7 = vcmp.gt.s32.totalorder %v2369_v47, 0  ;;  %vm5578_vm9 = vcmp.eq.s32.totalorder %v5573_v46, 2  ;;  %vm11448_vm8 = vcmp.le.f32.partialorder %v2463_v23, 0.7853982 }
 0x420   :  { %v2538_v31 = vor.u32 %v2537_v32, %v2536_v55  ;;  %v2541_v8 = vshll.u32 %v2540_v39, 23  ;;  %v8336_v60 = vpop.eup %8335  ;;  %v5851_v20 = vadd.s32 %v5850_v2, %v5846_v35  ;;  %v2371_v1 = vsel %vm2370_vm7, %v2369_v47, 0 }
 0x421   :  { %v8338_v38 = vpop.eup %8337  ;;  %v5579_v58 = vxor.u32 2147483648, %v8336_v60  ;;  %v11455_v33 = vsel %vm2465_vm5, %v2549_v28, %v11381_v21  ;;  %v2366_v40 = vand.u32 8388607, %v2359_v41  ;;  %v2373_v43 = vand.u32 31, %v2371_v1 }
 0x422   :  { %v2542_v59 = vor.u32 4788187, %v2541_v8  ;;  %v5576_v56 = vxor.u32 2147483648, %v8338_v38  ;;  %v5852_v22 = vadd.s32 536870912, %v5851_v20  ;;  %v5690_v23 = vand.u32 2139095040, %v11443_v45 }
 0x423   :  { %vm5575_vm11 = vcmp.eq.s32.totalorder %v5573_v46, 0  ;;  %v5580_v14 = vsel %vm5578_vm9, %v5579_v58, %v8338_v38  ;;  %v2545_v12 = vcvt.s32.f32 %v2538_v31  ;;  %vm5574_vm12 = vcmp.lt.s32.totalorder %v5573_v46, 2 }
 0x424   :  { %v2543_v36 = vand.u32 2147483647, %v2542_v59  ;;  %v5577_v16 = vsel %vm5575_vm11, %v8336_v60, %v5576_v56  ;;  %v11460_v17 = vshrl.u32 %v5852_v22, 30  ;;  %v2374_v30 = vsub.s32 32, %v2373_v43 }
 0x425   :  { %v5581_v63 = vsel %vm5574_vm12, %v5577_v16, %v5580_v14  ;;  %v2552_v18 = vsel %vm11448_vm8, 0, %v11455_v33  ;;  %v2367_v29 = vor.u32 8388608, %v2366_v40  ;;  %v2376_v13 = vshll.u32 %v8477_v44, %v2373_v43 }
 0x426   :  { %v2546_v21 = vmul.f32 %v2545_v12, %v2543_v36  ;;  %v5582_v53 = vsel %vm5571_vm4, nan, %v5581_v63  ;;  %v5854_v27 = vshll.u32 %v11460_v17, 30  ;;  %v5691_v26 = vshrl.u32 %v5690_v23, 23 }
 0x427   :  { %7398 = vst.msk [vmem:[%s13788_s3 + $0x170] sm:$0xff] %vm7351_vm0, %v5582_v53  ;;  %v2377_v24 = vshrl.u32 %v8478_v48, %v2374_v30  ;;  %v2380_v15 = vshrl.u32 %v8479_v50, %v2374_v30  ;;  %v2383_v4 = vshrl.u32 %v8480_v52, %v2374_v30  ;;  %v2379_v25 = vshll.u32 %v8478_v48, %v2373_v43 }
 0x428   :  { %v2547_v3 = vxor.u32 2147483648, %v2546_v21  ;;  %v11476_v7 = vsub.s32 %v5851_v20, %v5854_v27  ;;  %v2382_v10 = vshll.u32 %v8479_v50, %v2373_v43  ;;  %v2386_v5 = vshrl.u32 %v8481_v54, %v2374_v30 }
 0x429   :  { %v2372_v62 = vshrl.u32 %v2371_v1, 5  ;;  %v2378_v42 = vor.u32 %v2377_v24, %v2376_v13  ;;  %v2385_v46 = vshll.u32 %v8480_v52, %v2373_v43  ;;  %v2381_v32 = vor.u32 %v2380_v15, %v2379_v25 }
 0x42a   :  { %v2548_v19 = vsel %vm2465_vm5, %v2547_v3, %v2546_v21  ;;  %v5857_v28 = vsub.s32 0, %v11476_v7  ;;  %v2384_v39 = vor.u32 %v2383_v4, %v2382_v10  ;;  %vm5793_vm10 = vcmp.lt.s32.totalorder %v11285_v34, 0 }
 0x42b   :  { %v2551_v55 = vsel %vm11448_vm8, %v11210_v0, %v2548_v19  ;;  %v2387_v57 = vor.u32 %v2386_v5, %v2385_v46  ;;  %v2388_v47 = vshll.u32 %v8481_v54, %v2373_v43  ;;  %v2389_v35 = vshrl.u32 %v8482_v61, %v2374_v30 }
 0x42c   :  { %8339 = vcosq.f32 %v2551_v55  ;;  %v7690_v31 = vmin.u32 %v5857_v28, %v11476_v7  ;;  %v2407_v8 = vshll.u32 %v2367_v29, 8  ;;  %v7685_v2 = vadd.s32 4294967169, %v5691_v26 }
 0x42d   :  { %8341 = vsinq.f32 %v2551_v55  ;;  %v2375_v60 = vshrl.u32 %v8477_v44, %v2374_v30  ;;  %v2390_v6 = vor.u32 %v2389_v35, %v2388_v47  ;;  %vm2391_vm14 = vcmp.lt.s32.totalorder %v2372_v62, 1  ;;  %v7866_v35 = vpop.f32.mrf.mxu0 }
 0x42e   :  { %vm2392_vm13 = vcmp.lt.s32.totalorder %v2372_v62, 2  ;;  %v5859_v20 = vclz %v7690_v31  ;;  %vm2393_vm15 = vcmp.lt.s32.totalorder %v2372_v62, 3  ;;  %vm2394_vm1 = vcmp.lt.s32.totalorder %v2372_v62, 4 }
 0x42f   :  { %v2399_v1 = vsel %vm2391_vm14, %v2378_v42, %v2381_v32  ;;  %v2396_v38 = vsel %vm2394_vm1, %v2384_v39, 2102212464  ;;  %v2400_v58 = vsel %vm2394_vm1, %v2387_v57, 920167782  ;;  %v2403_v59 = vsel %vm2391_vm14, %v2381_v32, %v2384_v39 }
 0x430   :  { %v2404_v33 = vsel %vm2394_vm1, %v2390_v6, 1326507024  ;;  %v7691_v40 = vadd.s32 4294967294, %v5859_v20  ;;  %v5877_v56 = vsub.s32 4, %v11460_v17  ;;  %v2401_v22 = vsel %vm2393_vm15, %v2384_v39, %v2400_v58 }
 0x431   :  { %v2405_v43 = vsel %vm2393_vm15, %v2387_v57, %v2404_v33  ;;  %v2556_v23 = vadd.s32 3, %v2552_v18  ;;  %v2395_v14 = vsel %vm2391_vm14, %v2375_v60, %v2378_v42  ;;  %v2402_v36 = vsel %vm2392_vm13, %v2399_v1, %v2401_v22 }
 0x432   :  { %v2406_v12 = vsel %vm2392_vm13, %v2403_v59, %v2405_v43  ;;  %vm7692_vm2 = vcmp.lt.s32.totalorder %v7691_v40, 0  ;;  %v2397_v16 = vsel %vm2393_vm15, %v2381_v32, %v2396_v38  ;;  %v5697_v27 = vadd.s32 1, %v7685_v2 }
 0x433   :  { %v11499_v30 = vmul.u32.u64.low %v2407_v8, %v2406_v12  ;;  %v11500_v63 = vmul.u32.u64.high %v2407_v8, %v2406_v12, %v11499_v30  ;;  %v5862_v21 = vsel %vm7692_vm2, 0, %v7691_v40  ;;  %v5847_v18 = vadd.s32 %v11423_v9, %v11430_v49 }
 0x434   :  { %v11502_v29 = vmul.u32.u64.low %v2407_v8, %v2402_v36  ;;  %v11503_v53 = vmul.u32.u64.high %v2407_v8, %v2402_v36, %v11502_v29  ;;  %v5863_v13 = vsub.s32 32, %v5862_v21  ;;  %v5867_v26 = vsub.s32 4294967266, %v5862_v21 }
 0x435   :  { %v5878_v3 = vsel %vm5793_vm10, %v5877_v56, %v11460_v17  ;;  %vm2555_vm3 = vweird.f32 %v11210_v0  ;;  %v2557_v24 = vand.u32 3, %v2556_v23  ;;  %vm11514_vm4 = vcmp.le.f32.partialorder %v5791_v51, 0.7853982 }
 0x436   :  { %v2398_v4 = vsel %vm2392_vm13, %v2395_v14, %v2397_v16  ;;  %vm5698_vm5 = vcmp.gt.s32.totalorder %v5697_v27, 0  ;;  %v5864_v9 = vshll.u32 %v11476_v7, %v5862_v21  ;;  %v5865_v49 = vshrl.u32 %v5847_v18, %v5863_v13 }
 0x437   :  { %v5868_v25 = vadd.s32 127, %v5867_v26  ;;  %vm2416_vm6 = vc.u32 %v11500_v63, %v11502_v29  ;;  %v5880_v17 = vsel %vm11514_vm4, 0, %v5878_v3  ;;  %v2417_v10 = vadd.s32 1, %v11503_v53 }
 0x438   :  { %v5687_v51 = vand.u32 2147483647, %v11443_v45  ;;  %v5699_v5 = vsel %vm5698_vm5, %v5697_v27, 0  ;;  %v5866_v42 = vor.u32 %v5865_v49, %v5864_v9  ;;  %v2414_v46 = vmul.u32 %v2407_v8, %v2398_v4 }
 0x439   :  { %v8340_v19 = vpop.eup %8339  ;;  %v5869_v62 = vshll.u32 %v5868_v25, 23  ;;  %v5701_v55 = vand.u32 31, %v5699_v5  ;;  %vm2558_vm7 = vcmp.lt.s32.totalorder %v2557_v24, 2  ;;  %vm2559_vm9 = vcmp.eq.s32.totalorder %v2557_v24, 0 }
 0x43a   :  { %v8342_v28 = vpop.eup %8341  ;;  %v2563_v7 = vxor.u32 2147483648, %v8340_v19  ;;  %v2418_v32 = vsel %vm2416_vm6, %v2417_v10, %v11503_v53  ;;  %vm2562_vm8 = vcmp.eq.s32.totalorder %v2557_v24, 2  ;;  %v5884_v2 = vadd.s32 3, %v5880_v17 }
 0x43b   :  { %v2560_v39 = vxor.u32 2147483648, %v8342_v28  ;;  %v5870_v57 = vor.u32 4788187, %v5869_v62  ;;  %v2419_v47 = vadd.s32 %v2418_v32, %v2414_v46  ;;  %v5694_v60 = vand.u32 8388607, %v5687_v51 }
 0x43c   :  { %v2564_v31 = vsel %vm2562_vm8, %v2563_v7, %v8342_v28  ;;  %v5702_v6 = vsub.s32 32, %v5701_v55  ;;  %v5873_v1 = vcvt.s32.f32 %v5866_v42  ;;  %v11533_v40 = vadd.f32 %v11387_v11, %v7866_v35 }
 0x43d   :  { %v2561_v20 = vsel %vm2559_vm9, %v8340_v19, %v2560_v39  ;;  %v5871_v8 = vand.u32 2147483647, %v5870_v57  ;;  %v2420_v38 = vadd.s32 536870912, %v2419_v47  ;;  %v5700_v14 = vshrl.u32 %v5699_v5, 5 }
 0x43e   :  { %v2565_v58 = vsel %vm2558_vm7, %v2561_v20, %v2564_v31  ;;  %v5705_v59 = vshrl.u32 %v8478_v48, %v5702_v6  ;;  %v5708_v33 = vshrl.u32 %v8479_v50, %v5702_v6  ;;  %v5711_v23 = vshrl.u32 %v8480_v52, %v5702_v6  ;;  %v7914_v20 = vpop.f32.mrf.mxu1 }
 0x43f   :  { %v2566_v56 = vsel %vm2555_vm3, nan, %v2565_v58  ;;  %v5874_v22 = vmul.f32 %v5873_v1, %v5871_v8  ;;  %v11537_v43 = vshrl.u32 %v2420_v38, 30  ;;  %v5704_v36 = vshll.u32 %v8477_v44, %v5701_v55 }
 0x440   :  { %7369 = vst.msk [vmem:[%s13788_s3 + $0x88] sm:$0xff] %vm7351_vm0, %v2566_v56  ;;  %v5707_v12 = vshll.u32 %v8478_v48, %v5701_v55  ;;  %v5714_v16 = vshrl.u32 %v8481_v54, %v5702_v6  ;;  %v5710_v21 = vshll.u32 %v8479_v50, %v5701_v55  ;;  %v5713_v53 = vshll.u32 %v8480_v52, %v5701_v55 }
 0x441   :  { %v5875_v30 = vxor.u32 2147483648, %v5874_v22  ;;  %v2422_v0 = vshll.u32 %v11537_v43, 30  ;;  %v5706_v27 = vor.u32 %v5705_v59, %v5704_v36  ;;  %v5716_v13 = vshll.u32 %v8481_v54, %v5701_v55 }
 0x442   :  { %v5709_v18 = vor.u32 %v5708_v33, %v5707_v12  ;;  %v5717_v26 = vshrl.u32 %v8482_v61, %v5702_v6  ;;  %v5712_v4 = vor.u32 %v5711_v23, %v5710_v21  ;;  %v5715_v9 = vor.u32 %v5714_v16, %v5713_v53 }
 0x443   :  { %v5876_v3 = vsel %vm5793_vm10, %v5875_v30, %v5874_v22  ;;  %v11554_v24 = vsub.s32 %v2419_v47, %v2422_v0  ;;  %v11559_v25 = vand.u32 3, %v5884_v2  ;;  %v5695_v17 = vor.u32 8388608, %v5694_v60 }
 0x444   :  { %v5879_v49 = vsel %vm11514_vm4, %v11285_v34, %v5876_v3  ;;  %v5718_v10 = vor.u32 %v5717_v26, %v5716_v13  ;;  %v5703_v19 = vshrl.u32 %v8477_v44, %v5702_v6  ;;  %v2674_v42 = vand.u32 2139095040, %v11533_v40 }
 0x445   :  { %8343 = vcosq.f32 %v5879_v49  ;;  %v2425_v5 = vsub.s32 0, %v11554_v24  ;;  %vm5719_vm11 = vcmp.lt.s32.totalorder %v5700_v14, 1  ;;  %vm5721_vm12 = vcmp.lt.s32.totalorder %v5700_v14, 3 }
 0x446   :  { %8345 = vsinq.f32 %v5879_v49  ;;  %vm5722_vm10 = vcmp.lt.s32.totalorder %v5700_v14, 4  ;;  %v5727_v15 = vsel %vm5719_vm11, %v5706_v27, %v5709_v18  ;;  %v5731_v7 = vsel %vm5719_vm11, %v5709_v18, %v5712_v4 }
 0x447   :  { %v7558_v62 = vmin.u32 %v2425_v5, %v11554_v24  ;;  %v5724_v46 = vsel %vm5722_vm10, %v5712_v4, 2102212464  ;;  %v5728_v55 = vsel %vm5722_vm10, %v5715_v9, 920167782  ;;  %v5732_v32 = vsel %vm5722_vm10, %v5718_v10, 1326507024 }
 0x448   :  { %v5729_v28 = vsel %vm5721_vm12, %v5712_v4, %v5728_v55  ;;  %v5735_v39 = vshll.u32 %v5695_v17, 8  ;;  %v2445_v47 = vsub.s32 4, %v11537_v43  ;;  %vm5720_vm14 = vcmp.lt.s32.totalorder %v5700_v14, 2 }
 0x449   :  { %v2427_v57 = vclz %v7558_v62  ;;  %v5723_v35 = vsel %vm5719_vm11, %v5703_v19, %v5706_v27  ;;  %v5725_v31 = vsel %vm5721_vm12, %v5709_v18, %v5724_v46  ;;  %v5730_v2 = vsel %vm5720_vm14, %v5727_v15, %v5729_v28 }
 0x44a   :  { %v5733_v60 = vsel %vm5721_vm12, %v5715_v9, %v5732_v32  ;;  %v2675_v6 = vshrl.u32 %v2674_v42, 23  ;;  %v11569_v38 = vmul.u32.u64.low %v5735_v39, %v5730_v2  ;;  %v11570_v58 = vmul.u32.u64.high %v5735_v39, %v5730_v2, %v11569_v38 }
 0x44b   :  { %v7559_v8 = vadd.s32 4294967294, %v2427_v57  ;;  %v5734_v1 = vsel %vm5720_vm14, %v5731_v7, %v5733_v60  ;;  %vm2361_vm13 = vcmp.lt.s32.totalorder %v11390_v37, 0  ;;  %vm11578_vm15 = vcmp.le.f32.partialorder %v2359_v41, 0.7853982 }
 0x44c   :  { %v11573_v59 = vmul.u32.u64.low %v5735_v39, %v5734_v1  ;;  %v11574_v33 = vmul.u32.u64.high %v5735_v39, %v5734_v1, %v11573_v59  ;;  %v7569_v56 = vadd.s32 4294967169, %v2675_v6  ;;  %v5726_v23 = vsel %vm5720_vm14, %v5723_v35, %v5725_v31 }
 0x44d   :  { %vm7560_vm1 = vcmp.lt.s32.totalorder %v7559_v8, 0  ;;  %v11583_v14 = vadd.f32 %v11387_v11, %v7914_v20  ;;  %vm5886_vm2 = vcmp.lt.s32.totalorder %v11559_v25, 2  ;;  %v2415_v36 = vadd.s32 %v11502_v29, %v11500_v63 }
 0x44e   :  { %v2430_v12 = vsel %vm7560_vm1, 0, %v7559_v8  ;;  %v2671_v16 = vand.u32 2147483647, %v11533_v40  ;;  %v2681_v30 = vadd.s32 1, %v7569_v56  ;;  %vm5883_vm3 = vweird.f32 %v11285_v34 }
 0x44f   :  { %v2431_v41 = vsub.s32 32, %v2430_v12  ;;  %v2435_v0 = vsub.s32 4294967266, %v2430_v12  ;;  %v2446_v21 = vsel %vm2361_vm13, %v2445_v47, %v11537_v43  ;;  %v5745_v53 = vadd.s32 1, %v11570_v58 }
 0x450   :  { %v2432_v27 = vshll.u32 %v11554_v24, %v2430_v12  ;;  %v5742_v18 = vmul.u32 %v5735_v39, %v5726_v23  ;;  %vm5744_vm4 = vc.u32 %v11574_v33, %v11569_v38  ;;  %vm2682_vm5 = vcmp.gt.s32.totalorder %v2681_v30, 0 }
 0x451   :  { %v2433_v63 = vshrl.u32 %v2415_v36, %v2431_v41  ;;  %v2436_v29 = vadd.s32 127, %v2435_v0  ;;  %v5746_v13 = vsel %vm5744_vm4, %v5745_v53, %v11570_v58  ;;  %v2683_v26 = vsel %vm2682_vm5, %v2681_v30, 0 }
 0x452   :  { %v8344_v3 = vpop.eup %8343  ;;  %v2448_v4 = vsel %vm11578_vm15, 0, %v2446_v21  ;;  %v5747_v9 = vadd.s32 %v5746_v13, %v5742_v18  ;;  %v2678_v43 = vand.u32 8388607, %v2671_v16  ;;  %v2685_v49 = vand.u32 31, %v2683_v26 }
 0x453   :  { %v8346_v17 = vpop.eup %8345  ;;  %vm5887_vm6 = vcmp.eq.s32.totalorder %v11559_v25, 0  ;;  %v5891_v24 = vxor.u32 2147483648, %v8344_v3  ;;  %v2434_v10 = vor.u32 %v2433_v63, %v2432_v27  ;;  %v2437_v5 = vshll.u32 %v2436_v29, 23 }
 0x454   :  { %v5888_v19 = vxor.u32 2147483648, %v8346_v17  ;;  %vm5890_vm7 = vcmp.eq.s32.totalorder %v11559_v25, 2  ;;  %v5748_v42 = vadd.s32 536870912, %v5747_v9  ;;  %v2686_v62 = vsub.s32 32, %v2685_v49 }
 0x455   :  { %v5892_v46 = vsel %vm5890_vm7, %v5891_v24, %v8346_v17  ;;  %v2438_v15 = vor.u32 4788187, %v2437_v5  ;;  %v11603_v55 = vadd.s32 3, %v2448_v4  ;;  %v5999_v28 = vand.u32 2147483647, %v11583_v14 }
 0x456   :  { %v5889_v7 = vsel %vm5887_vm6, %v8344_v3, %v5888_v19  ;;  %v5749_v32 = vshrl.u32 %v5748_v42, 30  ;;  %v2679_v39 = vor.u32 8388608, %v2678_v43  ;;  %v6002_v57 = vand.u32 2139095040, %v11583_v14 }
 0x457   :  { %v5893_v47 = vsel %vm5886_vm2, %v5889_v7, %v5892_v46  ;;  %v2439_v35 = vand.u32 2147483647, %v2438_v15  ;;  %v2441_v31 = vcvt.s32.f32 %v2434_v10  ;;  %v2689_v2 = vshrl.u32 %v8478_v48, %v2686_v62 }
 0x458   :  { %v5894_v60 = vsel %vm5883_vm3, nan, %v5893_v47  ;;  %v11613_v6 = vadd.s32 %v11569_v38, %v11574_v33  ;;  %v5750_v20 = vshll.u32 %v5749_v32, 30  ;;  %v2692_v8 = vshrl.u32 %v8479_v50, %v2686_v62 }
 0x459   :  { %7401 = vst.msk [vmem:[%s13788_s3 + $0x188] sm:$0xff] %vm7351_vm0, %v5894_v60  ;;  %v2442_v25 = vmul.f32 %v2441_v31, %v2439_v35  ;;  %v2684_v1 = vshrl.u32 %v2683_v26, 5  ;;  %v2688_v58 = vshll.u32 %v8477_v44, %v2685_v49  ;;  %v2695_v59 = vshrl.u32 %v8480_v52, %v2686_v62 }
 0x45a   :  { %v11622_v56 = vsub.s32 %v5747_v9, %v5750_v20  ;;  %v2691_v34 = vshll.u32 %v8478_v48, %v2685_v49  ;;  %v2694_v38 = vshll.u32 %v8479_v50, %v2685_v49  ;;  %v2698_v33 = vshrl.u32 %v8481_v54, %v2686_v62 }
 0x45b   :  { %v2443_v23 = vxor.u32 2147483648, %v2442_v25  ;;  %v2690_v36 = vor.u32 %v2689_v2, %v2688_v58  ;;  %v2697_v12 = vshll.u32 %v8480_v52, %v2685_v49  ;;  %v2701_v30 = vshrl.u32 %v8482_v61, %v2686_v62 }
 0x45c   :  { %vm5689_vm9 = vcmp.lt.s32.totalorder %v11443_v45, 0  ;;  %v5753_v41 = vsub.s32 0, %v11622_v56  ;;  %v2693_v0 = vor.u32 %v2692_v8, %v2691_v34  ;;  %v2696_v21 = vor.u32 %v2695_v59, %v2694_v38 }
 0x45d   :  { %v2700_v53 = vshll.u32 %v8481_v54, %v2685_v49  ;;  %v2444_v27 = vsel %vm2361_vm13, %v2443_v23, %v2442_v25  ;;  %v2699_v18 = vor.u32 %v2698_v33, %v2697_v12  ;;  %v2719_v63 = vshll.u32 %v2679_v39, 8 }
 0x45e   :  { %v6003_v29 = vshrl.u32 %v6002_v57, 23  ;;  %v2447_v13 = vsel %vm11578_vm15, %v11390_v37, %v2444_v27  ;;  %v7686_v26 = vmin.u32 %v5753_v41, %v11622_v56  ;;  %v2687_v3 = vshrl.u32 %v8477_v44, %v2686_v62 }
 0x45f   :  { %v2702_v4 = vor.u32 %v2701_v30, %v2700_v53  ;;  %8347 = vcosq.f32 %v2447_v13  ;;  %v5773_v9 = vsub.s32 4, %v5749_v32  ;;  %vm2703_vm8 = vcmp.lt.s32.totalorder %v2684_v1, 1 }
 0x460   :  { %vm2706_vm11 = vcmp.lt.s32.totalorder %v2684_v1, 4  ;;  %8349 = vsinq.f32 %v2447_v13  ;;  %v5755_v43 = vclz %v7686_v26  ;;  %v2711_v17 = vsel %vm2703_vm8, %v2690_v36, %v2693_v0 }
 0x461   :  { %v2708_v49 = vsel %vm2706_vm11, %v2696_v21, 2102212464  ;;  %vm2704_vm12 = vcmp.lt.s32.totalorder %v2684_v1, 2  ;;  %vm2705_vm10 = vcmp.lt.s32.totalorder %v2684_v1, 3  ;;  %v2712_v24 = vsel %vm2706_vm11, %v2699_v18, 920167782 }
 0x462   :  { %v2715_v10 = vsel %vm2703_vm8, %v2693_v0, %v2696_v21  ;;  %v7687_v5 = vadd.s32 4294967294, %v5755_v43  ;;  %v2707_v22 = vsel %vm2703_vm8, %v2687_v3, %v2690_v36  ;;  %v2713_v19 = vsel %vm2705_vm10, %v2696_v21, %v2712_v24 }
 0x463   :  { %v2716_v42 = vsel %vm2706_vm11, %v2702_v4, 1326507024  ;;  %v2709_v46 = vsel %vm2705_vm10, %v2693_v0, %v2708_v49  ;;  %v2714_v62 = vsel %vm2704_vm12, %v2711_v17, %v2713_v19  ;;  %v7697_v7 = vadd.s32 4294967169, %v6003_v29 }
 0x464   :  { %v2717_v15 = vsel %vm2705_vm10, %v2699_v18, %v2716_v42  ;;  %vm7688_vm14 = vcmp.lt.s32.totalorder %v7687_v5, 0  ;;  %v11641_v57 = vmul.u32.u64.low %v2719_v63, %v2714_v62  ;;  %v11642_v47 = vmul.u32.u64.high %v2719_v63, %v2714_v62, %v11641_v57 }
 0x465   :  { %v2718_v39 = vsel %vm2704_vm12, %v2715_v10, %v2717_v15  ;;  %v5758_v35 = vsel %vm7688_vm14, 0, %v7687_v5  ;;  %v5774_v31 = vsel %vm5689_vm9, %v5773_v9, %v5749_v32  ;;  %v2710_v25 = vsel %vm2704_vm12, %v2707_v22, %v2709_v46 }
 0x466   :  { %v11647_v2 = vmul.u32.u64.low %v2719_v63, %v2718_v39  ;;  %v11648_v60 = vmul.u32.u64.high %v2719_v63, %v2718_v39, %v11647_v2  ;;  %v5759_v20 = vsub.s32 32, %v5758_v35  ;;  %v5763_v8 = vsub.s32 4294967266, %v5758_v35 }
 0x467   :  { %v6009_v58 = vadd.s32 1, %v7697_v7  ;;  %v2453_v59 = vand.u32 3, %v11603_v55  ;;  %vm11654_vm13 = vcmp.le.f32.partialorder %v5687_v51, 0.7853982  ;;  %v5760_v38 = vshll.u32 %v11622_v56, %v5758_v35  ;;  %v466_v35 = vpop.f32.mrf.mxu0 }
 0x468   :  { %v5761_v32 = vshrl.u32 %v11613_v6, %v5759_v20  ;;  %v5764_v33 = vadd.s32 127, %v5763_v8  ;;  %v2729_v23 = vadd.s32 1, %v11642_v47  ;;  %v5776_v1 = vsel %vm11654_vm13, 0, %v5774_v31 }
 0x469   :  { %vm6010_vm15 = vcmp.gt.s32.totalorder %v6009_v58, 0  ;;  %v2726_v36 = vmul.u32 %v2719_v63, %v2710_v25  ;;  %vm2728_vm1 = vc.u32 %v11648_v60, %v11641_v57  ;;  %v6006_v56 = vand.u32 8388607, %v5999_v28 }
 0x46a   :  { %v6011_v55 = vsel %vm6010_vm15, %v6009_v58, 0  ;;  %v5762_v51 = vor.u32 %v5761_v32, %v5760_v38  ;;  %v5765_v12 = vshll.u32 %v5764_v33, 23  ;;  %v2730_v30 = vsel %vm2728_vm1, %v2729_v23, %v11642_v47 }
 0x46b   :  { %vm2451_vm2 = vweird.f32 %v11390_v37  ;;  %v2731_v6 = vadd.s32 %v2730_v30, %v2726_v36  ;;  %v6013_v41 = vand.u32 31, %v6011_v55  ;;  %vm2454_vm3 = vcmp.lt.s32.totalorder %v2453_v59, 2 }
 0x46c   :  { %v8348_v0 = vpop.eup %8347  ;;  %vm2455_vm4 = vcmp.eq.s32.totalorder %v2453_v59, 0  ;;  %vm2458_vm5 = vcmp.eq.s32.totalorder %v2453_v59, 2  ;;  %v5766_v21 = vor.u32 4788187, %v5765_v12  ;;  %v11669_v18 = vadd.s32 3, %v5776_v1 }
 0x46d   :  { %v8350_v53 = vpop.eup %8349  ;;  %v2459_v27 = vxor.u32 2147483648, %v8348_v0  ;;  %v2732_v63 = vadd.s32 536870912, %v2731_v6  ;;  %v6014_v29 = vsub.s32 32, %v6013_v41  ;;  %v5769_v3 = vcvt.s32.f32 %v5762_v51 }
 0x46e   :  { %v2456_v13 = vxor.u32 2147483648, %v8350_v53  ;;  %v5767_v26 = vand.u32 2147483647, %v5766_v21  ;;  %v6007_v4 = vor.u32 8388608, %v6006_v56  ;;  %v6016_v49 = vshll.u32 %v8477_v44, %v6013_v41 }
 0x46f   :  { %v2460_v9 = vsel %vm2458_vm5, %v2459_v27, %v8350_v53  ;;  %v2733_v43 = vshrl.u32 %v2732_v63, 30  ;;  %v6017_v17 = vshrl.u32 %v8478_v48, %v6014_v29  ;;  %v6020_v5 = vshrl.u32 %v8479_v50, %v6014_v29 }
 0x470   :  { %v2457_v24 = vsel %vm2455_vm4, %v8348_v0, %v2456_v13  ;;  %v5770_v10 = vmul.f32 %v5769_v3, %v5767_v26  ;;  %v6023_v22 = vshrl.u32 %v8480_v52, %v6014_v29  ;;  %v6012_v46 = vshrl.u32 %v6011_v55, 5  ;;  %v626_v3 = vpop.f32.mrf.mxu1 }
 0x471   :  { %v2461_v19 = vsel %vm2454_vm3, %v2457_v24, %v2460_v9  ;;  %v2734_v42 = vshll.u32 %v2733_v43, 30  ;;  %v6019_v62 = vshll.u32 %v8478_v48, %v6013_v41  ;;  %vm2673_vm6 = vcmp.lt.s32.totalorder %v11533_v40, 0 }
 0x472   :  { %v2462_v15 = vsel %vm2451_vm2, nan, %v2461_v19  ;;  %v5771_v7 = vxor.u32 2147483648, %v5770_v10  ;;  %v6018_v39 = vor.u32 %v6017_v17, %v6016_v49  ;;  %v6022_v47 = vshll.u32 %v8479_v50, %v6013_v41 }
 0x473   :  { %7368 = vst.msk [vmem:[%s13788_s3 + $0x80] sm:$0xff] %vm7351_vm0, %v2462_v15  ;;  %v11686_v31 = vsub.s32 %v2731_v6, %v2734_v42  ;;  %v6021_v2 = vor.u32 %v6020_v5, %v6019_v62  ;;  %v6025_v20 = vshll.u32 %v8480_v52, %v6013_v41  ;;  %v6026_v37 = vshrl.u32 %v8481_v54, %v6014_v29 }
 0x474   :  { %v5772_v8 = vsel %vm5689_vm9, %v5771_v7, %v5770_v10  ;;  %v6024_v25 = vor.u32 %v6023_v22, %v6022_v47  ;;  %v6028_v58 = vshll.u32 %v8481_v54, %v6013_v41  ;;  %v6029_v59 = vshrl.u32 %v8482_v61, %v6014_v29 }
 0x475   :  { %v5775_v38 = vsel %vm11654_vm13, %v11443_v45, %v5772_v8  ;;  %v2737_v32 = vsub.s32 0, %v11686_v31  ;;  %v6027_v33 = vor.u32 %v6026_v37, %v6025_v20  ;;  %v11699_v23 = vadd.f32 %v11387_v11, %v466_v35 }
 0x476   :  { %8351 = vcosq.f32 %v5775_v38  ;;  %v6015_v1 = vshrl.u32 %v8477_v44, %v6014_v29  ;;  %v6030_v36 = vor.u32 %v6029_v59, %v6028_v58  ;;  %vm6031_vm7 = vcmp.lt.s32.totalorder %v6012_v46, 1 }
 0x477   :  { %8353 = vsinq.f32 %v5775_v38  ;;  %v7570_v55 = vmin.u32 %v2737_v32, %v11686_v31  ;;  %v2757_v51 = vsub.s32 4, %v2733_v43  ;;  %vm6034_vm9 = vcmp.lt.s32.totalorder %v6012_v46, 4 }
 0x478   :  { %v6036_v12 = vsel %vm6034_vm9, %v6024_v25, 2102212464  ;;  %v6039_v30 = vsel %vm6031_vm7, %v6018_v39, %v6021_v2  ;;  %v6040_v34 = vsel %vm6034_vm9, %v6027_v33, 920167782  ;;  %v6047_v56 = vshll.u32 %v6007_v4, 8 }
 0x479   :  { %v2739_v6 = vclz %v7570_v55  ;;  %vm6033_vm8 = vcmp.lt.s32.totalorder %v6012_v46, 3  ;;  %v6035_v41 = vsel %vm6031_vm7, %v6015_v1, %v6018_v39  ;;  %v6043_v0 = vsel %vm6031_vm7, %v6021_v2, %v6024_v25 }
 0x47a   :  { %vm6032_vm11 = vcmp.lt.s32.totalorder %v6012_v46, 2  ;;  %v6037_v21 = vsel %vm6033_vm8, %v6021_v2, %v6036_v12  ;;  %v6041_v53 = vsel %vm6033_vm8, %v6024_v25, %v6040_v34  ;;  %v6044_v27 = vsel %vm6034_vm9, %v6030_v36, 1326507024 }
 0x47b   :  { %v7571_v63 = vadd.s32 4294967294, %v2739_v6  ;;  %v2758_v29 = vsel %vm2673_vm6, %v2757_v51, %v2733_v43  ;;  %v6042_v13 = vsel %vm6032_vm11, %v6039_v30, %v6041_v53  ;;  %v6045_v26 = vsel %vm6033_vm8, %v6027_v33, %v6044_v27 }
 0x47c   :  { %v6038_v9 = vsel %vm6032_vm11, %v6035_v41, %v6037_v21  ;;  %v6046_v49 = vsel %vm6032_vm11, %v6043_v0, %v6045_v26  ;;  %v11705_v17 = vmul.u32.u64.low %v6047_v56, %v6042_v13  ;;  %v11706_v24 = vmul.u32.u64.high %v6047_v56, %v6042_v13, %v11705_v17 }
 0x47d   :  { %vm7572_vm12 = vcmp.lt.s32.totalorder %v7571_v63, 0  ;;  %v11709_v4 = vmul.u32.u64.low %v6047_v56, %v6046_v49  ;;  %v11710_v10 = vmul.u32.u64.high %v6047_v56, %v6046_v49, %v11709_v4  ;;  %v2570_v5 = vand.u32 2139095040, %v11699_v23 }
 0x47e   :  { %v5781_v22 = vand.u32 3, %v11669_v18  ;;  %vm11716_vm10 = vcmp.le.f32.partialorder %v2671_v16, 0.7853982  ;;  %v2742_v19 = vsel %vm7572_vm12, 0, %v7571_v63  ;;  %v11721_v42 = vadd.f32 %v11387_v11, %v626_v3 }
 0x47f   :  { %v2727_v46 = vadd.s32 %v11641_v57, %v11648_v60  ;;  %v2743_v62 = vsub.s32 32, %v2742_v19  ;;  %v2747_v15 = vsub.s32 4294967266, %v2742_v19  ;;  %v2571_v7 = vshrl.u32 %v2570_v5, 23 }
 0x480   :  { %v2760_v39 = vsel %vm11716_vm10, 0, %v2758_v29  ;;  %v6054_v18 = vmul.u32 %v6047_v56, %v6038_v9  ;;  %v6057_v47 = vadd.s32 1, %v11706_v24  ;;  %v2567_v16 = vand.u32 2147483647, %v11699_v23 }
 0x481   :  { %v2744_v35 = vshll.u32 %v11686_v31, %v2742_v19  ;;  %v2745_v2 = vshrl.u32 %v2727_v46, %v2743_v62  ;;  %v2748_v20 = vadd.s32 127, %v2747_v15  ;;  %vm6056_vm14 = vc.u32 %v11710_v10, %v11705_v17 }
 0x482   :  { %vm5782_vm13 = vcmp.lt.s32.totalorder %v5781_v22, 2  ;;  %v6058_v11 = vsel %vm6056_vm14, %v6057_v47, %v11706_v24  ;;  %v7565_v57 = vadd.s32 4294967169, %v2571_v7  ;;  %v5898_v60 = vand.u32 2139095040, %v11721_v42 }
 0x483   :  { %v8352_v37 = vpop.eup %8351  ;;  %vm5783_vm15 = vcmp.eq.s32.totalorder %v5781_v22, 0  ;;  %v2746_v8 = vor.u32 %v2745_v2, %v2744_v35  ;;  %v2749_v25 = vshll.u32 %v2748_v20, 23  ;;  %v6059_v58 = vadd.s32 %v6058_v11, %v6054_v18 }
 0x484   :  { %v8354_v59 = vpop.eup %8353  ;;  %vm5786_vm1 = vcmp.eq.s32.totalorder %v5781_v22, 2  ;;  %v5787_v38 = vxor.u32 2147483648, %v8352_v37  ;;  %v2764_v31 = vadd.s32 3, %v2760_v39  ;;  %v2577_v32 = vadd.s32 1, %v7565_v57 }
 0x485   :  { %v5784_v33 = vxor.u32 2147483648, %v8354_v59  ;;  %v2750_v1 = vor.u32 4788187, %v2749_v25  ;;  %v6060_v36 = vadd.s32 536870912, %v6059_v58  ;;  %v2574_v55 = vand.u32 8388607, %v2567_v16 }
 0x486   :  { %v5788_v51 = vsel %vm5786_vm1, %v5787_v38, %v8354_v59  ;;  %v2753_v12 = vcvt.s32.f32 %v2746_v8  ;;  %vm2578_vm2 = vcmp.gt.s32.totalorder %v2577_v32, 0  ;;  %v5899_v30 = vshrl.u32 %v5898_v60, 23 }
 0x487   :  { %v5785_v34 = vsel %vm5783_vm15, %v8352_v37, %v5784_v33  ;;  %v2751_v56 = vand.u32 2147483647, %v2750_v1  ;;  %v6061_v6 = vshrl.u32 %v6060_v36, 30  ;;  %v2579_v41 = vsel %vm2578_vm2, %v2577_v32, 0 }
 0x488   :  { %vm5779_vm3 = vweird.f32 %v11443_v45  ;;  %v5789_v0 = vsel %vm5782_vm13, %v5785_v34, %v5788_v51  ;;  %v2581_v21 = vand.u32 31, %v2579_v41  ;;  %v11739_v63 = vand.u32 3, %v2764_v31 }
 0x489   :  { %v5790_v53 = vsel %vm5779_vm3, nan, %v5789_v0  ;;  %v2754_v27 = vmul.f32 %v2753_v12, %v2751_v56  ;;  %vm6001_vm4 = vcmp.lt.s32.totalorder %v11583_v14, 0  ;;  %v6062_v29 = vshll.u32 %v6061_v6, 30 }
 0x48a   :  { %7400 = vst.msk [vmem:[%s13788_s3 + $0x180] sm:$0xff] %vm7351_vm0, %v5790_v53  ;;  %v2575_v13 = vor.u32 8388608, %v2574_v55  ;;  %v2582_v26 = vsub.s32 32, %v2581_v21  ;;  %v5895_v3 = vand.u32 2147483647, %v11721_v42  ;;  %v7693_v45 = vadd.s32 4294967169, %v5899_v30 }
 0x48b   :  { %v2755_v9 = vxor.u32 2147483648, %v2754_v27  ;;  %v11747_v49 = vsub.s32 %v6059_v58, %v6062_v29  ;;  %v6085_v24 = vsub.s32 4, %v6061_v6  ;;  %v2580_v4 = vshrl.u32 %v2579_v41, 5 }
 0x48c   :  { %v2584_v5 = vshll.u32 %v8477_v44, %v2581_v21  ;;  %v2585_v22 = vshrl.u32 %v8478_v48, %v2582_v26  ;;  %v2587_v19 = vshll.u32 %v8478_v48, %v2581_v21  ;;  %v2588_v46 = vshrl.u32 %v8479_v50, %v2582_v26 }
 0x48d   :  { %v2756_v62 = vsel %vm2673_vm6, %v2755_v9, %v2754_v27  ;;  %vm11757_vm5 = vcmp.le.f32.partialorder %v5999_v28, 0.7853982  ;;  %v6065_v7 = vsub.s32 0, %v11747_v49  ;;  %v2590_v39 = vshll.u32 %v8479_v50, %v2581_v21 }
 0x48e   :  { %v2591_v18 = vshrl.u32 %v8480_v52, %v2582_v26  ;;  %v2759_v47 = vsel %vm11716_vm10, %v11533_v40, %v2756_v62  ;;  %v2586_v35 = vor.u32 %v2585_v22, %v2584_v5  ;;  %v2593_v2 = vshll.u32 %v8480_v52, %v2581_v21 }
 0x48f   :  { %v2594_v20 = vshrl.u32 %v8481_v54, %v2582_v26  ;;  %8355 = vcosq.f32 %v2759_v47  ;;  %v7698_v28 = vmin.u32 %v6065_v7, %v11747_v49  ;;  %v2589_v11 = vor.u32 %v2588_v46, %v2587_v19 }
 0x490   :  { %v2592_v57 = vor.u32 %v2591_v18, %v2590_v39  ;;  %8357 = vsinq.f32 %v2759_v47  ;;  %v2596_v37 = vshll.u32 %v8481_v54, %v2581_v21  ;;  %v2597_v8 = vshrl.u32 %v8482_v61, %v2582_v26 }
 0x491   :  { %v2595_v60 = vor.u32 %v2594_v20, %v2593_v2  ;;  %v6055_v43 = vadd.s32 %v11705_v17, %v11710_v10  ;;  %v6067_v25 = vclz %v7698_v28  ;;  %v2615_v58 = vshll.u32 %v2575_v13, 8 }
 0x492   :  { %v5905_v59 = vadd.s32 1, %v7693_v45  ;;  %v6086_v38 = vsel %vm6001_vm4, %v6085_v24, %v6061_v6  ;;  %v2583_v31 = vshrl.u32 %v8477_v44, %v2582_v26  ;;  %v2598_v32 = vor.u32 %v2597_v8, %v2596_v37 }
 0x493   :  { %vm2599_vm6 = vcmp.lt.s32.totalorder %v2580_v4, 1  ;;  %v7699_v33 = vadd.s32 4294967294, %v6067_v25  ;;  %vm2601_vm7 = vcmp.lt.s32.totalorder %v2580_v4, 3  ;;  %vm2602_vm9 = vcmp.lt.s32.totalorder %v2580_v4, 4 }
 0x494   :  { %v2607_v1 = vsel %vm2599_vm6, %v2586_v35, %v2589_v11  ;;  %v2604_v36 = vsel %vm2602_vm9, %v2592_v57, 2102212464  ;;  %v2608_v55 = vsel %vm2602_vm9, %v2595_v60, 920167782  ;;  %v2611_v51 = vsel %vm2599_vm6, %v2589_v11, %v2592_v57 }
 0x495   :  { %v2612_v17 = vsel %vm2602_vm9, %v2598_v32, 1326507024  ;;  %vm7700_vm8 = vcmp.lt.s32.totalorder %v7699_v33, 0  ;;  %vm2600_vm11 = vcmp.lt.s32.totalorder %v2580_v4, 2  ;;  %v2609_v10 = vsel %vm2601_vm7, %v2592_v57, %v2608_v55 }
 0x496   :  { %v2613_v12 = vsel %vm2601_vm7, %v2595_v60, %v2612_v17  ;;  %v6070_v30 = vsel %vm7700_vm8, 0, %v7699_v33  ;;  %v6088_v34 = vsel %vm11757_vm5, 0, %v6086_v38  ;;  %v2610_v56 = vsel %vm2600_vm11, %v2607_v1, %v2609_v10 }
 0x497   :  { %v2614_v6 = vsel %vm2600_vm11, %v2611_v51, %v2613_v12  ;;  %v6071_v41 = vsub.s32 32, %v6070_v30  ;;  %v6075_v0 = vsub.s32 4294967266, %v6070_v30  ;;  %v2603_v21 = vsel %vm2599_vm6, %v2583_v31, %v2586_v35 }
 0x498   :  { %v2605_v53 = vsel %vm2601_vm7, %v2589_v11, %v2604_v36  ;;  %v11787_v27 = vmul.u32.u64.low %v2615_v58, %v2614_v6  ;;  %v11788_v29 = vmul.u32.u64.high %v2615_v58, %v2614_v6, %v11787_v27  ;;  %vm2763_vm12 = vweird.f32 %v11533_v40 }
 0x499   :  { %v11790_v13 = vmul.u32.u64.low %v2615_v58, %v2610_v56  ;;  %v11791_v26 = vmul.u32.u64.high %v2615_v58, %v2610_v56, %v11790_v13  ;;  %v6072_v45 = vshll.u32 %v11747_v49, %v6070_v30  ;;  %v6073_v9 = vshrl.u32 %v6055_v43, %v6071_v41  ;;  %v7869_v56 = vpop.f32.mrf.mxu0 }
 0x49a   :  { %v6076_v24 = vadd.s32 127, %v6075_v0  ;;  %vm5906_vm10 = vcmp.gt.s32.totalorder %v5905_v59, 0  ;;  %v6092_v5 = vadd.s32 3, %v6088_v34  ;;  %v2606_v22 = vsel %vm2600_vm11, %v2603_v21, %v2605_v53 }
 0x49b   :  { %v5902_v19 = vand.u32 8388607, %v5895_v3  ;;  %v5907_v46 = vsel %vm5906_vm10, %v5905_v59, 0  ;;  %vm2766_vm14 = vcmp.lt.s32.totalorder %v11739_v63, 2  ;;  %v6074_v62 = vor.u32 %v6073_v9, %v6072_v45 }
 0x49c   :  { %v6077_v7 = vshll.u32 %v6076_v24, 23  ;;  %v5909_v39 = vand.u32 31, %v5907_v46  ;;  %v8356_v18 = vpop.eup %8355  ;;  %vm2767_vm13 = vcmp.eq.s32.totalorder %v11739_v63, 0  ;;  %vm2770_vm15 = vcmp.eq.s32.totalorder %v11739_v63, 2 }
 0x49d   :  { %vm2624_vm1 = vc.u32 %v11788_v29, %v11790_v13  ;;  %v2625_v49 = vadd.s32 1, %v11791_v26  ;;  %v8358_v4 = vpop.eup %8357  ;;  %v2771_v47 = vxor.u32 2147483648, %v8356_v18  ;;  %v2622_v2 = vmul.u32 %v2615_v58, %v2606_v22 }
 0x49e   :  { %v6078_v35 = vor.u32 4788187, %v6077_v7  ;;  %v5910_v20 = vsub.s32 32, %v5909_v39  ;;  %v2768_v28 = vxor.u32 2147483648, %v8358_v4  ;;  %v11805_v11 = vand.u32 3, %v6092_v5 }
 0x49f   :  { %v2626_v57 = vsel %vm2624_vm1, %v2625_v49, %v11791_v26  ;;  %v5903_v60 = vor.u32 8388608, %v5902_v19  ;;  %v2772_v37 = vsel %vm2770_vm15, %v2771_v47, %v8358_v4  ;;  %v6081_v43 = vcvt.s32.f32 %v6074_v62  ;;  %v11838_v5 = vld [vmem:[%s13787_s2] ss:$0 sm:$0xff] }
 0x4a0   :  { %v6079_v8 = vand.u32 2147483647, %v6078_v35  ;;  %v2627_v25 = vadd.s32 %v2626_v57, %v2622_v2  ;;  %v2769_v59 = vsel %vm2767_vm13, %v8356_v18, %v2768_v28  ;;  %v11810_v38 = vshrl.u32 %v5907_v46, 5  ;;  %v7917_v57 = vpop.f32.mrf.mxu1 }
 0x4a1   :  { %v5913_v31 = vshrl.u32 %v8478_v48, %v5910_v20  ;;  %v5916_v58 = vshrl.u32 %v8479_v50, %v5910_v20  ;;  %v2773_v32 = vsel %vm2766_vm14, %v2769_v59, %v2772_v37  ;;  %v5919_v36 = vshrl.u32 %v8480_v52, %v5910_v20 }
 0x4a2   :  { %v6082_v33 = vmul.f32 %v6081_v43, %v6079_v8  ;;  %v2628_v1 = vadd.s32 536870912, %v2627_v25  ;;  %v2774_v55 = vsel %vm2763_vm12, nan, %v2773_v32  ;;  %v5912_v51 = vshll.u32 %v8477_v44, %v5909_v39 }
 0x4a3   :  { %v5915_v17 = vshll.u32 %v8478_v48, %v5909_v39  ;;  %v5918_v10 = vshll.u32 %v8479_v50, %v5909_v39  ;;  %7371 = vst.msk [vmem:[%s13788_s3 + $0x98] sm:$0xff] %vm7351_vm0, %v2774_v55  ;;  %v5921_v30 = vshll.u32 %v8480_v52, %v5909_v39  ;;  %v5922_v34 = vshrl.u32 %v8481_v54, %v5910_v20 }
 0x4a4   :  { %v6083_v63 = vxor.u32 2147483648, %v6082_v33  ;;  %v2629_v12 = vshrl.u32 %v2628_v1, 30  ;;  %v5914_v40 = vor.u32 %v5913_v31, %v5912_v51  ;;  %v5924_v41 = vshll.u32 %v8481_v54, %v5909_v39 }
 0x4a5   :  { %v5917_v6 = vor.u32 %v5916_v58, %v5915_v17  ;;  %v5925_v0 = vshrl.u32 %v8482_v61, %v5910_v20  ;;  %v5920_v27 = vor.u32 %v5919_v36, %v5918_v10  ;;  %v5923_v26 = vor.u32 %v5922_v34, %v5921_v30 }
 0x4a6   :  { %v6084_v21 = vsel %vm6001_vm4, %v6083_v63, %v6082_v33  ;;  %v2630_v53 = vshll.u32 %v2629_v12, 30  ;;  %v5943_v24 = vshll.u32 %v5903_v60, 8  ;;  %v11841_v22 = vadd.f32 %v11838_v5, %v7869_v56 }
 0x4a7   :  { %v6087_v45 = vsel %vm11757_vm5, %v11583_v14, %v6084_v21  ;;  %v5926_v9 = vor.u32 %v5925_v0, %v5924_v41  ;;  %v5911_v46 = vshrl.u32 %v8477_v44, %v5910_v20  ;;  %vm5927_vm2 = vcmp.lt.s32.totalorder %v11810_v38, 1 }
 0x4a8   :  { %8359 = vcosq.f32 %v6087_v45  ;;  %v11843_v19 = vsub.s32 %v2627_v25, %v2630_v53  ;;  %vm5928_vm3 = vcmp.lt.s32.totalorder %v11810_v38, 2  ;;  %vm5930_vm4 = vcmp.lt.s32.totalorder %v11810_v38, 4 }
 0x4a9   :  { %8361 = vsinq.f32 %v6087_v45  ;;  %v5935_v15 = vsel %vm5927_vm2, %v5914_v40, %v5917_v6  ;;  %vm5929_vm5 = vcmp.lt.s32.totalorder %v11810_v38, 3  ;;  %v5932_v7 = vsel %vm5930_vm4, %v5920_v27, 2102212464 }
 0x4aa   :  { %v2633_v62 = vsub.s32 0, %v11843_v19  ;;  %v5936_v39 = vsel %vm5930_vm4, %v5923_v26, 920167782  ;;  %v2653_v18 = vsub.s32 4, %v2629_v12  ;;  %v5939_v4 = vsel %vm5927_vm2, %v5917_v6, %v5920_v27 }
 0x4ab   :  { %v5937_v49 = vsel %vm5929_vm5, %v5920_v27, %v5936_v39  ;;  %v5940_v47 = vsel %vm5930_vm4, %v5926_v9, 1326507024  ;;  %v5931_v2 = vsel %vm5927_vm2, %v5911_v46, %v5914_v40  ;;  %v5933_v60 = vsel %vm5929_vm5, %v5917_v6, %v5932_v7 }
 0x4ac   :  { %v7566_v35 = vmin.u32 %v2633_v62, %v11843_v19  ;;  %v5938_v20 = vsel %vm5928_vm3, %v5935_v15, %v5937_v49  ;;  %v5941_v28 = vsel %vm5929_vm5, %v5923_v26, %v5940_v47  ;;  %vm2569_vm6 = vcmp.lt.s32.totalorder %v11699_v23, 0 }
 0x4ad   :  { %v5942_v37 = vsel %vm5928_vm3, %v5939_v4, %v5941_v28  ;;  %v11856_v8 = vmul.u32.u64.low %v5943_v24, %v5938_v20  ;;  %v11857_v43 = vmul.u32.u64.high %v5943_v24, %v5938_v20, %v11856_v8  ;;  %v11865_v58 = vadd.f32 %v11838_v5, %v7917_v57  ;;  %v476_v28 = vpop.f32.mrf.mxu0 }
 0x4ae   :  { %v2635_v25 = vclz %v7566_v35  ;;  %v11861_v59 = vmul.u32.u64.low %v5943_v24, %v5942_v37  ;;  %v11862_v31 = vmul.u32.u64.high %v5943_v24, %v5942_v37, %v11861_v59  ;;  %vm11869_vm7 = vcmp.le.f32.partialorder %v2567_v16, 0.7853982 }
 0x4af   :  { %v5934_v1 = vsel %vm5928_vm3, %v5931_v2, %v5933_v60  ;;  %v2882_v36 = vand.u32 2139095040, %v11841_v22  ;;  %vm6094_vm9 = vcmp.lt.s32.totalorder %v11805_v11, 2  ;;  %vm6095_vm8 = vcmp.eq.s32.totalorder %v11805_v11, 0 }
 0x4b0   :  { %v7567_v33 = vadd.s32 4294967294, %v2635_v25  ;;  %v2654_v55 = vsel %vm2569_vm6, %v2653_v18, %v2629_v12  ;;  %v5953_v51 = vadd.s32 1, %v11857_v43  ;;  %v2879_v16 = vand.u32 2147483647, %v11841_v22 }
 0x4b1   :  { %vm6091_vm11 = vweird.f32 %v11583_v14  ;;  %vm6098_vm12 = vcmp.eq.s32.totalorder %v11805_v11, 2  ;;  %v2623_v38 = vadd.s32 %v11790_v13, %v11788_v29  ;;  %v2883_v17 = vshrl.u32 %v2882_v36, 23 }
 0x4b2   :  { %vm7568_vm10 = vcmp.lt.s32.totalorder %v7567_v33, 0  ;;  %v5950_v63 = vmul.u32 %v5943_v24, %v5934_v1  ;;  %vm5952_vm14 = vc.u32 %v11862_v31, %v11856_v8  ;;  %v6210_v12 = vand.u32 2139095040, %v11865_v58 }
 0x4b3   :  { %v2638_v10 = vsel %vm7568_vm10, 0, %v7567_v33  ;;  %v2656_v56 = vsel %vm11869_vm7, 0, %v2654_v55  ;;  %v5954_v40 = vsel %vm5952_vm14, %v5953_v51, %v11857_v43  ;;  %v7577_v0 = vadd.s32 4294967169, %v2883_v17 }
 0x4b4   :  { %v2639_v30 = vsub.s32 32, %v2638_v10  ;;  %v2643_v34 = vsub.s32 4294967266, %v2638_v10  ;;  %v5955_v41 = vadd.s32 %v5954_v40, %v5950_v63  ;;  %v2886_v29 = vand.u32 8388607, %v2879_v16 }
 0x4b5   :  { %v8360_v6 = vpop.eup %8359  ;;  %v6207_v13 = vand.u32 2147483647, %v11865_v58  ;;  %v2640_v27 = vshll.u32 %v11843_v19, %v2638_v10  ;;  %v2889_v46 = vadd.s32 1, %v7577_v0  ;;  %v6211_v15 = vshrl.u32 %v6210_v12, 23 }
 0x4b6   :  { %v8362_v21 = vpop.eup %8361  ;;  %v6099_v53 = vxor.u32 2147483648, %v8360_v6  ;;  %v2641_v26 = vshrl.u32 %v2623_v38, %v2639_v30  ;;  %v2644_v45 = vadd.s32 127, %v2643_v34  ;;  %v5956_v24 = vadd.s32 536870912, %v5955_v41 }
 0x4b7   :  { %v6096_v9 = vxor.u32 2147483648, %v8362_v21  ;;  %v2660_v18 = vadd.s32 3, %v2656_v56  ;;  %v2887_v47 = vor.u32 8388608, %v2886_v29  ;;  %vm2890_vm13 = vcmp.gt.s32.totalorder %v2889_v46, 0 }
 0x4b8   :  { %v6100_v62 = vsel %vm6098_vm12, %v6099_v53, %v8362_v21  ;;  %v2642_v7 = vor.u32 %v2641_v26, %v2640_v27  ;;  %v2645_v39 = vshll.u32 %v2644_v45, 23  ;;  %v11900_v4 = vshrl.u32 %v5956_v24, 30 }
 0x4b9   :  { %v6097_v49 = vsel %vm6095_vm8, %v8360_v6, %v6096_v9  ;;  %v2891_v2 = vsel %vm2890_vm13, %v2889_v46, 0  ;;  %v11906_v20 = vand.u32 8388607, %v6207_v13  ;;  %v7705_v37 = vadd.s32 4294967169, %v6211_v15 }
 0x4ba   :  { %v6101_v19 = vsel %vm6094_vm9, %v6097_v49, %v6100_v62  ;;  %v2646_v35 = vor.u32 4788187, %v2645_v39  ;;  %v5958_v60 = vshll.u32 %v11900_v4, 30  ;;  %v2649_v43 = vcvt.s32.f32 %v2642_v7 }
 0x4bb   :  { %v6102_v57 = vsel %vm6091_vm11, nan, %v6101_v19  ;;  %v2893_v25 = vand.u32 31, %v2891_v2  ;;  %v11915_v59 = vand.u32 3, %v2660_v18  ;;  %v5951_v33 = vadd.s32 %v11856_v8, %v11862_v31 }
 0x4bc   :  { %7403 = vst.msk [vmem:[%s13788_s3 + $0x198] sm:$0xff] %vm7351_vm0, %v6102_v57  ;;  %v2647_v11 = vand.u32 2147483647, %v2646_v35  ;;  %v11919_v1 = vsub.s32 %v5955_v41, %v5958_v60  ;;  %v11922_v14 = vadd.f32 %v11838_v5, %v476_v28  ;;  %v11924_v51 = vshll.u32 %v2887_v47, 8 }
 0x4bd   :  { %v2894_v55 = vsub.s32 32, %v2893_v25  ;;  %v6215_v38 = vor.u32 8388608, %v11906_v20  ;;  %v2892_v10 = vshrl.u32 %v2891_v2, 5  ;;  %v2896_v63 = vshll.u32 %v8477_v44, %v2893_v25 }
 0x4be   :  { %v2650_v36 = vmul.f32 %v2649_v43, %v2647_v11  ;;  %v5961_v17 = vsub.s32 0, %v11919_v1  ;;  %v6217_v12 = vadd.s32 1, %v7705_v37  ;;  %v2899_v31 = vshll.u32 %v8478_v48, %v2893_v25 }
 0x4bf   :  { %v2897_v8 = vshrl.u32 %v8478_v48, %v2894_v55  ;;  %v2900_v34 = vshrl.u32 %v8479_v50, %v2894_v55  ;;  %v2902_v40 = vshll.u32 %v8479_v50, %v2893_v25  ;;  %v2903_v6 = vshrl.u32 %v8480_v52, %v2894_v55 }
 0x4c0   :  { %v2651_v30 = vxor.u32 2147483648, %v2650_v36  ;;  %v7694_v56 = vmin.u32 %v5961_v17, %v11919_v1  ;;  %v2905_v41 = vshll.u32 %v8480_v52, %v2893_v25  ;;  %v2906_v53 = vshrl.u32 %v8481_v54, %v2894_v55 }
 0x4c1   :  { %v2898_v29 = vor.u32 %v2897_v8, %v2896_v63  ;;  %v2901_v21 = vor.u32 %v2900_v34, %v2899_v31  ;;  %v5981_v45 = vsub.s32 4, %v11900_v4  ;;  %vm6218_vm15 = vcmp.gt.s32.totalorder %v6217_v12, 0 }
 0x4c2   :  { %v2652_v0 = vsel %vm2569_vm6, %v2651_v30, %v2650_v36  ;;  %v5963_v26 = vclz %v7694_v56  ;;  %v2904_v9 = vor.u32 %v2903_v6, %v2902_v40  ;;  %v2907_v24 = vor.u32 %v2906_v53, %v2905_v41 }
 0x4c3   :  { %v2655_v27 = vsel %vm11869_vm7, %v11699_v23, %v2652_v0  ;;  %vm2911_vm1 = vcmp.lt.s32.totalorder %v2892_v10, 1  ;;  %vm5897_vm2 = vcmp.lt.s32.totalorder %v11721_v42, 0  ;;  %v2908_v15 = vshll.u32 %v8481_v54, %v2893_v25 }
 0x4c4   :  { %8363 = vcosq.f32 %v2655_v27  ;;  %v7695_v46 = vadd.s32 4294967294, %v5963_v26  ;;  %v2909_v62 = vshrl.u32 %v8482_v61, %v2894_v55  ;;  %v2895_v7 = vshrl.u32 %v8477_v44, %v2894_v55 }
 0x4c5   :  { %8365 = vsinq.f32 %v2655_v27  ;;  %vm2913_vm3 = vcmp.lt.s32.totalorder %v2892_v10, 3  ;;  %vm2914_vm4 = vcmp.lt.s32.totalorder %v2892_v10, 4  ;;  %v2919_v32 = vsel %vm2911_vm1, %v2898_v29, %v2901_v21 }
 0x4c6   :  { %vm7696_vm5 = vcmp.lt.s32.totalorder %v7695_v46, 0  ;;  %v2910_v39 = vor.u32 %v2909_v62, %v2908_v15  ;;  %v2916_v18 = vsel %vm2914_vm4, %v2904_v9, 2102212464  ;;  %v2920_v49 = vsel %vm2914_vm4, %v2907_v24, 920167782 }
 0x4c7   :  { %v5966_v47 = vsel %vm7696_vm5, 0, %v7695_v46  ;;  %v2915_v19 = vsel %vm2911_vm1, %v2895_v7, %v2898_v29  ;;  %v2917_v35 = vsel %vm2913_vm3, %v2901_v21, %v2916_v18  ;;  %v2921_v2 = vsel %vm2913_vm3, %v2904_v9, %v2920_v49 }
 0x4c8   :  { %v5967_v28 = vsub.s32 32, %v5966_v47  ;;  %v5971_v57 = vsub.s32 4294967266, %v5966_v47  ;;  %vm2912_vm6 = vcmp.lt.s32.totalorder %v2892_v10, 2  ;;  %v2923_v60 = vsel %vm2911_vm1, %v2901_v21, %v2904_v9 }
 0x4c9   :  { %v5968_v37 = vshll.u32 %v11919_v1, %v5966_v47  ;;  %v2922_v11 = vsel %vm2912_vm6, %v2919_v32, %v2921_v2  ;;  %v2924_v43 = vsel %vm2914_vm4, %v2910_v39, 1326507024  ;;  %v6219_v25 = vsel %vm6218_vm15, %v6217_v12, 0 }
 0x4ca   :  { %v5969_v36 = vshrl.u32 %v5951_v33, %v5967_v28  ;;  %v5972_v55 = vadd.s32 127, %v5971_v57  ;;  %v2918_v17 = vsel %vm2912_vm6, %v2915_v19, %v2917_v35  ;;  %v2925_v63 = vsel %vm2913_vm3, %v2907_v24, %v2924_v43 }
 0x4cb   :  { %vm2663_vm7 = vcmp.eq.s32.totalorder %v11915_v59, 0  ;;  %v2926_v30 = vsel %vm2912_vm6, %v2923_v60, %v2925_v63  ;;  %v11960_v8 = vmul.u32.u64.low %v11924_v51, %v2922_v11  ;;  %v11961_v31 = vmul.u32.u64.high %v11924_v51, %v2922_v11, %v11960_v8 }
 0x4cc   :  { %v6221_v34 = vand.u32 31, %v6219_v25  ;;  %vm2662_vm9 = vcmp.lt.s32.totalorder %v11915_v59, 2  ;;  %vm11967_vm8 = vcmp.le.f32.partialorder %v5895_v3, 0.7853982  ;;  %v5970_v33 = vor.u32 %v5969_v36, %v5968_v37 }
 0x4cd   :  { %v5973_v10 = vshll.u32 %v5972_v55, 23  ;;  %v11972_v12 = vmul.u32.u64.low %v11924_v51, %v2926_v30  ;;  %v11973_v56 = vmul.u32.u64.high %v11924_v51, %v2926_v30, %v11972_v12  ;;  %vm2659_vm11 = vweird.f32 %v11699_v23 }
 0x4ce   :  { %vm2666_vm12 = vcmp.eq.s32.totalorder %v11915_v59, 2  ;;  %v5982_v40 = vsel %vm5897_vm2, %v5981_v45, %v11900_v4  ;;  %v6222_v6 = vsub.s32 32, %v6221_v34  ;;  %v11982_v3 = vshll.u32 %v6215_v38, 8 }
 0x4cf   :  { %v5974_v41 = vor.u32 4788187, %v5973_v10  ;;  %v2934_v0 = vmul.u32 %v11924_v51, %v2918_v17  ;;  %v11985_v29 = vshrl.u32 %v6219_v25, 5  ;;  %v6224_v21 = vshll.u32 %v8477_v44, %v6221_v34 }
 0x4d0   :  { %v2937_v53 = vadd.s32 1, %v11961_v31  ;;  %v6225_v27 = vshrl.u32 %v8478_v48, %v6222_v6  ;;  %v6227_v26 = vshll.u32 %v8478_v48, %v6221_v34  ;;  %v6230_v4 = vshll.u32 %v8479_v50, %v6221_v34 }
 0x4d1   :  { %v8364_v45 = vpop.eup %8363  ;;  %v5975_v9 = vand.u32 2147483647, %v5974_v41  ;;  %v5977_v20 = vcvt.s32.f32 %v5970_v33  ;;  %vm2936_vm10 = vc.u32 %v11973_v56, %v11960_v8  ;;  %v6228_v51 = vshrl.u32 %v8479_v50, %v6222_v6 }
 0x4d2   :  { %v8366_v38 = vpop.eup %8365  ;;  %v2667_v24 = vxor.u32 2147483648, %v8364_v45  ;;  %v2938_v46 = vsel %vm2936_vm10, %v2937_v53, %v11961_v31  ;;  %v6231_v15 = vshrl.u32 %v8480_v52, %v6222_v6  ;;  %v6233_v62 = vshll.u32 %v8480_v52, %v6221_v34 }
 0x4d3   :  { %v2664_v7 = vxor.u32 2147483648, %v8366_v38  ;;  %v5978_v32 = vmul.f32 %v5977_v20, %v5975_v9  ;;  %v2939_v39 = vadd.s32 %v2938_v46, %v2934_v0  ;;  %v6236_v18 = vshll.u32 %v8481_v54, %v6221_v34 }
 0x4d4   :  { %v2668_v49 = vsel %vm2666_vm12, %v2667_v24, %v8366_v38  ;;  %v6226_v47 = vor.u32 %v6225_v27, %v6224_v21  ;;  %v6234_v19 = vshrl.u32 %v8481_v54, %v6222_v6  ;;  %v6237_v35 = vshrl.u32 %v8482_v61, %v6222_v6 }
 0x4d5   :  { %v2665_v2 = vsel %vm2663_vm7, %v8364_v45, %v2664_v7  ;;  %v5979_v28 = vxor.u32 2147483648, %v5978_v32  ;;  %v2940_v57 = vadd.s32 536870912, %v2939_v39  ;;  %v6229_v60 = vor.u32 %v6228_v51, %v6227_v26 }
 0x4d6   :  { %v2669_v37 = vsel %vm2662_vm9, %v2665_v2, %v2668_v49  ;;  %v5984_v11 = vsel %vm11967_vm8, 0, %v5982_v40  ;;  %v6232_v43 = vor.u32 %v6231_v15, %v6230_v4  ;;  %v6235_v25 = vor.u32 %v6234_v19, %v6233_v62 }
 0x4d7   :  { %v2670_v36 = vsel %vm2659_vm11, nan, %v2669_v37  ;;  %v5980_v55 = vsel %vm5897_vm2, %v5979_v28, %v5978_v32  ;;  %v2941_v17 = vshrl.u32 %v2940_v57, 30  ;;  %v6238_v63 = vor.u32 %v6237_v35, %v6236_v18  ;;  %v636_v35 = vpop.f32.mrf.mxu1 }
 0x4d8   :  { %7370 = vst.msk [vmem:[%s13788_s3 + $0x90] sm:$0xff] %vm7351_vm0, %v2670_v36  ;;  %v5983_v59 = vsel %vm11967_vm8, %v11721_v42, %v5980_v55  ;;  %v6223_v30 = vshrl.u32 %v8477_v44, %v6222_v6  ;;  %vm6239_vm14 = vcmp.lt.s32.totalorder %v11985_v29, 1  ;;  %vm6241_vm13 = vcmp.lt.s32.totalorder %v11985_v29, 3 }
 0x4d9   :  { %8367 = vcosq.f32 %v5983_v59  ;;  %v2942_v23 = vshll.u32 %v2941_v17, 30  ;;  %vm6242_vm15 = vcmp.lt.s32.totalorder %v11985_v29, 4  ;;  %v6247_v31 = vsel %vm6239_vm14, %v6226_v47, %v6229_v60 }
 0x4da   :  { %8369 = vsinq.f32 %v5983_v59  ;;  %v6244_v34 = vsel %vm6242_vm15, %v6232_v43, 2102212464  ;;  %v6248_v33 = vsel %vm6242_vm15, %v6235_v25, 920167782  ;;  %v6251_v1 = vsel %vm6239_vm14, %v6229_v60, %v6232_v43 }
 0x4db   :  { %v12028_v10 = vsub.s32 %v2939_v39, %v2942_v23  ;;  %vm6240_vm1 = vcmp.lt.s32.totalorder %v11985_v29, 2  ;;  %v6249_v12 = vsel %vm6241_vm13, %v6232_v43, %v6248_v33  ;;  %v6252_v40 = vsel %vm6242_vm15, %v6238_v63, 1326507024 }
 0x4dc   :  { %v5988_v6 = vadd.s32 3, %v5984_v11  ;;  %v2965_v41 = vsub.s32 4, %v2941_v17  ;;  %v6250_v0 = vsel %vm6240_vm1, %v6247_v31, %v6249_v12  ;;  %v6253_v21 = vsel %vm6241_vm13, %v6235_v25, %v6252_v40 }
 0x4dd   :  { %v2945_v53 = vsub.s32 0, %v12028_v10  ;;  %v6243_v27 = vsel %vm6239_vm14, %v6223_v30, %v6226_v47  ;;  %v6245_v26 = vsel %vm6241_vm13, %v6229_v60, %v6244_v34  ;;  %v6254_v4 = vsel %vm6240_vm1, %v6251_v1, %v6253_v21 }
 0x4de   :  { %v12045_v45 = vmul.u32.u64.low %v11982_v3, %v6254_v4  ;;  %v12046_v9 = vmul.u32.u64.high %v11982_v3, %v6254_v4, %v12045_v45  ;;  %v12049_v20 = vmul.u32.u64.low %v11982_v3, %v6250_v0  ;;  %v12050_v51 = vmul.u32.u64.high %v11982_v3, %v6250_v0, %v12049_v20 }
 0x4df   :  { %vm2881_vm2 = vcmp.lt.s32.totalorder %v11841_v22, 0  ;;  %v7578_v38 = vmin.u32 %v2945_v53, %v12028_v10  ;;  %v5989_v24 = vand.u32 3, %v5988_v6  ;;  %v6246_v15 = vsel %vm6240_vm1, %v6243_v27, %v6245_v26 }
 0x4e0   :  { %v2966_v46 = vsel %vm2881_vm2, %v2965_v41, %v2941_v17  ;;  %v2778_v62 = vand.u32 2139095040, %v11922_v14  ;;  %vm12061_vm3 = vcmp.le.f32.partialorder %v2879_v16, 0.7853982  ;;  %vm6264_vm4 = vc.u32 %v12046_v9, %v12049_v20 }
 0x4e1   :  { %v2947_v7 = vclz %v7578_v38  ;;  %v6265_v39 = vadd.s32 1, %v12050_v51  ;;  %v2968_v47 = vsel %vm12061_vm3, 0, %v2966_v46  ;;  %v6262_v29 = vmul.u32 %v11982_v3, %v6246_v15 }
 0x4e2   :  { %v2779_v18 = vshrl.u32 %v2778_v62, 23  ;;  %v2775_v19 = vand.u32 2147483647, %v11922_v14  ;;  %vm5990_vm5 = vcmp.lt.s32.totalorder %v5989_v24, 2  ;;  %vm5991_vm6 = vcmp.eq.s32.totalorder %v5989_v24, 0 }
 0x4e3   :  { %v7579_v49 = vadd.s32 4294967294, %v2947_v7  ;;  %v6266_v16 = vsel %vm6264_vm4, %v6265_v39, %v12050_v51  ;;  %vm5994_vm7 = vcmp.eq.s32.totalorder %v5989_v24, 2  ;;  %v2935_v28 = vadd.s32 %v11960_v8, %v11973_v56 }
 0x4e4   :  { %v7573_v2 = vadd.s32 4294967169, %v2779_v18  ;;  %v6267_v57 = vadd.s32 %v6266_v16, %v6262_v29  ;;  %v2972_v11 = vadd.s32 3, %v2968_v47  ;;  %v12075_v3 = vadd.f32 %v11838_v5, %v636_v35 }
 0x4e5   :  { %vm7580_vm9 = vcmp.lt.s32.totalorder %v7579_v49, 0  ;;  %v2782_v63 = vand.u32 8388607, %v2775_v19  ;;  %vm5987_vm11 = vweird.f32 %v11721_v42  ;;  %vm6209_vm12 = vcmp.lt.s32.totalorder %v11865_v58, 0 }
 0x4e6   :  { %v8368_v60 = vpop.eup %8367  ;;  %v2950_v37 = vsel %vm7580_vm9, 0, %v7579_v49  ;;  %v2785_v43 = vadd.s32 1, %v7573_v2  ;;  %v6268_v8 = vadd.s32 536870912, %v6267_v57  ;;  %v6106_v40 = vand.u32 2139095040, %v12075_v3 }
 0x4e7   :  { %v8370_v25 = vpop.eup %8369  ;;  %v5995_v36 = vxor.u32 2147483648, %v8368_v60  ;;  %v2951_v55 = vsub.s32 32, %v2950_v37  ;;  %v2955_v17 = vsub.s32 4294967266, %v2950_v37  ;;  %v2952_v30 = vshll.u32 %v12028_v10, %v2950_v37 }
 0x4e8   :  { %v5992_v59 = vxor.u32 2147483648, %v8370_v25  ;;  %vm2786_vm8 = vcmp.gt.s32.totalorder %v2785_v43, 0  ;;  %v6269_v1 = vshrl.u32 %v6268_v8, 30  ;;  %v12090_v26 = vand.u32 3, %v2972_v11 }
 0x4e9   :  { %v5996_v56 = vsel %vm5994_vm7, %v5995_v36, %v8370_v25  ;;  %v2953_v23 = vshrl.u32 %v2935_v28, %v2951_v55  ;;  %v2956_v31 = vadd.s32 127, %v2955_v17  ;;  %v2787_v34 = vsel %vm2786_vm8, %v2785_v43, 0 }
 0x4ea   :  { %v5993_v33 = vsel %vm5991_vm6, %v8368_v60, %v5992_v59  ;;  %v2789_v12 = vand.u32 31, %v2787_v34  ;;  %v6270_v21 = vshll.u32 %v6269_v1, 30  ;;  %v6263_v4 = vadd.s32 %v12049_v20, %v12046_v9 }
 0x4eb   :  { %v5997_v6 = vsel %vm5990_vm5, %v5993_v33, %v5996_v56  ;;  %v2954_v41 = vor.u32 %v2953_v23, %v2952_v30  ;;  %v2957_v0 = vshll.u32 %v2956_v31, 23  ;;  %v2783_v42 = vor.u32 8388608, %v2782_v63 }
 0x4ec   :  { %v5998_v10 = vsel %vm5987_vm11, nan, %v5997_v6  ;;  %v2790_v53 = vsub.s32 32, %v2789_v12  ;;  %v12093_v45 = vsub.s32 %v6267_v57, %v6270_v21  ;;  %v6293_v51 = vsub.s32 4, %v6269_v1 }
 0x4ed   :  { %7402 = vst.msk [vmem:[%s13788_s3 + $0x190] sm:$0xff] %vm7351_vm0, %v5998_v10  ;;  %v2958_v27 = vor.u32 4788187, %v2957_v0  ;;  %v6107_v24 = vshrl.u32 %v6106_v40, 23  ;;  %v2961_v15 = vcvt.s32.f32 %v2954_v41  ;;  %v2792_v62 = vshll.u32 %v8477_v44, %v2789_v12 }
 0x4ee   :  { %v2793_v38 = vshrl.u32 %v8478_v48, %v2790_v53  ;;  %v2796_v7 = vshrl.u32 %v8479_v50, %v2790_v53  ;;  %v6273_v39 = vsub.s32 0, %v12093_v45  ;;  %v2795_v18 = vshll.u32 %v8478_v48, %v2789_v12 }
 0x4ef   :  { %v2959_v46 = vand.u32 2147483647, %v2958_v27  ;;  %v2798_v49 = vshll.u32 %v8479_v50, %v2789_v12  ;;  %v2799_v9 = vshrl.u32 %v8480_v52, %v2790_v53  ;;  %v2788_v47 = vshrl.u32 %v2787_v34, 5 }
 0x4f0   :  { %v2801_v29 = vshll.u32 %v8480_v52, %v2789_v12  ;;  %v2802_v35 = vshrl.u32 %v8481_v54, %v2790_v53  ;;  %v7706_v16 = vmin.u32 %v6273_v39, %v12093_v45  ;;  %v2794_v2 = vor.u32 %v2793_v38, %v2792_v62 }
 0x4f1   :  { %v2962_v20 = vmul.f32 %v2961_v15, %v2959_v46  ;;  %v2797_v28 = vor.u32 %v2796_v7, %v2795_v18  ;;  %v2800_v57 = vor.u32 %v2799_v9, %v2798_v49  ;;  %v2804_v11 = vshll.u32 %v8481_v54, %v2789_v12 }
 0x4f2   :  { %v2803_v37 = vor.u32 %v2802_v35, %v2801_v29  ;;  %v2805_v43 = vshrl.u32 %v8482_v61, %v2790_v53  ;;  %vm12109_vm10 = vcmp.le.f32.partialorder %v6207_v13, 0.7853982  ;;  %v6275_v36 = vclz %v7706_v16  ;;  %v7872_v35 = vpop.f32.mrf.mxu0 }
 0x4f3   :  { %v2963_v60 = vxor.u32 2147483648, %v2962_v20  ;;  %v6294_v55 = vsel %vm6209_vm12, %v6293_v51, %v6269_v1  ;;  %v2823_v17 = vshll.u32 %v2783_v42, 8  ;;  %v7701_v63 = vadd.s32 4294967169, %v6107_v24 }
 0x4f4   :  { %v2791_v30 = vshrl.u32 %v8477_v44, %v2790_v53  ;;  %v2806_v8 = vor.u32 %v2805_v43, %v2804_v11  ;;  %vm2807_vm14 = vcmp.lt.s32.totalorder %v2788_v47, 1  ;;  %v7707_v56 = vadd.s32 4294967294, %v6275_v36 }
 0x4f5   :  { %v2964_v59 = vsel %vm2881_vm2, %v2963_v60, %v2962_v20  ;;  %vm2809_vm13 = vcmp.lt.s32.totalorder %v2788_v47, 3  ;;  %vm2810_vm15 = vcmp.lt.s32.totalorder %v2788_v47, 4  ;;  %v2815_v31 = vsel %vm2807_vm14, %v2794_v2, %v2797_v28 }
 0x4f6   :  { %v2967_v13 = vsel %vm12061_vm3, %v11841_v22, %v2964_v59  ;;  %v2812_v23 = vsel %vm2810_vm15, %v2800_v57, 2102212464  ;;  %v2816_v34 = vsel %vm2810_vm15, %v2803_v37, 920167782  ;;  %vm7708_vm1 = vcmp.lt.s32.totalorder %v7707_v56, 0 }
 0x4f7   :  { %8371 = vcosq.f32 %v2967_v13  ;;  %vm2808_vm2 = vcmp.lt.s32.totalorder %v2788_v47, 2  ;;  %v2817_v33 = vsel %vm2809_vm13, %v2800_v57, %v2816_v34  ;;  %v6278_v1 = vsel %vm7708_vm1, 0, %v7707_v56 }
 0x4f8   :  { %8373 = vsinq.f32 %v2967_v13  ;;  %v2811_v12 = vsel %vm2807_vm14, %v2791_v30, %v2794_v2  ;;  %v2818_v32 = vsel %vm2808_vm2, %v2815_v31, %v2817_v33  ;;  %v2819_v40 = vsel %vm2807_vm14, %v2797_v28, %v2800_v57 }
 0x4f9   :  { %v6279_v6 = vsub.s32 32, %v6278_v1  ;;  %v6283_v41 = vsub.s32 4294967266, %v6278_v1  ;;  %v2813_v0 = vsel %vm2809_vm13, %v2797_v28, %v2812_v23  ;;  %v2820_v10 = vsel %vm2810_vm15, %v2806_v8, 1326507024 }
 0x4fa   :  { %v6280_v21 = vshll.u32 %v12093_v45, %v6278_v1  ;;  %v2821_v53 = vsel %vm2809_vm13, %v2803_v37, %v2820_v10  ;;  %v12132_v27 = vmul.u32.u64.low %v2823_v17, %v2818_v32  ;;  %v12133_v42 = vmul.u32.u64.high %v2823_v17, %v2818_v32, %v12132_v27 }
 0x4fb   :  { %v6281_v51 = vshrl.u32 %v6263_v4, %v6279_v6  ;;  %v6284_v38 = vadd.s32 127, %v6283_v41  ;;  %v2822_v24 = vsel %vm2808_vm2, %v2819_v40, %v2821_v53  ;;  %v6113_v46 = vadd.s32 1, %v7701_v63 }
 0x4fc   :  { %v6296_v15 = vsel %vm12109_vm10, 0, %v6294_v55  ;;  %v12139_v62 = vmul.u32.u64.low %v2823_v17, %v2822_v24  ;;  %v12140_v7 = vmul.u32.u64.high %v2823_v17, %v2822_v24, %v12139_v62  ;;  %v6103_v39 = vand.u32 2147483647, %v12075_v3 }
 0x4fd   :  { %v6282_v45 = vor.u32 %v6281_v51, %v6280_v21  ;;  %v6285_v18 = vshll.u32 %v6284_v38, 23  ;;  %v2814_v49 = vsel %vm2808_vm2, %v2811_v12, %v2813_v0  ;;  %vm6114_vm3 = vcmp.gt.s32.totalorder %v6113_v46, 0 }
 0x4fe   :  { %v2833_v9 = vadd.s32 1, %v12133_v42  ;;  %v6115_v4 = vsel %vm6114_vm3, %v6113_v46, 0  ;;  %vm2974_vm4 = vcmp.lt.s32.totalorder %v12090_v26, 2  ;;  %vm2975_vm5 = vcmp.eq.s32.totalorder %v12090_v26, 0 }
 0x4ff   :  { %vm2978_vm6 = vcmp.eq.s32.totalorder %v12090_v26, 2  ;;  %v6286_v20 = vor.u32 4788187, %v6285_v18  ;;  %v6117_v29 = vand.u32 31, %v6115_v4  ;;  %vm2971_vm7 = vweird.f32 %v11841_v22 }
 0x500   :  { %v6300_v16 = vadd.s32 3, %v6296_v15  ;;  %v2830_v2 = vmul.u32 %v2823_v17, %v2814_v49  ;;  %vm2832_vm9 = vc.u32 %v12140_v7, %v12132_v27  ;;  %v6110_v47 = vand.u32 8388607, %v6103_v39 }
 0x501   :  { %v6287_v28 = vand.u32 2147483647, %v6286_v20  ;;  %v6289_v57 = vcvt.s32.f32 %v6282_v45  ;;  %v2834_v60 = vsel %vm2832_vm9, %v2833_v9, %v12133_v42  ;;  %v6118_v37 = vsub.s32 32, %v6117_v29 }
 0x502   :  { %v2835_v11 = vadd.s32 %v2834_v60, %v2830_v2  ;;  %v12154_v43 = vshrl.u32 %v6115_v4, 5  ;;  %v6120_v36 = vshll.u32 %v8477_v44, %v6117_v29  ;;  %v12158_v55 = vadd.f32 %v11838_v5, %v7872_v35 }
 0x503   :  { %v6290_v63 = vmul.f32 %v6289_v57, %v6287_v28  ;;  %v6121_v59 = vshrl.u32 %v8478_v48, %v6118_v37  ;;  %v6123_v30 = vshll.u32 %v8478_v48, %v6117_v29  ;;  %v6124_v8 = vshrl.u32 %v8479_v50, %v6118_v37 }
 0x504   :  { %v8372_v17 = vpop.eup %8371  ;;  %v2836_v23 = vadd.s32 536870912, %v2835_v11  ;;  %v6126_v31 = vshll.u32 %v8479_v50, %v6117_v29  ;;  %v6127_v34 = vshrl.u32 %v8480_v52, %v6118_v37  ;;  %v6129_v12 = vshll.u32 %v8480_v52, %v6117_v29 }
 0x505   :  { %v8374_v13 = vpop.eup %8373  ;;  %v2979_v56 = vxor.u32 2147483648, %v8372_v17  ;;  %v6291_v1 = vxor.u32 2147483648, %v6290_v63  ;;  %v6130_v32 = vshrl.u32 %v8481_v54, %v6118_v37  ;;  %v6122_v41 = vor.u32 %v6121_v59, %v6120_v36 }
 0x506   :  { %v2976_v33 = vxor.u32 2147483648, %v8374_v13  ;;  %v12169_v6 = vshrl.u32 %v2836_v23, 30  ;;  %v6125_v0 = vor.u32 %v6124_v8, %v6123_v30  ;;  %v6132_v53 = vshll.u32 %v8481_v54, %v6117_v29 }
 0x507   :  { %v2980_v40 = vsel %vm2978_vm6, %v2979_v56, %v8374_v13  ;;  %v6292_v21 = vsel %vm6209_vm12, %v6291_v1, %v6290_v63  ;;  %v6133_v42 = vshrl.u32 %v8482_v61, %v6118_v37  ;;  %v6128_v46 = vor.u32 %v6127_v34, %v6126_v31  ;;  %v7920_v13 = vpop.f32.mrf.mxu1 }
 0x508   :  { %v2977_v10 = vsel %vm2975_vm5, %v8372_v17, %v2976_v33  ;;  %v6295_v38 = vsel %vm12109_vm10, %v11865_v58, %v6292_v21  ;;  %v2838_v24 = vshll.u32 %v12169_v6, 30  ;;  %v6131_v62 = vor.u32 %v6130_v32, %v6129_v12 }
 0x509   :  { %v2981_v51 = vsel %vm2974_vm4, %v2977_v10, %v2980_v40  ;;  %8375 = vcosq.f32 %v6295_v38  ;;  %v6134_v45 = vor.u32 %v6133_v42, %v6132_v53  ;;  %v12191_v18 = vand.u32 3, %v6300_v16 }
 0x50a   :  { %v2982_v15 = vsel %vm2971_vm7, nan, %v2981_v51  ;;  %8377 = vsinq.f32 %v6295_v38  ;;  %v12189_v26 = vsub.s32 %v2835_v11, %v2838_v24  ;;  %v6111_v25 = vor.u32 8388608, %v6110_v47 }
 0x50b   :  { %7373 = vst.msk [vmem:[%s13788_s3 + $0xa8] sm:$0xff] %vm7351_vm0, %v2982_v15  ;;  %vm6135_vm8 = vcmp.lt.s32.totalorder %v12154_v43, 1  ;;  %v3090_v49 = vand.u32 2139095040, %v12158_v55  ;;  %vm6137_vm11 = vcmp.lt.s32.totalorder %v12154_v43, 3  ;;  %vm6138_vm12 = vcmp.lt.s32.totalorder %v12154_v43, 4 }
 0x50c   :  { %v2841_v22 = vsub.s32 0, %v12189_v26  ;;  %v6143_v9 = vsel %vm6135_vm8, %v6122_v41, %v6125_v0  ;;  %v6119_v4 = vshrl.u32 %v8477_v44, %v6118_v37  ;;  %v6140_v20 = vsel %vm6138_vm12, %v6128_v46, 2102212464 }
 0x50d   :  { %v6144_v29 = vsel %vm6138_vm12, %v6131_v62, 920167782  ;;  %v6148_v35 = vsel %vm6138_vm12, %v6134_v45, 1326507024  ;;  %vm6136_vm10 = vcmp.lt.s32.totalorder %v12154_v43, 2  ;;  %v6147_v47 = vsel %vm6135_vm8, %v6125_v0, %v6128_v46 }
 0x50e   :  { %v7574_v16 = vmin.u32 %v2841_v22, %v12189_v26  ;;  %v6145_v2 = vsel %vm6137_vm11, %v6128_v46, %v6144_v29  ;;  %v6149_v57 = vsel %vm6137_vm11, %v6131_v62, %v6148_v35  ;;  %v6151_v60 = vshll.u32 %v6111_v25, 8 }
 0x50f   :  { %v6146_v28 = vsel %vm6136_vm10, %v6143_v9, %v6145_v2  ;;  %v3091_v37 = vshrl.u32 %v3090_v49, 23  ;;  %v6139_v36 = vsel %vm6135_vm8, %v6119_v4, %v6122_v41  ;;  %v6141_v17 = vsel %vm6137_vm11, %v6125_v0, %v6140_v20 }
 0x510   :  { %v2843_v11 = vclz %v7574_v16  ;;  %v6150_v63 = vsel %vm6136_vm10, %v6147_v47, %v6149_v57  ;;  %v12217_v59 = vmul.u32.u64.low %v6151_v60, %v6146_v28  ;;  %v12218_v30 = vmul.u32.u64.high %v6151_v60, %v6146_v28, %v12217_v59 }
 0x511   :  { %v7585_v8 = vadd.s32 4294967169, %v3091_v37  ;;  %v2861_v23 = vsub.s32 4, %v12169_v6  ;;  %v12222_v31 = vmul.u32.u64.low %v6151_v60, %v6150_v63  ;;  %v12223_v34 = vmul.u32.u64.high %v6151_v60, %v6150_v63, %v12222_v31 }
 0x512   :  { %v7575_v56 = vadd.s32 4294967294, %v2843_v11  ;;  %vm6299_vm14 = vweird.f32 %v11865_v58  ;;  %vm6303_vm13 = vcmp.eq.s32.totalorder %v12191_v18, 0  ;;  %vm2777_vm15 = vcmp.lt.s32.totalorder %v11922_v14, 0 }
 0x513   :  { %v6142_v33 = vsel %vm6136_vm10, %v6139_v36, %v6141_v17  ;;  %v3097_v1 = vadd.s32 1, %v7585_v8  ;;  %vm6306_vm1 = vcmp.eq.s32.totalorder %v12191_v18, 2  ;;  %v3087_v12 = vand.u32 2147483647, %v12158_v55 }
 0x514   :  { %vm7576_vm2 = vcmp.lt.s32.totalorder %v7575_v56, 0  ;;  %v12233_v32 = vadd.f32 %v11838_v5, %v7920_v13  ;;  %v2831_v40 = vadd.s32 %v12132_v27, %v12140_v7  ;;  %v6161_v0 = vadd.s32 1, %v12218_v30 }
 0x515   :  { %v2846_v41 = vsel %vm7576_vm2, 0, %v7575_v56  ;;  %vm3098_vm3 = vcmp.gt.s32.totalorder %v3097_v1, 0  ;;  %v2862_v53 = vsel %vm2777_vm15, %v2861_v23, %v12169_v6  ;;  %v6158_v42 = vmul.u32 %v6151_v60, %v6142_v33 }
 0x516   :  { %v8376_v10 = vpop.eup %8375  ;;  %v2847_v21 = vsub.s32 32, %v2846_v41  ;;  %v2851_v43 = vsub.s32 4294967266, %v2846_v41  ;;  %v2848_v5 = vshll.u32 %v12189_v26, %v2846_v41  ;;  %vm6160_vm4 = vc.u32 %v12223_v34, %v12217_v59 }
 0x517   :  { %v8378_v51 = vpop.eup %8377  ;;  %v6307_v38 = vxor.u32 2147483648, %v8376_v10  ;;  %v3099_v27 = vsel %vm3098_vm3, %v3097_v1, 0  ;;  %v6162_v15 = vsel %vm6160_vm4, %v6161_v0, %v12218_v30  ;;  %v3094_v6 = vand.u32 8388607, %v3087_v12 }
 0x518   :  { %v6304_v7 = vxor.u32 2147483648, %v8378_v51  ;;  %v2849_v24 = vshrl.u32 %v2831_v40, %v2847_v21  ;;  %v2852_v46 = vadd.s32 127, %v2851_v43  ;;  %v6163_v45 = vadd.s32 %v6162_v15, %v6158_v42 }
 0x519   :  { %v6308_v62 = vsel %vm6306_vm1, %v6307_v38, %v8378_v51  ;;  %v3101_v25 = vand.u32 31, %v3099_v27  ;;  %vm6302_vm5 = vcmp.lt.s32.totalorder %v12191_v18, 2  ;;  %vm12254_vm6 = vcmp.le.f32.partialorder %v2775_v19, 0.7853982 }
 0x51a   :  { %v6305_v26 = vsel %vm6303_vm13, %v8376_v10, %v6304_v7  ;;  %v2850_v49 = vor.u32 %v2849_v24, %v2848_v5  ;;  %v2853_v22 = vshll.u32 %v2852_v46, 23  ;;  %v6164_v20 = vadd.s32 536870912, %v6163_v45 }
 0x51b   :  { %v6309_v9 = vsel %vm6302_vm5, %v6305_v26, %v6308_v62  ;;  %v3102_v29 = vsub.s32 32, %v3101_v25  ;;  %v2864_v2 = vsel %vm12254_vm6, 0, %v2862_v53  ;;  %v3095_v19 = vor.u32 8388608, %v3094_v6 }
 0x51c   :  { %v6310_v35 = vsel %vm6299_vm14, nan, %v6309_v9  ;;  %v2854_v16 = vor.u32 4788187, %v2853_v22  ;;  %v12266_v18 = vshrl.u32 %v6164_v20, 30  ;;  %v6418_v28 = vand.u32 2139095040, %v12233_v32 }
 0x51d   :  { %7405 = vst.msk [vmem:[%s13788_s3 + $0x1a8] sm:$0xff] %vm7351_vm0, %v6310_v35  ;;  %v3105_v47 = vshrl.u32 %v8478_v48, %v3102_v29  ;;  %v2857_v60 = vcvt.s32.f32 %v2850_v49  ;;  %v3108_v58 = vshrl.u32 %v8479_v50, %v3102_v29  ;;  %v3111_v37 = vshrl.u32 %v8480_v52, %v3102_v29 }
 0x51e   :  { %v2855_v57 = vand.u32 2147483647, %v2854_v16  ;;  %v6166_v11 = vshll.u32 %v12266_v18, 30  ;;  %v3100_v36 = vshrl.u32 %v3099_v27, 5  ;;  %v3104_v17 = vshll.u32 %v8477_v44, %v3101_v25 }
 0x51f   :  { %v3110_v63 = vshll.u32 %v8479_v50, %v3101_v25  ;;  %v3107_v8 = vshll.u32 %v8478_v48, %v3101_v25  ;;  %v3113_v13 = vshll.u32 %v8480_v52, %v3101_v25  ;;  %v3114_v56 = vshrl.u32 %v8481_v54, %v3102_v29 }
 0x520   :  { %v2858_v30 = vmul.f32 %v2857_v60, %v2855_v57  ;;  %v12278_v23 = vsub.s32 %v6163_v45, %v6166_v11  ;;  %v3106_v31 = vor.u32 %v3105_v47, %v3104_v17  ;;  %v3117_v1 = vshrl.u32 %v8482_v61, %v3102_v29 }
 0x521   :  { %v3112_v33 = vor.u32 %v3111_v37, %v3110_v63  ;;  %v3109_v41 = vor.u32 %v3108_v58, %v3107_v8  ;;  %v3115_v0 = vor.u32 %v3114_v56, %v3113_v13  ;;  %v3116_v10 = vshll.u32 %v8481_v54, %v3101_v25 }
 0x522   :  { %v2859_v40 = vxor.u32 2147483648, %v2858_v30  ;;  %v2868_v21 = vadd.s32 3, %v2864_v2  ;;  %v6169_v43 = vsub.s32 0, %v12278_v23  ;;  %v3135_v53 = vshll.u32 %v3095_v19, 8 }
 0x523   :  { %v6419_v42 = vshrl.u32 %v6418_v28, 23  ;;  %v3103_v38 = vshrl.u32 %v8477_v44, %v3102_v29  ;;  %v3118_v5 = vor.u32 %v3117_v1, %v3116_v10  ;;  %vm3122_vm7 = vcmp.lt.s32.totalorder %v3100_v36, 4 }
 0x524   :  { %v2860_v51 = vsel %vm2777_vm15, %v2859_v40, %v2858_v30  ;;  %v7702_v7 = vmin.u32 %v6169_v43, %v12278_v23  ;;  %vm3119_vm9 = vcmp.lt.s32.totalorder %v3100_v36, 1  ;;  %v3124_v24 = vsel %vm3122_vm7, %v3112_v33, 2102212464  ;;  %v486_v43 = vpop.f32.mrf.mxu0 }
 0x525   :  { %v2863_v27 = vsel %vm12254_vm6, %v11922_v14, %v2860_v51  ;;  %vm3120_vm8 = vcmp.lt.s32.totalorder %v3100_v36, 2  ;;  %v3127_v46 = vsel %vm3119_vm9, %v3106_v31, %v3109_v41  ;;  %v3128_v15 = vsel %vm3122_vm7, %v3115_v0, 920167782 }
 0x526   :  { %8379 = vcosq.f32 %v2863_v27  ;;  %v6171_v62 = vclz %v7702_v7  ;;  %vm3121_vm11 = vcmp.lt.s32.totalorder %v3100_v36, 3  ;;  %v3131_v45 = vsel %vm3119_vm9, %v3109_v41, %v3112_v33 }
 0x527   :  { %8381 = vsinq.f32 %v2863_v27  ;;  %v3123_v6 = vsel %vm3119_vm9, %v3103_v38, %v3106_v31  ;;  %v3125_v25 = vsel %vm3121_vm11, %v3109_v41, %v3124_v24  ;;  %v3129_v26 = vsel %vm3121_vm11, %v3112_v33, %v3128_v15 }
 0x528   :  { %v3132_v49 = vsel %vm3122_vm7, %v3118_v5, 1326507024  ;;  %v7703_v22 = vadd.s32 4294967294, %v6171_v62  ;;  %v6189_v9 = vsub.s32 4, %v12266_v18  ;;  %v3130_v4 = vsel %vm3120_vm8, %v3127_v46, %v3129_v26 }
 0x529   :  { %v3133_v20 = vsel %vm3121_vm11, %v3115_v0, %v3132_v49  ;;  %v12296_v35 = vmul.u32.u64.low %v3135_v53, %v3130_v4  ;;  %v12297_v16 = vmul.u32.u64.high %v3135_v53, %v3130_v4, %v12296_v35  ;;  %v7713_v2 = vadd.s32 4294967169, %v6419_v42 }
 0x52a   :  { %v3134_v29 = vsel %vm3120_vm8, %v3131_v45, %v3133_v20  ;;  %vm7704_vm12 = vcmp.lt.s32.totalorder %v7703_v22, 0  ;;  %v3126_v19 = vsel %vm3120_vm8, %v3123_v6, %v3125_v25  ;;  %v2869_v57 = vand.u32 3, %v2868_v21  ;;  %v12335_v45 = vld [vmem:[%s13787_s2] ss:$0 sm:$0xff] }
 0x52b   :  { %v12301_v47 = vmul.u32.u64.low %v3135_v53, %v3134_v29  ;;  %v12302_v28 = vmul.u32.u64.high %v3135_v53, %v3134_v29, %v12301_v47  ;;  %vm6105_vm10 = vcmp.lt.s32.totalorder %v12075_v3, 0  ;;  %v6174_v60 = vsel %vm7704_vm12, 0, %v7703_v22 }
 0x52c   :  { %v6425_v58 = vadd.s32 1, %v7713_v2  ;;  %v6159_v37 = vadd.s32 %v12217_v59, %v12223_v34  ;;  %v6175_v11 = vsub.s32 32, %v6174_v60  ;;  %v6179_v17 = vsub.s32 4294967266, %v6174_v60 }
 0x52d   :  { %v6415_v63 = vand.u32 2147483647, %v12233_v32  ;;  %v6190_v36 = vsel %vm6105_vm10, %v6189_v9, %v12266_v18  ;;  %v3142_v30 = vmul.u32 %v3135_v53, %v3126_v19  ;;  %v3145_v8 = vadd.s32 1, %v12297_v16 }
 0x52e   :  { %vm6426_vm14 = vcmp.gt.s32.totalorder %v6425_v58, 0  ;;  %v6176_v13 = vshll.u32 %v12278_v23, %v6174_v60  ;;  %v6177_v56 = vshrl.u32 %v6159_v37, %v6175_v11  ;;  %v6180_v31 = vadd.s32 127, %v6179_v17 }
 0x52f   :  { %vm3144_vm13 = vc.u32 %v12302_v28, %v12296_v35  ;;  %vm12317_vm15 = vcmp.le.f32.partialorder %v6103_v39, 0.7853982  ;;  %v6427_v18 = vsel %vm6426_vm14, %v6425_v58, 0  ;;  %vm2867_vm1 = vweird.f32 %v11922_v14 }
 0x530   :  { %v3146_v34 = vsel %vm3144_vm13, %v3145_v8, %v12297_v16  ;;  %v6178_v33 = vor.u32 %v6177_v56, %v6176_v13  ;;  %v6181_v1 = vshll.u32 %v6180_v31, 23  ;;  %v6192_v40 = vsel %vm12317_vm15, 0, %v6190_v36 }
 0x531   :  { %v3147_v23 = vadd.s32 %v3146_v34, %v3142_v30  ;;  %v6422_v41 = vand.u32 8388607, %v6415_v63  ;;  %v6429_v0 = vand.u32 31, %v6427_v18  ;;  %vm2870_vm2 = vcmp.lt.s32.totalorder %v2869_v57, 2 }
 0x532   :  { %vm2871_vm3 = vcmp.eq.s32.totalorder %v2869_v57, 0  ;;  %v6182_v39 = vor.u32 4788187, %v6181_v1  ;;  %vm2874_vm4 = vcmp.eq.s32.totalorder %v2869_v57, 2  ;;  %v12327_v51 = vadd.s32 3, %v6192_v40 }
 0x533   :  { %v8380_v10 = vpop.eup %8379  ;;  %v3148_v21 = vadd.s32 536870912, %v3147_v23  ;;  %v6430_v38 = vsub.s32 32, %v6429_v0  ;;  %v6185_v7 = vcvt.s32.f32 %v6178_v33  ;;  %v6423_v15 = vor.u32 8388608, %v6422_v41 }
 0x534   :  { %v8382_v53 = vpop.eup %8381  ;;  %v2875_v42 = vxor.u32 2147483648, %v8380_v10  ;;  %v6183_v27 = vand.u32 2147483647, %v6182_v39  ;;  %v12338_v6 = vadd.f32 %v12335_v45, %v486_v43  ;;  %v6432_v4 = vshll.u32 %v8477_v44, %v6429_v0 }
 0x535   :  { %v2872_v5 = vxor.u32 2147483648, %v8382_v53  ;;  %v12329_v24 = vshrl.u32 %v3148_v21, 30  ;;  %v6433_v62 = vshrl.u32 %v8478_v48, %v6430_v38  ;;  %v6436_v22 = vshrl.u32 %v8479_v50, %v6430_v38 }
 0x536   :  { %v2876_v46 = vsel %vm2874_vm4, %v2875_v42, %v8382_v53  ;;  %v6186_v26 = vmul.f32 %v6185_v7, %v6183_v27  ;;  %v6435_v20 = vshll.u32 %v8478_v48, %v6429_v0  ;;  %v6439_v29 = vshrl.u32 %v8480_v52, %v6430_v38 }
 0x537   :  { %v2873_v25 = vsel %vm2871_vm3, %v8380_v10, %v2872_v5  ;;  %v3150_v49 = vshll.u32 %v12329_v24, 30  ;;  %v6438_v47 = vshll.u32 %v8479_v50, %v6429_v0  ;;  %v6428_v57 = vshrl.u32 %v6427_v18, 5 }
 0x538   :  { %v2877_v9 = vsel %vm2870_vm2, %v2873_v25, %v2876_v46  ;;  %v6187_v2 = vxor.u32 2147483648, %v6186_v26  ;;  %v6434_v60 = vor.u32 %v6433_v62, %v6432_v4  ;;  %v6441_v58 = vshll.u32 %v8480_v52, %v6429_v0 }
 0x539   :  { %v2878_v16 = vsel %vm2867_vm1, nan, %v2877_v9  ;;  %v12349_v19 = vsub.s32 %v3147_v23, %v3150_v49  ;;  %v6442_v37 = vshrl.u32 %v8481_v54, %v6430_v38  ;;  %v6437_v17 = vor.u32 %v6436_v22, %v6435_v20  ;;  %v646_v20 = vpop.f32.mrf.mxu1 }
 0x53a   :  { %7372 = vst.msk [vmem:[%s13788_s3 + $0xa0] sm:$0xff] %vm7351_vm0, %v2878_v16  ;;  %v6188_v14 = vsel %vm6105_vm10, %v6187_v2, %v6186_v26  ;;  %v6440_v36 = vor.u32 %v6439_v29, %v6438_v47  ;;  %v6444_v13 = vshll.u32 %v8481_v54, %v6429_v0  ;;  %v6445_v56 = vshrl.u32 %v8482_v61, %v6430_v38 }
 0x53b   :  { %v3153_v11 = vsub.s32 0, %v12349_v19  ;;  %v6191_v30 = vsel %vm12317_vm15, %v12075_v3, %v6188_v14  ;;  %v6443_v8 = vor.u32 %v6442_v37, %v6441_v58  ;;  %v6463_v34 = vshll.u32 %v6423_v15, 8 }
 0x53c   :  { %8383 = vcosq.f32 %v6191_v30  ;;  %v2986_v18 = vand.u32 2139095040, %v12338_v6  ;;  %v6431_v33 = vshrl.u32 %v8477_v44, %v6430_v38  ;;  %v6446_v1 = vor.u32 %v6445_v56, %v6444_v13 }
 0x53d   :  { %v7586_v31 = vmin.u32 %v3153_v11, %v12349_v19  ;;  %8385 = vsinq.f32 %v6191_v30  ;;  %vm6447_vm5 = vcmp.lt.s32.totalorder %v6428_v57, 1  ;;  %vm6448_vm6 = vcmp.lt.s32.totalorder %v6428_v57, 2 }
 0x53e   :  { %vm6449_vm7 = vcmp.lt.s32.totalorder %v6428_v57, 3  ;;  %vm6450_vm9 = vcmp.lt.s32.totalorder %v6428_v57, 4  ;;  %v6455_v23 = vsel %vm6447_vm5, %v6434_v60, %v6437_v17  ;;  %v6459_v0 = vsel %vm6447_vm5, %v6437_v17, %v6440_v36 }
 0x53f   :  { %v3155_v40 = vclz %v7586_v31  ;;  %v6452_v59 = vsel %vm6450_vm9, %v6440_v36, 2102212464  ;;  %v6456_v41 = vsel %vm6450_vm9, %v6443_v8, 920167782  ;;  %v6451_v39 = vsel %vm6447_vm5, %v6431_v33, %v6434_v60 }
 0x540   :  { %v6457_v21 = vsel %vm6449_vm7, %v6440_v36, %v6456_v41  ;;  %v6460_v43 = vsel %vm6450_vm9, %v6446_v1, 1326507024  ;;  %v6453_v53 = vsel %vm6449_vm7, %v6437_v17, %v6452_v59  ;;  %v2987_v27 = vshrl.u32 %v2986_v18, 23 }
 0x541   :  { %v7587_v10 = vadd.s32 4294967294, %v3155_v40  ;;  %v6458_v42 = vsel %vm6448_vm6, %v6455_v23, %v6457_v21  ;;  %v6461_v5 = vsel %vm6449_vm7, %v6443_v8, %v6460_v43  ;;  %v3143_v15 = vadd.s32 %v12296_v35, %v12302_v28 }
 0x542   :  { %v6462_v38 = vsel %vm6448_vm6, %v6459_v0, %v6461_v5  ;;  %v12371_v7 = vmul.u32.u64.low %v6463_v34, %v6458_v42  ;;  %v12372_v46 = vmul.u32.u64.high %v6463_v34, %v6458_v42, %v12371_v7  ;;  %v6454_v9 = vsel %vm6448_vm6, %v6451_v39, %v6453_v53 }
 0x543   :  { %vm7588_vm8 = vcmp.lt.s32.totalorder %v7587_v10, 0  ;;  %v12377_v25 = vmul.u32.u64.low %v6463_v34, %v6462_v38  ;;  %v12378_v26 = vmul.u32.u64.high %v6463_v34, %v6462_v38, %v12377_v25  ;;  %v7581_v4 = vadd.s32 4294967169, %v2987_v27 }
 0x544   :  { %v3158_v62 = vsel %vm7588_vm8, 0, %v7587_v10  ;;  %v6197_v29 = vand.u32 3, %v12327_v51  ;;  %v3173_v2 = vsub.s32 4, %v12329_v24  ;;  %v2983_v47 = vand.u32 2147483647, %v12338_v6 }
 0x545   :  { %v3159_v49 = vsub.s32 32, %v3158_v62  ;;  %v3163_v22 = vsub.s32 4294967266, %v3158_v62  ;;  %v3160_v16 = vshll.u32 %v12349_v19, %v3158_v62  ;;  %vm6195_vm11 = vweird.f32 %v12075_v3 }
 0x546   :  { %v6473_v60 = vadd.s32 1, %v12372_v46  ;;  %v2993_v58 = vadd.s32 1, %v7581_v4  ;;  %vm3089_vm12 = vcmp.lt.s32.totalorder %v12158_v55, 0  ;;  %v6470_v57 = vmul.u32 %v6463_v34, %v6454_v9 }
 0x547   :  { %v3161_v35 = vshrl.u32 %v3143_v15, %v3159_v49  ;;  %v3164_v28 = vadd.s32 127, %v3163_v22  ;;  %vm6472_vm10 = vc.u32 %v12378_v26, %v12371_v7  ;;  %v12391_v51 = vadd.f32 %v12335_v45, %v646_v20 }
 0x548   :  { %v6474_v14 = vsel %vm6472_vm10, %v6473_v60, %v12372_v46  ;;  %vm2994_vm14 = vcmp.gt.s32.totalorder %v2993_v58, 0  ;;  %vm6202_vm13 = vcmp.eq.s32.totalorder %v6197_v29, 2  ;;  %vm12396_vm15 = vcmp.le.f32.partialorder %v3087_v12, 0.7853982 }
 0x549   :  { %v3162_v19 = vor.u32 %v3161_v35, %v3160_v16  ;;  %v3165_v37 = vshll.u32 %v3164_v28, 23  ;;  %v8384_v11 = vpop.eup %8383  ;;  %v6475_v36 = vadd.s32 %v6474_v14, %v6470_v57  ;;  %v2995_v30 = vsel %vm2994_vm14, %v2993_v58, 0 }
 0x54a   :  { %v8386_v8 = vpop.eup %8385  ;;  %v6203_v13 = vxor.u32 2147483648, %v8384_v11  ;;  %v12403_v31 = vsel %vm3089_vm12, %v3173_v2, %v12329_v24  ;;  %v2990_v34 = vand.u32 8388607, %v2983_v47  ;;  %v2997_v1 = vand.u32 31, %v2995_v30 }
 0x54b   :  { %v3166_v56 = vor.u32 4788187, %v3165_v37  ;;  %v6200_v18 = vxor.u32 2147483648, %v8386_v8  ;;  %v6476_v33 = vadd.s32 536870912, %v6475_v36  ;;  %v6314_v12 = vand.u32 2139095040, %v12391_v51 }
 0x54c   :  { %vm6199_vm1 = vcmp.eq.s32.totalorder %v6197_v29, 0  ;;  %v6204_v40 = vsel %vm6202_vm13, %v6203_v13, %v8386_v8  ;;  %v3169_v23 = vcvt.s32.f32 %v3162_v19  ;;  %vm6198_vm2 = vcmp.lt.s32.totalorder %v6197_v29, 2 }
 0x54d   :  { %v3167_v59 = vand.u32 2147483647, %v3166_v56  ;;  %v6201_v41 = vsel %vm6199_vm1, %v8384_v11, %v6200_v18  ;;  %v12408_v0 = vshrl.u32 %v6476_v33, 30  ;;  %v2998_v10 = vsub.s32 32, %v2997_v1 }
 0x54e   :  { %v6205_v39 = vsel %vm6198_vm2, %v6201_v41, %v6204_v40  ;;  %v3176_v21 = vsel %vm12396_vm15, 0, %v12403_v31  ;;  %v2991_v43 = vor.u32 8388608, %v2990_v34  ;;  %v3000_v5 = vshll.u32 %v8477_v44, %v2997_v1 }
 0x54f   :  { %v3170_v24 = vmul.f32 %v3169_v23, %v3167_v59  ;;  %v6206_v53 = vsel %vm6195_vm11, nan, %v6205_v39  ;;  %v6478_v42 = vshll.u32 %v12408_v0, 30  ;;  %v6315_v27 = vshrl.u32 %v6314_v12, 23 }
 0x550   :  { %7404 = vst.msk [vmem:[%s13788_s3 + $0x1a0] sm:$0xff] %vm7351_vm0, %v6206_v53  ;;  %v3001_v46 = vshrl.u32 %v8478_v48, %v2998_v10  ;;  %v3004_v15 = vshrl.u32 %v8479_v50, %v2998_v10  ;;  %v3007_v62 = vshrl.u32 %v8480_v52, %v2998_v10  ;;  %v3003_v3 = vshll.u32 %v8478_v48, %v2997_v1 }
 0x551   :  { %v3171_v38 = vxor.u32 2147483648, %v3170_v24  ;;  %v12424_v25 = vsub.s32 %v6475_v36, %v6478_v42  ;;  %v3006_v49 = vshll.u32 %v8479_v50, %v2997_v1  ;;  %v3010_v22 = vshrl.u32 %v8481_v54, %v2998_v10 }
 0x552   :  { %v2996_v4 = vshrl.u32 %v2995_v30, 5  ;;  %v3002_v20 = vor.u32 %v3001_v46, %v3000_v5  ;;  %v3009_v29 = vshll.u32 %v8480_v52, %v2997_v1  ;;  %v3005_v35 = vor.u32 %v3004_v15, %v3003_v3 }
 0x553   :  { %v3172_v9 = vsel %vm3089_vm12, %v3171_v38, %v3170_v24  ;;  %v6481_v2 = vsub.s32 0, %v12424_v25  ;;  %v3008_v28 = vor.u32 %v3007_v62, %v3006_v49  ;;  %vm6417_vm3 = vcmp.lt.s32.totalorder %v12233_v32, 0 }
 0x554   :  { %v3175_v16 = vsel %vm12396_vm15, %v12158_v55, %v3172_v9  ;;  %v3011_v60 = vor.u32 %v3010_v22, %v3009_v29  ;;  %v3012_v58 = vshll.u32 %v8481_v54, %v2997_v1  ;;  %v3013_v57 = vshrl.u32 %v8482_v61, %v2998_v10 }
 0x555   :  { %8387 = vcosq.f32 %v3175_v16  ;;  %v7714_v19 = vmin.u32 %v6481_v2, %v12424_v25  ;;  %v3031_v37 = vshll.u32 %v2991_v43, 8  ;;  %v7709_v14 = vadd.s32 4294967169, %v6315_v27 }
 0x556   :  { %8389 = vsinq.f32 %v3175_v16  ;;  %v2999_v11 = vshrl.u32 %v8477_v44, %v2998_v10  ;;  %v3014_v17 = vor.u32 %v3013_v57, %v3012_v58  ;;  %vm3015_vm4 = vcmp.lt.s32.totalorder %v2996_v4, 1  ;;  %v7875_v57 = vpop.f32.mrf.mxu0 }
 0x557   :  { %vm3016_vm5 = vcmp.lt.s32.totalorder %v2996_v4, 2  ;;  %v6483_v36 = vclz %v7714_v19  ;;  %vm3017_vm6 = vcmp.lt.s32.totalorder %v2996_v4, 3  ;;  %vm3018_vm7 = vcmp.lt.s32.totalorder %v2996_v4, 4 }
 0x558   :  { %v3023_v30 = vsel %vm3015_vm4, %v3002_v20, %v3005_v35  ;;  %v3020_v8 = vsel %vm3018_vm7, %v3008_v28, 2102212464  ;;  %v3024_v13 = vsel %vm3018_vm7, %v3011_v60, 920167782  ;;  %v3027_v56 = vsel %vm3015_vm4, %v3005_v35, %v3008_v28 }
 0x559   :  { %v3028_v31 = vsel %vm3018_vm7, %v3014_v17, 1326507024  ;;  %v7715_v34 = vadd.s32 4294967294, %v6483_v36  ;;  %v6501_v18 = vsub.s32 4, %v12408_v0  ;;  %v3025_v33 = vsel %vm3017_vm6, %v3008_v28, %v3024_v13 }
 0x55a   :  { %v3029_v1 = vsel %vm3017_vm6, %v3011_v60, %v3028_v31  ;;  %v3180_v12 = vadd.s32 3, %v3176_v21  ;;  %v3019_v40 = vsel %vm3015_vm4, %v2999_v11, %v3002_v20  ;;  %v3026_v59 = vsel %vm3016_vm5, %v3023_v30, %v3025_v33 }
 0x55b   :  { %v3030_v23 = vsel %vm3016_vm5, %v3027_v56, %v3029_v1  ;;  %vm7716_vm9 = vcmp.lt.s32.totalorder %v7715_v34, 0  ;;  %v3021_v41 = vsel %vm3017_vm6, %v3005_v35, %v3020_v8  ;;  %v6321_v42 = vadd.s32 1, %v7709_v14 }
 0x55c   :  { %v12447_v10 = vmul.u32.u64.low %v3031_v37, %v3030_v23  ;;  %v12448_v39 = vmul.u32.u64.high %v3031_v37, %v3030_v23, %v12447_v10  ;;  %v6486_v24 = vsel %vm7716_vm9, 0, %v7715_v34  ;;  %v6471_v21 = vadd.s32 %v12371_v7, %v12378_v26 }
 0x55d   :  { %v12450_v43 = vmul.u32.u64.low %v3031_v37, %v3026_v59  ;;  %v12451_v53 = vmul.u32.u64.high %v3031_v37, %v3026_v59, %v12450_v43  ;;  %v6487_v5 = vsub.s32 32, %v6486_v24  ;;  %v6491_v27 = vsub.s32 4294967266, %v6486_v24 }
 0x55e   :  { %v6502_v38 = vsel %vm6417_vm3, %v6501_v18, %v12408_v0  ;;  %vm3179_vm8 = vweird.f32 %v12158_v55  ;;  %v3181_v46 = vand.u32 3, %v3180_v12  ;;  %vm12462_vm11 = vcmp.le.f32.partialorder %v6415_v63, 0.7853982 }
 0x55f   :  { %v3022_v62 = vsel %vm3016_vm5, %v3019_v40, %v3021_v41  ;;  %vm6322_vm12 = vcmp.gt.s32.totalorder %v6321_v42, 0  ;;  %v6488_v7 = vshll.u32 %v12424_v25, %v6486_v24  ;;  %v6489_v26 = vshrl.u32 %v6471_v21, %v6487_v5 }
 0x560   :  { %v6492_v3 = vadd.s32 127, %v6491_v27  ;;  %vm3040_vm10 = vc.u32 %v12448_v39, %v12450_v43  ;;  %v6504_v0 = vsel %vm12462_vm11, 0, %v6502_v38  ;;  %v3041_v49 = vadd.s32 1, %v12451_v53 }
 0x561   :  { %v6311_v63 = vand.u32 2147483647, %v12391_v51  ;;  %v6323_v22 = vsel %vm6322_vm12, %v6321_v42, 0  ;;  %v6490_v20 = vor.u32 %v6489_v26, %v6488_v7  ;;  %v3038_v29 = vmul.u32 %v3031_v37, %v3022_v62 }
 0x562   :  { %v8388_v9 = vpop.eup %8387  ;;  %v6493_v4 = vshll.u32 %v6492_v3, 23  ;;  %v6325_v16 = vand.u32 31, %v6323_v22  ;;  %vm3182_vm14 = vcmp.lt.s32.totalorder %v3181_v46, 2  ;;  %vm3183_vm13 = vcmp.eq.s32.totalorder %v3181_v46, 0 }
 0x563   :  { %v8390_v2 = vpop.eup %8389  ;;  %v3187_v25 = vxor.u32 2147483648, %v8388_v9  ;;  %v3042_v35 = vsel %vm3040_vm10, %v3041_v49, %v12451_v53  ;;  %vm3186_vm15 = vcmp.eq.s32.totalorder %v3181_v46, 2  ;;  %v6508_v14 = vadd.s32 3, %v6504_v0 }
 0x564   :  { %v3184_v28 = vxor.u32 2147483648, %v8390_v2  ;;  %v6494_v60 = vor.u32 4788187, %v6493_v4  ;;  %v3043_v58 = vadd.s32 %v3042_v35, %v3038_v29  ;;  %v6318_v11 = vand.u32 8388607, %v6311_v63 }
 0x565   :  { %v3188_v19 = vsel %vm3186_vm15, %v3187_v25, %v8390_v2  ;;  %v6326_v17 = vsub.s32 32, %v6325_v16  ;;  %v6497_v30 = vcvt.s32.f32 %v6490_v20  ;;  %v12481_v34 = vadd.f32 %v12335_v45, %v7875_v57 }
 0x566   :  { %v3185_v36 = vsel %vm3183_vm13, %v8388_v9, %v3184_v28  ;;  %v6495_v37 = vand.u32 2147483647, %v6494_v60  ;;  %v3044_v8 = vadd.s32 536870912, %v3043_v58  ;;  %v6324_v40 = vshrl.u32 %v6323_v22, 5 }
 0x567   :  { %v3189_v13 = vsel %vm3182_vm14, %v3185_v36, %v3188_v19  ;;  %v6329_v56 = vshrl.u32 %v8478_v48, %v6326_v17  ;;  %v6332_v31 = vshrl.u32 %v8479_v50, %v6326_v17  ;;  %v6335_v12 = vshrl.u32 %v8480_v52, %v6326_v17  ;;  %v7923_v36 = vpop.f32.mrf.mxu1 }
 0x568   :  { %v3190_v18 = vsel %vm3179_vm8, nan, %v3189_v13  ;;  %v6498_v33 = vmul.f32 %v6497_v30, %v6495_v37  ;;  %v12485_v1 = vshrl.u32 %v3044_v8, 30  ;;  %v6328_v59 = vshll.u32 %v8477_v44, %v6325_v16 }
 0x569   :  { %7375 = vst.msk [vmem:[%s13788_s3 + $0xb8] sm:$0xff] %vm7351_vm0, %v3190_v18  ;;  %v6331_v23 = vshll.u32 %v8478_v48, %v6325_v16  ;;  %v6338_v41 = vshrl.u32 %v8481_v54, %v6326_v17  ;;  %v6334_v24 = vshll.u32 %v8479_v50, %v6325_v16  ;;  %v6337_v53 = vshll.u32 %v8480_v52, %v6325_v16 }
 0x56a   :  { %v6499_v10 = vxor.u32 2147483648, %v6498_v33  ;;  %v3046_v55 = vshll.u32 %v12485_v1, 30  ;;  %v6330_v42 = vor.u32 %v6329_v56, %v6328_v59  ;;  %v6340_v5 = vshll.u32 %v8481_v54, %v6325_v16 }
 0x56b   :  { %v6333_v21 = vor.u32 %v6332_v31, %v6331_v23  ;;  %v6341_v27 = vshrl.u32 %v8482_v61, %v6326_v17  ;;  %v6336_v62 = vor.u32 %v6335_v12, %v6334_v24  ;;  %v6339_v7 = vor.u32 %v6338_v41, %v6337_v53 }
 0x56c   :  { %v6500_v38 = vsel %vm6417_vm3, %v6499_v10, %v6498_v33  ;;  %v12502_v46 = vsub.s32 %v3043_v58, %v3046_v55  ;;  %v12507_v3 = vand.u32 3, %v6508_v14  ;;  %v6319_v0 = vor.u32 8388608, %v6318_v11 }
 0x56d   :  { %v6503_v26 = vsel %vm12462_vm11, %v12233_v32, %v6500_v38  ;;  %v6342_v49 = vor.u32 %v6341_v27, %v6340_v5  ;;  %v6327_v9 = vshrl.u32 %v8477_v44, %v6326_v17  ;;  %v3298_v20 = vand.u32 2139095040, %v12481_v34 }
 0x56e   :  { %8391 = vcosq.f32 %v6503_v26  ;;  %v3049_v22 = vsub.s32 0, %v12502_v46  ;;  %vm6343_vm1 = vcmp.lt.s32.totalorder %v6324_v40, 1  ;;  %vm6345_vm2 = vcmp.lt.s32.totalorder %v6324_v40, 3 }
 0x56f   :  { %8393 = vsinq.f32 %v6503_v26  ;;  %vm6346_vm3 = vcmp.lt.s32.totalorder %v6324_v40, 4  ;;  %v6351_v15 = vsel %vm6343_vm1, %v6330_v42, %v6333_v21  ;;  %v6355_v25 = vsel %vm6343_vm1, %v6333_v21, %v6336_v62 }
 0x570   :  { %v7582_v4 = vmin.u32 %v3049_v22, %v12502_v46  ;;  %v6348_v29 = vsel %vm6346_vm3, %v6336_v62, 2102212464  ;;  %v6352_v16 = vsel %vm6346_vm3, %v6339_v7, 920167782  ;;  %v6356_v35 = vsel %vm6346_vm3, %v6342_v49, 1326507024 }
 0x571   :  { %v6353_v2 = vsel %vm6345_vm2, %v6336_v62, %v6352_v16  ;;  %v6359_v28 = vshll.u32 %v6319_v0, 8  ;;  %v3069_v58 = vsub.s32 4, %v12485_v1  ;;  %vm6344_vm4 = vcmp.lt.s32.totalorder %v6324_v40, 2 }
 0x572   :  { %v3051_v60 = vclz %v7582_v4  ;;  %v6347_v57 = vsel %vm6343_vm1, %v6327_v9, %v6330_v42  ;;  %v6349_v19 = vsel %vm6345_vm2, %v6333_v21, %v6348_v29  ;;  %v6354_v14 = vsel %vm6344_vm4, %v6351_v15, %v6353_v2 }
 0x573   :  { %v6357_v11 = vsel %vm6345_vm2, %v6339_v7, %v6356_v35  ;;  %v3299_v17 = vshrl.u32 %v3298_v20, 23  ;;  %v12517_v8 = vmul.u32.u64.low %v6359_v28, %v6354_v14  ;;  %v12518_v13 = vmul.u32.u64.high %v6359_v28, %v6354_v14, %v12517_v8 }
 0x574   :  { %v7583_v37 = vadd.s32 4294967294, %v3051_v60  ;;  %v6358_v30 = vsel %vm6344_vm4, %v6355_v25, %v6357_v11  ;;  %vm2985_vm5 = vcmp.lt.s32.totalorder %v12338_v6, 0  ;;  %vm12526_vm6 = vcmp.le.f32.partialorder %v2983_v47, 0.7853982 }
 0x575   :  { %v12521_v56 = vmul.u32.u64.low %v6359_v28, %v6358_v30  ;;  %v12522_v31 = vmul.u32.u64.high %v6359_v28, %v6358_v30, %v12521_v56  ;;  %v7593_v18 = vadd.s32 4294967169, %v3299_v17  ;;  %v6350_v12 = vsel %vm6344_vm4, %v6347_v57, %v6349_v19 }
 0x576   :  { %vm7584_vm7 = vcmp.lt.s32.totalorder %v7583_v37, 0  ;;  %v12531_v40 = vadd.f32 %v12335_v45, %v7923_v36  ;;  %vm6510_vm9 = vcmp.lt.s32.totalorder %v12507_v3, 2  ;;  %v3039_v59 = vadd.s32 %v12450_v43, %v12448_v39 }
 0x577   :  { %v3054_v23 = vsel %vm7584_vm7, 0, %v7583_v37  ;;  %v3295_v41 = vand.u32 2147483647, %v12481_v34  ;;  %v3305_v10 = vadd.s32 1, %v7593_v18  ;;  %vm6507_vm8 = vweird.f32 %v12233_v32 }
 0x578   :  { %v3055_v47 = vsub.s32 32, %v3054_v23  ;;  %v3059_v55 = vsub.s32 4294967266, %v3054_v23  ;;  %v3070_v24 = vsel %vm2985_vm5, %v3069_v58, %v12485_v1  ;;  %v6369_v53 = vadd.s32 1, %v12518_v13 }
 0x579   :  { %v3056_v42 = vshll.u32 %v12502_v46, %v3054_v23  ;;  %v6366_v21 = vmul.u32 %v6359_v28, %v6350_v12  ;;  %vm6368_vm11 = vc.u32 %v12522_v31, %v12517_v8  ;;  %vm3306_vm12 = vcmp.gt.s32.totalorder %v3305_v10, 0 }
 0x57a   :  { %v3057_v39 = vshrl.u32 %v3039_v59, %v3055_v47  ;;  %v3060_v43 = vadd.s32 127, %v3059_v55  ;;  %v6370_v5 = vsel %vm6368_vm11, %v6369_v53, %v12518_v13  ;;  %v3307_v27 = vsel %vm3306_vm12, %v3305_v10, 0 }
 0x57b   :  { %v8392_v38 = vpop.eup %8391  ;;  %v3072_v62 = vsel %vm12526_vm6, 0, %v3070_v24  ;;  %v6371_v7 = vadd.s32 %v6370_v5, %v6366_v21  ;;  %v3302_v1 = vand.u32 8388607, %v3295_v41  ;;  %v3309_v26 = vand.u32 31, %v3307_v27 }
 0x57c   :  { %v8394_v0 = vpop.eup %8393  ;;  %vm6511_vm10 = vcmp.eq.s32.totalorder %v12507_v3, 0  ;;  %v6515_v46 = vxor.u32 2147483648, %v8392_v38  ;;  %v3058_v49 = vor.u32 %v3057_v39, %v3056_v42  ;;  %v3061_v22 = vshll.u32 %v3060_v43, 23 }
 0x57d   :  { %v6512_v9 = vxor.u32 2147483648, %v8394_v0  ;;  %vm6514_vm14 = vcmp.eq.s32.totalorder %v12507_v3, 2  ;;  %v6372_v20 = vadd.s32 536870912, %v6371_v7  ;;  %v3310_v4 = vsub.s32 32, %v3309_v26 }
 0x57e   :  { %v6516_v29 = vsel %vm6514_vm14, %v6515_v46, %v8394_v0  ;;  %v3062_v15 = vor.u32 4788187, %v3061_v22  ;;  %v12551_v16 = vadd.s32 3, %v3072_v62  ;;  %v6623_v2 = vand.u32 2147483647, %v12531_v40 }
 0x57f   :  { %v6513_v25 = vsel %vm6511_vm10, %v8392_v38, %v6512_v9  ;;  %v6373_v35 = vshrl.u32 %v6372_v20, 30  ;;  %v3303_v28 = vor.u32 8388608, %v3302_v1  ;;  %v6626_v60 = vand.u32 2139095040, %v12531_v40 }
 0x580   :  { %v6517_v58 = vsel %vm6510_vm9, %v6513_v25, %v6516_v29  ;;  %v3063_v57 = vand.u32 2147483647, %v3062_v15  ;;  %v3065_v19 = vcvt.s32.f32 %v3058_v49  ;;  %v3313_v14 = vshrl.u32 %v8478_v48, %v3310_v4 }
 0x581   :  { %v6518_v11 = vsel %vm6507_vm8, nan, %v6517_v58  ;;  %v12561_v17 = vadd.s32 %v12517_v8, %v12522_v31  ;;  %v6374_v36 = vshll.u32 %v6373_v35, 30  ;;  %v3316_v37 = vshrl.u32 %v8479_v50, %v3310_v4 }
 0x582   :  { %7407 = vst.msk [vmem:[%s13788_s3 + $0x1b8] sm:$0xff] %vm7351_vm0, %v6518_v11  ;;  %v3066_v3 = vmul.f32 %v3065_v19, %v3063_v57  ;;  %v3308_v30 = vshrl.u32 %v3307_v27, 5  ;;  %v3312_v13 = vshll.u32 %v8477_v44, %v3309_v26  ;;  %v3319_v56 = vshrl.u32 %v8480_v52, %v3310_v4 }
 0x583   :  { %v12570_v18 = vsub.s32 %v6371_v7, %v6374_v36  ;;  %v3315_v32 = vshll.u32 %v8478_v48, %v3309_v26  ;;  %v3318_v8 = vshll.u32 %v8479_v50, %v3309_v26  ;;  %v3322_v31 = vshrl.u32 %v8481_v54, %v3310_v4 }
 0x584   :  { %v3067_v12 = vxor.u32 2147483648, %v3066_v3  ;;  %v3314_v59 = vor.u32 %v3313_v14, %v3312_v13  ;;  %v3321_v23 = vshll.u32 %v8480_v52, %v3309_v26  ;;  %v3325_v10 = vshrl.u32 %v8482_v61, %v3310_v4 }
 0x585   :  { %vm6313_vm13 = vcmp.lt.s32.totalorder %v12391_v51, 0  ;;  %v6377_v47 = vsub.s32 0, %v12570_v18  ;;  %v3317_v55 = vor.u32 %v3316_v37, %v3315_v32  ;;  %v3320_v24 = vor.u32 %v3319_v56, %v3318_v8 }
 0x586   :  { %v3324_v53 = vshll.u32 %v8481_v54, %v3309_v26  ;;  %v3068_v42 = vsel %vm2985_vm5, %v3067_v12, %v3066_v3  ;;  %v3323_v21 = vor.u32 %v3322_v31, %v3321_v23  ;;  %v3343_v39 = vshll.u32 %v3303_v28, 8 }
 0x587   :  { %v6627_v43 = vshrl.u32 %v6626_v60, 23  ;;  %v3071_v5 = vsel %vm12526_vm6, %v12338_v6, %v3068_v42  ;;  %v7710_v27 = vmin.u32 %v6377_v47, %v12570_v18  ;;  %v3311_v38 = vshrl.u32 %v8477_v44, %v3310_v4 }
 0x588   :  { %v3326_v62 = vor.u32 %v3325_v10, %v3324_v53  ;;  %8395 = vcosq.f32 %v3071_v5  ;;  %v6397_v7 = vsub.s32 4, %v6373_v35  ;;  %vm3327_vm15 = vcmp.lt.s32.totalorder %v3308_v30, 1 }
 0x589   :  { %vm3330_vm1 = vcmp.lt.s32.totalorder %v3308_v30, 4  ;;  %8397 = vsinq.f32 %v3071_v5  ;;  %v6379_v1 = vclz %v7710_v27  ;;  %v3335_v0 = vsel %vm3327_vm15, %v3314_v59, %v3317_v55 }
 0x58a   :  { %v3332_v26 = vsel %vm3330_vm1, %v3320_v24, 2102212464  ;;  %vm3328_vm2 = vcmp.lt.s32.totalorder %v3308_v30, 2  ;;  %vm3329_vm3 = vcmp.lt.s32.totalorder %v3308_v30, 3  ;;  %v3336_v46 = vsel %vm3330_vm1, %v3323_v21, 920167782 }
 0x58b   :  { %v3339_v49 = vsel %vm3327_vm15, %v3317_v55, %v3320_v24  ;;  %v7711_v22 = vadd.s32 4294967294, %v6379_v1  ;;  %v3331_v33 = vsel %vm3327_vm15, %v3311_v38, %v3314_v59  ;;  %v3337_v9 = vsel %vm3329_vm3, %v3320_v24, %v3336_v46 }
 0x58c   :  { %v3340_v20 = vsel %vm3330_vm1, %v3326_v62, 1326507024  ;;  %v3333_v29 = vsel %vm3329_vm3, %v3317_v55, %v3332_v26  ;;  %v3338_v4 = vsel %vm3328_vm2, %v3335_v0, %v3337_v9  ;;  %v7721_v25 = vadd.s32 4294967169, %v6627_v43 }
 0x58d   :  { %v3341_v15 = vsel %vm3329_vm3, %v3323_v21, %v3340_v20  ;;  %vm7712_vm4 = vcmp.lt.s32.totalorder %v7711_v22, 0  ;;  %v12589_v60 = vmul.u32.u64.low %v3343_v39, %v3338_v4  ;;  %v12590_v58 = vmul.u32.u64.high %v3343_v39, %v3338_v4, %v12589_v60 }
 0x58e   :  { %v3342_v28 = vsel %vm3328_vm2, %v3339_v49, %v3341_v15  ;;  %v6382_v57 = vsel %vm7712_vm4, 0, %v7711_v22  ;;  %v6398_v19 = vsel %vm6313_vm13, %v6397_v7, %v6373_v35  ;;  %v3334_v3 = vsel %vm3328_vm2, %v3331_v33, %v3333_v29 }
 0x58f   :  { %v12595_v14 = vmul.u32.u64.low %v3343_v39, %v3342_v28  ;;  %v12596_v11 = vmul.u32.u64.high %v3343_v39, %v3342_v28, %v12595_v14  ;;  %v6383_v36 = vsub.s32 32, %v6382_v57  ;;  %v6387_v37 = vsub.s32 4294967266, %v6382_v57 }
 0x590   :  { %v6633_v13 = vadd.s32 1, %v7721_v25  ;;  %v3077_v56 = vand.u32 3, %v12551_v16  ;;  %vm12602_vm5 = vcmp.le.f32.partialorder %v6311_v63, 0.7853982  ;;  %v6384_v8 = vshll.u32 %v12570_v18, %v6382_v57  ;;  %v496_v57 = vpop.f32.mrf.mxu0 }
 0x591   :  { %v6385_v35 = vshrl.u32 %v12561_v17, %v6383_v36  ;;  %v6388_v31 = vadd.s32 127, %v6387_v37  ;;  %v3353_v12 = vadd.s32 1, %v12590_v58  ;;  %v6400_v30 = vsel %vm12602_vm5, 0, %v6398_v19 }
 0x592   :  { %vm6634_vm6 = vcmp.gt.s32.totalorder %v6633_v13, 0  ;;  %v3350_v59 = vmul.u32 %v3343_v39, %v3334_v3  ;;  %vm3352_vm7 = vc.u32 %v12596_v11, %v12589_v60  ;;  %v6630_v18 = vand.u32 8388607, %v6623_v2 }
 0x593   :  { %v6635_v16 = vsel %vm6634_vm6, %v6633_v13, 0  ;;  %v6386_v63 = vor.u32 %v6385_v35, %v6384_v8  ;;  %v6389_v23 = vshll.u32 %v6388_v31, 23  ;;  %v3354_v10 = vsel %vm3352_vm7, %v3353_v12, %v12590_v58 }
 0x594   :  { %vm3075_vm9 = vweird.f32 %v12338_v6  ;;  %v3355_v17 = vadd.s32 %v3354_v10, %v3350_v59  ;;  %v6637_v47 = vand.u32 31, %v6635_v16  ;;  %vm3078_vm8 = vcmp.lt.s32.totalorder %v3077_v56, 2 }
 0x595   :  { %v8396_v55 = vpop.eup %8395  ;;  %vm3079_vm11 = vcmp.eq.s32.totalorder %v3077_v56, 0  ;;  %vm3082_vm12 = vcmp.eq.s32.totalorder %v3077_v56, 2  ;;  %v6390_v24 = vor.u32 4788187, %v6389_v23  ;;  %v12617_v21 = vadd.s32 3, %v6400_v30 }
 0x596   :  { %v8398_v53 = vpop.eup %8397  ;;  %v3083_v42 = vxor.u32 2147483648, %v8396_v55  ;;  %v3356_v39 = vadd.s32 536870912, %v3355_v17  ;;  %v6638_v43 = vsub.s32 32, %v6637_v47  ;;  %v6393_v38 = vcvt.s32.f32 %v6386_v63 }
 0x597   :  { %v3080_v5 = vxor.u32 2147483648, %v8398_v53  ;;  %v6391_v27 = vand.u32 2147483647, %v6390_v24  ;;  %v6631_v62 = vor.u32 8388608, %v6630_v18  ;;  %v6640_v26 = vshll.u32 %v8477_v44, %v6637_v47 }
 0x598   :  { %v3084_v7 = vsel %vm3082_vm12, %v3083_v42, %v8398_v53  ;;  %v3357_v1 = vshrl.u32 %v3356_v39, 30  ;;  %v6641_v0 = vshrl.u32 %v8478_v48, %v6638_v43  ;;  %v6644_v22 = vshrl.u32 %v8479_v50, %v6638_v43 }
 0x599   :  { %v3081_v46 = vsel %vm3079_vm11, %v8396_v55, %v3080_v5  ;;  %v6394_v49 = vmul.f32 %v6393_v38, %v6391_v27  ;;  %v6647_v33 = vshrl.u32 %v8480_v52, %v6638_v43  ;;  %v6636_v29 = vshrl.u32 %v6635_v16, 5  ;;  %v656_v38 = vpop.f32.mrf.mxu1 }
 0x59a   :  { %v3085_v9 = vsel %vm3078_vm8, %v3081_v46, %v3084_v7  ;;  %v3358_v20 = vshll.u32 %v3357_v1, 30  ;;  %v6643_v4 = vshll.u32 %v8478_v48, %v6637_v47  ;;  %vm3297_vm10 = vcmp.lt.s32.totalorder %v12481_v34, 0 }
 0x59b   :  { %v3086_v15 = vsel %vm3075_vm9, nan, %v3085_v9  ;;  %v6395_v25 = vxor.u32 2147483648, %v6394_v49  ;;  %v6642_v28 = vor.u32 %v6641_v0, %v6640_v26  ;;  %v6646_v58 = vshll.u32 %v8479_v50, %v6637_v47 }
 0x59c   :  { %7374 = vst.msk [vmem:[%s13788_s3 + $0xb0] sm:$0xff] %vm7351_vm0, %v3086_v15  ;;  %v12634_v19 = vsub.s32 %v3355_v17, %v3358_v20  ;;  %v6645_v14 = vor.u32 %v6644_v22, %v6643_v4  ;;  %v6649_v36 = vshll.u32 %v8480_v52, %v6637_v47  ;;  %v6650_v6 = vshrl.u32 %v8481_v54, %v6638_v43 }
 0x59d   :  { %v6396_v37 = vsel %vm6313_vm13, %v6395_v25, %v6394_v49  ;;  %v6648_v3 = vor.u32 %v6647_v33, %v6646_v58  ;;  %v6652_v13 = vshll.u32 %v8481_v54, %v6637_v47  ;;  %v6653_v56 = vshrl.u32 %v8482_v61, %v6638_v43 }
 0x59e   :  { %v6399_v8 = vsel %vm12602_vm5, %v12391_v51, %v6396_v37  ;;  %v3361_v35 = vsub.s32 0, %v12634_v19  ;;  %v6651_v31 = vor.u32 %v6650_v6, %v6649_v36  ;;  %v12647_v12 = vadd.f32 %v12335_v45, %v496_v57 }
 0x59f   :  { %8399 = vcosq.f32 %v6399_v8  ;;  %v6639_v30 = vshrl.u32 %v8477_v44, %v6638_v43  ;;  %v6654_v59 = vor.u32 %v6653_v56, %v6652_v13  ;;  %vm6655_vm14 = vcmp.lt.s32.totalorder %v6636_v29, 1 }
 0x5a0   :  { %8401 = vsinq.f32 %v6399_v8  ;;  %v7594_v16 = vmin.u32 %v3361_v35, %v12634_v19  ;;  %v3381_v63 = vsub.s32 4, %v3357_v1  ;;  %vm6658_vm13 = vcmp.lt.s32.totalorder %v6636_v29, 4 }
 0x5a1   :  { %v6660_v23 = vsel %vm6658_vm13, %v6648_v3, 2102212464  ;;  %v6663_v10 = vsel %vm6655_vm14, %v6642_v28, %v6645_v14  ;;  %v6664_v32 = vsel %vm6658_vm13, %v6651_v31, 920167782  ;;  %v6671_v18 = vshll.u32 %v6631_v62, 8 }
 0x5a2   :  { %v3363_v17 = vclz %v7594_v16  ;;  %vm6657_vm15 = vcmp.lt.s32.totalorder %v6636_v29, 3  ;;  %v6659_v47 = vsel %vm6655_vm14, %v6639_v30, %v6642_v28  ;;  %v6667_v55 = vsel %vm6655_vm14, %v6645_v14, %v6648_v3 }
 0x5a3   :  { %vm6656_vm1 = vcmp.lt.s32.totalorder %v6636_v29, 2  ;;  %v6661_v24 = vsel %vm6657_vm15, %v6645_v14, %v6660_v23  ;;  %v6665_v53 = vsel %vm6657_vm15, %v6648_v3, %v6664_v32  ;;  %v6668_v42 = vsel %vm6658_vm13, %v6654_v59, 1326507024 }
 0x5a4   :  { %v7595_v39 = vadd.s32 4294967294, %v3363_v17  ;;  %v3382_v43 = vsel %vm3297_vm10, %v3381_v63, %v3357_v1  ;;  %v6666_v5 = vsel %vm6656_vm1, %v6663_v10, %v6665_v53  ;;  %v6669_v27 = vsel %vm6657_vm15, %v6651_v31, %v6668_v42 }
 0x5a5   :  { %v6662_v7 = vsel %vm6656_vm1, %v6659_v47, %v6661_v24  ;;  %v6670_v26 = vsel %vm6656_vm1, %v6667_v55, %v6669_v27  ;;  %v12653_v0 = vmul.u32.u64.low %v6671_v18, %v6666_v5  ;;  %v12654_v46 = vmul.u32.u64.high %v6671_v18, %v6666_v5, %v12653_v0 }
 0x5a6   :  { %vm7596_vm2 = vcmp.lt.s32.totalorder %v7595_v39, 0  ;;  %v12657_v62 = vmul.u32.u64.low %v6671_v18, %v6670_v26  ;;  %v12658_v49 = vmul.u32.u64.high %v6671_v18, %v6670_v26, %v12657_v62  ;;  %v3194_v22 = vand.u32 2139095040, %v12647_v12 }
 0x5a7   :  { %v6405_v33 = vand.u32 3, %v12617_v21  ;;  %vm12664_vm3 = vcmp.le.f32.partialorder %v3295_v41, 0.7853982  ;;  %v3366_v9 = vsel %vm7596_vm2, 0, %v7595_v39  ;;  %v12669_v20 = vadd.f32 %v12335_v45, %v656_v38 }
 0x5a8   :  { %v3351_v29 = vadd.s32 %v12589_v60, %v12596_v11  ;;  %v3367_v4 = vsub.s32 32, %v3366_v9  ;;  %v3371_v15 = vsub.s32 4294967266, %v3366_v9  ;;  %v3195_v25 = vshrl.u32 %v3194_v22, 23 }
 0x5a9   :  { %v3384_v28 = vsel %vm12664_vm3, 0, %v3382_v43  ;;  %v6678_v21 = vmul.u32 %v6671_v18, %v6662_v7  ;;  %v6681_v58 = vadd.s32 1, %v12654_v46  ;;  %v3191_v41 = vand.u32 2147483647, %v12647_v12 }
 0x5aa   :  { %v3368_v57 = vshll.u32 %v12634_v19, %v3366_v9  ;;  %v3369_v14 = vshrl.u32 %v3351_v29, %v3367_v4  ;;  %v3372_v36 = vadd.s32 127, %v3371_v15  ;;  %vm6680_vm4 = vc.u32 %v12658_v49, %v12653_v0 }
 0x5ab   :  { %vm6406_vm5 = vcmp.lt.s32.totalorder %v6405_v33, 2  ;;  %v6682_v45 = vsel %vm6680_vm4, %v6681_v58, %v12654_v46  ;;  %v7589_v60 = vadd.s32 4294967169, %v3195_v25  ;;  %v6522_v11 = vand.u32 2139095040, %v12669_v20 }
 0x5ac   :  { %v8400_v6 = vpop.eup %8399  ;;  %vm6407_vm6 = vcmp.eq.s32.totalorder %v6405_v33, 0  ;;  %v3370_v37 = vor.u32 %v3369_v14, %v3368_v57  ;;  %v3373_v3 = vshll.u32 %v3372_v36, 23  ;;  %v6683_v13 = vadd.s32 %v6682_v45, %v6678_v21 }
 0x5ad   :  { %v8402_v56 = vpop.eup %8401  ;;  %vm6410_vm7 = vcmp.eq.s32.totalorder %v6405_v33, 2  ;;  %v6411_v8 = vxor.u32 2147483648, %v8400_v6  ;;  %v3388_v19 = vadd.s32 3, %v3384_v28  ;;  %v3201_v35 = vadd.s32 1, %v7589_v60 }
 0x5ae   :  { %v6408_v31 = vxor.u32 2147483648, %v8402_v56  ;;  %v3374_v30 = vor.u32 4788187, %v3373_v3  ;;  %v6684_v59 = vadd.s32 536870912, %v6683_v13  ;;  %v3198_v16 = vand.u32 8388607, %v3191_v41 }
 0x5af   :  { %v6412_v63 = vsel %vm6410_vm7, %v6411_v8, %v8402_v56  ;;  %v3377_v23 = vcvt.s32.f32 %v3370_v37  ;;  %vm3202_vm9 = vcmp.gt.s32.totalorder %v3201_v35, 0  ;;  %v6523_v10 = vshrl.u32 %v6522_v11, 23 }
 0x5b0   :  { %v6409_v32 = vsel %vm6407_vm6, %v8400_v6, %v6408_v31  ;;  %v3375_v18 = vand.u32 2147483647, %v3374_v30  ;;  %v6685_v17 = vshrl.u32 %v6684_v59, 30  ;;  %v3203_v47 = vsel %vm3202_vm9, %v3201_v35, 0 }
 0x5b1   :  { %vm6403_vm8 = vweird.f32 %v12391_v51  ;;  %v6413_v55 = vsel %vm6406_vm5, %v6409_v32, %v6412_v63  ;;  %v3205_v24 = vand.u32 31, %v3203_v47  ;;  %v12687_v39 = vand.u32 3, %v3388_v19 }
 0x5b2   :  { %v6414_v53 = vsel %vm6403_vm8, nan, %v6413_v55  ;;  %v3378_v42 = vmul.f32 %v3377_v23, %v3375_v18  ;;  %vm6625_vm11 = vcmp.lt.s32.totalorder %v12531_v40, 0  ;;  %v6686_v43 = vshll.u32 %v6685_v17, 30 }
 0x5b3   :  { %7406 = vst.msk [vmem:[%s13788_s3 + $0x1b0] sm:$0xff] %vm7351_vm0, %v6414_v53  ;;  %v3199_v5 = vor.u32 8388608, %v3198_v16  ;;  %v3206_v27 = vsub.s32 32, %v3205_v24  ;;  %v6519_v38 = vand.u32 2147483647, %v12669_v20  ;;  %v7717_v51 = vadd.s32 4294967169, %v6523_v10 }
 0x5b4   :  { %v3379_v7 = vxor.u32 2147483648, %v3378_v42  ;;  %v12695_v26 = vsub.s32 %v6683_v13, %v6686_v43  ;;  %v6709_v46 = vsub.s32 4, %v6685_v17  ;;  %v3204_v62 = vshrl.u32 %v3203_v47, 5 }
 0x5b5   :  { %v3208_v22 = vshll.u32 %v8477_v44, %v3205_v24  ;;  %v3209_v33 = vshrl.u32 %v8478_v48, %v3206_v27  ;;  %v3211_v9 = vshll.u32 %v8478_v48, %v3205_v24  ;;  %v3212_v29 = vshrl.u32 %v8479_v50, %v3206_v27 }
 0x5b6   :  { %v3380_v4 = vsel %vm3297_vm10, %v3379_v7, %v3378_v42  ;;  %vm12705_vm12 = vcmp.le.f32.partialorder %v6623_v2, 0.7853982  ;;  %v6689_v25 = vsub.s32 0, %v12695_v26  ;;  %v3214_v28 = vshll.u32 %v8479_v50, %v3205_v24 }
 0x5b7   :  { %v3215_v21 = vshrl.u32 %v8480_v52, %v3206_v27  ;;  %v3383_v58 = vsel %vm12664_vm3, %v12481_v34, %v3380_v4  ;;  %v3210_v57 = vor.u32 %v3209_v33, %v3208_v22  ;;  %v3217_v14 = vshll.u32 %v8480_v52, %v3205_v24 }
 0x5b8   :  { %v3218_v36 = vshrl.u32 %v8481_v54, %v3206_v27  ;;  %8403 = vcosq.f32 %v3383_v58  ;;  %v7722_v2 = vmin.u32 %v6689_v25, %v12695_v26  ;;  %v3213_v45 = vor.u32 %v3212_v29, %v3211_v9 }
 0x5b9   :  { %v3216_v60 = vor.u32 %v3215_v21, %v3214_v28  ;;  %8405 = vsinq.f32 %v3383_v58  ;;  %v3220_v6 = vshll.u32 %v8481_v54, %v3205_v24  ;;  %v3221_v37 = vshrl.u32 %v8482_v61, %v3206_v27 }
 0x5ba   :  { %v3219_v11 = vor.u32 %v3218_v36, %v3217_v14  ;;  %v6679_v1 = vadd.s32 %v12653_v0, %v12658_v49  ;;  %v6691_v3 = vclz %v7722_v2  ;;  %v3239_v13 = vshll.u32 %v3199_v5, 8 }
 0x5bb   :  { %v6529_v56 = vadd.s32 1, %v7717_v51  ;;  %v6710_v8 = vsel %vm6625_vm11, %v6709_v46, %v6685_v17  ;;  %v3207_v19 = vshrl.u32 %v8477_v44, %v3206_v27  ;;  %v3222_v35 = vor.u32 %v3221_v37, %v3220_v6 }
 0x5bc   :  { %vm3223_vm10 = vcmp.lt.s32.totalorder %v3204_v62, 1  ;;  %v7723_v31 = vadd.s32 4294967294, %v6691_v3  ;;  %vm3225_vm14 = vcmp.lt.s32.totalorder %v3204_v62, 3  ;;  %vm3226_vm13 = vcmp.lt.s32.totalorder %v3204_v62, 4 }
 0x5bd   :  { %v3231_v30 = vsel %vm3223_vm10, %v3210_v57, %v3213_v45  ;;  %v3228_v59 = vsel %vm3226_vm13, %v3216_v60, 2102212464  ;;  %v3232_v16 = vsel %vm3226_vm13, %v3219_v11, 920167782  ;;  %v3235_v63 = vsel %vm3223_vm10, %v3213_v45, %v3216_v60 }
 0x5be   :  { %v3236_v0 = vsel %vm3226_vm13, %v3222_v35, 1326507024  ;;  %vm7724_vm15 = vcmp.lt.s32.totalorder %v7723_v31, 0  ;;  %vm3224_vm1 = vcmp.lt.s32.totalorder %v3204_v62, 2  ;;  %v3233_v49 = vsel %vm3225_vm14, %v3216_v60, %v3232_v16 }
 0x5bf   :  { %v3237_v23 = vsel %vm3225_vm14, %v3219_v11, %v3236_v0  ;;  %v6694_v10 = vsel %vm7724_vm15, 0, %v7723_v31  ;;  %v6712_v32 = vsel %vm12705_vm12, 0, %v6710_v8  ;;  %v3234_v18 = vsel %vm3224_vm1, %v3231_v30, %v3233_v49 }
 0x5c0   :  { %v3238_v17 = vsel %vm3224_vm1, %v3235_v63, %v3237_v23  ;;  %v6695_v47 = vsub.s32 32, %v6694_v10  ;;  %v6699_v55 = vsub.s32 4294967266, %v6694_v10  ;;  %v3227_v24 = vsel %vm3223_vm10, %v3207_v19, %v3210_v57 }
 0x5c1   :  { %v3229_v53 = vsel %vm3225_vm14, %v3213_v45, %v3228_v59  ;;  %v12735_v42 = vmul.u32.u64.low %v3239_v13, %v3238_v17  ;;  %v12736_v43 = vmul.u32.u64.high %v3239_v13, %v3238_v17, %v12735_v42  ;;  %vm3387_vm2 = vweird.f32 %v12481_v34 }
 0x5c2   :  { %v12738_v5 = vmul.u32.u64.low %v3239_v13, %v3234_v18  ;;  %v12739_v27 = vmul.u32.u64.high %v3239_v13, %v3234_v18, %v12738_v5  ;;  %v6696_v51 = vshll.u32 %v12695_v26, %v6694_v10  ;;  %v6697_v7 = vshrl.u32 %v6679_v1, %v6695_v47  ;;  %v7878_v18 = vpop.f32.mrf.mxu0 }
 0x5c3   :  { %v6700_v46 = vadd.s32 127, %v6699_v55  ;;  %vm6530_vm3 = vcmp.gt.s32.totalorder %v6529_v56, 0  ;;  %v6716_v22 = vadd.s32 3, %v6712_v32  ;;  %v3230_v33 = vsel %vm3224_vm1, %v3227_v24, %v3229_v53 }
 0x5c4   :  { %v6526_v9 = vand.u32 8388607, %v6519_v38  ;;  %v6531_v29 = vsel %vm6530_vm3, %v6529_v56, 0  ;;  %vm3390_vm4 = vcmp.lt.s32.totalorder %v12687_v39, 2  ;;  %v6698_v4 = vor.u32 %v6697_v7, %v6696_v51 }
 0x5c5   :  { %v6701_v25 = vshll.u32 %v6700_v46, 23  ;;  %v6533_v28 = vand.u32 31, %v6531_v29  ;;  %v8404_v21 = vpop.eup %8403  ;;  %vm3391_vm5 = vcmp.eq.s32.totalorder %v12687_v39, 0  ;;  %vm3394_vm6 = vcmp.eq.s32.totalorder %v12687_v39, 2 }
 0x5c6   :  { %vm3248_vm7 = vc.u32 %v12736_v43, %v12738_v5  ;;  %v3249_v26 = vadd.s32 1, %v12739_v27  ;;  %v8406_v62 = vpop.eup %8405  ;;  %v3395_v58 = vxor.u32 2147483648, %v8404_v21  ;;  %v3246_v14 = vmul.u32 %v3239_v13, %v3230_v33 }
 0x5c7   :  { %v6702_v57 = vor.u32 4788187, %v6701_v25  ;;  %v6534_v36 = vsub.s32 32, %v6533_v28  ;;  %v3392_v2 = vxor.u32 2147483648, %v8406_v62  ;;  %v12753_v45 = vand.u32 3, %v6716_v22 }
 0x5c8   :  { %v3250_v60 = vsel %vm3248_vm7, %v3249_v26, %v12739_v27  ;;  %v6527_v11 = vor.u32 8388608, %v6526_v9  ;;  %v3396_v6 = vsel %vm3394_vm6, %v3395_v58, %v8406_v62  ;;  %v6705_v1 = vcvt.s32.f32 %v6698_v4  ;;  %v12786_v22 = vld [vmem:[%s13787_s2] ss:$0 sm:$0xff] }
 0x5c9   :  { %v6703_v37 = vand.u32 2147483647, %v6702_v57  ;;  %v3251_v3 = vadd.s32 %v3250_v60, %v3246_v14  ;;  %v3393_v56 = vsel %vm3391_vm5, %v8404_v21, %v3392_v2  ;;  %v12758_v8 = vshrl.u32 %v6531_v29, 5  ;;  %v7926_v60 = vpop.f32.mrf.mxu1 }
 0x5ca   :  { %v6537_v19 = vshrl.u32 %v8478_v48, %v6534_v36  ;;  %v6540_v13 = vshrl.u32 %v8479_v50, %v6534_v36  ;;  %v3397_v35 = vsel %vm3390_vm4, %v3393_v56, %v3396_v6  ;;  %v6543_v59 = vshrl.u32 %v8480_v52, %v6534_v36 }
 0x5cb   :  { %v6706_v31 = vmul.f32 %v6705_v1, %v6703_v37  ;;  %v3252_v30 = vadd.s32 536870912, %v3251_v3  ;;  %v3398_v16 = vsel %vm3387_vm2, nan, %v3397_v35  ;;  %v6536_v63 = vshll.u32 %v8477_v44, %v6533_v28 }
 0x5cc   :  { %v6539_v0 = vshll.u32 %v8478_v48, %v6533_v28  ;;  %v6542_v49 = vshll.u32 %v8479_v50, %v6533_v28  ;;  %7377 = vst.msk [vmem:[%s13788_s3 + $0xc8] sm:$0xff] %vm7351_vm0, %v3398_v16  ;;  %v6545_v10 = vshll.u32 %v8480_v52, %v6533_v28  ;;  %v6546_v32 = vshrl.u32 %v8481_v54, %v6534_v36 }
 0x5cd   :  { %v6707_v39 = vxor.u32 2147483648, %v6706_v31  ;;  %v3253_v23 = vshrl.u32 %v3252_v30, 30  ;;  %v6538_v34 = vor.u32 %v6537_v19, %v6536_v63  ;;  %v6548_v47 = vshll.u32 %v8481_v54, %v6533_v28 }
 0x5ce   :  { %v6541_v17 = vor.u32 %v6540_v13, %v6539_v0  ;;  %v6549_v55 = vshrl.u32 %v8482_v61, %v6534_v36  ;;  %v6544_v42 = vor.u32 %v6543_v59, %v6542_v49  ;;  %v6547_v27 = vor.u32 %v6546_v32, %v6545_v10 }
 0x5cf   :  { %v6708_v24 = vsel %vm6625_vm11, %v6707_v39, %v6706_v31  ;;  %v3254_v53 = vshll.u32 %v3253_v23, 30  ;;  %v6567_v46 = vshll.u32 %v6527_v11, 8  ;;  %v12789_v33 = vadd.f32 %v12786_v22, %v7878_v18 }
 0x5d0   :  { %v6711_v51 = vsel %vm12705_vm12, %v12531_v40, %v6708_v24  ;;  %v6550_v7 = vor.u32 %v6549_v55, %v6548_v47  ;;  %v6535_v29 = vshrl.u32 %v8477_v44, %v6534_v36  ;;  %vm6551_vm9 = vcmp.lt.s32.totalorder %v12758_v8, 1 }
 0x5d1   :  { %8407 = vcosq.f32 %v6711_v51  ;;  %v12791_v9 = vsub.s32 %v3251_v3, %v3254_v53  ;;  %vm6552_vm8 = vcmp.lt.s32.totalorder %v12758_v8, 2  ;;  %vm6554_vm11 = vcmp.lt.s32.totalorder %v12758_v8, 4 }
 0x5d2   :  { %8409 = vsinq.f32 %v6711_v51  ;;  %v6559_v15 = vsel %vm6551_vm9, %v6538_v34, %v6541_v17  ;;  %vm6553_vm12 = vcmp.lt.s32.totalorder %v12758_v8, 3  ;;  %v6556_v25 = vsel %vm6554_vm11, %v6544_v42, 2102212464 }
 0x5d3   :  { %v3257_v4 = vsub.s32 0, %v12791_v9  ;;  %v6560_v28 = vsel %vm6554_vm11, %v6547_v27, 920167782  ;;  %v3277_v21 = vsub.s32 4, %v3253_v23  ;;  %v6563_v62 = vsel %vm6551_vm9, %v6541_v17, %v6544_v42 }
 0x5d4   :  { %v6561_v26 = vsel %vm6553_vm12, %v6544_v42, %v6560_v28  ;;  %v6564_v58 = vsel %vm6554_vm11, %v6550_v7, 1326507024  ;;  %v6555_v14 = vsel %vm6551_vm9, %v6535_v29, %v6538_v34  ;;  %v6557_v11 = vsel %vm6553_vm12, %v6541_v17, %v6556_v25 }
 0x5d5   :  { %v7590_v57 = vmin.u32 %v3257_v4, %v12791_v9  ;;  %v6562_v36 = vsel %vm6552_vm8, %v6559_v15, %v6561_v26  ;;  %v6565_v2 = vsel %vm6553_vm12, %v6547_v27, %v6564_v58  ;;  %vm3193_vm10 = vcmp.lt.s32.totalorder %v12647_v12, 0 }
 0x5d6   :  { %v6566_v6 = vsel %vm6552_vm8, %v6563_v62, %v6565_v2  ;;  %v12804_v37 = vmul.u32.u64.low %v6567_v46, %v6562_v36  ;;  %v12805_v1 = vmul.u32.u64.high %v6567_v46, %v6562_v36, %v12804_v37  ;;  %v12813_v13 = vadd.f32 %v12786_v22, %v7926_v60  ;;  %v506_v2 = vpop.f32.mrf.mxu0 }
 0x5d7   :  { %v3259_v3 = vclz %v7590_v57  ;;  %v12809_v56 = vmul.u32.u64.low %v6567_v46, %v6566_v6  ;;  %v12810_v19 = vmul.u32.u64.high %v6567_v46, %v6566_v6, %v12809_v56  ;;  %vm12817_vm14 = vcmp.le.f32.partialorder %v3191_v41, 0.7853982 }
 0x5d8   :  { %v6558_v30 = vsel %vm6552_vm8, %v6555_v14, %v6557_v11  ;;  %v3506_v59 = vand.u32 2139095040, %v12789_v33  ;;  %vm6718_vm13 = vcmp.lt.s32.totalorder %v12753_v45, 2  ;;  %vm6719_vm15 = vcmp.eq.s32.totalorder %v12753_v45, 0 }
 0x5d9   :  { %v7591_v31 = vadd.s32 4294967294, %v3259_v3  ;;  %v3278_v16 = vsel %vm3193_vm10, %v3277_v21, %v3253_v23  ;;  %v6577_v63 = vadd.s32 1, %v12805_v1  ;;  %v3503_v41 = vand.u32 2147483647, %v12789_v33 }
 0x5da   :  { %vm6715_vm1 = vweird.f32 %v12531_v40  ;;  %vm6722_vm2 = vcmp.eq.s32.totalorder %v12753_v45, 2  ;;  %v3247_v8 = vadd.s32 %v12738_v5, %v12736_v43  ;;  %v3507_v0 = vshrl.u32 %v3506_v59, 23 }
 0x5db   :  { %vm7592_vm3 = vcmp.lt.s32.totalorder %v7591_v31, 0  ;;  %v6574_v39 = vmul.u32 %v6567_v46, %v6558_v30  ;;  %vm6576_vm4 = vc.u32 %v12810_v19, %v12804_v37  ;;  %v6834_v23 = vand.u32 2139095040, %v12813_v13 }
 0x5dc   :  { %v3262_v49 = vsel %vm7592_vm3, 0, %v7591_v31  ;;  %v3280_v18 = vsel %vm12817_vm14, 0, %v3278_v16  ;;  %v6578_v34 = vsel %vm6576_vm4, %v6577_v63, %v12805_v1  ;;  %v7601_v55 = vadd.s32 4294967169, %v3507_v0 }
 0x5dd   :  { %v3263_v10 = vsub.s32 32, %v3262_v49  ;;  %v3267_v32 = vsub.s32 4294967266, %v3262_v49  ;;  %v6579_v47 = vadd.s32 %v6578_v34, %v6574_v39  ;;  %v3510_v43 = vand.u32 8388607, %v3503_v41 }
 0x5de   :  { %v8408_v17 = vpop.eup %8407  ;;  %v6831_v5 = vand.u32 2147483647, %v12813_v13  ;;  %v3264_v42 = vshll.u32 %v12791_v9, %v3262_v49  ;;  %v3513_v29 = vadd.s32 1, %v7601_v55  ;;  %v6835_v15 = vshrl.u32 %v6834_v23, 23 }
 0x5df   :  { %v8410_v24 = vpop.eup %8409  ;;  %v6723_v53 = vxor.u32 2147483648, %v8408_v17  ;;  %v3265_v27 = vshrl.u32 %v3247_v8, %v3263_v10  ;;  %v3268_v51 = vadd.s32 127, %v3267_v32  ;;  %v6580_v46 = vadd.s32 536870912, %v6579_v47 }
 0x5e0   :  { %v6720_v7 = vxor.u32 2147483648, %v8410_v24  ;;  %v3284_v21 = vadd.s32 3, %v3280_v18  ;;  %v3511_v58 = vor.u32 8388608, %v3510_v43  ;;  %vm3514_vm5 = vcmp.gt.s32.totalorder %v3513_v29, 0 }
 0x5e1   :  { %v6724_v4 = vsel %vm6722_vm2, %v6723_v53, %v8410_v24  ;;  %v3266_v25 = vor.u32 %v3265_v27, %v3264_v42  ;;  %v3269_v28 = vshll.u32 %v3268_v51, 23  ;;  %v12848_v62 = vshrl.u32 %v6580_v46, 30 }
 0x5e2   :  { %v6721_v26 = vsel %vm6719_vm15, %v8408_v17, %v6720_v7  ;;  %v3515_v14 = vsel %vm3514_vm5, %v3513_v29, 0  ;;  %v12854_v36 = vand.u32 8388607, %v6831_v5  ;;  %v7729_v6 = vadd.s32 4294967169, %v6835_v15 }
 0x5e3   :  { %v6725_v9 = vsel %vm6718_vm13, %v6721_v26, %v6724_v4  ;;  %v3270_v57 = vor.u32 4788187, %v3269_v28  ;;  %v6582_v11 = vshll.u32 %v12848_v62, 30  ;;  %v3273_v1 = vcvt.s32.f32 %v3266_v25 }
 0x5e4   :  { %v6726_v60 = vsel %vm6715_vm1, nan, %v6725_v9  ;;  %v3517_v3 = vand.u32 31, %v3515_v14  ;;  %v12863_v56 = vand.u32 3, %v3284_v21  ;;  %v6575_v31 = vadd.s32 %v12804_v37, %v12810_v19 }
 0x5e5   :  { %7409 = vst.msk [vmem:[%s13788_s3 + $0x1c8] sm:$0xff] %vm7351_vm0, %v6726_v60  ;;  %v3271_v45 = vand.u32 2147483647, %v3270_v57  ;;  %v12867_v30 = vsub.s32 %v6579_v47, %v6582_v11  ;;  %v12870_v40 = vadd.f32 %v12786_v22, %v506_v2  ;;  %v12872_v63 = vshll.u32 %v3511_v58, 8 }
 0x5e6   :  { %v3518_v16 = vsub.s32 32, %v3517_v3  ;;  %v6839_v8 = vor.u32 8388608, %v12854_v36  ;;  %v3516_v49 = vshrl.u32 %v3515_v14, 5  ;;  %v3520_v39 = vshll.u32 %v8477_v44, %v3517_v3 }
 0x5e7   :  { %v3274_v59 = vmul.f32 %v3273_v1, %v3271_v45  ;;  %v6585_v0 = vsub.s32 0, %v12867_v30  ;;  %v6841_v23 = vadd.s32 1, %v7729_v6  ;;  %v3523_v19 = vshll.u32 %v8478_v48, %v3517_v3 }
 0x5e8   :  { %v3521_v37 = vshrl.u32 %v8478_v48, %v3518_v16  ;;  %v3524_v32 = vshrl.u32 %v8479_v50, %v3518_v16  ;;  %v3526_v34 = vshll.u32 %v8479_v50, %v3517_v3  ;;  %v3527_v17 = vshrl.u32 %v8480_v52, %v3518_v16 }
 0x5e9   :  { %v3275_v10 = vxor.u32 2147483648, %v3274_v59  ;;  %v7718_v18 = vmin.u32 %v6585_v0, %v12867_v30  ;;  %v3529_v47 = vshll.u32 %v8480_v52, %v3517_v3  ;;  %v3530_v53 = vshrl.u32 %v8481_v54, %v3518_v16 }
 0x5ea   :  { %v3522_v43 = vor.u32 %v3521_v37, %v3520_v39  ;;  %v3525_v24 = vor.u32 %v3524_v32, %v3523_v19  ;;  %v6605_v51 = vsub.s32 4, %v12848_v62  ;;  %vm6842_vm6 = vcmp.gt.s32.totalorder %v6841_v23, 0 }
 0x5eb   :  { %v3276_v55 = vsel %vm3193_vm10, %v3275_v10, %v3274_v59  ;;  %v6587_v27 = vclz %v7718_v18  ;;  %v3528_v7 = vor.u32 %v3527_v17, %v3526_v34  ;;  %v3531_v46 = vor.u32 %v3530_v53, %v3529_v47 }
 0x5ec   :  { %v3279_v42 = vsel %vm12817_vm14, %v12647_v12, %v3276_v55  ;;  %vm3535_vm7 = vcmp.lt.s32.totalorder %v3516_v49, 1  ;;  %vm6521_vm9 = vcmp.lt.s32.totalorder %v12669_v20, 0  ;;  %v3532_v15 = vshll.u32 %v8481_v54, %v3517_v3 }
 0x5ed   :  { %8411 = vcosq.f32 %v3279_v42  ;;  %v7719_v29 = vadd.s32 4294967294, %v6587_v27  ;;  %v3533_v4 = vshrl.u32 %v8482_v61, %v3518_v16  ;;  %v3519_v25 = vshrl.u32 %v8477_v44, %v3518_v16 }
 0x5ee   :  { %8413 = vsinq.f32 %v3279_v42  ;;  %vm3537_vm8 = vcmp.lt.s32.totalorder %v3516_v49, 3  ;;  %vm3538_vm11 = vcmp.lt.s32.totalorder %v3516_v49, 4  ;;  %v3543_v35 = vsel %vm3535_vm7, %v3522_v43, %v3525_v24 }
 0x5ef   :  { %vm7720_vm12 = vcmp.lt.s32.totalorder %v7719_v29, 0  ;;  %v3534_v28 = vor.u32 %v3533_v4, %v3532_v15  ;;  %v3540_v21 = vsel %vm3538_vm11, %v3528_v7, 2102212464  ;;  %v3544_v26 = vsel %vm3538_vm11, %v3531_v46, 920167782 }
 0x5f0   :  { %v6590_v58 = vsel %vm7720_vm12, 0, %v7719_v29  ;;  %v3539_v9 = vsel %vm3535_vm7, %v3519_v25, %v3522_v43  ;;  %v3541_v57 = vsel %vm3537_vm8, %v3525_v24, %v3540_v21  ;;  %v3545_v14 = vsel %vm3537_vm8, %v3528_v7, %v3544_v26 }
 0x5f1   :  { %v6591_v2 = vsub.s32 32, %v6590_v58  ;;  %v6595_v60 = vsub.s32 4294967266, %v6590_v58  ;;  %vm3536_vm10 = vcmp.lt.s32.totalorder %v3516_v49, 2  ;;  %v3547_v11 = vsel %vm3535_vm7, %v3525_v24, %v3528_v7 }
 0x5f2   :  { %v6592_v6 = vshll.u32 %v12867_v30, %v6590_v58  ;;  %v3546_v45 = vsel %vm3536_vm10, %v3543_v35, %v3545_v14  ;;  %v3548_v1 = vsel %vm3538_vm11, %v3534_v28, 1326507024  ;;  %v6843_v3 = vsel %vm6842_vm6, %v6841_v23, 0 }
 0x5f3   :  { %v6593_v59 = vshrl.u32 %v6575_v31, %v6591_v2  ;;  %v6596_v16 = vadd.s32 127, %v6595_v60  ;;  %v3542_v0 = vsel %vm3536_vm10, %v3539_v9, %v3541_v57  ;;  %v3549_v39 = vsel %vm3537_vm8, %v3531_v46, %v3548_v1 }
 0x5f4   :  { %vm3287_vm14 = vcmp.eq.s32.totalorder %v12863_v56, 0  ;;  %v3550_v10 = vsel %vm3536_vm10, %v3547_v11, %v3549_v39  ;;  %v12908_v37 = vmul.u32.u64.low %v12872_v63, %v3546_v45  ;;  %v12909_v19 = vmul.u32.u64.high %v12872_v63, %v3546_v45, %v12908_v37 }
 0x5f5   :  { %v6845_v32 = vand.u32 31, %v6843_v3  ;;  %vm3286_vm13 = vcmp.lt.s32.totalorder %v12863_v56, 2  ;;  %vm12915_vm15 = vcmp.le.f32.partialorder %v6519_v38, 0.7853982  ;;  %v6594_v31 = vor.u32 %v6593_v59, %v6592_v6 }
 0x5f6   :  { %v6597_v49 = vshll.u32 %v6596_v16, 23  ;;  %v12920_v23 = vmul.u32.u64.low %v12872_v63, %v3550_v10  ;;  %v12921_v18 = vmul.u32.u64.high %v12872_v63, %v3550_v10, %v12920_v23  ;;  %vm3283_vm1 = vweird.f32 %v12647_v12 }
 0x5f7   :  { %vm3290_vm2 = vcmp.eq.s32.totalorder %v12863_v56, 2  ;;  %v6606_v34 = vsel %vm6521_vm9, %v6605_v51, %v12848_v62  ;;  %v6846_v17 = vsub.s32 32, %v6845_v32  ;;  %v12930_v38 = vshll.u32 %v6839_v8, 8 }
 0x5f8   :  { %v6598_v47 = vor.u32 4788187, %v6597_v49  ;;  %v3558_v55 = vmul.u32 %v12872_v63, %v3542_v0  ;;  %v12933_v43 = vshrl.u32 %v6843_v3, 5  ;;  %v6848_v24 = vshll.u32 %v8477_v44, %v6845_v32 }
 0x5f9   :  { %v3561_v53 = vadd.s32 1, %v12909_v19  ;;  %v6849_v42 = vshrl.u32 %v8478_v48, %v6846_v17  ;;  %v6851_v27 = vshll.u32 %v8478_v48, %v6845_v32  ;;  %v6854_v62 = vshll.u32 %v8479_v50, %v6845_v32 }
 0x5fa   :  { %v8412_v51 = vpop.eup %8411  ;;  %v6599_v7 = vand.u32 2147483647, %v6598_v47  ;;  %v6601_v36 = vcvt.s32.f32 %v6594_v31  ;;  %vm3560_vm3 = vc.u32 %v12921_v18, %v12908_v37  ;;  %v6852_v63 = vshrl.u32 %v8479_v50, %v6846_v17 }
 0x5fb   :  { %v8414_v8 = vpop.eup %8413  ;;  %v3291_v46 = vxor.u32 2147483648, %v8412_v51  ;;  %v3562_v29 = vsel %vm3560_vm3, %v3561_v53, %v12909_v19  ;;  %v6855_v15 = vshrl.u32 %v8480_v52, %v6846_v17  ;;  %v6857_v4 = vshll.u32 %v8480_v52, %v6845_v32 }
 0x5fc   :  { %v3288_v25 = vxor.u32 2147483648, %v8414_v8  ;;  %v6602_v35 = vmul.f32 %v6601_v36, %v6599_v7  ;;  %v3563_v28 = vadd.s32 %v3562_v29, %v3558_v55  ;;  %v6860_v21 = vshll.u32 %v8481_v54, %v6845_v32 }
 0x5fd   :  { %v3292_v26 = vsel %vm3290_vm2, %v3291_v46, %v8414_v8  ;;  %v6850_v58 = vor.u32 %v6849_v42, %v6848_v24  ;;  %v6858_v9 = vshrl.u32 %v8481_v54, %v6846_v17  ;;  %v6861_v57 = vshrl.u32 %v8482_v61, %v6846_v17 }
 0x5fe   :  { %v3289_v14 = vsel %vm3287_vm14, %v8412_v51, %v3288_v25  ;;  %v6603_v2 = vxor.u32 2147483648, %v6602_v35  ;;  %v3564_v60 = vadd.s32 536870912, %v3563_v28  ;;  %v6853_v11 = vor.u32 %v6852_v63, %v6851_v27 }
 0x5ff   :  { %v3293_v6 = vsel %vm3286_vm13, %v3289_v14, %v3292_v26  ;;  %v6608_v45 = vsel %vm12915_vm15, 0, %v6606_v34  ;;  %v6856_v1 = vor.u32 %v6855_v15, %v6854_v62  ;;  %v6859_v3 = vor.u32 %v6858_v9, %v6857_v4 }
 0x600   :  { %v3294_v59 = vsel %vm3283_vm1, nan, %v3293_v6  ;;  %v6604_v16 = vsel %vm6521_vm9, %v6603_v2, %v6602_v35  ;;  %v3565_v0 = vshrl.u32 %v3564_v60, 30  ;;  %v6862_v39 = vor.u32 %v6861_v57, %v6860_v21  ;;  %v666_v57 = vpop.f32.mrf.mxu1 }
 0x601   :  { %7376 = vst.msk [vmem:[%s13788_s3 + $0xc0] sm:$0xff] %vm7351_vm0, %v3294_v59  ;;  %v6607_v56 = vsel %vm12915_vm15, %v12669_v20, %v6604_v16  ;;  %v6847_v10 = vshrl.u32 %v8477_v44, %v6846_v17  ;;  %vm6863_vm4 = vcmp.lt.s32.totalorder %v12933_v43, 1  ;;  %vm6865_vm5 = vcmp.lt.s32.totalorder %v12933_v43, 3 }
 0x602   :  { %8415 = vcosq.f32 %v6607_v56  ;;  %v3566_v12 = vshll.u32 %v3565_v0, 30  ;;  %vm6866_vm6 = vcmp.lt.s32.totalorder %v12933_v43, 4  ;;  %v6871_v19 = vsel %vm6863_vm4, %v6850_v58, %v6853_v11 }
 0x603   :  { %8417 = vsinq.f32 %v6607_v56  ;;  %v6868_v32 = vsel %vm6866_vm6, %v6856_v1, 2102212464  ;;  %v6872_v31 = vsel %vm6866_vm6, %v6859_v3, 920167782  ;;  %v6875_v30 = vsel %vm6863_vm4, %v6853_v11, %v6856_v1 }
 0x604   :  { %v12976_v49 = vsub.s32 %v3563_v28, %v3566_v12  ;;  %vm6864_vm7 = vcmp.lt.s32.totalorder %v12933_v43, 2  ;;  %v6873_v23 = vsel %vm6865_vm5, %v6856_v1, %v6872_v31  ;;  %v6876_v34 = vsel %vm6866_vm6, %v6862_v39, 1326507024 }
 0x605   :  { %v6612_v17 = vadd.s32 3, %v6608_v45  ;;  %v3589_v47 = vsub.s32 4, %v3565_v0  ;;  %v6874_v55 = vsel %vm6864_vm7, %v6871_v19, %v6873_v23  ;;  %v6877_v24 = vsel %vm6865_vm5, %v6859_v3, %v6876_v34 }
 0x606   :  { %v3569_v53 = vsub.s32 0, %v12976_v49  ;;  %v6867_v42 = vsel %vm6863_vm4, %v6847_v10, %v6850_v58  ;;  %v6869_v27 = vsel %vm6865_vm5, %v6853_v11, %v6868_v32  ;;  %v6878_v62 = vsel %vm6864_vm7, %v6875_v30, %v6877_v24 }
 0x607   :  { %v12993_v51 = vmul.u32.u64.low %v12930_v38, %v6878_v62  ;;  %v12994_v7 = vmul.u32.u64.high %v12930_v38, %v6878_v62, %v12993_v51  ;;  %v12997_v36 = vmul.u32.u64.low %v12930_v38, %v6874_v55  ;;  %v12998_v63 = vmul.u32.u64.high %v12930_v38, %v6874_v55, %v12997_v36 }
 0x608   :  { %vm3505_vm9 = vcmp.lt.s32.totalorder %v12789_v33, 0  ;;  %v7602_v8 = vmin.u32 %v3569_v53, %v12976_v49  ;;  %v6613_v46 = vand.u32 3, %v6612_v17  ;;  %v6870_v15 = vsel %vm6864_vm7, %v6867_v42, %v6869_v27 }
 0x609   :  { %v3590_v29 = vsel %vm3505_vm9, %v3589_v47, %v3565_v0  ;;  %v3402_v4 = vand.u32 2139095040, %v12870_v40  ;;  %vm13009_vm8 = vcmp.le.f32.partialorder %v3503_v41, 0.7853982  ;;  %vm6888_vm11 = vc.u32 %v12994_v7, %v12997_v36 }
 0x60a   :  { %v3571_v25 = vclz %v7602_v8  ;;  %v6889_v28 = vadd.s32 1, %v12998_v63  ;;  %v3592_v58 = vsel %vm13009_vm8, 0, %v3590_v29  ;;  %v6886_v43 = vmul.u32 %v12930_v38, %v6870_v15 }
 0x60b   :  { %v3403_v21 = vshrl.u32 %v3402_v4, 23  ;;  %v3399_v9 = vand.u32 2147483647, %v12870_v40  ;;  %vm6614_vm12 = vcmp.lt.s32.totalorder %v6613_v46, 2  ;;  %vm6615_vm10 = vcmp.eq.s32.totalorder %v6613_v46, 0 }
 0x60c   :  { %v7603_v26 = vadd.s32 4294967294, %v3571_v25  ;;  %v6890_v41 = vsel %vm6888_vm11, %v6889_v28, %v12998_v63  ;;  %vm6618_vm14 = vcmp.eq.s32.totalorder %v6613_v46, 2  ;;  %v3559_v2 = vadd.s32 %v12908_v37, %v12921_v18 }
 0x60d   :  { %v7597_v14 = vadd.s32 4294967169, %v3403_v21  ;;  %v6891_v60 = vadd.s32 %v6890_v41, %v6886_v43  ;;  %v3596_v45 = vadd.s32 3, %v3592_v58  ;;  %v13023_v38 = vadd.f32 %v12786_v22, %v666_v57 }
 0x60e   :  { %vm7604_vm13 = vcmp.lt.s32.totalorder %v7603_v26, 0  ;;  %v3406_v39 = vand.u32 8388607, %v3399_v9  ;;  %vm6611_vm1 = vweird.f32 %v12669_v20  ;;  %vm6833_vm2 = vcmp.lt.s32.totalorder %v12813_v13, 0 }
 0x60f   :  { %v8416_v11 = vpop.eup %8415  ;;  %v3574_v6 = vsel %vm7604_vm13, 0, %v7603_v26  ;;  %v3409_v1 = vadd.s32 1, %v7597_v14  ;;  %v6892_v37 = vadd.s32 536870912, %v6891_v60  ;;  %v6730_v34 = vand.u32 2139095040, %v13023_v38 }
 0x610   :  { %v8418_v3 = vpop.eup %8417  ;;  %v6619_v59 = vxor.u32 2147483648, %v8416_v11  ;;  %v3575_v16 = vsub.s32 32, %v3574_v6  ;;  %v3579_v0 = vsub.s32 4294967266, %v3574_v6  ;;  %v3576_v10 = vshll.u32 %v12976_v49, %v3574_v6 }
 0x611   :  { %v6616_v56 = vxor.u32 2147483648, %v8418_v3  ;;  %vm3410_vm15 = vcmp.gt.s32.totalorder %v3409_v1, 0  ;;  %v6893_v30 = vshrl.u32 %v6892_v37, 30  ;;  %v13038_v27 = vand.u32 3, %v3596_v45 }
 0x612   :  { %v6620_v18 = vsel %vm6618_vm14, %v6619_v59, %v8418_v3  ;;  %v3577_v12 = vshrl.u32 %v3559_v2, %v3575_v16  ;;  %v3580_v19 = vadd.s32 127, %v3579_v0  ;;  %v3411_v32 = vsel %vm3410_vm15, %v3409_v1, 0 }
 0x613   :  { %v6617_v31 = vsel %vm6615_vm10, %v8416_v11, %v6616_v56  ;;  %v3413_v23 = vand.u32 31, %v3411_v32  ;;  %v6894_v24 = vshll.u32 %v6893_v30, 30  ;;  %v6887_v62 = vadd.s32 %v12997_v36, %v12994_v7 }
 0x614   :  { %v6621_v17 = vsel %vm6614_vm12, %v6617_v31, %v6620_v18  ;;  %v3578_v47 = vor.u32 %v3577_v12, %v3576_v10  ;;  %v3581_v55 = vshll.u32 %v3580_v19, 23  ;;  %v3407_v20 = vor.u32 8388608, %v3406_v39 }
 0x615   :  { %v6622_v49 = vsel %vm6611_vm1, nan, %v6621_v17  ;;  %v3414_v53 = vsub.s32 32, %v3413_v23  ;;  %v13041_v51 = vsub.s32 %v6891_v60, %v6894_v24  ;;  %v6917_v63 = vsub.s32 4, %v6893_v30 }
 0x616   :  { %7408 = vst.msk [vmem:[%s13788_s3 + $0x1c0] sm:$0xff] %vm7351_vm0, %v6622_v49  ;;  %v3582_v42 = vor.u32 4788187, %v3581_v55  ;;  %v6731_v46 = vshrl.u32 %v6730_v34, 23  ;;  %v3585_v15 = vcvt.s32.f32 %v3578_v47  ;;  %v3416_v4 = vshll.u32 %v8477_v44, %v3413_v23 }
 0x617   :  { %v3417_v8 = vshrl.u32 %v8478_v48, %v3414_v53  ;;  %v3420_v25 = vshrl.u32 %v8479_v50, %v3414_v53  ;;  %v6897_v28 = vsub.s32 0, %v13041_v51  ;;  %v3419_v21 = vshll.u32 %v8478_v48, %v3413_v23 }
 0x618   :  { %v3583_v29 = vand.u32 2147483647, %v3582_v42  ;;  %v3422_v26 = vshll.u32 %v8479_v50, %v3413_v23  ;;  %v3423_v7 = vshrl.u32 %v8480_v52, %v3414_v53  ;;  %v3412_v58 = vshrl.u32 %v3411_v32, 5 }
 0x619   :  { %v3425_v43 = vshll.u32 %v8480_v52, %v3413_v23  ;;  %v3426_v57 = vshrl.u32 %v8481_v54, %v3414_v53  ;;  %v7730_v41 = vmin.u32 %v6897_v28, %v13041_v51  ;;  %v3418_v14 = vor.u32 %v3417_v8, %v3416_v4 }
 0x61a   :  { %v3586_v36 = vmul.f32 %v3585_v15, %v3583_v29  ;;  %v3421_v2 = vor.u32 %v3420_v25, %v3419_v21  ;;  %v3424_v60 = vor.u32 %v3423_v7, %v3422_v26  ;;  %v3428_v45 = vshll.u32 %v8481_v54, %v3413_v23 }
 0x61b   :  { %v3427_v6 = vor.u32 %v3426_v57, %v3425_v43  ;;  %v3429_v1 = vshrl.u32 %v8482_v61, %v3414_v53  ;;  %vm13057_vm3 = vcmp.le.f32.partialorder %v6831_v5, 0.7853982  ;;  %v6899_v59 = vclz %v7730_v41  ;;  %v7881_v57 = vpop.f32.mrf.mxu0 }
 0x61c   :  { %v3587_v11 = vxor.u32 2147483648, %v3586_v36  ;;  %v6918_v16 = vsel %vm6833_vm2, %v6917_v63, %v6893_v30  ;;  %v3447_v0 = vshll.u32 %v3407_v20, 8  ;;  %v7725_v39 = vadd.s32 4294967169, %v6731_v46 }
 0x61d   :  { %v3415_v10 = vshrl.u32 %v8477_v44, %v3414_v53  ;;  %v3430_v37 = vor.u32 %v3429_v1, %v3428_v45  ;;  %vm3431_vm4 = vcmp.lt.s32.totalorder %v3412_v58, 1  ;;  %v7731_v18 = vadd.s32 4294967294, %v6899_v59 }
 0x61e   :  { %v3588_v56 = vsel %vm3505_vm9, %v3587_v11, %v3586_v36  ;;  %vm3433_vm5 = vcmp.lt.s32.totalorder %v3412_v58, 3  ;;  %vm3434_vm6 = vcmp.lt.s32.totalorder %v3412_v58, 4  ;;  %v3439_v19 = vsel %vm3431_vm4, %v3418_v14, %v3421_v2 }
 0x61f   :  { %v3591_v5 = vsel %vm13009_vm8, %v12789_v33, %v3588_v56  ;;  %v3436_v12 = vsel %vm3434_vm6, %v3424_v60, 2102212464  ;;  %v3440_v32 = vsel %vm3434_vm6, %v3427_v6, 920167782  ;;  %vm7732_vm7 = vcmp.lt.s32.totalorder %v7731_v18, 0 }
 0x620   :  { %8419 = vcosq.f32 %v3591_v5  ;;  %vm3432_vm9 = vcmp.lt.s32.totalorder %v3412_v58, 2  ;;  %v3441_v31 = vsel %vm3433_vm5, %v3424_v60, %v3440_v32  ;;  %v6902_v30 = vsel %vm7732_vm7, 0, %v7731_v18 }
 0x621   :  { %8421 = vsinq.f32 %v3591_v5  ;;  %v3435_v23 = vsel %vm3431_vm4, %v3415_v10, %v3418_v14  ;;  %v3442_v35 = vsel %vm3432_vm9, %v3439_v19, %v3441_v31  ;;  %v3443_v34 = vsel %vm3431_vm4, %v3421_v2, %v3424_v60 }
 0x622   :  { %v6903_v17 = vsub.s32 32, %v6902_v30  ;;  %v6907_v47 = vsub.s32 4294967266, %v6902_v30  ;;  %v3437_v55 = vsel %vm3433_vm5, %v3421_v2, %v3436_v12  ;;  %v3444_v49 = vsel %vm3434_vm6, %v3430_v37, 1326507024 }
 0x623   :  { %v6904_v24 = vshll.u32 %v13041_v51, %v6902_v30  ;;  %v3445_v53 = vsel %vm3433_vm5, %v3427_v6, %v3444_v49  ;;  %v13080_v42 = vmul.u32.u64.low %v3447_v0, %v3442_v35  ;;  %v13081_v20 = vmul.u32.u64.high %v3447_v0, %v3442_v35, %v13080_v42 }
 0x624   :  { %v6905_v63 = vshrl.u32 %v6887_v62, %v6903_v17  ;;  %v6908_v8 = vadd.s32 127, %v6907_v47  ;;  %v3446_v46 = vsel %vm3432_vm9, %v3443_v34, %v3445_v53  ;;  %v6737_v29 = vadd.s32 1, %v7725_v39 }
 0x625   :  { %v6920_v15 = vsel %vm13057_vm3, 0, %v6918_v16  ;;  %v13087_v4 = vmul.u32.u64.low %v3447_v0, %v3446_v46  ;;  %v13088_v25 = vmul.u32.u64.high %v3447_v0, %v3446_v46, %v13087_v4  ;;  %v6727_v28 = vand.u32 2147483647, %v13023_v38 }
 0x626   :  { %v6906_v51 = vor.u32 %v6905_v63, %v6904_v24  ;;  %v6909_v21 = vshll.u32 %v6908_v8, 23  ;;  %v3438_v26 = vsel %vm3432_vm9, %v3435_v23, %v3437_v55  ;;  %vm6738_vm8 = vcmp.gt.s32.totalorder %v6737_v29, 0 }
 0x627   :  { %v3457_v7 = vadd.s32 1, %v13081_v20  ;;  %v6739_v62 = vsel %vm6738_vm8, %v6737_v29, 0  ;;  %vm3598_vm11 = vcmp.lt.s32.totalorder %v13038_v27, 2  ;;  %vm3599_vm12 = vcmp.eq.s32.totalorder %v13038_v27, 0 }
 0x628   :  { %vm3602_vm10 = vcmp.eq.s32.totalorder %v13038_v27, 2  ;;  %v6910_v36 = vor.u32 4788187, %v6909_v21  ;;  %v6741_v43 = vand.u32 31, %v6739_v62  ;;  %vm3595_vm14 = vweird.f32 %v12789_v33 }
 0x629   :  { %v6924_v41 = vadd.s32 3, %v6920_v15  ;;  %v3454_v14 = vmul.u32 %v3447_v0, %v3438_v26  ;;  %vm3456_vm13 = vc.u32 %v13088_v25, %v13080_v42  ;;  %v6734_v58 = vand.u32 8388607, %v6727_v28 }
 0x62a   :  { %v6911_v2 = vand.u32 2147483647, %v6910_v36  ;;  %v6913_v60 = vcvt.s32.f32 %v6906_v51  ;;  %v3458_v11 = vsel %vm3456_vm13, %v3457_v7, %v13081_v20  ;;  %v6742_v6 = vsub.s32 32, %v6741_v43 }
 0x62b   :  { %v3459_v45 = vadd.s32 %v3458_v11, %v3454_v14  ;;  %v13102_v1 = vshrl.u32 %v6739_v62, 5  ;;  %v6744_v59 = vshll.u32 %v8477_v44, %v6741_v43  ;;  %v13106_v16 = vadd.f32 %v12786_v22, %v7881_v57 }
 0x62c   :  { %v6914_v39 = vmul.f32 %v6913_v60, %v6911_v2  ;;  %v6745_v56 = vshrl.u32 %v8478_v48, %v6742_v6  ;;  %v6747_v10 = vshll.u32 %v8478_v48, %v6741_v43  ;;  %v6748_v37 = vshrl.u32 %v8479_v50, %v6742_v6 }
 0x62d   :  { %v8420_v0 = vpop.eup %8419  ;;  %v3460_v12 = vadd.s32 536870912, %v3459_v45  ;;  %v6750_v19 = vshll.u32 %v8479_v50, %v6741_v43  ;;  %v6751_v32 = vshrl.u32 %v8480_v52, %v6742_v6  ;;  %v6753_v23 = vshll.u32 %v8480_v52, %v6741_v43 }
 0x62e   :  { %v8422_v5 = vpop.eup %8421  ;;  %v3603_v18 = vxor.u32 2147483648, %v8420_v0  ;;  %v6915_v30 = vxor.u32 2147483648, %v6914_v39  ;;  %v6754_v35 = vshrl.u32 %v8481_v54, %v6742_v6  ;;  %v6746_v47 = vor.u32 %v6745_v56, %v6744_v59 }
 0x62f   :  { %v3600_v31 = vxor.u32 2147483648, %v8422_v5  ;;  %v13117_v17 = vshrl.u32 %v3460_v12, 30  ;;  %v6749_v55 = vor.u32 %v6748_v37, %v6747_v10  ;;  %v6756_v53 = vshll.u32 %v8481_v54, %v6741_v43 }
 0x630   :  { %v3604_v34 = vsel %vm3602_vm10, %v3603_v18, %v8422_v5  ;;  %v6916_v24 = vsel %vm6833_vm2, %v6915_v30, %v6914_v39  ;;  %v6757_v20 = vshrl.u32 %v8482_v61, %v6742_v6  ;;  %v6752_v29 = vor.u32 %v6751_v32, %v6750_v19  ;;  %v7929_v5 = vpop.f32.mrf.mxu1 }
 0x631   :  { %v3601_v49 = vsel %vm3599_vm12, %v8420_v0, %v3600_v31  ;;  %v6919_v8 = vsel %vm13057_vm3, %v12813_v13, %v6916_v24  ;;  %v3462_v46 = vshll.u32 %v13117_v17, 30  ;;  %v6755_v4 = vor.u32 %v6754_v35, %v6753_v23 }
 0x632   :  { %v3605_v63 = vsel %vm3598_vm11, %v3601_v49, %v3604_v34  ;;  %8423 = vcosq.f32 %v6919_v8  ;;  %v6758_v51 = vor.u32 %v6757_v20, %v6756_v53  ;;  %v13139_v21 = vand.u32 3, %v6924_v41 }
 0x633   :  { %v3606_v15 = vsel %vm3595_vm14, nan, %v3605_v63  ;;  %8425 = vsinq.f32 %v6919_v8  ;;  %v13137_v27 = vsub.s32 %v3459_v45, %v3462_v46  ;;  %v6735_v3 = vor.u32 8388608, %v6734_v58 }
 0x634   :  { %7379 = vst.msk [vmem:[%s13788_s3 + $0xd8] sm:$0xff] %vm7351_vm0, %v3606_v15  ;;  %vm6759_vm15 = vcmp.lt.s32.totalorder %v13102_v1, 1  ;;  %v3714_v26 = vand.u32 2139095040, %v13106_v16  ;;  %vm6761_vm1 = vcmp.lt.s32.totalorder %v13102_v1, 3  ;;  %vm6762_vm2 = vcmp.lt.s32.totalorder %v13102_v1, 4 }
 0x635   :  { %v3465_v33 = vsub.s32 0, %v13137_v27  ;;  %v6767_v7 = vsel %vm6759_vm15, %v6746_v47, %v6749_v55  ;;  %v6743_v62 = vshrl.u32 %v8477_v44, %v6742_v6  ;;  %v6764_v36 = vsel %vm6762_vm2, %v6752_v29, 2102212464 }
 0x636   :  { %v6768_v43 = vsel %vm6762_vm2, %v6755_v4, 920167782  ;;  %v6772_v57 = vsel %vm6762_vm2, %v6758_v51, 1326507024  ;;  %vm6760_vm3 = vcmp.lt.s32.totalorder %v13102_v1, 2  ;;  %v6771_v58 = vsel %vm6759_vm15, %v6749_v55, %v6752_v29 }
 0x637   :  { %v7598_v41 = vmin.u32 %v3465_v33, %v13137_v27  ;;  %v6769_v14 = vsel %vm6761_vm1, %v6752_v29, %v6768_v43  ;;  %v6773_v60 = vsel %vm6761_vm1, %v6755_v4, %v6772_v57  ;;  %v6775_v11 = vshll.u32 %v6735_v3, 8 }
 0x638   :  { %v6770_v2 = vsel %vm6760_vm3, %v6767_v7, %v6769_v14  ;;  %v3715_v6 = vshrl.u32 %v3714_v26, 23  ;;  %v6763_v59 = vsel %vm6759_vm15, %v6743_v62, %v6746_v47  ;;  %v6765_v0 = vsel %vm6761_vm1, %v6749_v55, %v6764_v36 }
 0x639   :  { %v3467_v45 = vclz %v7598_v41  ;;  %v6774_v39 = vsel %vm6760_vm3, %v6771_v58, %v6773_v60  ;;  %v13165_v56 = vmul.u32.u64.low %v6775_v11, %v6770_v2  ;;  %v13166_v10 = vmul.u32.u64.high %v6775_v11, %v6770_v2, %v13165_v56 }
 0x63a   :  { %v7609_v37 = vadd.s32 4294967169, %v3715_v6  ;;  %v3485_v12 = vsub.s32 4, %v13117_v17  ;;  %v13170_v19 = vmul.u32.u64.low %v6775_v11, %v6774_v39  ;;  %v13171_v32 = vmul.u32.u64.high %v6775_v11, %v6774_v39, %v13170_v19 }
 0x63b   :  { %v7599_v18 = vadd.s32 4294967294, %v3467_v45  ;;  %vm6923_vm4 = vweird.f32 %v12813_v13  ;;  %vm6927_vm5 = vcmp.eq.s32.totalorder %v13139_v21, 0  ;;  %vm3401_vm6 = vcmp.lt.s32.totalorder %v12870_v40, 0 }
 0x63c   :  { %v6766_v31 = vsel %vm6760_vm3, %v6763_v59, %v6765_v0  ;;  %v3721_v30 = vadd.s32 1, %v7609_v37  ;;  %vm6930_vm7 = vcmp.eq.s32.totalorder %v13139_v21, 2  ;;  %v3711_v23 = vand.u32 2147483647, %v13106_v16 }
 0x63d   :  { %vm7600_vm9 = vcmp.lt.s32.totalorder %v7599_v18, 0  ;;  %v13181_v35 = vadd.f32 %v12786_v22, %v7929_v5  ;;  %v3455_v34 = vadd.s32 %v13080_v42, %v13088_v25  ;;  %v6785_v55 = vadd.s32 1, %v13166_v10 }
 0x63e   :  { %v3470_v47 = vsel %vm7600_vm9, 0, %v7599_v18  ;;  %vm3722_vm8 = vcmp.gt.s32.totalorder %v3721_v30, 0  ;;  %v3486_v53 = vsel %vm3401_vm6, %v3485_v12, %v13117_v17  ;;  %v6782_v20 = vmul.u32 %v6775_v11, %v6766_v31 }
 0x63f   :  { %v8424_v49 = vpop.eup %8423  ;;  %v3471_v24 = vsub.s32 32, %v3470_v47  ;;  %v3475_v1 = vsub.s32 4294967266, %v3470_v47  ;;  %v3472_v22 = vshll.u32 %v13137_v27, %v3470_v47  ;;  %vm6784_vm11 = vc.u32 %v13171_v32, %v13165_v56 }
 0x640   :  { %v8426_v63 = vpop.eup %8425  ;;  %v6931_v8 = vxor.u32 2147483648, %v8424_v49  ;;  %v3723_v42 = vsel %vm3722_vm8, %v3721_v30, 0  ;;  %v6786_v15 = vsel %vm6784_vm11, %v6785_v55, %v13166_v10  ;;  %v3718_v17 = vand.u32 8388607, %v3711_v23 }
 0x641   :  { %v6928_v25 = vxor.u32 2147483648, %v8426_v63  ;;  %v3473_v46 = vshrl.u32 %v3455_v34, %v3471_v24  ;;  %v3476_v29 = vadd.s32 127, %v3475_v1  ;;  %v6787_v51 = vadd.s32 %v6786_v15, %v6782_v20 }
 0x642   :  { %v6932_v4 = vsel %vm6930_vm7, %v6931_v8, %v8426_v63  ;;  %v3725_v3 = vand.u32 31, %v3723_v42  ;;  %vm6926_vm12 = vcmp.lt.s32.totalorder %v13139_v21, 2  ;;  %vm13202_vm10 = vcmp.le.f32.partialorder %v3399_v9, 0.7853982 }
 0x643   :  { %v6929_v27 = vsel %vm6927_vm5, %v8424_v49, %v6928_v25  ;;  %v3474_v26 = vor.u32 %v3473_v46, %v3472_v22  ;;  %v3477_v33 = vshll.u32 %v3476_v29, 23  ;;  %v6788_v36 = vadd.s32 536870912, %v6787_v51 }
 0x644   :  { %v6933_v7 = vsel %vm6926_vm12, %v6929_v27, %v6932_v4  ;;  %v3726_v43 = vsub.s32 32, %v3725_v3  ;;  %v3488_v14 = vsel %vm13202_vm10, 0, %v3486_v53  ;;  %v3719_v9 = vor.u32 8388608, %v3718_v17 }
 0x645   :  { %v6934_v57 = vsel %vm6923_vm4, nan, %v6933_v7  ;;  %v3478_v41 = vor.u32 4788187, %v3477_v33  ;;  %v13214_v21 = vshrl.u32 %v6788_v36, 30  ;;  %v7042_v2 = vand.u32 2139095040, %v13181_v35 }
 0x646   :  { %7411 = vst.msk [vmem:[%s13788_s3 + $0x1d8] sm:$0xff] %vm7351_vm0, %v6934_v57  ;;  %v3729_v58 = vshrl.u32 %v8478_v48, %v3726_v43  ;;  %v3481_v11 = vcvt.s32.f32 %v3474_v26  ;;  %v3732_v13 = vshrl.u32 %v8479_v50, %v3726_v43  ;;  %v3735_v6 = vshrl.u32 %v8480_v52, %v3726_v43 }
 0x647   :  { %v3479_v60 = vand.u32 2147483647, %v3478_v41  ;;  %v6790_v45 = vshll.u32 %v13214_v21, 30  ;;  %v3724_v59 = vshrl.u32 %v3723_v42, 5  ;;  %v3728_v0 = vshll.u32 %v8477_v44, %v3725_v3 }
 0x648   :  { %v3734_v39 = vshll.u32 %v8479_v50, %v3725_v3  ;;  %v3731_v37 = vshll.u32 %v8478_v48, %v3725_v3  ;;  %v3737_v5 = vshll.u32 %v8480_v52, %v3725_v3  ;;  %v3738_v18 = vshrl.u32 %v8481_v54, %v3726_v43 }
 0x649   :  { %v3482_v10 = vmul.f32 %v3481_v11, %v3479_v60  ;;  %v13226_v12 = vsub.s32 %v6787_v51, %v6790_v45  ;;  %v3730_v19 = vor.u32 %v3729_v58, %v3728_v0  ;;  %v3741_v30 = vshrl.u32 %v8482_v61, %v3726_v43 }
 0x64a   :  { %v3736_v31 = vor.u32 %v3735_v6, %v3734_v39  ;;  %v3733_v47 = vor.u32 %v3732_v13, %v3731_v37  ;;  %v3739_v55 = vor.u32 %v3738_v18, %v3737_v5  ;;  %v3740_v49 = vshll.u32 %v8481_v54, %v3725_v3 }
 0x64b   :  { %v3483_v34 = vxor.u32 2147483648, %v3482_v10  ;;  %v3492_v24 = vadd.s32 3, %v3488_v14  ;;  %v6793_v1 = vsub.s32 0, %v13226_v12  ;;  %v3759_v53 = vshll.u32 %v3719_v9, 8 }
 0x64c   :  { %v7043_v20 = vshrl.u32 %v7042_v2, 23  ;;  %v3727_v8 = vshrl.u32 %v8477_v44, %v3726_v43  ;;  %v3742_v22 = vor.u32 %v3741_v30, %v3740_v49  ;;  %vm3746_vm14 = vcmp.lt.s32.totalorder %v3724_v59, 4 }
 0x64d   :  { %v3484_v63 = vsel %vm3401_vm6, %v3483_v34, %v3482_v10  ;;  %v7726_v25 = vmin.u32 %v6793_v1, %v13226_v12  ;;  %vm3743_vm13 = vcmp.lt.s32.totalorder %v3724_v59, 1  ;;  %v3748_v46 = vsel %vm3746_vm14, %v3736_v31, 2102212464  ;;  %v516_v1 = vpop.f32.mrf.mxu0 }
 0x64e   :  { %v3487_v42 = vsel %vm13202_vm10, %v12870_v40, %v3484_v63  ;;  %vm3744_vm15 = vcmp.lt.s32.totalorder %v3724_v59, 2  ;;  %v3751_v29 = vsel %vm3743_vm13, %v3730_v19, %v3733_v47  ;;  %v3752_v15 = vsel %vm3746_vm14, %v3739_v55, 920167782 }
 0x64f   :  { %8427 = vcosq.f32 %v3487_v42  ;;  %v6795_v4 = vclz %v7726_v25  ;;  %vm3745_vm1 = vcmp.lt.s32.totalorder %v3724_v59, 3  ;;  %v3755_v51 = vsel %vm3743_vm13, %v3733_v47, %v3736_v31 }
 0x650   :  { %8429 = vsinq.f32 %v3487_v42  ;;  %v3747_v17 = vsel %vm3743_vm13, %v3727_v8, %v3730_v19  ;;  %v3749_v3 = vsel %vm3745_vm1, %v3733_v47, %v3748_v46  ;;  %v3753_v27 = vsel %vm3745_vm1, %v3736_v31, %v3752_v15 }
 0x651   :  { %v3756_v26 = vsel %vm3746_vm14, %v3742_v22, 1326507024  ;;  %v7727_v33 = vadd.s32 4294967294, %v6795_v4  ;;  %v6813_v7 = vsub.s32 4, %v13214_v21  ;;  %v3754_v62 = vsel %vm3744_vm15, %v3751_v29, %v3753_v27 }
 0x652   :  { %v3757_v36 = vsel %vm3745_vm1, %v3739_v55, %v3756_v26  ;;  %v13244_v57 = vmul.u32.u64.low %v3759_v53, %v3754_v62  ;;  %v13245_v41 = vmul.u32.u64.high %v3759_v53, %v3754_v62, %v13244_v57  ;;  %v7737_v14 = vadd.s32 4294967169, %v7043_v20 }
 0x653   :  { %v3758_v43 = vsel %vm3744_vm15, %v3755_v51, %v3757_v36  ;;  %vm7728_vm2 = vcmp.lt.s32.totalorder %v7727_v33, 0  ;;  %v3750_v9 = vsel %vm3744_vm15, %v3747_v17, %v3749_v3  ;;  %v3493_v60 = vand.u32 3, %v3492_v24  ;;  %v13283_v51 = vld [vmem:[%s13787_s2] ss:$0 sm:$0xff] }
 0x654   :  { %v13249_v58 = vmul.u32.u64.low %v3759_v53, %v3758_v43  ;;  %v13250_v2 = vmul.u32.u64.high %v3759_v53, %v3758_v43, %v13249_v58  ;;  %vm6729_vm3 = vcmp.lt.s32.totalorder %v13023_v38, 0  ;;  %v6798_v11 = vsel %vm7728_vm2, 0, %v7727_v33 }
 0x655   :  { %v7049_v13 = vadd.s32 1, %v7737_v14  ;;  %v6783_v6 = vadd.s32 %v13165_v56, %v13171_v32  ;;  %v6799_v45 = vsub.s32 32, %v6798_v11  ;;  %v6803_v0 = vsub.s32 4294967266, %v6798_v11 }
 0x656   :  { %v7039_v39 = vand.u32 2147483647, %v13181_v35  ;;  %v6814_v59 = vsel %vm6729_vm3, %v6813_v7, %v13214_v21  ;;  %v3766_v10 = vmul.u32 %v3759_v53, %v3750_v9  ;;  %v3769_v37 = vadd.s32 1, %v13245_v41 }
 0x657   :  { %vm7050_vm4 = vcmp.gt.s32.totalorder %v7049_v13, 0  ;;  %v6800_v5 = vshll.u32 %v13226_v12, %v6798_v11  ;;  %v6801_v18 = vshrl.u32 %v6783_v6, %v6799_v45  ;;  %v6804_v19 = vadd.s32 127, %v6803_v0 }
 0x658   :  { %vm3768_vm5 = vc.u32 %v13250_v2, %v13244_v57  ;;  %vm13265_vm6 = vcmp.le.f32.partialorder %v6727_v28, 0.7853982  ;;  %v7051_v21 = vsel %vm7050_vm4, %v7049_v13, 0  ;;  %vm3491_vm7 = vweird.f32 %v12870_v40 }
 0x659   :  { %v3770_v32 = vsel %vm3768_vm5, %v3769_v37, %v13245_v41  ;;  %v6802_v31 = vor.u32 %v6801_v18, %v6800_v5  ;;  %v6805_v30 = vshll.u32 %v6804_v19, 23  ;;  %v6816_v34 = vsel %vm13265_vm6, 0, %v6814_v59 }
 0x65a   :  { %v3771_v12 = vadd.s32 %v3770_v32, %v3766_v10  ;;  %v7046_v47 = vand.u32 8388607, %v7039_v39  ;;  %v7053_v55 = vand.u32 31, %v7051_v21  ;;  %vm3494_vm9 = vcmp.lt.s32.totalorder %v3493_v60, 2 }
 0x65b   :  { %vm3495_vm8 = vcmp.eq.s32.totalorder %v3493_v60, 0  ;;  %v6806_v28 = vor.u32 4788187, %v6805_v30  ;;  %vm3498_vm11 = vcmp.eq.s32.totalorder %v3493_v60, 2  ;;  %v13275_v63 = vadd.s32 3, %v6816_v34 }
 0x65c   :  { %v8428_v49 = vpop.eup %8427  ;;  %v3772_v24 = vadd.s32 536870912, %v3771_v12  ;;  %v7054_v8 = vsub.s32 32, %v7053_v55  ;;  %v6809_v25 = vcvt.s32.f32 %v6802_v31  ;;  %v7047_v15 = vor.u32 8388608, %v7046_v47 }
 0x65d   :  { %v8430_v53 = vpop.eup %8429  ;;  %v3499_v20 = vxor.u32 2147483648, %v8428_v49  ;;  %v6807_v42 = vand.u32 2147483647, %v6806_v28  ;;  %v13286_v17 = vadd.f32 %v13283_v51, %v516_v1  ;;  %v7056_v62 = vshll.u32 %v8477_v44, %v7053_v55 }
 0x65e   :  { %v3496_v22 = vxor.u32 2147483648, %v8430_v53  ;;  %v13277_v46 = vshrl.u32 %v3772_v24, 30  ;;  %v7057_v4 = vshrl.u32 %v8478_v48, %v7054_v8  ;;  %v7060_v33 = vshrl.u32 %v8479_v50, %v7054_v8 }
 0x65f   :  { %v3500_v29 = vsel %vm3498_vm11, %v3499_v20, %v8430_v53  ;;  %v6810_v27 = vmul.f32 %v6809_v25, %v6807_v42  ;;  %v7059_v36 = vshll.u32 %v8478_v48, %v7053_v55  ;;  %v7063_v43 = vshrl.u32 %v8480_v52, %v7054_v8 }
 0x660   :  { %v3497_v3 = vsel %vm3495_vm8, %v8428_v49, %v3496_v22  ;;  %v3774_v26 = vshll.u32 %v13277_v46, 30  ;;  %v7062_v58 = vshll.u32 %v8479_v50, %v7053_v55  ;;  %v7052_v60 = vshrl.u32 %v7051_v21, 5 }
 0x661   :  { %v3501_v7 = vsel %vm3494_vm9, %v3497_v3, %v3500_v29  ;;  %v6811_v14 = vxor.u32 2147483648, %v6810_v27  ;;  %v7058_v11 = vor.u32 %v7057_v4, %v7056_v62  ;;  %v7065_v13 = vshll.u32 %v8480_v52, %v7053_v55 }
 0x662   :  { %v3502_v41 = vsel %vm3491_vm7, nan, %v3501_v7  ;;  %v13297_v9 = vsub.s32 %v3771_v12, %v3774_v26  ;;  %v7066_v6 = vshrl.u32 %v8481_v54, %v7054_v8  ;;  %v7061_v0 = vor.u32 %v7060_v33, %v7059_v36  ;;  %v676_v36 = vpop.f32.mrf.mxu1 }
 0x663   :  { %7378 = vst.msk [vmem:[%s13788_s3 + $0xd0] sm:$0xff] %vm7351_vm0, %v3502_v41  ;;  %v6812_v40 = vsel %vm6729_vm3, %v6811_v14, %v6810_v27  ;;  %v7064_v59 = vor.u32 %v7063_v43, %v7062_v58  ;;  %v7068_v5 = vshll.u32 %v8481_v54, %v7053_v55  ;;  %v7069_v18 = vshrl.u32 %v8482_v61, %v7054_v8 }
 0x664   :  { %v3777_v45 = vsub.s32 0, %v13297_v9  ;;  %v6815_v10 = vsel %vm13265_vm6, %v13023_v38, %v6812_v40  ;;  %v7067_v37 = vor.u32 %v7066_v6, %v7065_v13  ;;  %v7087_v32 = vshll.u32 %v7047_v15, 8 }
 0x665   :  { %8431 = vcosq.f32 %v6815_v10  ;;  %v3610_v21 = vand.u32 2139095040, %v13286_v17  ;;  %v7055_v31 = vshrl.u32 %v8477_v44, %v7054_v8  ;;  %v7070_v30 = vor.u32 %v7069_v18, %v7068_v5 }
 0x666   :  { %v7610_v19 = vmin.u32 %v3777_v45, %v13297_v9  ;;  %8433 = vsinq.f32 %v6815_v10  ;;  %vm7071_vm12 = vcmp.lt.s32.totalorder %v7052_v60, 1  ;;  %vm7072_vm10 = vcmp.lt.s32.totalorder %v7052_v60, 2 }
 0x667   :  { %vm7073_vm14 = vcmp.lt.s32.totalorder %v7052_v60, 3  ;;  %vm7074_vm13 = vcmp.lt.s32.totalorder %v7052_v60, 4  ;;  %v7079_v12 = vsel %vm7071_vm12, %v7058_v11, %v7061_v0  ;;  %v7083_v55 = vsel %vm7071_vm12, %v7061_v0, %v7064_v59 }
 0x668   :  { %v3779_v34 = vclz %v7610_v19  ;;  %v7076_v56 = vsel %vm7074_vm13, %v7064_v59, 2102212464  ;;  %v7080_v47 = vsel %vm7074_vm13, %v7067_v37, 920167782  ;;  %v7075_v28 = vsel %vm7071_vm12, %v7055_v31, %v7058_v11 }
 0x669   :  { %v7081_v24 = vsel %vm7073_vm14, %v7064_v59, %v7080_v47  ;;  %v7084_v1 = vsel %vm7074_vm13, %v7070_v30, 1326507024  ;;  %v7077_v53 = vsel %vm7073_vm14, %v7061_v0, %v7076_v56  ;;  %v3611_v42 = vshrl.u32 %v3610_v21, 23 }
 0x66a   :  { %v7611_v49 = vadd.s32 4294967294, %v3779_v34  ;;  %v7082_v20 = vsel %vm7072_vm10, %v7079_v12, %v7081_v24  ;;  %v7085_v22 = vsel %vm7073_vm14, %v7067_v37, %v7084_v1  ;;  %v3767_v15 = vadd.s32 %v13244_v57, %v13250_v2 }
 0x66b   :  { %v7086_v8 = vsel %vm7072_vm10, %v7083_v55, %v7085_v22  ;;  %v13319_v25 = vmul.u32.u64.low %v7087_v32, %v7082_v20  ;;  %v13320_v29 = vmul.u32.u64.high %v7087_v32, %v7082_v20, %v13319_v25  ;;  %v7078_v7 = vsel %vm7072_vm10, %v7075_v28, %v7077_v53 }
 0x66c   :  { %vm7612_vm15 = vcmp.lt.s32.totalorder %v7611_v49, 0  ;;  %v13325_v3 = vmul.u32.u64.low %v7087_v32, %v7086_v8  ;;  %v13326_v27 = vmul.u32.u64.high %v7087_v32, %v7086_v8, %v13325_v3  ;;  %v7605_v62 = vadd.s32 4294967169, %v3611_v42 }
 0x66d   :  { %v3782_v4 = vsel %vm7612_vm15, 0, %v7611_v49  ;;  %v6821_v43 = vand.u32 3, %v13275_v63  ;;  %v3797_v14 = vsub.s32 4, %v13277_v46  ;;  %v3607_v58 = vand.u32 2147483647, %v13286_v17 }
 0x66e   :  { %v3783_v26 = vsub.s32 32, %v3782_v4  ;;  %v3787_v33 = vsub.s32 4294967266, %v3782_v4  ;;  %v3784_v41 = vshll.u32 %v13297_v9, %v3782_v4  ;;  %vm6819_vm1 = vweird.f32 %v13023_v38 }
 0x66f   :  { %v7097_v11 = vadd.s32 1, %v13320_v29  ;;  %v3617_v13 = vadd.s32 1, %v7605_v62  ;;  %vm3713_vm2 = vcmp.lt.s32.totalorder %v13106_v16, 0  ;;  %v7094_v60 = vmul.u32 %v7087_v32, %v7078_v7 }
 0x670   :  { %v3785_v57 = vshrl.u32 %v3767_v15, %v3783_v26  ;;  %v3788_v2 = vadd.s32 127, %v3787_v33  ;;  %vm7096_vm3 = vc.u32 %v13326_v27, %v13319_v25  ;;  %v13339_v63 = vadd.f32 %v13283_v51, %v676_v36 }
 0x671   :  { %v7098_v40 = vsel %vm7096_vm3, %v7097_v11, %v13320_v29  ;;  %vm3618_vm4 = vcmp.gt.s32.totalorder %v3617_v13, 0  ;;  %vm6826_vm5 = vcmp.eq.s32.totalorder %v6821_v43, 2  ;;  %vm13344_vm6 = vcmp.le.f32.partialorder %v3711_v23, 0.7853982 }
 0x672   :  { %v3786_v9 = vor.u32 %v3785_v57, %v3784_v41  ;;  %v3789_v6 = vshll.u32 %v3788_v2, 23  ;;  %v8432_v45 = vpop.eup %8431  ;;  %v7099_v59 = vadd.s32 %v7098_v40, %v7094_v60  ;;  %v3619_v10 = vsel %vm3618_vm4, %v3617_v13, 0 }
 0x673   :  { %v8434_v37 = vpop.eup %8433  ;;  %v6827_v5 = vxor.u32 2147483648, %v8432_v45  ;;  %v13351_v19 = vsel %vm3713_vm2, %v3797_v14, %v13277_v46  ;;  %v3614_v32 = vand.u32 8388607, %v3607_v58  ;;  %v3621_v30 = vand.u32 31, %v3619_v10 }
 0x674   :  { %v3790_v18 = vor.u32 4788187, %v3789_v6  ;;  %v6824_v21 = vxor.u32 2147483648, %v8434_v37  ;;  %v7100_v31 = vadd.s32 536870912, %v7099_v59  ;;  %v6938_v23 = vand.u32 2139095040, %v13339_v63 }
 0x675   :  { %vm6823_vm7 = vcmp.eq.s32.totalorder %v6821_v43, 0  ;;  %v6828_v34 = vsel %vm6826_vm5, %v6827_v5, %v8434_v37  ;;  %v3793_v12 = vcvt.s32.f32 %v3786_v9  ;;  %vm6822_vm9 = vcmp.lt.s32.totalorder %v6821_v43, 2 }
 0x676   :  { %v3791_v56 = vand.u32 2147483647, %v3790_v18  ;;  %v6825_v47 = vsel %vm6823_vm7, %v8432_v45, %v6824_v21  ;;  %v13356_v55 = vshrl.u32 %v7100_v31, 30  ;;  %v3622_v49 = vsub.s32 32, %v3621_v30 }
 0x677   :  { %v6829_v28 = vsel %vm6822_vm9, %v6825_v47, %v6828_v34  ;;  %v3800_v24 = vsel %vm13344_vm6, 0, %v13351_v19  ;;  %v3615_v1 = vor.u32 8388608, %v3614_v32  ;;  %v3624_v22 = vshll.u32 %v8477_v44, %v3621_v30 }
 0x678   :  { %v3794_v46 = vmul.f32 %v3793_v12, %v3791_v56  ;;  %v6830_v53 = vsel %vm6819_vm1, nan, %v6829_v28  ;;  %v7102_v20 = vshll.u32 %v13356_v55, 30  ;;  %v6939_v42 = vshrl.u32 %v6938_v23, 23 }
 0x679   :  { %7410 = vst.msk [vmem:[%s13788_s3 + $0x1d0] sm:$0xff] %vm7351_vm0, %v6830_v53  ;;  %v3625_v29 = vshrl.u32 %v8478_v48, %v3622_v49  ;;  %v3628_v15 = vshrl.u32 %v8479_v50, %v3622_v49  ;;  %v3631_v4 = vshrl.u32 %v8480_v52, %v3622_v49  ;;  %v3627_v38 = vshll.u32 %v8478_v48, %v3621_v30 }
 0x67a   :  { %v3795_v8 = vxor.u32 2147483648, %v3794_v46  ;;  %v13372_v3 = vsub.s32 %v7099_v59, %v7102_v20  ;;  %v3630_v26 = vshll.u32 %v8479_v50, %v3621_v30  ;;  %v3634_v33 = vshrl.u32 %v8481_v54, %v3622_v49 }
 0x67b   :  { %v3620_v62 = vshrl.u32 %v3619_v10, 5  ;;  %v3626_v36 = vor.u32 %v3625_v29, %v3624_v22  ;;  %v3633_v43 = vshll.u32 %v8480_v52, %v3621_v30  ;;  %v3629_v57 = vor.u32 %v3628_v15, %v3627_v38 }
 0x67c   :  { %v3796_v7 = vsel %vm3713_vm2, %v3795_v8, %v3794_v46  ;;  %v7105_v14 = vsub.s32 0, %v13372_v3  ;;  %v3632_v2 = vor.u32 %v3631_v4, %v3630_v26  ;;  %vm7041_vm8 = vcmp.lt.s32.totalorder %v13181_v35, 0 }
 0x67d   :  { %v3799_v41 = vsel %vm13344_vm6, %v13106_v16, %v3796_v7  ;;  %v3635_v11 = vor.u32 %v3634_v33, %v3633_v43  ;;  %v3636_v13 = vshll.u32 %v8481_v54, %v3621_v30  ;;  %v3637_v60 = vshrl.u32 %v8482_v61, %v3622_v49 }
 0x67e   :  { %8435 = vcosq.f32 %v3799_v41  ;;  %v7738_v9 = vmin.u32 %v7105_v14, %v13372_v3  ;;  %v3655_v6 = vshll.u32 %v3615_v1, 8  ;;  %v7733_v40 = vadd.s32 4294967169, %v6939_v42 }
 0x67f   :  { %8437 = vsinq.f32 %v3799_v41  ;;  %v3623_v45 = vshrl.u32 %v8477_v44, %v3622_v49  ;;  %v3638_v0 = vor.u32 %v3637_v60, %v3636_v13  ;;  %vm3639_vm11 = vcmp.lt.s32.totalorder %v3620_v62, 1  ;;  %v7884_v60 = vpop.f32.mrf.mxu0 }
 0x680   :  { %vm3640_vm12 = vcmp.lt.s32.totalorder %v3620_v62, 2  ;;  %v7107_v59 = vclz %v7738_v9  ;;  %vm3641_vm10 = vcmp.lt.s32.totalorder %v3620_v62, 3  ;;  %vm3642_vm14 = vcmp.lt.s32.totalorder %v3620_v62, 4 }
 0x681   :  { %v3647_v10 = vsel %vm3639_vm11, %v3626_v36, %v3629_v57  ;;  %v3644_v37 = vsel %vm3642_vm14, %v3632_v2, 2102212464  ;;  %v3648_v5 = vsel %vm3642_vm14, %v3635_v11, 920167782  ;;  %v3651_v18 = vsel %vm3639_vm11, %v3629_v57, %v3632_v2 }
 0x682   :  { %v3652_v19 = vsel %vm3642_vm14, %v3638_v0, 1326507024  ;;  %v7739_v32 = vadd.s32 4294967294, %v7107_v59  ;;  %v7125_v21 = vsub.s32 4, %v13356_v55  ;;  %v3649_v31 = vsel %vm3641_vm10, %v3632_v2, %v3648_v5 }
 0x683   :  { %v3653_v30 = vsel %vm3641_vm10, %v3635_v11, %v3652_v19  ;;  %v3804_v23 = vadd.s32 3, %v3800_v24  ;;  %v3643_v34 = vsel %vm3639_vm11, %v3623_v45, %v3626_v36  ;;  %v3650_v56 = vsel %vm3640_vm12, %v3647_v10, %v3649_v31 }
 0x684   :  { %v3654_v12 = vsel %vm3640_vm12, %v3651_v18, %v3653_v30  ;;  %vm7740_vm13 = vcmp.lt.s32.totalorder %v7739_v32, 0  ;;  %v3645_v47 = vsel %vm3641_vm10, %v3629_v57, %v3644_v37  ;;  %v6945_v20 = vadd.s32 1, %v7733_v40 }
 0x685   :  { %v13395_v49 = vmul.u32.u64.low %v3655_v6, %v3654_v12  ;;  %v13396_v28 = vmul.u32.u64.high %v3655_v6, %v3654_v12, %v13395_v49  ;;  %v7110_v46 = vsel %vm7740_vm13, 0, %v7739_v32  ;;  %v7095_v24 = vadd.s32 %v13319_v25, %v13326_v27 }
 0x686   :  { %v13398_v1 = vmul.u32.u64.low %v3655_v6, %v3650_v56  ;;  %v13399_v53 = vmul.u32.u64.high %v3655_v6, %v3650_v56, %v13398_v1  ;;  %v7111_v22 = vsub.s32 32, %v7110_v46  ;;  %v7115_v42 = vsub.s32 4294967266, %v7110_v46 }
 0x687   :  { %v7126_v8 = vsel %vm7041_vm8, %v7125_v21, %v13356_v55  ;;  %vm3803_vm15 = vweird.f32 %v13106_v16  ;;  %v3805_v29 = vand.u32 3, %v3804_v23  ;;  %vm13410_vm1 = vcmp.le.f32.partialorder %v7039_v39, 0.7853982 }
 0x688   :  { %v3646_v4 = vsel %vm3640_vm12, %v3643_v34, %v3645_v47  ;;  %vm6946_vm2 = vcmp.gt.s32.totalorder %v6945_v20, 0  ;;  %v7112_v25 = vshll.u32 %v13372_v3, %v7110_v46  ;;  %v7113_v27 = vshrl.u32 %v7095_v24, %v7111_v22 }
 0x689   :  { %v7116_v38 = vadd.s32 127, %v7115_v42  ;;  %vm3664_vm3 = vc.u32 %v13396_v28, %v13398_v1  ;;  %v7128_v55 = vsel %vm13410_vm1, 0, %v7126_v8  ;;  %v3665_v26 = vadd.s32 1, %v13399_v53 }
 0x68a   :  { %v6935_v39 = vand.u32 2147483647, %v13339_v63  ;;  %v6947_v33 = vsel %vm6946_vm2, %v6945_v20, 0  ;;  %v7114_v36 = vor.u32 %v7113_v27, %v7112_v25  ;;  %v3662_v43 = vmul.u32 %v3655_v6, %v3646_v4 }
 0x68b   :  { %v8436_v7 = vpop.eup %8435  ;;  %v7117_v62 = vshll.u32 %v7116_v38, 23  ;;  %v6949_v41 = vand.u32 31, %v6947_v33  ;;  %vm3806_vm4 = vcmp.lt.s32.totalorder %v3805_v29, 2  ;;  %vm3807_vm5 = vcmp.eq.s32.totalorder %v3805_v29, 0 }
 0x68c   :  { %v8438_v14 = vpop.eup %8437  ;;  %v3811_v3 = vxor.u32 2147483648, %v8436_v7  ;;  %v3666_v57 = vsel %vm3664_vm3, %v3665_v26, %v13399_v53  ;;  %vm3810_vm6 = vcmp.eq.s32.totalorder %v3805_v29, 2  ;;  %v7132_v40 = vadd.s32 3, %v7128_v55 }
 0x68d   :  { %v3808_v2 = vxor.u32 2147483648, %v8438_v14  ;;  %v7118_v11 = vor.u32 4788187, %v7117_v62  ;;  %v3667_v13 = vadd.s32 %v3666_v57, %v3662_v43  ;;  %v6942_v45 = vand.u32 8388607, %v6935_v39 }
 0x68e   :  { %v3812_v9 = vsel %vm3810_vm6, %v3811_v3, %v8438_v14  ;;  %v6950_v0 = vsub.s32 32, %v6949_v41  ;;  %v7121_v10 = vcvt.s32.f32 %v7114_v36  ;;  %v13429_v32 = vadd.f32 %v13283_v51, %v7884_v60 }
 0x68f   :  { %v3809_v59 = vsel %vm3807_vm5, %v8436_v7, %v3808_v2  ;;  %v7119_v6 = vand.u32 2147483647, %v7118_v11  ;;  %v3668_v37 = vadd.s32 536870912, %v3667_v13  ;;  %v6948_v34 = vshrl.u32 %v6947_v33, 5 }
 0x690   :  { %v3813_v5 = vsel %vm3806_vm4, %v3809_v59, %v3812_v9  ;;  %v6953_v18 = vshrl.u32 %v8478_v48, %v6950_v0  ;;  %v6956_v19 = vshrl.u32 %v8479_v50, %v6950_v0  ;;  %v6959_v23 = vshrl.u32 %v8480_v52, %v6950_v0  ;;  %v7932_v59 = vpop.f32.mrf.mxu1 }
 0x691   :  { %v3814_v21 = vsel %vm3803_vm15, nan, %v3813_v5  ;;  %v7122_v31 = vmul.f32 %v7121_v10, %v7119_v6  ;;  %v13433_v30 = vshrl.u32 %v3668_v37, 30  ;;  %v6952_v56 = vshll.u32 %v8477_v44, %v6949_v41 }
 0x692   :  { %7381 = vst.msk [vmem:[%s13788_s3 + $0xe8] sm:$0xff] %vm7351_vm0, %v3814_v21  ;;  %v6955_v12 = vshll.u32 %v8478_v48, %v6949_v41  ;;  %v6962_v47 = vshrl.u32 %v8481_v54, %v6950_v0  ;;  %v6958_v46 = vshll.u32 %v8479_v50, %v6949_v41  ;;  %v6961_v53 = vshll.u32 %v8480_v52, %v6949_v41 }
 0x693   :  { %v7123_v49 = vxor.u32 2147483648, %v7122_v31  ;;  %v3670_v16 = vshll.u32 %v13433_v30, 30  ;;  %v6954_v20 = vor.u32 %v6953_v18, %v6952_v56  ;;  %v6964_v22 = vshll.u32 %v8481_v54, %v6949_v41 }
 0x694   :  { %v6957_v24 = vor.u32 %v6956_v19, %v6955_v12  ;;  %v6965_v42 = vshrl.u32 %v8482_v61, %v6950_v0  ;;  %v6960_v4 = vor.u32 %v6959_v23, %v6958_v46  ;;  %v6963_v25 = vor.u32 %v6962_v47, %v6961_v53 }
 0x695   :  { %v7124_v8 = vsel %vm7041_vm8, %v7123_v49, %v7122_v31  ;;  %v13450_v29 = vsub.s32 %v3667_v13, %v3670_v16  ;;  %v13455_v38 = vand.u32 3, %v7132_v40  ;;  %v6943_v55 = vor.u32 8388608, %v6942_v45 }
 0x696   :  { %v7127_v27 = vsel %vm13410_vm1, %v13181_v35, %v7124_v8  ;;  %v6966_v26 = vor.u32 %v6965_v42, %v6964_v22  ;;  %v6951_v7 = vshrl.u32 %v8477_v44, %v6950_v0  ;;  %v3922_v36 = vand.u32 2139095040, %v13429_v32 }
 0x697   :  { %8439 = vcosq.f32 %v7127_v27  ;;  %v3673_v33 = vsub.s32 0, %v13450_v29  ;;  %vm6967_vm7 = vcmp.lt.s32.totalorder %v6948_v34, 1  ;;  %vm6969_vm9 = vcmp.lt.s32.totalorder %v6948_v34, 3 }
 0x698   :  { %8441 = vsinq.f32 %v7127_v27  ;;  %vm6970_vm8 = vcmp.lt.s32.totalorder %v6948_v34, 4  ;;  %v6975_v15 = vsel %vm6967_vm7, %v6954_v20, %v6957_v24  ;;  %v6979_v3 = vsel %vm6967_vm7, %v6957_v24, %v6960_v4 }
 0x699   :  { %v7606_v62 = vmin.u32 %v3673_v33, %v13450_v29  ;;  %v6972_v43 = vsel %vm6970_vm8, %v6960_v4, 2102212464  ;;  %v6976_v41 = vsel %vm6970_vm8, %v6963_v25, 920167782  ;;  %v6980_v57 = vsel %vm6970_vm8, %v6966_v26, 1326507024 }
 0x69a   :  { %v6977_v14 = vsel %vm6969_vm9, %v6960_v4, %v6976_v41  ;;  %v6983_v2 = vshll.u32 %v6943_v55, 8  ;;  %v3693_v13 = vsub.s32 4, %v13433_v30  ;;  %vm6968_vm11 = vcmp.lt.s32.totalorder %v6948_v34, 2 }
 0x69b   :  { %v3675_v11 = vclz %v7606_v62  ;;  %v6971_v60 = vsel %vm6967_vm7, %v6951_v7, %v6954_v20  ;;  %v6973_v9 = vsel %vm6969_vm9, %v6957_v24, %v6972_v43  ;;  %v6978_v40 = vsel %vm6968_vm11, %v6975_v15, %v6977_v14 }
 0x69c   :  { %v6981_v45 = vsel %vm6969_vm9, %v6963_v25, %v6980_v57  ;;  %v3923_v0 = vshrl.u32 %v3922_v36, 23  ;;  %v13465_v37 = vmul.u32.u64.low %v6983_v2, %v6978_v40  ;;  %v13466_v5 = vmul.u32.u64.high %v6983_v2, %v6978_v40, %v13465_v37 }
 0x69d   :  { %v7607_v6 = vadd.s32 4294967294, %v3675_v11  ;;  %v6982_v10 = vsel %vm6968_vm11, %v6979_v3, %v6981_v45  ;;  %vm3609_vm12 = vcmp.lt.s32.totalorder %v13286_v17, 0  ;;  %vm13474_vm10 = vcmp.le.f32.partialorder %v3607_v58, 0.7853982 }
 0x69e   :  { %v13469_v18 = vmul.u32.u64.low %v6983_v2, %v6982_v10  ;;  %v13470_v19 = vmul.u32.u64.high %v6983_v2, %v6982_v10, %v13469_v18  ;;  %v7617_v21 = vadd.s32 4294967169, %v3923_v0  ;;  %v6974_v23 = vsel %vm6968_vm11, %v6971_v60, %v6973_v9 }
 0x69f   :  { %vm7608_vm14 = vcmp.lt.s32.totalorder %v7607_v6, 0  ;;  %v13479_v34 = vadd.f32 %v13283_v51, %v7932_v59  ;;  %vm7134_vm13 = vcmp.lt.s32.totalorder %v13455_v38, 2  ;;  %v3663_v56 = vadd.s32 %v13398_v1, %v13396_v28 }
 0x6a0   :  { %v3678_v12 = vsel %vm7608_vm14, 0, %v7607_v6  ;;  %v3919_v47 = vand.u32 2147483647, %v13429_v32  ;;  %v3929_v49 = vadd.s32 1, %v7617_v21  ;;  %vm7131_vm15 = vweird.f32 %v13181_v35 }
 0x6a1   :  { %v3679_v58 = vsub.s32 32, %v3678_v12  ;;  %v3683_v16 = vsub.s32 4294967266, %v3678_v12  ;;  %v3694_v46 = vsel %vm3609_vm12, %v3693_v13, %v13433_v30  ;;  %v6993_v53 = vadd.s32 1, %v13466_v5 }
 0x6a2   :  { %v3680_v20 = vshll.u32 %v13450_v29, %v3678_v12  ;;  %v6990_v24 = vmul.u32 %v6983_v2, %v6974_v23  ;;  %vm6992_vm1 = vc.u32 %v13470_v19, %v13465_v37  ;;  %vm3930_vm2 = vcmp.gt.s32.totalorder %v3929_v49, 0 }
 0x6a3   :  { %v3681_v28 = vshrl.u32 %v3663_v56, %v3679_v58  ;;  %v3684_v1 = vadd.s32 127, %v3683_v16  ;;  %v6994_v22 = vsel %vm6992_vm1, %v6993_v53, %v13466_v5  ;;  %v3931_v42 = vsel %vm3930_vm2, %v3929_v49, 0 }
 0x6a4   :  { %v8440_v8 = vpop.eup %8439  ;;  %v3696_v4 = vsel %vm13474_vm10, 0, %v3694_v46  ;;  %v6995_v25 = vadd.s32 %v6994_v22, %v6990_v24  ;;  %v3926_v30 = vand.u32 8388607, %v3919_v47  ;;  %v3933_v27 = vand.u32 31, %v3931_v42 }
 0x6a5   :  { %v8442_v55 = vpop.eup %8441  ;;  %vm7135_vm3 = vcmp.eq.s32.totalorder %v13455_v38, 0  ;;  %v7139_v29 = vxor.u32 2147483648, %v8440_v8  ;;  %v3682_v26 = vor.u32 %v3681_v28, %v3680_v20  ;;  %v3685_v33 = vshll.u32 %v3684_v1, 23 }
 0x6a6   :  { %v7136_v7 = vxor.u32 2147483648, %v8442_v55  ;;  %vm7138_vm4 = vcmp.eq.s32.totalorder %v13455_v38, 2  ;;  %v6996_v36 = vadd.s32 536870912, %v6995_v25  ;;  %v3934_v62 = vsub.s32 32, %v3933_v27 }
 0x6a7   :  { %v7140_v43 = vsel %vm7138_vm4, %v7139_v29, %v8442_v55  ;;  %v3686_v15 = vor.u32 4788187, %v3685_v33  ;;  %v13499_v41 = vadd.s32 3, %v3696_v4  ;;  %v7247_v14 = vand.u32 2147483647, %v13479_v34 }
 0x6a8   :  { %v7137_v3 = vsel %vm7135_vm3, %v8440_v8, %v7136_v7  ;;  %v6997_v57 = vshrl.u32 %v6996_v36, 30  ;;  %v3927_v2 = vor.u32 8388608, %v3926_v30  ;;  %v7250_v11 = vand.u32 2139095040, %v13479_v34 }
 0x6a9   :  { %v7141_v13 = vsel %vm7134_vm13, %v7137_v3, %v7140_v43  ;;  %v3687_v60 = vand.u32 2147483647, %v3686_v15  ;;  %v3689_v9 = vcvt.s32.f32 %v3682_v26  ;;  %v3937_v40 = vshrl.u32 %v8478_v48, %v3934_v62 }
 0x6aa   :  { %v7142_v45 = vsel %vm7131_vm15, nan, %v7141_v13  ;;  %v13509_v0 = vadd.s32 %v13465_v37, %v13470_v19  ;;  %v6998_v59 = vshll.u32 %v6997_v57, 30  ;;  %v3940_v6 = vshrl.u32 %v8479_v50, %v3934_v62 }
 0x6ab   :  { %7413 = vst.msk [vmem:[%s13788_s3 + $0x1e8] sm:$0xff] %vm7351_vm0, %v7142_v45  ;;  %v3690_v38 = vmul.f32 %v3689_v9, %v3687_v60  ;;  %v3932_v10 = vshrl.u32 %v3931_v42, 5  ;;  %v3936_v5 = vshll.u32 %v8477_v44, %v3933_v27  ;;  %v3943_v18 = vshrl.u32 %v8480_v52, %v3934_v62 }
 0x6ac   :  { %v13518_v21 = vsub.s32 %v6995_v25, %v6998_v59  ;;  %v3939_v35 = vshll.u32 %v8478_v48, %v3933_v27  ;;  %v3942_v37 = vshll.u32 %v8479_v50, %v3933_v27  ;;  %v3946_v19 = vshrl.u32 %v8481_v54, %v3934_v62 }
 0x6ad   :  { %v3691_v23 = vxor.u32 2147483648, %v3690_v38  ;;  %v3938_v56 = vor.u32 %v3937_v40, %v3936_v5  ;;  %v3945_v12 = vshll.u32 %v8480_v52, %v3933_v27  ;;  %v3949_v49 = vshrl.u32 %v8482_v61, %v3934_v62 }
 0x6ae   :  { %vm6937_vm5 = vcmp.lt.s32.totalorder %v13339_v63, 0  ;;  %v7001_v58 = vsub.s32 0, %v13518_v21  ;;  %v3941_v16 = vor.u32 %v3940_v6, %v3939_v35  ;;  %v3944_v46 = vor.u32 %v3943_v18, %v3942_v37 }
 0x6af   :  { %v3948_v53 = vshll.u32 %v8481_v54, %v3933_v27  ;;  %v3692_v20 = vsel %vm3609_vm12, %v3691_v23, %v3690_v38  ;;  %v3947_v24 = vor.u32 %v3946_v19, %v3945_v12  ;;  %v3967_v28 = vshll.u32 %v3927_v2, 8 }
 0x6b0   :  { %v7251_v1 = vshrl.u32 %v7250_v11, 23  ;;  %v3695_v22 = vsel %vm13474_vm10, %v13286_v17, %v3692_v20  ;;  %v7734_v42 = vmin.u32 %v7001_v58, %v13518_v21  ;;  %v3935_v8 = vshrl.u32 %v8477_v44, %v3934_v62 }
 0x6b1   :  { %v3950_v4 = vor.u32 %v3949_v49, %v3948_v53  ;;  %8443 = vcosq.f32 %v3695_v22  ;;  %v7021_v25 = vsub.s32 4, %v6997_v57  ;;  %vm3951_vm6 = vcmp.lt.s32.totalorder %v3932_v10, 1 }
 0x6b2   :  { %vm3954_vm7 = vcmp.lt.s32.totalorder %v3932_v10, 4  ;;  %8445 = vsinq.f32 %v3695_v22  ;;  %v7003_v30 = vclz %v7734_v42  ;;  %v3959_v55 = vsel %vm3951_vm6, %v3938_v56, %v3941_v16 }
 0x6b3   :  { %v3956_v27 = vsel %vm3954_vm7, %v3944_v46, 2102212464  ;;  %vm3952_vm9 = vcmp.lt.s32.totalorder %v3932_v10, 2  ;;  %vm3953_vm8 = vcmp.lt.s32.totalorder %v3932_v10, 3  ;;  %v3960_v29 = vsel %vm3954_vm7, %v3947_v24, 920167782 }
 0x6b4   :  { %v3963_v26 = vsel %vm3951_vm6, %v3941_v16, %v3944_v46  ;;  %v7735_v33 = vadd.s32 4294967294, %v7003_v30  ;;  %v3955_v31 = vsel %vm3951_vm6, %v3935_v8, %v3938_v56  ;;  %v3961_v7 = vsel %vm3953_vm8, %v3944_v46, %v3960_v29 }
 0x6b5   :  { %v3964_v36 = vsel %vm3954_vm7, %v3950_v4, 1326507024  ;;  %v3957_v43 = vsel %vm3953_vm8, %v3941_v16, %v3956_v27  ;;  %v3962_v62 = vsel %vm3952_vm9, %v3959_v55, %v3961_v7  ;;  %v7745_v3 = vadd.s32 4294967169, %v7251_v1 }
 0x6b6   :  { %v3965_v15 = vsel %vm3953_vm8, %v3947_v24, %v3964_v36  ;;  %vm7736_vm11 = vcmp.lt.s32.totalorder %v7735_v33, 0  ;;  %v13537_v11 = vmul.u32.u64.low %v3967_v28, %v3962_v62  ;;  %v13538_v13 = vmul.u32.u64.high %v3967_v28, %v3962_v62, %v13537_v11 }
 0x6b7   :  { %v3966_v2 = vsel %vm3952_vm9, %v3963_v26, %v3965_v15  ;;  %v7006_v60 = vsel %vm7736_vm11, 0, %v7735_v33  ;;  %v7022_v9 = vsel %vm6937_vm5, %v7021_v25, %v6997_v57  ;;  %v3958_v38 = vsel %vm3952_vm9, %v3955_v31, %v3957_v43 }
 0x6b8   :  { %v13543_v40 = vmul.u32.u64.low %v3967_v28, %v3966_v2  ;;  %v13544_v45 = vmul.u32.u64.high %v3967_v28, %v3966_v2, %v13543_v40  ;;  %v7007_v59 = vsub.s32 32, %v7006_v60  ;;  %v7011_v6 = vsub.s32 4294967266, %v7006_v60 }
 0x6b9   :  { %v7257_v5 = vadd.s32 1, %v7745_v3  ;;  %v3701_v18 = vand.u32 3, %v13499_v41  ;;  %vm13550_vm12 = vcmp.le.f32.partialorder %v6935_v39, 0.7853982  ;;  %v7008_v37 = vshll.u32 %v13518_v21, %v7006_v60 }
 0x6ba   :  { %v7009_v57 = vshrl.u32 %v13509_v0, %v7007_v59  ;;  %v7012_v19 = vadd.s32 127, %v7011_v6  ;;  %v3977_v23 = vadd.s32 1, %v13538_v13  ;;  %v7024_v10 = vsel %vm13550_vm12, 0, %v7022_v9  ;;  %v526_v6 = vpop.f32.mrf.mxu0 }
 0x6bb   :  { %vm7258_vm10 = vcmp.gt.s32.totalorder %v7257_v5, 0  ;;  %v3974_v56 = vmul.u32 %v3967_v28, %v3958_v38  ;;  %vm3976_vm14 = vc.u32 %v13544_v45, %v13537_v11  ;;  %v7254_v21 = vand.u32 8388607, %v7247_v14 }
 0x6bc   :  { %v7259_v41 = vsel %vm7258_vm10, %v7257_v5, 0  ;;  %v7010_v39 = vor.u32 %v7009_v57, %v7008_v37  ;;  %v7013_v12 = vshll.u32 %v7012_v19, 23  ;;  %v3978_v49 = vsel %vm3976_vm14, %v3977_v23, %v13538_v13 }
 0x6bd   :  { %vm3699_vm13 = vweird.f32 %v13286_v17  ;;  %v3979_v0 = vadd.s32 %v3978_v49, %v3974_v56  ;;  %v7261_v58 = vand.u32 31, %v7259_v41  ;;  %vm3702_vm15 = vcmp.lt.s32.totalorder %v3701_v18, 2 }
 0x6be   :  { %v8444_v16 = vpop.eup %8443  ;;  %vm3703_vm1 = vcmp.eq.s32.totalorder %v3701_v18, 0  ;;  %vm3706_vm2 = vcmp.eq.s32.totalorder %v3701_v18, 2  ;;  %v7014_v46 = vor.u32 4788187, %v7013_v12  ;;  %v7028_v24 = vadd.s32 3, %v7024_v10 }
 0x6bf   :  { %v8446_v53 = vpop.eup %8445  ;;  %v3707_v20 = vxor.u32 2147483648, %v8444_v16  ;;  %v3980_v28 = vadd.s32 536870912, %v3979_v0  ;;  %v7262_v1 = vsub.s32 32, %v7261_v58  ;;  %v7017_v8 = vcvt.s32.f32 %v7010_v39 }
 0x6c0   :  { %v3704_v22 = vxor.u32 2147483648, %v8446_v53  ;;  %v7015_v42 = vand.u32 2147483647, %v7014_v46  ;;  %v7255_v4 = vor.u32 8388608, %v7254_v21  ;;  %v7264_v27 = vshll.u32 %v8477_v44, %v7261_v58 }
 0x6c1   :  { %v3708_v25 = vsel %vm3706_vm2, %v3707_v20, %v8446_v53  ;;  %v13565_v30 = vshrl.u32 %v3980_v28, 30  ;;  %v7265_v55 = vshrl.u32 %v8478_v48, %v7262_v1  ;;  %v7268_v33 = vshrl.u32 %v8479_v50, %v7262_v1 }
 0x6c2   :  { %v3705_v29 = vsel %vm3703_vm1, %v8444_v16, %v3704_v22  ;;  %v7018_v26 = vmul.f32 %v7017_v8, %v7015_v42  ;;  %v7271_v31 = vshrl.u32 %v8480_v52, %v7262_v1  ;;  %v7260_v43 = vshrl.u32 %v7259_v41, 5  ;;  %v686_v8 = vpop.f32.mrf.mxu1 }
 0x6c3   :  { %v3709_v7 = vsel %vm3702_vm15, %v3705_v29, %v3708_v25  ;;  %v3982_v36 = vshll.u32 %v13565_v30, 30  ;;  %v7267_v62 = vshll.u32 %v8478_v48, %v7261_v58  ;;  %v7266_v2 = vor.u32 %v7265_v55, %v7264_v27 }
 0x6c4   :  { %v3710_v15 = vsel %vm3699_vm13, nan, %v3709_v7  ;;  %v7019_v3 = vxor.u32 2147483648, %v7018_v26  ;;  %v7270_v13 = vshll.u32 %v8479_v50, %v7261_v58  ;;  %v7273_v40 = vshll.u32 %v8480_v52, %v7261_v58 }
 0x6c5   :  { %7380 = vst.msk [vmem:[%s13788_s3 + $0xe0] sm:$0xff] %vm7351_vm0, %v3710_v15  ;;  %v13582_v60 = vsub.s32 %v3979_v0, %v3982_v36  ;;  %v7269_v9 = vor.u32 %v7268_v33, %v7267_v62  ;;  %v7274_v59 = vshrl.u32 %v8481_v54, %v7262_v1  ;;  %v7276_v5 = vshll.u32 %v8481_v54, %v7261_v58 }
 0x6c6   :  { %v7020_v17 = vsel %vm6937_vm5, %v7019_v3, %v7018_v26  ;;  %v7272_v38 = vor.u32 %v7271_v31, %v7270_v13  ;;  %v7277_v18 = vshrl.u32 %v8482_v61, %v7262_v1  ;;  %v13593_v57 = vand.u32 3, %v7028_v24 }
 0x6c7   :  { %v7023_v37 = vsel %vm13550_vm12, %v13339_v63, %v7020_v17  ;;  %v3985_v19 = vsub.s32 0, %v13582_v60  ;;  %v7275_v23 = vor.u32 %v7274_v59, %v7273_v40  ;;  %vm7279_vm3 = vcmp.lt.s32.totalorder %v7260_v43, 1 }
 0x6c8   :  { %8447 = vcosq.f32 %v7023_v37  ;;  %v7278_v10 = vor.u32 %v7277_v18, %v7276_v5  ;;  %v13597_v56 = vadd.f32 %v13283_v51, %v526_v6  ;;  %v7263_v39 = vshrl.u32 %v8477_v44, %v7262_v1 }
 0x6c9   :  { %8449 = vsinq.f32 %v7023_v37  ;;  %v7618_v41 = vmin.u32 %v3985_v19, %v13582_v60  ;;  %vm7282_vm4 = vcmp.lt.s32.totalorder %v7260_v43, 4  ;;  %v7287_v35 = vsel %vm7279_vm3, %v7266_v2, %v7269_v9 }
 0x6ca   :  { %v7284_v12 = vsel %vm7282_vm4, %v7272_v38, 2102212464  ;;  %v7288_v49 = vsel %vm7282_vm4, %v7275_v23, 920167782  ;;  %v7295_v21 = vshll.u32 %v7255_v4, 8  ;;  %vm7281_vm5 = vcmp.lt.s32.totalorder %v7260_v43, 3 }
 0x6cb   :  { %v3987_v0 = vclz %v7618_v41  ;;  %v7283_v58 = vsel %vm7279_vm3, %v7263_v39, %v7266_v2  ;;  %v7291_v16 = vsel %vm7279_vm3, %v7269_v9, %v7272_v38  ;;  %vm7280_vm6 = vcmp.lt.s32.totalorder %v7260_v43, 2 }
 0x6cc   :  { %v7285_v46 = vsel %vm7281_vm5, %v7269_v9, %v7284_v12  ;;  %v7289_v53 = vsel %vm7281_vm5, %v7272_v38, %v7288_v49  ;;  %v7292_v20 = vsel %vm7282_vm4, %v7278_v10, 1326507024  ;;  %v4005_v28 = vsub.s32 4, %v13565_v30 }
 0x6cd   :  { %v7619_v24 = vadd.s32 4294967294, %v3987_v0  ;;  %v7290_v22 = vsel %vm7280_vm6, %v7287_v35, %v7289_v53  ;;  %v7293_v42 = vsel %vm7281_vm5, %v7275_v23, %v7292_v20  ;;  %v7286_v1 = vsel %vm7280_vm6, %v7283_v58, %v7285_v46 }
 0x6ce   :  { %v7294_v25 = vsel %vm7280_vm6, %v7291_v16, %v7293_v42  ;;  %v13602_v27 = vmul.u32.u64.low %v7295_v21, %v7290_v22  ;;  %v13603_v55 = vmul.u32.u64.high %v7295_v21, %v7290_v22, %v13602_v27  ;;  %v3818_v26 = vand.u32 2139095040, %v13597_v56 }
 0x6cf   :  { %vm7620_vm7 = vcmp.lt.s32.totalorder %v7619_v24, 0  ;;  %v13606_v4 = vmul.u32.u64.low %v7295_v21, %v7294_v25  ;;  %v13607_v29 = vmul.u32.u64.high %v7295_v21, %v7294_v25, %v13606_v4  ;;  %vm3921_vm9 = vcmp.lt.s32.totalorder %v13429_v32, 0 }
 0x6d0   :  { %v3975_v33 = vadd.s32 %v13537_v11, %v13544_v45  ;;  %v3990_v31 = vsel %vm7620_vm7, 0, %v7619_v24  ;;  %v13614_v7 = vadd.f32 %v13283_v51, %v686_v8  ;;  %v4006_v62 = vsel %vm3921_vm9, %v4005_v28, %v13565_v30 }
 0x6d1   :  { %v3991_v36 = vsub.s32 32, %v3990_v31  ;;  %v3995_v43 = vsub.s32 4294967266, %v3990_v31  ;;  %v3819_v15 = vshrl.u32 %v3818_v26, 23  ;;  %vm7030_vm8 = vcmp.lt.s32.totalorder %v13593_v57, 2 }
 0x6d2   :  { %vm13622_vm11 = vcmp.le.f32.partialorder %v3919_v47, 0.7853982  ;;  %v7302_v11 = vmul.u32 %v7295_v21, %v7286_v1  ;;  %v7305_v45 = vadd.s32 1, %v13603_v55  ;;  %v3992_v51 = vshll.u32 %v13582_v60, %v3990_v31 }
 0x6d3   :  { %v3993_v2 = vshrl.u32 %v3975_v33, %v3991_v36  ;;  %v3996_v13 = vadd.s32 127, %v3995_v43  ;;  %vm7304_vm12 = vc.u32 %v13607_v29, %v13602_v27  ;;  %v4008_v30 = vsel %vm13622_vm11, 0, %v4006_v62 }
 0x6d4   :  { %v7306_v9 = vsel %vm7304_vm12, %v7305_v45, %v13603_v55  ;;  %v7613_v40 = vadd.s32 4294967169, %v3819_v15  ;;  %v7146_v47 = vand.u32 2139095040, %v13614_v7  ;;  %vm7031_vm10 = vcmp.eq.s32.totalorder %v13593_v57, 0 }
 0x6d5   :  { %v8448_v59 = vpop.eup %8447  ;;  %v3994_v6 = vor.u32 %v3993_v2, %v3992_v51  ;;  %v3997_v17 = vshll.u32 %v3996_v13, 23  ;;  %v7307_v38 = vadd.s32 %v7306_v9, %v7302_v11  ;;  %vm7034_vm14 = vcmp.eq.s32.totalorder %v13593_v57, 2 }
 0x6d6   :  { %v8450_v60 = vpop.eup %8449  ;;  %v7035_v5 = vxor.u32 2147483648, %v8448_v59  ;;  %v3815_v18 = vand.u32 2147483647, %v13597_v56  ;;  %v3825_v37 = vadd.s32 1, %v7613_v40  ;;  %v4012_v10 = vadd.s32 3, %v4008_v30 }
 0x6d7   :  { %v7032_v19 = vxor.u32 2147483648, %v8450_v60  ;;  %v3998_v23 = vor.u32 4788187, %v3997_v17  ;;  %v7308_v41 = vadd.s32 536870912, %v7307_v38  ;;  %v4001_v12 = vcvt.s32.f32 %v3994_v6 }
 0x6d8   :  { %v7036_v39 = vsel %vm7034_vm14, %v7035_v5, %v8450_v60  ;;  %vm3826_vm13 = vcmp.gt.s32.totalorder %v3825_v37, 0  ;;  %v7147_v35 = vshrl.u32 %v7146_v47, 23  ;;  %vm7027_vm15 = vweird.f32 %v13339_v63 }
 0x6d9   :  { %v7033_v49 = vsel %vm7031_vm10, %v8448_v59, %v7032_v19  ;;  %v3999_v21 = vand.u32 2147483647, %v3998_v23  ;;  %v13639_v0 = vshrl.u32 %v7308_v41, 30  ;;  %v3827_v58 = vsel %vm3826_vm13, %v3825_v37, 0 }
 0x6da   :  { %v7037_v16 = vsel %vm7030_vm8, %v7033_v49, %v7036_v39  ;;  %v3829_v46 = vand.u32 31, %v3827_v58  ;;  %v13649_v28 = vand.u32 3, %v4012_v10  ;;  %v3822_v22 = vand.u32 8388607, %v3815_v18 }
 0x6db   :  { %v7038_v53 = vsel %vm7027_vm15, nan, %v7037_v16  ;;  %v4002_v20 = vmul.f32 %v4001_v12, %v3999_v21  ;;  %v7310_v24 = vshll.u32 %v13639_v0, 30  ;;  %v3828_v57 = vshrl.u32 %v3827_v58, 5 }
 0x6dc   :  { %7412 = vst.msk [vmem:[%s13788_s3 + $0x1e0] sm:$0xff] %vm7351_vm0, %v7038_v53  ;;  %v3830_v42 = vsub.s32 32, %v3829_v46  ;;  %v7741_v1 = vadd.s32 4294967169, %v7147_v35  ;;  %v3832_v25 = vshll.u32 %v8477_v44, %v3829_v46  ;;  %v3835_v4 = vshll.u32 %v8478_v48, %v3829_v46 }
 0x6dd   :  { %v4003_v63 = vxor.u32 2147483648, %v4002_v20  ;;  %v13653_v8 = vsub.s32 %v7307_v38, %v7310_v24  ;;  %v3838_v36 = vshll.u32 %v8479_v50, %v3829_v46  ;;  %v3841_v11 = vshll.u32 %v8480_v52, %v3829_v46 }
 0x6de   :  { %v3833_v55 = vshrl.u32 %v8478_v48, %v3830_v42  ;;  %v3836_v26 = vshrl.u32 %v8479_v50, %v3830_v42  ;;  %v3839_v43 = vshrl.u32 %v8480_v52, %v3830_v42  ;;  %v3842_v45 = vshrl.u32 %v8481_v54, %v3830_v42 }
 0x6df   :  { %v4004_v33 = vsel %vm3921_vm9, %v4003_v63, %v4002_v20  ;;  %v7313_v31 = vsub.s32 0, %v13653_v8  ;;  %v3844_v9 = vshll.u32 %v8481_v54, %v3829_v46  ;;  %v3845_v40 = vshrl.u32 %v8482_v61, %v3830_v42 }
 0x6e0   :  { %v4007_v62 = vsel %vm13622_vm11, %v13429_v32, %v4004_v33  ;;  %v3834_v15 = vor.u32 %v3833_v55, %v3832_v25  ;;  %v3837_v2 = vor.u32 %v3836_v26, %v3835_v4  ;;  %v3840_v13 = vor.u32 %v3839_v43, %v3838_v36 }
 0x6e1   :  { %8451 = vcosq.f32 %v4007_v62  ;;  %v7746_v51 = vmin.u32 %v7313_v31, %v13653_v8  ;;  %v3843_v30 = vor.u32 %v3842_v45, %v3841_v11  ;;  %v7303_v3 = vadd.s32 %v13602_v27, %v13607_v29 }
 0x6e2   :  { %8453 = vsinq.f32 %v4007_v62  ;;  %v3823_v59 = vor.u32 8388608, %v3822_v22  ;;  %v7143_v6 = vand.u32 2147483647, %v13614_v7  ;;  %v3831_v17 = vshrl.u32 %v8477_v44, %v3830_v42 }
 0x6e3   :  { %v7315_v47 = vclz %v7746_v51  ;;  %v3846_v38 = vor.u32 %v3845_v40, %v3844_v9  ;;  %vm3847_vm1 = vcmp.lt.s32.totalorder %v3828_v57, 1  ;;  %v7153_v60 = vadd.s32 1, %v7741_v1 }
 0x6e4   :  { %vm3849_vm2 = vcmp.lt.s32.totalorder %v3828_v57, 3  ;;  %vm3850_vm3 = vcmp.lt.s32.totalorder %v3828_v57, 4  ;;  %v3855_v37 = vsel %vm3847_vm1, %v3834_v15, %v3837_v2  ;;  %v3859_v10 = vsel %vm3847_vm1, %v3837_v2, %v3840_v13 }
 0x6e5   :  { %v7747_v5 = vadd.s32 4294967294, %v7315_v47  ;;  %v3852_v19 = vsel %vm3850_vm3, %v3840_v13, 2102212464  ;;  %v3856_v23 = vsel %vm3850_vm3, %v3843_v30, 920167782  ;;  %vm7249_vm4 = vcmp.lt.s32.totalorder %v13479_v34, 0 }
 0x6e6   :  { %v3860_v41 = vsel %vm3850_vm3, %v3846_v38, 1326507024  ;;  %vm3848_vm6 = vcmp.lt.s32.totalorder %v3828_v57, 2  ;;  %v3857_v27 = vsel %vm3849_vm2, %v3840_v13, %v3856_v23  ;;  %v3863_v49 = vshll.u32 %v3823_v59, 8 }
 0x6e7   :  { %vm7748_vm5 = vcmp.lt.s32.totalorder %v7747_v5, 0  ;;  %v3861_v29 = vsel %vm3849_vm2, %v3843_v30, %v3860_v41  ;;  %v3858_v12 = vsel %vm3848_vm6, %v3855_v37, %v3857_v27  ;;  %v3851_v16 = vsel %vm3847_vm1, %v3831_v17, %v3834_v15 }
 0x6e8   :  { %v7318_v39 = vsel %vm7748_vm5, 0, %v7747_v5  ;;  %v3862_v35 = vsel %vm3848_vm6, %v3859_v10, %v3861_v29  ;;  %v3853_v46 = vsel %vm3849_vm2, %v3837_v2, %v3852_v19  ;;  %vm4011_vm7 = vweird.f32 %v13429_v32 }
 0x6e9   :  { %v7319_v21 = vsub.s32 32, %v7318_v39  ;;  %v7323_v58 = vsub.s32 4294967266, %v7318_v39  ;;  %v13685_v53 = vmul.u32.u64.low %v3863_v49, %v3862_v35  ;;  %v13686_v20 = vmul.u32.u64.high %v3863_v49, %v3862_v35, %v13685_v53 }
 0x6ea   :  { %v13688_v24 = vmul.u32.u64.low %v3863_v49, %v3858_v12  ;;  %v13689_v22 = vmul.u32.u64.high %v3863_v49, %v3858_v12, %v13688_v24  ;;  %v7320_v42 = vshll.u32 %v13653_v8, %v7318_v39  ;;  %vm7154_vm9 = vcmp.gt.s32.totalorder %v7153_v60, 0 }
 0x6eb   :  { %v7321_v63 = vshrl.u32 %v7303_v3, %v7319_v21  ;;  %v7324_v1 = vadd.s32 127, %v7323_v58  ;;  %v7333_v25 = vsub.s32 4, %v13639_v0  ;;  %v3854_v55 = vsel %vm3848_vm6, %v3851_v16, %v3853_v46 }
 0x6ec   :  { %v7150_v4 = vand.u32 8388607, %v7143_v6  ;;  %v7155_v26 = vsel %vm7154_vm9, %v7153_v60, 0  ;;  %vm4014_vm8 = vcmp.lt.s32.totalorder %v13649_v28, 2  ;;  %vm4015_vm11 = vcmp.eq.s32.totalorder %v13649_v28, 0 }
 0x6ed   :  { %v7322_v33 = vor.u32 %v7321_v63, %v7320_v42  ;;  %v7325_v31 = vshll.u32 %v7324_v1, 23  ;;  %v7157_v36 = vand.u32 31, %v7155_v26  ;;  %vm4018_vm12 = vcmp.eq.s32.totalorder %v13649_v28, 2 }
 0x6ee   :  { %v8452_v43 = vpop.eup %8451  ;;  %vm3872_vm10 = vc.u32 %v13686_v20, %v13688_v24  ;;  %v3873_v8 = vadd.s32 1, %v13689_v22  ;;  %vm13706_vm14 = vcmp.le.f32.partialorder %v7247_v14, 0.7853982  ;;  %v3870_v45 = vmul.u32 %v3863_v49, %v3854_v55 }
 0x6ef   :  { %v8454_v57 = vpop.eup %8453  ;;  %v4019_v62 = vxor.u32 2147483648, %v8452_v43  ;;  %v7326_v11 = vor.u32 4788187, %v7325_v31  ;;  %v7158_v51 = vsub.s32 32, %v7157_v36  ;;  %v7334_v13 = vsel %vm7249_vm4, %v7333_v25, %v13639_v0 }
 0x6f0   :  { %v4016_v2 = vxor.u32 2147483648, %v8454_v57  ;;  %v3874_v30 = vsel %vm3872_vm10, %v3873_v8, %v13689_v22  ;;  %v7151_v9 = vor.u32 8388608, %v7150_v4  ;;  %v7329_v47 = vcvt.s32.f32 %v7322_v33 }
 0x6f1   :  { %v4020_v40 = vsel %vm4018_vm12, %v4019_v62, %v8454_v57  ;;  %v7327_v3 = vand.u32 2147483647, %v7326_v11  ;;  %v3875_v59 = vadd.s32 %v3874_v30, %v3870_v45  ;;  %v7156_v17 = vshrl.u32 %v7155_v26, 5 }
 0x6f2   :  { %v4017_v14 = vsel %vm4015_vm11, %v8452_v43, %v4016_v2  ;;  %v7161_v38 = vshrl.u32 %v8478_v48, %v7158_v51  ;;  %v7164_v60 = vshrl.u32 %v8479_v50, %v7158_v51  ;;  %v7167_v19 = vshrl.u32 %v8480_v52, %v7158_v51 }
 0x6f3   :  { %v4021_v5 = vsel %vm4014_vm8, %v4017_v14, %v4020_v40  ;;  %v7330_v37 = vmul.f32 %v7329_v47, %v7327_v3  ;;  %v3876_v0 = vadd.s32 536870912, %v3875_v59  ;;  %v7160_v10 = vshll.u32 %v8477_v44, %v7157_v36 }
 0x6f4   :  { %v4022_v23 = vsel %vm4011_vm7, nan, %v4021_v5  ;;  %v7163_v41 = vshll.u32 %v8478_v48, %v7157_v36  ;;  %v7166_v27 = vshll.u32 %v8479_v50, %v7157_v36  ;;  %v7169_v39 = vshll.u32 %v8480_v52, %v7157_v36 }
 0x6f5   :  { %7383 = vst.msk [vmem:[%s13788_s3 + $0xf8] sm:$0xff] %vm7351_vm0, %v4022_v23  ;;  %v7331_v28 = vxor.u32 2147483648, %v7330_v37  ;;  %v13730_v29 = vshrl.u32 %v3876_v0, 30  ;;  %v7170_v12 = vshrl.u32 %v8481_v54, %v7158_v51  ;;  %v7162_v32 = vor.u32 %v7161_v38, %v7160_v10 }
 0x6f6   :  { %v7165_v35 = vor.u32 %v7164_v60, %v7163_v41  ;;  %v7172_v49 = vshll.u32 %v8481_v54, %v7157_v36  ;;  %v7173_v48 = vshrl.u32 %v8482_v61, %v7158_v51  ;;  %v7168_v58 = vor.u32 %v7167_v19, %v7166_v27 }
 0x6f7   :  { %v7332_v50 = vsel %vm7249_vm4, %v7331_v28, %v7330_v37  ;;  %v3878_v21 = vshll.u32 %v13730_v29, 30  ;;  %v7171_v16 = vor.u32 %v7170_v12, %v7169_v39  ;;  %v7336_v52 = vsel %vm13706_vm14, 0, %v7334_v13 }
 0x6f8   :  { %v7335_v46 = vsel %vm13706_vm14, %v13479_v34, %v7332_v50  ;;  %v7174_v53 = vor.u32 %v7173_v48, %v7172_v49  ;;  %vm7175_vm13 = vcmp.lt.s32.totalorder %v7156_v17, 1  ;;  %v7191_v54 = vshll.u32 %v7151_v9, 8 }
 0x6f9   :  { %8455 = vcosq.f32 %v7335_v46  ;;  %v3879_v22 = vsub.s32 %v3875_v59, %v3878_v21  ;;  %v7159_v61 = vshrl.u32 %v8477_v44, %v7158_v51  ;;  %vm7178_vm15 = vcmp.lt.s32.totalorder %v7156_v17, 4 }
 0x6fa   :  { %8457 = vsinq.f32 %v7335_v46  ;;  %v7183_v42 = vsel %vm7175_vm13, %v7162_v32, %v7165_v35  ;;  %vm7177_vm1 = vcmp.lt.s32.totalorder %v7156_v17, 3  ;;  %v7180_v1 = vsel %vm7178_vm15, %v7168_v58, 2102212464 }
 0x6fb   :  { %v3881_v63 = vsub.s32 0, %v3879_v22  ;;  %v7184_v25 = vsel %vm7178_vm15, %v7171_v16, 920167782  ;;  %vm7176_vm2 = vcmp.lt.s32.totalorder %v7156_v17, 2  ;;  %v7187_v4 = vsel %vm7175_vm13, %v7165_v35, %v7168_v58 }
 0x6fc   :  { %v7185_v55 = vsel %vm7177_vm1, %v7168_v58, %v7184_v25  ;;  %v7188_v26 = vsel %vm7178_vm15, %v7174_v53, 1326507024  ;;  %v7179_v31 = vsel %vm7175_vm13, %v7159_v61, %v7162_v32  ;;  %v7181_v8 = vsel %vm7177_vm1, %v7165_v35, %v7180_v1 }
 0x6fd   :  { %v7614_v33 = vmin.u32 %v3881_v63, %v3879_v22  ;;  %v7186_v36 = vsel %vm7176_vm2, %v7183_v42, %v7185_v55  ;;  %v7189_v43 = vsel %vm7177_vm1, %v7171_v16, %v7188_v26  ;;  %v7340_v11 = vadd.s32 3, %v7336_v52 }
 0x6fe   :  { %v7190_v57 = vsel %vm7176_vm2, %v7187_v4, %v7189_v43  ;;  %v13747_v62 = vmul.u32.u64.low %v7191_v54, %v7186_v36  ;;  %v13748_v44 = vmul.u32.u64.high %v7191_v54, %v7186_v36, %v13747_v62  ;;  %v7182_v13 = vsel %vm7176_vm2, %v7179_v31, %v7181_v8 }
 0x6ff   :  { %v3883_v15 = vclz %v7614_v33  ;;  %v13750_v45 = vmul.u32.u64.low %v7191_v54, %v7190_v57  ;;  %v13751_v51 = vmul.u32.u64.high %v7191_v54, %v7190_v57, %v13750_v45  ;;  %v7341_v9 = vand.u32 3, %v7340_v11 }
 0x700   :  { %v7201_v30 = vadd.s32 1, %v13748_v44  ;;  %v7198_v3 = vmul.u32 %v7191_v54, %v7182_v13  ;;  %v3871_v47 = vadd.s32 %v13688_v24, %v13686_v20  ;;  %vm7339_vm9 = vweird.f32 %v13479_v34 }
 0x701   :  { %v7615_v2 = vadd.s32 4294967294, %v3883_v15  ;;  %vm7200_vm4 = vc.u32 %v13751_v51, %v13747_v62  ;;  %vm7346_vm5 = vcmp.eq.s32.totalorder %v7341_v9, 2  ;;  %vm7343_vm6 = vcmp.eq.s32.totalorder %v7341_v9, 0 }
 0x702   :  { %v7202_v38 = vsel %vm7200_vm4, %v7201_v30, %v13748_v44  ;;  %vm7342_vm7 = vcmp.lt.s32.totalorder %v7341_v9, 2  ;;  %vm3817_vm8 = vcmp.lt.s32.totalorder %v13597_v56, 0  ;;  %v3901_v52 = vsub.s32 4, %v13730_v29 }
 0x703   :  { %vm7616_vm3 = vcmp.lt.s32.totalorder %v7615_v2, 0  ;;  %v7203_v5 = vadd.s32 %v7202_v38, %v7198_v3  ;;  %vm3816_vm11 = vcmp.le.f32.partialorder %v3815_v18, 0.7853982  ;;  %v7199_v25 = vadd.s32 %v13747_v62, %v13751_v51 }
 0x704   :  { %v3886_v40 = vsel %vm7616_vm3, 0, %v7615_v2  ;;  %v3902_v61 = vsel %vm3817_vm8, %v3901_v52, %v13730_v29  ;;  %vm3907_vm15 = vweird.f32 %v13597_v56  ;;  %vm7145_vm1 = vcmp.lt.s32.totalorder %v13614_v7, 0 }
 0x705   :  { %v3887_v59 = vsub.s32 32, %v3886_v40  ;;  %v3891_v14 = vsub.s32 4294967266, %v3886_v40  ;;  %v3888_v0 = vshll.u32 %v3879_v22, %v3886_v40  ;;  %v7204_v41 = vadd.s32 536870912, %v7203_v5 }
 0x706   :  { %v8456_v60 = vpop.eup %8455  ;;  %v3904_v63 = vsel %vm3816_vm11, 0, %v3902_v61  ;;  %vm7144_vm2 = vcmp.le.f32.partialorder %v7143_v6, 0.7853982 }
 0x707   :  { %v8458_v37 = vpop.eup %8457  ;;  %v7347_v17 = vxor.u32 2147483648, %v8456_v60  ;;  %v3889_v19 = vshrl.u32 %v3871_v47, %v3887_v59  ;;  %v3892_v23 = vadd.s32 127, %v3891_v14  ;;  %v7205_v24 = vshrl.u32 %v7204_v41, 30 }
 0x708   :  { %v7344_v10 = vxor.u32 2147483648, %v8458_v37  ;;  %v3908_v26 = vadd.s32 3, %v3904_v63 }
 0x709   :  { %v7348_v27 = vsel %vm7346_vm5, %v7347_v17, %v8458_v37  ;;  %v3890_v28 = vor.u32 %v3889_v19, %v3888_v0  ;;  %v3893_v39 = vshll.u32 %v3892_v23, 23  ;;  %v7206_v49 = vshll.u32 %v7205_v24, 30 }
 0x70a   :  { %v7345_v20 = vsel %vm7343_vm6, %v8456_v60, %v7344_v10  ;;  %v3909_v8 = vand.u32 3, %v3908_v26  ;;  %v7229_v40 = vsub.s32 4, %v7205_v24  ;;  %vm7235_vm6 = vweird.f32 %v13614_v7 }
 0x70b   :  { %v7349_v12 = vsel %vm7342_vm7, %v7345_v20, %v7348_v27  ;;  %v3894_v32 = vor.u32 4788187, %v3893_v39  ;;  %v3897_v50 = vcvt.s32.f32 %v3890_v28  ;;  %v7207_v21 = vsub.s32 %v7203_v5, %v7206_v49 }
 0x70c   :  { %v7350_v35 = vsel %vm7339_vm9, nan, %v7349_v12  ;;  %vm3914_vm10 = vcmp.eq.s32.totalorder %v3909_v8, 2  ;;  %vm3911_vm14 = vcmp.eq.s32.totalorder %v3909_v8, 0  ;;  %vm3910_vm13 = vcmp.lt.s32.totalorder %v3909_v8, 2 }
 0x70d   :  { %7415 = vst.msk [vmem:[%s13788_s3 + $0x1f8] sm:$0xff] %vm7351_vm0, %v7350_v35  ;;  %v3895_v48 = vand.u32 2147483647, %v3894_v32  ;;  %v7209_v16 = vsub.s32 0, %v7207_v21  ;;  %v7230_v14 = vsel %vm7145_vm1, %v7229_v40, %v7205_v24 }
 0x70f   :  { %v3898_v58 = vmul.f32 %v3897_v50, %v3895_v48  ;;  %v7742_v34 = vmin.u32 %v7209_v16, %v7207_v21 }
 0x711   :  { %v3899_v46 = vxor.u32 2147483648, %v3898_v58  ;;  %v7211_v54 = vclz %v7742_v34 }
 0x713   :  { %v3900_v53 = vsel %vm3817_vm8, %v3899_v46, %v3898_v58  ;;  %v7743_v42 = vadd.s32 4294967294, %v7211_v54 }
 0x714   :  { %v3903_v22 = vsel %vm3816_vm11, %v13597_v56, %v3900_v53  ;;  %v7232_v56 = vsel %vm7144_vm2, 0, %v7230_v14 }
 0x715   :  { %8459 = vcosq.f32 %v3903_v22  ;;  %vm7744_vm12 = vcmp.lt.s32.totalorder %v7743_v42, 0  ;;  %v7236_v38 = vadd.s32 3, %v7232_v56 }
 0x716   :  { %8461 = vsinq.f32 %v3903_v22  ;;  %v7214_v1 = vsel %vm7744_vm12, 0, %v7743_v42 }
 0x717   :  { %v7215_v55 = vsub.s32 32, %v7214_v1  ;;  %v7219_v4 = vsub.s32 4294967266, %v7214_v1  ;;  %v7216_v33 = vshll.u32 %v7207_v21, %v7214_v1  ;;  %v7237_v60 = vand.u32 3, %v7236_v38 }
 0x719   :  { %v7217_v31 = vshrl.u32 %v7199_v25, %v7215_v55  ;;  %v7220_v18 = vadd.s32 127, %v7219_v4  ;;  %vm7242_vm3 = vcmp.eq.s32.totalorder %v7237_v60, 2  ;;  %vm7239_vm4 = vcmp.eq.s32.totalorder %v7237_v60, 0 }
 0x71a   :  { %vm7238_vm5 = vcmp.lt.s32.totalorder %v7237_v60, 2 }
 0x71b   :  { %v7218_v36 = vor.u32 %v7217_v31, %v7216_v33  ;;  %v7221_v43 = vshll.u32 %v7220_v18, 23 }
 0x71d   :  { %v7222_v57 = vor.u32 4788187, %v7221_v43  ;;  %v7225_v29 = vcvt.s32.f32 %v7218_v36 }
 0x71f   :  { %v7223_v15 = vand.u32 2147483647, %v7222_v57 }
 0x721   :  { %v7226_v13 = vmul.f32 %v7225_v29, %v7223_v15 }
 0x722   :  { %v8460_v44 = vpop.eup %8459 }
 0x723   :  { %v8462_v11 = vpop.eup %8461  ;;  %v3915_v45 = vxor.u32 2147483648, %v8460_v44  ;;  %v7227_v30 = vxor.u32 2147483648, %v7226_v13 }
 0x724   :  { %v3912_v2 = vxor.u32 2147483648, %v8462_v11 }
 0x725   :  { %v3916_v62 = vsel %vm3914_vm10, %v3915_v45, %v8462_v11  ;;  %v7228_v47 = vsel %vm7145_vm1, %v7227_v30, %v7226_v13 }
 0x726   :  { %v3913_v51 = vsel %vm3911_vm14, %v8460_v44, %v3912_v2  ;;  %v7231_v59 = vsel %vm7144_vm2, %v13614_v7, %v7228_v47 }
 0x727   :  { %v3917_v9 = vsel %vm3910_vm13, %v3913_v51, %v3916_v62  ;;  %8463 = vcosq.f32 %v7231_v59 }
 0x728   :  { %v3918_v3 = vsel %vm3907_vm15, nan, %v3917_v9  ;;  %8465 = vsinq.f32 %v7231_v59 }
 0x729   :  { %7382 = vst.msk [vmem:[%s13788_s3 + $0xf0] sm:$0xff] %vm7351_vm0, %v3918_v3 }
 0x734   :  { %v8464_v5 = vpop.eup %8463 }
 0x735   :  { %v8466_v37 = vpop.eup %8465  ;;  %v7243_v17 = vxor.u32 2147483648, %v8464_v5 }
 0x736   :  { %v7240_v0 = vxor.u32 2147483648, %v8466_v37 }
 0x737   :  { %v7244_v6 = vsel %vm7242_vm3, %v7243_v17, %v8466_v37 }
 0x738   :  { %v7241_v19 = vsel %vm7239_vm4, %v8464_v5, %v7240_v0 }
 0x739   :  { %v7245_v23 = vsel %vm7238_vm5, %v7241_v19, %v7244_v6 }
 0x73a   :  { %v7246_v10 = vsel %vm7235_vm6, nan, %v7245_v23 }
 0x73b   :  { %7414 = vst.msk [vmem:[%s13788_s3 + $0x1f0] sm:$0xff] %vm7351_vm0, %v7246_v10 }

</bundles_post_ra>
